<compile_context>
chip_gen: v6e
topology: v6e:2x2x1
jax: 0.10.0
libtpu: 0.0.40
codegen_flags: <defaults>
</compile_context>

<pallas_src>
import jax
import jax.numpy as jnp
from jax.experimental import pallas as pl
from jax.experimental.pallas import tpu as pltpu

N_ACTIONS = 6            # PongNoFrameskip-v4 action-space size (no gym here)
_HEAD_PAD = 128          # lane-dense padded width of the output head
_IN_C = 4                # frame-stack depth fixed by the module
_VMEM_LIMIT_BYTES = 8 * 1024 * 1024   # ~4x the fused working set (<2 MB)


def conv2d_size_out(size, kernel_size, stride):
    return (size - (kernel_size - 1) - 1) // stride + 1


def _geom(h, w):
    oh1, ow1 = conv2d_size_out(h, 8, 4), conv2d_size_out(w, 8, 4)
    oh2, ow2 = conv2d_size_out(oh1, 4, 2), conv2d_size_out(ow1, 4, 2)
    oh3, ow3 = conv2d_size_out(oh2, 3, 1), conv2d_size_out(ow2, 3, 1)
    return (oh1, ow1), (oh2, ow2), (oh3, ow3)


# ----------------------------------------------------------------------------
# Fused kernel: one grid step == one image; everything stays in VMEM.
# ----------------------------------------------------------------------------
def _make_dqn_kernel(dims):
    (oh1_n, ow1_n), (oh2_n, ow2_n), (oh3_n, ow3_n) = dims
    owb1 = ow1_n // 2            # conv1 output is stored ow-blocked by 2

    def kernel(x_ref, w1_ref, b1_ref, w2_ref, b2_ref, w3_ref, b3_ref,
               wf_ref, bf_ref, wo_ref, bo_ref, o_ref,
               h1_ref, h2_ref, h3_ref):
        # ---- conv1: 8x8 stride-4 ("double-patch" rows -> ow-blocked output) -
        for oh in range(oh1_n):
            pieces = []
            for ki in range(8):
                r = 4 * oh + ki
                # window offset dw in [0,8): all 8*C lanes of block owb;
                # dw in [8,12): first 4*C lanes of block owb+1.
                pieces.append(x_ref[0, r, pl.ds(0, owb1), :])
                pieces.append(x_ref[0, r, pl.ds(1, owb1), pl.ds(0, 4 * _IN_C)])
            patch = jnp.concatenate(pieces, axis=-1)          # (owb1, 384)
            acc = jnp.dot(patch, w1_ref[...],
                          preferred_element_type=jnp.float32)
            acc = jnp.maximum(acc + b1_ref[...], 0.0)
            h1_ref[oh] = acc.astype(jnp.bfloat16)             # (owb1, 64)

        # ---- conv2: 4x4 stride-2 (reads the ow-blocked conv1 layout) --------
        for oh in range(oh2_n):
            pieces = []
            for ki in range(4):
                r = 2 * oh + ki
                for kb in range(2):                           # kj = 2*kb + t
                    pieces.append(h1_ref[r, pl.ds(kb, ow2_n), :])
            patch = jnp.concatenate(pieces, axis=-1)          # (ow2, 512)
            acc = jnp.dot(patch, w2_ref[...],
                          preferred_element_type=jnp.float32)
            acc = jnp.maximum(acc + b2_ref[...], 0.0)
            h2_ref[oh] = acc.astype(jnp.bfloat16)             # (ow2, 64)

        # ---- conv3: 3x3 stride-1 ---------------------------------------------
        for oh in range(oh3_n):
            pieces = []
            for ki in range(3):
                for kj in range(3):
                    pieces.append(h2_ref[oh + ki, pl.ds(kj, ow3_n), :])
            patch = jnp.concatenate(pieces, axis=-1)          # (ow3, 576)
            acc = jnp.dot(patch, w3_ref[...],
                          preferred_element_type=jnp.float32)
            acc = jnp.maximum(acc + b3_ref[...], 0.0)
            h3_ref[oh] = acc.astype(jnp.bfloat16)             # (ow3, 64)

        # ---- fc1 + output head (NHWC flatten matches permuted fc1 weights) --
        feats = jnp.concatenate(
            [h3_ref[i, pl.ds(j, 1), :]
             for i in range(oh3_n) for j in range(ow3_n)], axis=-1)
        hid = jnp.dot(feats, wf_ref[...], preferred_element_type=jnp.float32)
        hid = jnp.maximum(hid + bf_ref[...], 0.0).astype(jnp.bfloat16)
        q = jnp.dot(hid, wo_ref[...], preferred_element_type=jnp.float32)
        o_ref[0] = q + bo_ref[...]                            # (1, 128)

    return kernel


# ----------------------------------------------------------------------------
# Forward wrapper
# ----------------------------------------------------------------------------
def deep_q_net_forward(pp, x):
    """x: (N, 4, H, W) float -> (N, n_actions) float32 via ONE fused kernel."""
    n, c, h, w = x.shape
    assert c == _IN_C, c
    dims = _geom(h, w)
    (oh1, ow1), (oh2, ow2), (oh3, ow3) = dims
    assert ow1 % 2 == 0, "conv1 output width must be even for the blocked layout"

    # One tiny fused XLA prep op on the raw input: cast + NCHW->NHWC + pad W
    # to whole 8-blocks + block W by 8 (lane index inside a block = (w%8)*C+c).
    # TODO(synk): fold this transpose/blocking into the kernel's loads as well.
    owb1 = ow1 // 2
    wb8 = owb1 + 1
    wp = 8 * wb8
    xq = jnp.transpose(x.astype(jnp.bfloat16), (0, 2, 3, 1))
    xq = jnp.pad(xq, ((0, 0), (0, 0), (0, wp - w), (0, 0)))
    xq = xq.reshape(n, h, wb8, 8 * _IN_C)

    hdim = pp["fc1_w"].shape[1]
    k1, k2, k3, kf = (pp["c1w"].shape[0], pp["c2w"].shape[0],
                      pp["c3w"].shape[0], pp["fc1_w"].shape[0])
    flops = 2 * n * (oh1 * owb1 * k1 * 64 + oh2 * ow2 * k2 * 64
                     + oh3 * ow3 * k3 * 64 + kf * hdim + hdim * _HEAD_PAD)
    weight_bytes = sum(int(v.size) * v.dtype.itemsize for v in pp.values())
    bytes_accessed = int(xq.size) * 2 + weight_bytes + n * _HEAD_PAD * 4

    out = pl.pallas_call(
        _make_dqn_kernel(dims),
        out_shape=jax.ShapeDtypeStruct((n, 1, _HEAD_PAD), jnp.float32),
        grid=(n,),
        in_specs=[
            pl.BlockSpec((1, h, wb8, 8 * _IN_C), lambda i: (i, 0, 0, 0)),
            pl.BlockSpec(pp["c1w"].shape, lambda i: (0, 0)),
            pl.BlockSpec(pp["c1b"].shape, lambda i: (0, 0)),
            pl.BlockSpec(pp["c2w"].shape, lambda i: (0, 0)),
            pl.BlockSpec(pp["c2b"].shape, lambda i: (0, 0)),
            pl.BlockSpec(pp["c3w"].shape, lambda i: (0, 0)),
            pl.BlockSpec(pp["c3b"].shape, lambda i: (0, 0)),
            pl.BlockSpec(pp["fc1_w"].shape, lambda i: (0, 0)),
            pl.BlockSpec(pp["fc1_b"].shape, lambda i: (0, 0)),
            pl.BlockSpec(pp["out_w"].shape, lambda i: (0, 0)),
            pl.BlockSpec(pp["out_b"].shape, lambda i: (0, 0)),
        ],
        out_specs=pl.BlockSpec((1, 1, _HEAD_PAD), lambda i: (i, 0, 0)),
        scratch_shapes=[
            pltpu.VMEM((oh1, owb1, 64), jnp.bfloat16),   # conv1 out (ow-blocked)
            pltpu.VMEM((oh2, ow2, 64), jnp.bfloat16),    # conv2 out
            pltpu.VMEM((oh3, ow3, 64), jnp.bfloat16),    # conv3 out
        ],
        compiler_params=pltpu.CompilerParams(
            dimension_semantics=("parallel",),
            vmem_limit_bytes=_VMEM_LIMIT_BYTES),
        cost_estimate=pl.CostEstimate(
            flops=int(flops), transcendentals=0,
            bytes_accessed=int(bytes_accessed)),
    )(xq, pp["c1w"], pp["c1b"], pp["c2w"], pp["c2b"], pp["c3w"], pp["c3b"],
      pp["fc1_w"], pp["fc1_b"], pp["out_w"], pp["out_b"])
    return out[:, 0, :N_ACTIONS]


# ----------------------------------------------------------------------------
# DeepQNet parameters + one-time preparation
# ----------------------------------------------------------------------------
def init_params(key, h, w):
    (_, _), (_, _), (oh3, ow3) = _geom(h, w)
    linear_input = oh3 * ow3 * 64
    ks = jax.random.split(key, 10)
    s = 0.05
    return {
        "conv1_w": jax.random.normal(ks[0], (32, _IN_C, 8, 8), jnp.float32) * s,
        "conv1_b": jax.random.normal(ks[1], (32,), jnp.float32) * s,
        "conv2_w": jax.random.normal(ks[2], (64, 32, 4, 4), jnp.float32) * s,
        "conv2_b": jax.random.normal(ks[3], (64,), jnp.float32) * s,
        "conv3_w": jax.random.normal(ks[4], (64, 64, 3, 3), jnp.float32) * s,
        "conv3_b": jax.random.normal(ks[5], (64,), jnp.float32) * s,
        "fc1_w": jax.random.normal(ks[6], (512, linear_input), jnp.float32) * s,
        "fc1_b": jax.random.normal(ks[7], (512,), jnp.float32) * s,
        "out_w": jax.random.normal(ks[8], (N_ACTIONS, 512), jnp.float32) * s,
        "out_b": jax.random.normal(ks[9], (N_ACTIONS,), jnp.float32) * s,
    }


def prepare_params(params, h, w):
    """One-time weight permutes / casts / padding (out of the per-call path)."""
    (_, ow1), (_, _), (oh3, ow3) = _geom(h, w)
    assert ow1 % 2 == 0, "conv1 output width must be even for the blocked layout"

    # conv1 "double-patch" weights: one GEMM row produces TWO adjacent output
    # columns (ow = 2*owb + owt).  Row index = ki*12*C + dw*C + c with window
    # offset dw = kj + 4*owt in [0, 12); column index = owt*32 + oc.
    k1 = jnp.transpose(params["conv1_w"], (2, 3, 1, 0))       # (ki, kj, c, oc)
    w1p = jnp.zeros((8, 12, _IN_C, 2, 32), jnp.float32)
    for owt in range(2):
        w1p = w1p.at[:, 4 * owt:4 * owt + 8, :, owt, :].set(k1)
    w1p = w1p.reshape(8 * 12 * _IN_C, 64)
    b1p = jnp.tile(params["conv1_b"].reshape(1, 32), (1, 2))

    def prep_conv(wt, bias):                                  # (ki,kj,c) -> oc
        o, i, kh, kw = wt.shape
        wm = jnp.transpose(wt, (2, 3, 1, 0)).reshape(kh * kw * i, o)
        return wm.astype(jnp.bfloat16), bias.reshape(1, o).astype(jnp.float32)

    c2w, c2b = prep_conv(params["conv2_w"], params["conv2_b"])
    c3w, c3b = prep_conv(params["conv3_w"], params["conv3_b"])

    # fc1: torch flattens NCHW (C,H,W); the kernel flattens NHWC (H,W,C) ->
    # permute fc1 columns once so torch's .view() semantics are preserved.
    hdim = params["fc1_w"].shape[0]
    fc1 = params["fc1_w"].reshape(hdim, 64, oh3, ow3)
    fc1 = fc1.transpose(0, 2, 3, 1).reshape(hdim, oh3 * ow3 * 64).T

    # Output head padded to 128 lanes for dense stores.
    n_act = params["out_w"].shape[0]
    out_w = jnp.zeros((hdim, _HEAD_PAD), jnp.float32).at[:, :n_act].set(
        params["out_w"].T)
    out_b = jnp.zeros((1, _HEAD_PAD), jnp.float32).at[0, :n_act].set(
        params["out_b"])

    return {
        "c1w": w1p.astype(jnp.bfloat16), "c1b": b1p.astype(jnp.float32),
        "c2w": c2w, "c2b": c2b, "c3w": c3w, "c3b": c3b,
        "fc1_w": fc1.astype(jnp.bfloat16),
        "fc1_b": params["fc1_b"].reshape(1, hdim).astype(jnp.float32),
        "out_w": out_w.astype(jnp.bfloat16), "out_b": out_b,
    }


# ----------------------------------------------------------------------------
# Reference with matching bf16-input / f32-accumulate numerics (XLA convs)
# ----------------------------------------------------------------------------
def _ref_forward(params, x):
    xf = x.astype(jnp.float32)

    def conv(z, wt, bias, stride):
        y = jax.lax.conv_general_dilated(
            z.astype(jnp.bfloat16), wt.astype(jnp.bfloat16),
            window_strides=(stride, stride), padding="VALID",
            dimension_numbers=("NCHW", "OIHW", "NCHW"),
            preferred_element_type=jnp.float32)
        return jax.nn.relu(y + bias[None, :, None, None])

    h = conv(xf, params["conv1_w"], params["conv1_b"], 4)
    h = conv(h, params["conv2_w"], params["conv2_b"], 2)
    h = conv(h, params["conv3_w"], params["conv3_b"], 1)
    h = h.reshape(h.shape[0], -1)
    h = jax.nn.relu(
        jnp.dot(h.astype(jnp.bfloat16), params["fc1_w"].T.astype(jnp.bfloat16),
                preferred_element_type=jnp.float32) + params["fc1_b"])
    return (jnp.dot(h.astype(jnp.bfloat16), params["out_w"].T.astype(jnp.bfloat16),
                    preferred_element_type=jnp.float32) + params["out_b"])


if __name__ == "__main__":
    H = W = 52      # smallest Atari-style size giving a 3x3x64 conv3 output
    BATCH = 4

    key = jax.random.PRNGKey(0)
    k_params, k_x = jax.random.split(key)
    params = init_params(k_params, H, W)
    prepped = prepare_params(params, H, W)
    x = jax.random.uniform(k_x, (BATCH, _IN_C, H, W), jnp.float32)

    fwd = jax.jit(deep_q_net_forward)
    q = jax.block_until_ready(fwd(prepped, x))

    q_ref = jax.block_until_ready(_ref_forward(params, x))
    assert q.shape == (BATCH, N_ACTIONS), q.shape
    assert jnp.allclose(q, q_ref, rtol=3e-3, atol=3e-3), \
        float(jnp.max(jnp.abs(q - q_ref)))

    print("KERNEL_OK")
</pallas_src>

<mosaic_0001>
module attributes {stable_mosaic.version = 11 : i64} {
  func.func @kernel(%arg0: i32, %arg1: memref<1x52x7x32xbf16, #tpu.memory_space<vmem>>, %arg2: memref<384x64xbf16, #tpu.memory_space<vmem>>, %arg3: memref<1x64xf32, #tpu.memory_space<vmem>>, %arg4: memref<512x64xbf16, #tpu.memory_space<vmem>>, %arg5: memref<1x64xf32, #tpu.memory_space<vmem>>, %arg6: memref<576x64xbf16, #tpu.memory_space<vmem>>, %arg7: memref<1x64xf32, #tpu.memory_space<vmem>>, %arg8: memref<576x512xbf16, #tpu.memory_space<vmem>>, %arg9: memref<1x512xf32, #tpu.memory_space<vmem>>, %arg10: memref<512x128xbf16, #tpu.memory_space<vmem>>, %arg11: memref<1x128xf32, #tpu.memory_space<vmem>>, %arg12: memref<1x1x128xf32, #tpu.memory_space<vmem>>, %arg13: memref<12x6x64xbf16, #tpu.memory_space<vmem>>, %arg14: memref<5x5x64xbf16, #tpu.memory_space<vmem>>, %arg15: memref<3x3x64xbf16, #tpu.memory_space<vmem>>) attributes {dimension_semantics = [#tpu.dimension_semantics<parallel>], iteration_bounds = array<i64: 4>, scalar_prefetch = 0 : i64, scratch_operands = 3 : i64, tpu.core_type = #tpu.core_type<tc>, window_params = [{transform_indices = @transform_0, window_bounds = array<i64: 1, 52, 7, 32>}, {pipeline_mode = #tpu.pipeline_mode<synchronous>, transform_indices = @transform_1, window_bounds = array<i64: 384, 64>}, {pipeline_mode = #tpu.pipeline_mode<synchronous>, transform_indices = @transform_2, window_bounds = array<i64: 1, 64>}, {pipeline_mode = #tpu.pipeline_mode<synchronous>, transform_indices = @transform_3, window_bounds = array<i64: 512, 64>}, {pipeline_mode = #tpu.pipeline_mode<synchronous>, transform_indices = @transform_4, window_bounds = array<i64: 1, 64>}, {pipeline_mode = #tpu.pipeline_mode<synchronous>, transform_indices = @transform_5, window_bounds = array<i64: 576, 64>}, {pipeline_mode = #tpu.pipeline_mode<synchronous>, transform_indices = @transform_6, window_bounds = array<i64: 1, 64>}, {pipeline_mode = #tpu.pipeline_mode<synchronous>, transform_indices = @transform_7, window_bounds = array<i64: 576, 512>}, {pipeline_mode = #tpu.pipeline_mode<synchronous>, transform_indices = @transform_8, window_bounds = array<i64: 1, 512>}, {pipeline_mode = #tpu.pipeline_mode<synchronous>, transform_indices = @transform_9, window_bounds = array<i64: 512, 128>}, {pipeline_mode = #tpu.pipeline_mode<synchronous>, transform_indices = @transform_10, window_bounds = array<i64: 1, 128>}, {transform_indices = @transform_11, window_bounds = array<i64: 1, 1, 128>}]} {
    %c0 = arith.constant 0 : index
    %c0_0 = arith.constant 0 : index
    %c0_1 = arith.constant 0 : index
    %c0_2 = arith.constant 0 : index
    %0 = vector.load %arg1[%c0, %c0_0, %c0_1, %c0_2] : memref<1x52x7x32xbf16, #tpu.memory_space<vmem>>, vector<1x1x6x32xbf16>
    %1 = vector.shape_cast %0 : vector<1x1x6x32xbf16> to vector<6x32xbf16>
    %c0_3 = arith.constant 0 : index
    %c0_4 = arith.constant 0 : index
    %c1 = arith.constant 1 : index
    %c0_5 = arith.constant 0 : index
    %2 = vector.load %arg1[%c0_3, %c0_4, %c1, %c0_5] : memref<1x52x7x32xbf16, #tpu.memory_space<vmem>>, vector<1x1x6x16xbf16>
    %3 = vector.shape_cast %2 : vector<1x1x6x16xbf16> to vector<6x16xbf16>
    %c0_6 = arith.constant 0 : index
    %c1_7 = arith.constant 1 : index
    %c0_8 = arith.constant 0 : index
    %c0_9 = arith.constant 0 : index
    %4 = vector.load %arg1[%c0_6, %c1_7, %c0_8, %c0_9] : memref<1x52x7x32xbf16, #tpu.memory_space<vmem>>, vector<1x1x6x32xbf16>
    %5 = vector.shape_cast %4 : vector<1x1x6x32xbf16> to vector<6x32xbf16>
    %c0_10 = arith.constant 0 : index
    %c1_11 = arith.constant 1 : index
    %c1_12 = arith.constant 1 : index
    %c0_13 = arith.constant 0 : index
    %6 = vector.load %arg1[%c0_10, %c1_11, %c1_12, %c0_13] : memref<1x52x7x32xbf16, #tpu.memory_space<vmem>>, vector<1x1x6x16xbf16>
    %7 = vector.shape_cast %6 : vector<1x1x6x16xbf16> to vector<6x16xbf16>
    %c0_14 = arith.constant 0 : index
    %c2 = arith.constant 2 : index
    %c0_15 = arith.constant 0 : index
    %c0_16 = arith.constant 0 : index
    %8 = vector.load %arg1[%c0_14, %c2, %c0_15, %c0_16] : memref<1x52x7x32xbf16, #tpu.memory_space<vmem>>, vector<1x1x6x32xbf16>
    %9 = vector.shape_cast %8 : vector<1x1x6x32xbf16> to vector<6x32xbf16>
    %c0_17 = arith.constant 0 : index
    %c2_18 = arith.constant 2 : index
    %c1_19 = arith.constant 1 : index
    %c0_20 = arith.constant 0 : index
    %10 = vector.load %arg1[%c0_17, %c2_18, %c1_19, %c0_20] : memref<1x52x7x32xbf16, #tpu.memory_space<vmem>>, vector<1x1x6x16xbf16>
    %11 = vector.shape_cast %10 : vector<1x1x6x16xbf16> to vector<6x16xbf16>
    %c0_21 = arith.constant 0 : index
    %c3 = arith.constant 3 : index
    %c0_22 = arith.constant 0 : index
    %c0_23 = arith.constant 0 : index
    %12 = vector.load %arg1[%c0_21, %c3, %c0_22, %c0_23] : memref<1x52x7x32xbf16, #tpu.memory_space<vmem>>, vector<1x1x6x32xbf16>
    %13 = vector.shape_cast %12 : vector<1x1x6x32xbf16> to vector<6x32xbf16>
    %c0_24 = arith.constant 0 : index
    %c3_25 = arith.constant 3 : index
    %c1_26 = arith.constant 1 : index
    %c0_27 = arith.constant 0 : index
    %14 = vector.load %arg1[%c0_24, %c3_25, %c1_26, %c0_27] : memref<1x52x7x32xbf16, #tpu.memory_space<vmem>>, vector<1x1x6x16xbf16>
    %15 = vector.shape_cast %14 : vector<1x1x6x16xbf16> to vector<6x16xbf16>
    %c0_28 = arith.constant 0 : index
    %c4 = arith.constant 4 : index
    %c0_29 = arith.constant 0 : index
    %c0_30 = arith.constant 0 : index
    %16 = vector.load %arg1[%c0_28, %c4, %c0_29, %c0_30] : memref<1x52x7x32xbf16, #tpu.memory_space<vmem>>, vector<1x1x6x32xbf16>
    %17 = vector.shape_cast %16 : vector<1x1x6x32xbf16> to vector<6x32xbf16>
    %c0_31 = arith.constant 0 : index
    %c4_32 = arith.constant 4 : index
    %c1_33 = arith.constant 1 : index
    %c0_34 = arith.constant 0 : index
    %18 = vector.load %arg1[%c0_31, %c4_32, %c1_33, %c0_34] : memref<1x52x7x32xbf16, #tpu.memory_space<vmem>>, vector<1x1x6x16xbf16>
    %19 = vector.shape_cast %18 : vector<1x1x6x16xbf16> to vector<6x16xbf16>
    %c0_35 = arith.constant 0 : index
    %c5 = arith.constant 5 : index
    %c0_36 = arith.constant 0 : index
    %c0_37 = arith.constant 0 : index
    %20 = vector.load %arg1[%c0_35, %c5, %c0_36, %c0_37] : memref<1x52x7x32xbf16, #tpu.memory_space<vmem>>, vector<1x1x6x32xbf16>
    %21 = vector.shape_cast %20 : vector<1x1x6x32xbf16> to vector<6x32xbf16>
    %c0_38 = arith.constant 0 : index
    %c5_39 = arith.constant 5 : index
    %c1_40 = arith.constant 1 : index
    %c0_41 = arith.constant 0 : index
    %22 = vector.load %arg1[%c0_38, %c5_39, %c1_40, %c0_41] : memref<1x52x7x32xbf16, #tpu.memory_space<vmem>>, vector<1x1x6x16xbf16>
    %23 = vector.shape_cast %22 : vector<1x1x6x16xbf16> to vector<6x16xbf16>
    %c0_42 = arith.constant 0 : index
    %c6 = arith.constant 6 : index
    %c0_43 = arith.constant 0 : index
    %c0_44 = arith.constant 0 : index
    %24 = vector.load %arg1[%c0_42, %c6, %c0_43, %c0_44] : memref<1x52x7x32xbf16, #tpu.memory_space<vmem>>, vector<1x1x6x32xbf16>
    %25 = vector.shape_cast %24 : vector<1x1x6x32xbf16> to vector<6x32xbf16>
    %c0_45 = arith.constant 0 : index
    %c6_46 = arith.constant 6 : index
    %c1_47 = arith.constant 1 : index
    %c0_48 = arith.constant 0 : index
    %26 = vector.load %arg1[%c0_45, %c6_46, %c1_47, %c0_48] : memref<1x52x7x32xbf16, #tpu.memory_space<vmem>>, vector<1x1x6x16xbf16>
    %27 = vector.shape_cast %26 : vector<1x1x6x16xbf16> to vector<6x16xbf16>
    %c0_49 = arith.constant 0 : index
    %c7 = arith.constant 7 : index
    %c0_50 = arith.constant 0 : index
    %c0_51 = arith.constant 0 : index
    %28 = vector.load %arg1[%c0_49, %c7, %c0_50, %c0_51] : memref<1x52x7x32xbf16, #tpu.memory_space<vmem>>, vector<1x1x6x32xbf16>
    %29 = vector.shape_cast %28 : vector<1x1x6x32xbf16> to vector<6x32xbf16>
    %c0_52 = arith.constant 0 : index
    %c7_53 = arith.constant 7 : index
    %c1_54 = arith.constant 1 : index
    %c0_55 = arith.constant 0 : index
    %30 = vector.load %arg1[%c0_52, %c7_53, %c1_54, %c0_55] : memref<1x52x7x32xbf16, #tpu.memory_space<vmem>>, vector<1x1x6x16xbf16>
    %31 = vector.shape_cast %30 : vector<1x1x6x16xbf16> to vector<6x16xbf16>
    %32 = tpu.concatenate %1, %3, %5, %7, %9, %11, %13, %15, %17, %19, %21, %23, %25, %27, %29, %31 in 1 : vector<6x32xbf16>, vector<6x16xbf16>, vector<6x32xbf16>, vector<6x16xbf16>, vector<6x32xbf16>, vector<6x16xbf16>, vector<6x32xbf16>, vector<6x16xbf16>, vector<6x32xbf16>, vector<6x16xbf16>, vector<6x32xbf16>, vector<6x16xbf16>, vector<6x32xbf16>, vector<6x16xbf16>, vector<6x32xbf16>, vector<6x16xbf16> -> vector<6x384xbf16>
    %c0_56 = arith.constant 0 : index
    %c0_57 = arith.constant 0 : index
    %33 = vector.load %arg2[%c0_56, %c0_57] : memref<384x64xbf16, #tpu.memory_space<vmem>>, vector<384x64xbf16>
    %cst = arith.constant dense<0.000000e+00> : vector<6x64xf32>
    %34 = tpu.matmul %32, %33, %cst {dimension_numbers = #tpu.dot_dimension_numbers<[1], [0], [0], [1], [0, 0, 1, 1], [], []>} : vector<6x384xbf16>, vector<384x64xbf16>, vector<6x64xf32> -> vector<6x64xf32>
    %c0_58 = arith.constant 0 : index
    %c0_59 = arith.constant 0 : index
    %35 = vector.load %arg3[%c0_58, %c0_59] : memref<1x64xf32, #tpu.memory_space<vmem>>, vector<1x64xf32>
    %36 = vector.broadcast %35 : vector<1x64xf32> to vector<6x64xf32>
    %37 = arith.addf %34, %36 : vector<6x64xf32>
    %cst_60 = arith.constant 0.000000e+00 : f32
    %38 = vector.broadcast %cst_60 : f32 to vector<6x64xf32>
    %39 = arith.maximumf %37, %38 : vector<6x64xf32>
    %40 = arith.truncf %39 : vector<6x64xf32> to vector<6x64xbf16>
    %c0_61 = arith.constant 0 : index
    %c0_62 = arith.constant 0 : index
    %c0_63 = arith.constant 0 : index
    %41 = vector.load %arg13[%c0_61, %c0_62, %c0_63] : memref<12x6x64xbf16, #tpu.memory_space<vmem>>, vector<1x6x64xbf16>
    %42 = vector.shape_cast %41 : vector<1x6x64xbf16> to vector<6x64xbf16>
    %43 = vector.shape_cast %40 : vector<6x64xbf16> to vector<1x6x64xbf16>
    tpu.vector_store %arg13[%c0_61, %c0_62, %c0_63], %43 {strides = array<i32>} : memref<12x6x64xbf16, #tpu.memory_space<vmem>>, vector<1x6x64xbf16>,
    %c0_64 = arith.constant 0 : index
    %c4_65 = arith.constant 4 : index
    %c0_66 = arith.constant 0 : index
    %c0_67 = arith.constant 0 : index
    %44 = vector.load %arg1[%c0_64, %c4_65, %c0_66, %c0_67] : memref<1x52x7x32xbf16, #tpu.memory_space<vmem>>, vector<1x1x6x32xbf16>
    %45 = vector.shape_cast %44 : vector<1x1x6x32xbf16> to vector<6x32xbf16>
    %c0_68 = arith.constant 0 : index
    %c4_69 = arith.constant 4 : index
    %c1_70 = arith.constant 1 : index
    %c0_71 = arith.constant 0 : index
    %46 = vector.load %arg1[%c0_68, %c4_69, %c1_70, %c0_71] : memref<1x52x7x32xbf16, #tpu.memory_space<vmem>>, vector<1x1x6x16xbf16>
    %47 = vector.shape_cast %46 : vector<1x1x6x16xbf16> to vector<6x16xbf16>
    %c0_72 = arith.constant 0 : index
    %c5_73 = arith.constant 5 : index
    %c0_74 = arith.constant 0 : index
    %c0_75 = arith.constant 0 : index
    %48 = vector.load %arg1[%c0_72, %c5_73, %c0_74, %c0_75] : memref<1x52x7x32xbf16, #tpu.memory_space<vmem>>, vector<1x1x6x32xbf16>
    %49 = vector.shape_cast %48 : vector<1x1x6x32xbf16> to vector<6x32xbf16>
    %c0_76 = arith.constant 0 : index
    %c5_77 = arith.constant 5 : index
    %c1_78 = arith.constant 1 : index
    %c0_79 = arith.constant 0 : index
    %50 = vector.load %arg1[%c0_76, %c5_77, %c1_78, %c0_79] : memref<1x52x7x32xbf16, #tpu.memory_space<vmem>>, vector<1x1x6x16xbf16>
    %51 = vector.shape_cast %50 : vector<1x1x6x16xbf16> to vector<6x16xbf16>
    %c0_80 = arith.constant 0 : index
    %c6_81 = arith.constant 6 : index
    %c0_82 = arith.constant 0 : index
    %c0_83 = arith.constant 0 : index
    %52 = vector.load %arg1[%c0_80, %c6_81, %c0_82, %c0_83] : memref<1x52x7x32xbf16, #tpu.memory_space<vmem>>, vector<1x1x6x32xbf16>
    %53 = vector.shape_cast %52 : vector<1x1x6x32xbf16> to vector<6x32xbf16>
    %c0_84 = arith.constant 0 : index
    %c6_85 = arith.constant 6 : index
    %c1_86 = arith.constant 1 : index
    %c0_87 = arith.constant 0 : index
    %54 = vector.load %arg1[%c0_84, %c6_85, %c1_86, %c0_87] : memref<1x52x7x32xbf16, #tpu.memory_space<vmem>>, vector<1x1x6x16xbf16>
    %55 = vector.shape_cast %54 : vector<1x1x6x16xbf16> to vector<6x16xbf16>
    %c0_88 = arith.constant 0 : index
    %c7_89 = arith.constant 7 : index
    %c0_90 = arith.constant 0 : index
    %c0_91 = arith.constant 0 : index
    %56 = vector.load %arg1[%c0_88, %c7_89, %c0_90, %c0_91] : memref<1x52x7x32xbf16, #tpu.memory_space<vmem>>, vector<1x1x6x32xbf16>
    %57 = vector.shape_cast %56 : vector<1x1x6x32xbf16> to vector<6x32xbf16>
    %c0_92 = arith.constant 0 : index
    %c7_93 = arith.constant 7 : index
    %c1_94 = arith.constant 1 : index
    %c0_95 = arith.constant 0 : index
    %58 = vector.load %arg1[%c0_92, %c7_93, %c1_94, %c0_95] : memref<1x52x7x32xbf16, #tpu.memory_space<vmem>>, vector<1x1x6x16xbf16>
    %59 = vector.shape_cast %58 : vector<1x1x6x16xbf16> to vector<6x16xbf16>
    %c0_96 = arith.constant 0 : index
    %c8 = arith.constant 8 : index
    %c0_97 = arith.constant 0 : index
    %c0_98 = arith.constant 0 : index
    %60 = vector.load %arg1[%c0_96, %c8, %c0_97, %c0_98] : memref<1x52x7x32xbf16, #tpu.memory_space<vmem>>, vector<1x1x6x32xbf16>
    %61 = vector.shape_cast %60 : vector<1x1x6x32xbf16> to vector<6x32xbf16>
    %c0_99 = arith.constant 0 : index
    %c8_100 = arith.constant 8 : index
    %c1_101 = arith.constant 1 : index
    %c0_102 = arith.constant 0 : index
    %62 = vector.load %arg1[%c0_99, %c8_100, %c1_101, %c0_102] : memref<1x52x7x32xbf16, #tpu.memory_space<vmem>>, vector<1x1x6x16xbf16>
    %63 = vector.shape_cast %62 : vector<1x1x6x16xbf16> to vector<6x16xbf16>
    %c0_103 = arith.constant 0 : index
    %c9 = arith.constant 9 : index
    %c0_104 = arith.constant 0 : index
    %c0_105 = arith.constant 0 : index
    %64 = vector.load %arg1[%c0_103, %c9, %c0_104, %c0_105] : memref<1x52x7x32xbf16, #tpu.memory_space<vmem>>, vector<1x1x6x32xbf16>
    %65 = vector.shape_cast %64 : vector<1x1x6x32xbf16> to vector<6x32xbf16>
    %c0_106 = arith.constant 0 : index
    %c9_107 = arith.constant 9 : index
    %c1_108 = arith.constant 1 : index
    %c0_109 = arith.constant 0 : index
    %66 = vector.load %arg1[%c0_106, %c9_107, %c1_108, %c0_109] : memref<1x52x7x32xbf16, #tpu.memory_space<vmem>>, vector<1x1x6x16xbf16>
    %67 = vector.shape_cast %66 : vector<1x1x6x16xbf16> to vector<6x16xbf16>
    %c0_110 = arith.constant 0 : index
    %c10 = arith.constant 10 : index
    %c0_111 = arith.constant 0 : index
    %c0_112 = arith.constant 0 : index
    %68 = vector.load %arg1[%c0_110, %c10, %c0_111, %c0_112] : memref<1x52x7x32xbf16, #tpu.memory_space<vmem>>, vector<1x1x6x32xbf16>
    %69 = vector.shape_cast %68 : vector<1x1x6x32xbf16> to vector<6x32xbf16>
    %c0_113 = arith.constant 0 : index
    %c10_114 = arith.constant 10 : index
    %c1_115 = arith.constant 1 : index
    %c0_116 = arith.constant 0 : index
    %70 = vector.load %arg1[%c0_113, %c10_114, %c1_115, %c0_116] : memref<1x52x7x32xbf16, #tpu.memory_space<vmem>>, vector<1x1x6x16xbf16>
    %71 = vector.shape_cast %70 : vector<1x1x6x16xbf16> to vector<6x16xbf16>
    %c0_117 = arith.constant 0 : index
    %c11 = arith.constant 11 : index
    %c0_118 = arith.constant 0 : index
    %c0_119 = arith.constant 0 : index
    %72 = vector.load %arg1[%c0_117, %c11, %c0_118, %c0_119] : memref<1x52x7x32xbf16, #tpu.memory_space<vmem>>, vector<1x1x6x32xbf16>
    %73 = vector.shape_cast %72 : vector<1x1x6x32xbf16> to vector<6x32xbf16>
    %c0_120 = arith.constant 0 : index
    %c11_121 = arith.constant 11 : index
    %c1_122 = arith.constant 1 : index
    %c0_123 = arith.constant 0 : index
    %74 = vector.load %arg1[%c0_120, %c11_121, %c1_122, %c0_123] : memref<1x52x7x32xbf16, #tpu.memory_space<vmem>>, vector<1x1x6x16xbf16>
    %75 = vector.shape_cast %74 : vector<1x1x6x16xbf16> to vector<6x16xbf16>
    %76 = tpu.concatenate %45, %47, %49, %51, %53, %55, %57, %59, %61, %63, %65, %67, %69, %71, %73, %75 in 1 : vector<6x32xbf16>, vector<6x16xbf16>, vector<6x32xbf16>, vector<6x16xbf16>, vector<6x32xbf16>, vector<6x16xbf16>, vector<6x32xbf16>, vector<6x16xbf16>, vector<6x32xbf16>, vector<6x16xbf16>, vector<6x32xbf16>, vector<6x16xbf16>, vector<6x32xbf16>, vector<6x16xbf16>, vector<6x32xbf16>, vector<6x16xbf16> -> vector<6x384xbf16>
    %c0_124 = arith.constant 0 : index
    %c0_125 = arith.constant 0 : index
    %77 = vector.load %arg2[%c0_124, %c0_125] : memref<384x64xbf16, #tpu.memory_space<vmem>>, vector<384x64xbf16>
    %cst_126 = arith.constant dense<0.000000e+00> : vector<6x64xf32>
    %78 = tpu.matmul %76, %77, %cst_126 {dimension_numbers = #tpu.dot_dimension_numbers<[1], [0], [0], [1], [0, 0, 1, 1], [], []>} : vector<6x384xbf16>, vector<384x64xbf16>, vector<6x64xf32> -> vector<6x64xf32>
    %c0_127 = arith.constant 0 : index
    %c0_128 = arith.constant 0 : index
    %79 = vector.load %arg3[%c0_127, %c0_128] : memref<1x64xf32, #tpu.memory_space<vmem>>, vector<1x64xf32>
    %80 = vector.broadcast %79 : vector<1x64xf32> to vector<6x64xf32>
    %81 = arith.addf %78, %80 : vector<6x64xf32>
    %cst_129 = arith.constant 0.000000e+00 : f32
    %82 = vector.broadcast %cst_129 : f32 to vector<6x64xf32>
    %83 = arith.maximumf %81, %82 : vector<6x64xf32>
    %84 = arith.truncf %83 : vector<6x64xf32> to vector<6x64xbf16>
    %c1_130 = arith.constant 1 : index
    %c0_131 = arith.constant 0 : index
    %c0_132 = arith.constant 0 : index
    %85 = vector.load %arg13[%c1_130, %c0_131, %c0_132] : memref<12x6x64xbf16, #tpu.memory_space<vmem>>, vector<1x6x64xbf16>
    %86 = vector.shape_cast %85 : vector<1x6x64xbf16> to vector<6x64xbf16>
    %87 = vector.shape_cast %84 : vector<6x64xbf16> to vector<1x6x64xbf16>
    tpu.vector_store %arg13[%c1_130, %c0_131, %c0_132], %87 {strides = array<i32>} : memref<12x6x64xbf16, #tpu.memory_space<vmem>>, vector<1x6x64xbf16>,
    %c0_133 = arith.constant 0 : index
    %c8_134 = arith.constant 8 : index
    %c0_135 = arith.constant 0 : index
    %c0_136 = arith.constant 0 : index
    %88 = vector.load %arg1[%c0_133, %c8_134, %c0_135, %c0_136] : memref<1x52x7x32xbf16, #tpu.memory_space<vmem>>, vector<1x1x6x32xbf16>
    %89 = vector.shape_cast %88 : vector<1x1x6x32xbf16> to vector<6x32xbf16>
    %c0_137 = arith.constant 0 : index
    %c8_138 = arith.constant 8 : index
    %c1_139 = arith.constant 1 : index
    %c0_140 = arith.constant 0 : index
    %90 = vector.load %arg1[%c0_137, %c8_138, %c1_139, %c0_140] : memref<1x52x7x32xbf16, #tpu.memory_space<vmem>>, vector<1x1x6x16xbf16>
    %91 = vector.shape_cast %90 : vector<1x1x6x16xbf16> to vector<6x16xbf16>
    %c0_141 = arith.constant 0 : index
    %c9_142 = arith.constant 9 : index
    %c0_143 = arith.constant 0 : index
    %c0_144 = arith.constant 0 : index
    %92 = vector.load %arg1[%c0_141, %c9_142, %c0_143, %c0_144] : memref<1x52x7x32xbf16, #tpu.memory_space<vmem>>, vector<1x1x6x32xbf16>
    %93 = vector.shape_cast %92 : vector<1x1x6x32xbf16> to vector<6x32xbf16>
    %c0_145 = arith.constant 0 : index
    %c9_146 = arith.constant 9 : index
    %c1_147 = arith.constant 1 : index
    %c0_148 = arith.constant 0 : index
    %94 = vector.load %arg1[%c0_145, %c9_146, %c1_147, %c0_148] : memref<1x52x7x32xbf16, #tpu.memory_space<vmem>>, vector<1x1x6x16xbf16>
    %95 = vector.shape_cast %94 : vector<1x1x6x16xbf16> to vector<6x16xbf16>
    %c0_149 = arith.constant 0 : index
    %c10_150 = arith.constant 10 : index
    %c0_151 = arith.constant 0 : index
    %c0_152 = arith.constant 0 : index
    %96 = vector.load %arg1[%c0_149, %c10_150, %c0_151, %c0_152] : memref<1x52x7x32xbf16, #tpu.memory_space<vmem>>, vector<1x1x6x32xbf16>
    %97 = vector.shape_cast %96 : vector<1x1x6x32xbf16> to vector<6x32xbf16>
    %c0_153 = arith.constant 0 : index
    %c10_154 = arith.constant 10 : index
    %c1_155 = arith.constant 1 : index
    %c0_156 = arith.constant 0 : index
    %98 = vector.load %arg1[%c0_153, %c10_154, %c1_155, %c0_156] : memref<1x52x7x32xbf16, #tpu.memory_space<vmem>>, vector<1x1x6x16xbf16>
    %99 = vector.shape_cast %98 : vector<1x1x6x16xbf16> to vector<6x16xbf16>
    %c0_157 = arith.constant 0 : index
    %c11_158 = arith.constant 11 : index
    %c0_159 = arith.constant 0 : index
    %c0_160 = arith.constant 0 : index
    %100 = vector.load %arg1[%c0_157, %c11_158, %c0_159, %c0_160] : memref<1x52x7x32xbf16, #tpu.memory_space<vmem>>, vector<1x1x6x32xbf16>
    %101 = vector.shape_cast %100 : vector<1x1x6x32xbf16> to vector<6x32xbf16>
    %c0_161 = arith.constant 0 : index
    %c11_162 = arith.constant 11 : index
    %c1_163 = arith.constant 1 : index
    %c0_164 = arith.constant 0 : index
    %102 = vector.load %arg1[%c0_161, %c11_162, %c1_163, %c0_164] : memref<1x52x7x32xbf16, #tpu.memory_space<vmem>>, vector<1x1x6x16xbf16>
    %103 = vector.shape_cast %102 : vector<1x1x6x16xbf16> to vector<6x16xbf16>
    %c0_165 = arith.constant 0 : index
    %c12 = arith.constant 12 : index
    %c0_166 = arith.constant 0 : index
    %c0_167 = arith.constant 0 : index
    %104 = vector.load %arg1[%c0_165, %c12, %c0_166, %c0_167] : memref<1x52x7x32xbf16, #tpu.memory_space<vmem>>, vector<1x1x6x32xbf16>
    %105 = vector.shape_cast %104 : vector<1x1x6x32xbf16> to vector<6x32xbf16>
    %c0_168 = arith.constant 0 : index
    %c12_169 = arith.constant 12 : index
    %c1_170 = arith.constant 1 : index
    %c0_171 = arith.constant 0 : index
    %106 = vector.load %arg1[%c0_168, %c12_169, %c1_170, %c0_171] : memref<1x52x7x32xbf16, #tpu.memory_space<vmem>>, vector<1x1x6x16xbf16>
    %107 = vector.shape_cast %106 : vector<1x1x6x16xbf16> to vector<6x16xbf16>
    %c0_172 = arith.constant 0 : index
    %c13 = arith.constant 13 : index
    %c0_173 = arith.constant 0 : index
    %c0_174 = arith.constant 0 : index
    %108 = vector.load %arg1[%c0_172, %c13, %c0_173, %c0_174] : memref<1x52x7x32xbf16, #tpu.memory_space<vmem>>, vector<1x1x6x32xbf16>
    %109 = vector.shape_cast %108 : vector<1x1x6x32xbf16> to vector<6x32xbf16>
    %c0_175 = arith.constant 0 : index
    %c13_176 = arith.constant 13 : index
    %c1_177 = arith.constant 1 : index
    %c0_178 = arith.constant 0 : index
    %110 = vector.load %arg1[%c0_175, %c13_176, %c1_177, %c0_178] : memref<1x52x7x32xbf16, #tpu.memory_space<vmem>>, vector<1x1x6x16xbf16>
    %111 = vector.shape_cast %110 : vector<1x1x6x16xbf16> to vector<6x16xbf16>
    %c0_179 = arith.constant 0 : index
    %c14 = arith.constant 14 : index
    %c0_180 = arith.constant 0 : index
    %c0_181 = arith.constant 0 : index
    %112 = vector.load %arg1[%c0_179, %c14, %c0_180, %c0_181] : memref<1x52x7x32xbf16, #tpu.memory_space<vmem>>, vector<1x1x6x32xbf16>
    %113 = vector.shape_cast %112 : vector<1x1x6x32xbf16> to vector<6x32xbf16>
    %c0_182 = arith.constant 0 : index
    %c14_183 = arith.constant 14 : index
    %c1_184 = arith.constant 1 : index
    %c0_185 = arith.constant 0 : index
    %114 = vector.load %arg1[%c0_182, %c14_183, %c1_184, %c0_185] : memref<1x52x7x32xbf16, #tpu.memory_space<vmem>>, vector<1x1x6x16xbf16>
    %115 = vector.shape_cast %114 : vector<1x1x6x16xbf16> to vector<6x16xbf16>
    %c0_186 = arith.constant 0 : index
    %c15 = arith.constant 15 : index
    %c0_187 = arith.constant 0 : index
    %c0_188 = arith.constant 0 : index
    %116 = vector.load %arg1[%c0_186, %c15, %c0_187, %c0_188] : memref<1x52x7x32xbf16, #tpu.memory_space<vmem>>, vector<1x1x6x32xbf16>
    %117 = vector.shape_cast %116 : vector<1x1x6x32xbf16> to vector<6x32xbf16>
    %c0_189 = arith.constant 0 : index
    %c15_190 = arith.constant 15 : index
    %c1_191 = arith.constant 1 : index
    %c0_192 = arith.constant 0 : index
    %118 = vector.load %arg1[%c0_189, %c15_190, %c1_191, %c0_192] : memref<1x52x7x32xbf16, #tpu.memory_space<vmem>>, vector<1x1x6x16xbf16>
    %119 = vector.shape_cast %118 : vector<1x1x6x16xbf16> to vector<6x16xbf16>
    %120 = tpu.concatenate %89, %91, %93, %95, %97, %99, %101, %103, %105, %107, %109, %111, %113, %115, %117, %119 in 1 : vector<6x32xbf16>, vector<6x16xbf16>, vector<6x32xbf16>, vector<6x16xbf16>, vector<6x32xbf16>, vector<6x16xbf16>, vector<6x32xbf16>, vector<6x16xbf16>, vector<6x32xbf16>, vector<6x16xbf16>, vector<6x32xbf16>, vector<6x16xbf16>, vector<6x32xbf16>, vector<6x16xbf16>, vector<6x32xbf16>, vector<6x16xbf16> -> vector<6x384xbf16>
    %c0_193 = arith.constant 0 : index
    %c0_194 = arith.constant 0 : index
    %121 = vector.load %arg2[%c0_193, %c0_194] : memref<384x64xbf16, #tpu.memory_space<vmem>>, vector<384x64xbf16>
    %cst_195 = arith.constant dense<0.000000e+00> : vector<6x64xf32>
    %122 = tpu.matmul %120, %121, %cst_195 {dimension_numbers = #tpu.dot_dimension_numbers<[1], [0], [0], [1], [0, 0, 1, 1], [], []>} : vector<6x384xbf16>, vector<384x64xbf16>, vector<6x64xf32> -> vector<6x64xf32>
    %c0_196 = arith.constant 0 : index
    %c0_197 = arith.constant 0 : index
    %123 = vector.load %arg3[%c0_196, %c0_197] : memref<1x64xf32, #tpu.memory_space<vmem>>, vector<1x64xf32>
    %124 = vector.broadcast %123 : vector<1x64xf32> to vector<6x64xf32>
    %125 = arith.addf %122, %124 : vector<6x64xf32>
    %cst_198 = arith.constant 0.000000e+00 : f32
    %126 = vector.broadcast %cst_198 : f32 to vector<6x64xf32>
    %127 = arith.maximumf %125, %126 : vector<6x64xf32>
    %128 = arith.truncf %127 : vector<6x64xf32> to vector<6x64xbf16>
    %c2_199 = arith.constant 2 : index
    %c0_200 = arith.constant 0 : index
    %c0_201 = arith.constant 0 : index
    %129 = vector.load %arg13[%c2_199, %c0_200, %c0_201] : memref<12x6x64xbf16, #tpu.memory_space<vmem>>, vector<1x6x64xbf16>
    %130 = vector.shape_cast %129 : vector<1x6x64xbf16> to vector<6x64xbf16>
    %131 = vector.shape_cast %128 : vector<6x64xbf16> to vector<1x6x64xbf16>
    tpu.vector_store %arg13[%c2_199, %c0_200, %c0_201], %131 {strides = array<i32>} : memref<12x6x64xbf16, #tpu.memory_space<vmem>>, vector<1x6x64xbf16>,
    %c0_202 = arith.constant 0 : index
    %c12_203 = arith.constant 12 : index
    %c0_204 = arith.constant 0 : index
    %c0_205 = arith.constant 0 : index
    %132 = vector.load %arg1[%c0_202, %c12_203, %c0_204, %c0_205] : memref<1x52x7x32xbf16, #tpu.memory_space<vmem>>, vector<1x1x6x32xbf16>
    %133 = vector.shape_cast %132 : vector<1x1x6x32xbf16> to vector<6x32xbf16>
    %c0_206 = arith.constant 0 : index
    %c12_207 = arith.constant 12 : index
    %c1_208 = arith.constant 1 : index
    %c0_209 = arith.constant 0 : index
    %134 = vector.load %arg1[%c0_206, %c12_207, %c1_208, %c0_209] : memref<1x52x7x32xbf16, #tpu.memory_space<vmem>>, vector<1x1x6x16xbf16>
    %135 = vector.shape_cast %134 : vector<1x1x6x16xbf16> to vector<6x16xbf16>
    %c0_210 = arith.constant 0 : index
    %c13_211 = arith.constant 13 : index
    %c0_212 = arith.constant 0 : index
    %c0_213 = arith.constant 0 : index
    %136 = vector.load %arg1[%c0_210, %c13_211, %c0_212, %c0_213] : memref<1x52x7x32xbf16, #tpu.memory_space<vmem>>, vector<1x1x6x32xbf16>
    %137 = vector.shape_cast %136 : vector<1x1x6x32xbf16> to vector<6x32xbf16>
    %c0_214 = arith.constant 0 : index
    %c13_215 = arith.constant 13 : index
    %c1_216 = arith.constant 1 : index
    %c0_217 = arith.constant 0 : index
    %138 = vector.load %arg1[%c0_214, %c13_215, %c1_216, %c0_217] : memref<1x52x7x32xbf16, #tpu.memory_space<vmem>>, vector<1x1x6x16xbf16>
    %139 = vector.shape_cast %138 : vector<1x1x6x16xbf16> to vector<6x16xbf16>
    %c0_218 = arith.constant 0 : index
    %c14_219 = arith.constant 14 : index
    %c0_220 = arith.constant 0 : index
    %c0_221 = arith.constant 0 : index
    %140 = vector.load %arg1[%c0_218, %c14_219, %c0_220, %c0_221] : memref<1x52x7x32xbf16, #tpu.memory_space<vmem>>, vector<1x1x6x32xbf16>
    %141 = vector.shape_cast %140 : vector<1x1x6x32xbf16> to vector<6x32xbf16>
    %c0_222 = arith.constant 0 : index
    %c14_223 = arith.constant 14 : index
    %c1_224 = arith.constant 1 : index
    %c0_225 = arith.constant 0 : index
    %142 = vector.load %arg1[%c0_222, %c14_223, %c1_224, %c0_225] : memref<1x52x7x32xbf16, #tpu.memory_space<vmem>>, vector<1x1x6x16xbf16>
    %143 = vector.shape_cast %142 : vector<1x1x6x16xbf16> to vector<6x16xbf16>
    %c0_226 = arith.constant 0 : index
    %c15_227 = arith.constant 15 : index
    %c0_228 = arith.constant 0 : index
    %c0_229 = arith.constant 0 : index
    %144 = vector.load %arg1[%c0_226, %c15_227, %c0_228, %c0_229] : memref<1x52x7x32xbf16, #tpu.memory_space<vmem>>, vector<1x1x6x32xbf16>
    %145 = vector.shape_cast %144 : vector<1x1x6x32xbf16> to vector<6x32xbf16>
    %c0_230 = arith.constant 0 : index
    %c15_231 = arith.constant 15 : index
    %c1_232 = arith.constant 1 : index
    %c0_233 = arith.constant 0 : index
    %146 = vector.load %arg1[%c0_230, %c15_231, %c1_232, %c0_233] : memref<1x52x7x32xbf16, #tpu.memory_space<vmem>>, vector<1x1x6x16xbf16>
    %147 = vector.shape_cast %146 : vector<1x1x6x16xbf16> to vector<6x16xbf16>
    %c0_234 = arith.constant 0 : index
    %c16 = arith.constant 16 : index
    %c0_235 = arith.constant 0 : index
    %c0_236 = arith.constant 0 : index
    %148 = vector.load %arg1[%c0_234, %c16, %c0_235, %c0_236] : memref<1x52x7x32xbf16, #tpu.memory_space<vmem>>, vector<1x1x6x32xbf16>
    %149 = vector.shape_cast %148 : vector<1x1x6x32xbf16> to vector<6x32xbf16>
    %c0_237 = arith.constant 0 : index
    %c16_238 = arith.constant 16 : index
    %c1_239 = arith.constant 1 : index
    %c0_240 = arith.constant 0 : index
    %150 = vector.load %arg1[%c0_237, %c16_238, %c1_239, %c0_240] : memref<1x52x7x32xbf16, #tpu.memory_space<vmem>>, vector<1x1x6x16xbf16>
    %151 = vector.shape_cast %150 : vector<1x1x6x16xbf16> to vector<6x16xbf16>
    %c0_241 = arith.constant 0 : index
    %c17 = arith.constant 17 : index
    %c0_242 = arith.constant 0 : index
    %c0_243 = arith.constant 0 : index
    %152 = vector.load %arg1[%c0_241, %c17, %c0_242, %c0_243] : memref<1x52x7x32xbf16, #tpu.memory_space<vmem>>, vector<1x1x6x32xbf16>
    %153 = vector.shape_cast %152 : vector<1x1x6x32xbf16> to vector<6x32xbf16>
    %c0_244 = arith.constant 0 : index
    %c17_245 = arith.constant 17 : index
    %c1_246 = arith.constant 1 : index
    %c0_247 = arith.constant 0 : index
    %154 = vector.load %arg1[%c0_244, %c17_245, %c1_246, %c0_247] : memref<1x52x7x32xbf16, #tpu.memory_space<vmem>>, vector<1x1x6x16xbf16>
    %155 = vector.shape_cast %154 : vector<1x1x6x16xbf16> to vector<6x16xbf16>
    %c0_248 = arith.constant 0 : index
    %c18 = arith.constant 18 : index
    %c0_249 = arith.constant 0 : index
    %c0_250 = arith.constant 0 : index
    %156 = vector.load %arg1[%c0_248, %c18, %c0_249, %c0_250] : memref<1x52x7x32xbf16, #tpu.memory_space<vmem>>, vector<1x1x6x32xbf16>
    %157 = vector.shape_cast %156 : vector<1x1x6x32xbf16> to vector<6x32xbf16>
    %c0_251 = arith.constant 0 : index
    %c18_252 = arith.constant 18 : index
    %c1_253 = arith.constant 1 : index
    %c0_254 = arith.constant 0 : index
    %158 = vector.load %arg1[%c0_251, %c18_252, %c1_253, %c0_254] : memref<1x52x7x32xbf16, #tpu.memory_space<vmem>>, vector<1x1x6x16xbf16>
    %159 = vector.shape_cast %158 : vector<1x1x6x16xbf16> to vector<6x16xbf16>
    %c0_255 = arith.constant 0 : index
    %c19 = arith.constant 19 : index
    %c0_256 = arith.constant 0 : index
    %c0_257 = arith.constant 0 : index
    %160 = vector.load %arg1[%c0_255, %c19, %c0_256, %c0_257] : memref<1x52x7x32xbf16, #tpu.memory_space<vmem>>, vector<1x1x6x32xbf16>
    %161 = vector.shape_cast %160 : vector<1x1x6x32xbf16> to vector<6x32xbf16>
    %c0_258 = arith.constant 0 : index
    %c19_259 = arith.constant 19 : index
    %c1_260 = arith.constant 1 : index
    %c0_261 = arith.constant 0 : index
    %162 = vector.load %arg1[%c0_258, %c19_259, %c1_260, %c0_261] : memref<1x52x7x32xbf16, #tpu.memory_space<vmem>>, vector<1x1x6x16xbf16>
    %163 = vector.shape_cast %162 : vector<1x1x6x16xbf16> to vector<6x16xbf16>
    %164 = tpu.concatenate %133, %135, %137, %139, %141, %143, %145, %147, %149, %151, %153, %155, %157, %159, %161, %163 in 1 : vector<6x32xbf16>, vector<6x16xbf16>, vector<6x32xbf16>, vector<6x16xbf16>, vector<6x32xbf16>, vector<6x16xbf16>, vector<6x32xbf16>, vector<6x16xbf16>, vector<6x32xbf16>, vector<6x16xbf16>, vector<6x32xbf16>, vector<6x16xbf16>, vector<6x32xbf16>, vector<6x16xbf16>, vector<6x32xbf16>, vector<6x16xbf16> -> vector<6x384xbf16>
    %c0_262 = arith.constant 0 : index
    %c0_263 = arith.constant 0 : index
    %165 = vector.load %arg2[%c0_262, %c0_263] : memref<384x64xbf16, #tpu.memory_space<vmem>>, vector<384x64xbf16>
    %cst_264 = arith.constant dense<0.000000e+00> : vector<6x64xf32>
    %166 = tpu.matmul %164, %165, %cst_264 {dimension_numbers = #tpu.dot_dimension_numbers<[1], [0], [0], [1], [0, 0, 1, 1], [], []>} : vector<6x384xbf16>, vector<384x64xbf16>, vector<6x64xf32> -> vector<6x64xf32>
    %c0_265 = arith.constant 0 : index
    %c0_266 = arith.constant 0 : index
    %167 = vector.load %arg3[%c0_265, %c0_266] : memref<1x64xf32, #tpu.memory_space<vmem>>, vector<1x64xf32>
    %168 = vector.broadcast %167 : vector<1x64xf32> to vector<6x64xf32>
    %169 = arith.addf %166, %168 : vector<6x64xf32>
    %cst_267 = arith.constant 0.000000e+00 : f32
    %170 = vector.broadcast %cst_267 : f32 to vector<6x64xf32>
    %171 = arith.maximumf %169, %170 : vector<6x64xf32>
    %172 = arith.truncf %171 : vector<6x64xf32> to vector<6x64xbf16>
    %c3_268 = arith.constant 3 : index
    %c0_269 = arith.constant 0 : index
    %c0_270 = arith.constant 0 : index
    %173 = vector.load %arg13[%c3_268, %c0_269, %c0_270] : memref<12x6x64xbf16, #tpu.memory_space<vmem>>, vector<1x6x64xbf16>
    %174 = vector.shape_cast %173 : vector<1x6x64xbf16> to vector<6x64xbf16>
    %175 = vector.shape_cast %172 : vector<6x64xbf16> to vector<1x6x64xbf16>
    tpu.vector_store %arg13[%c3_268, %c0_269, %c0_270], %175 {strides = array<i32>} : memref<12x6x64xbf16, #tpu.memory_space<vmem>>, vector<1x6x64xbf16>,
    %c0_271 = arith.constant 0 : index
    %c16_272 = arith.constant 16 : index
    %c0_273 = arith.constant 0 : index
    %c0_274 = arith.constant 0 : index
    %176 = vector.load %arg1[%c0_271, %c16_272, %c0_273, %c0_274] : memref<1x52x7x32xbf16, #tpu.memory_space<vmem>>, vector<1x1x6x32xbf16>
    %177 = vector.shape_cast %176 : vector<1x1x6x32xbf16> to vector<6x32xbf16>
    %c0_275 = arith.constant 0 : index
    %c16_276 = arith.constant 16 : index
    %c1_277 = arith.constant 1 : index
    %c0_278 = arith.constant 0 : index
    %178 = vector.load %arg1[%c0_275, %c16_276, %c1_277, %c0_278] : memref<1x52x7x32xbf16, #tpu.memory_space<vmem>>, vector<1x1x6x16xbf16>
    %179 = vector.shape_cast %178 : vector<1x1x6x16xbf16> to vector<6x16xbf16>
    %c0_279 = arith.constant 0 : index
    %c17_280 = arith.constant 17 : index
    %c0_281 = arith.constant 0 : index
    %c0_282 = arith.constant 0 : index
    %180 = vector.load %arg1[%c0_279, %c17_280, %c0_281, %c0_282] : memref<1x52x7x32xbf16, #tpu.memory_space<vmem>>, vector<1x1x6x32xbf16>
    %181 = vector.shape_cast %180 : vector<1x1x6x32xbf16> to vector<6x32xbf16>
    %c0_283 = arith.constant 0 : index
    %c17_284 = arith.constant 17 : index
    %c1_285 = arith.constant 1 : index
    %c0_286 = arith.constant 0 : index
    %182 = vector.load %arg1[%c0_283, %c17_284, %c1_285, %c0_286] : memref<1x52x7x32xbf16, #tpu.memory_space<vmem>>, vector<1x1x6x16xbf16>
    %183 = vector.shape_cast %182 : vector<1x1x6x16xbf16> to vector<6x16xbf16>
    %c0_287 = arith.constant 0 : index
    %c18_288 = arith.constant 18 : index
    %c0_289 = arith.constant 0 : index
    %c0_290 = arith.constant 0 : index
    %184 = vector.load %arg1[%c0_287, %c18_288, %c0_289, %c0_290] : memref<1x52x7x32xbf16, #tpu.memory_space<vmem>>, vector<1x1x6x32xbf16>
    %185 = vector.shape_cast %184 : vector<1x1x6x32xbf16> to vector<6x32xbf16>
    %c0_291 = arith.constant 0 : index
    %c18_292 = arith.constant 18 : index
    %c1_293 = arith.constant 1 : index
    %c0_294 = arith.constant 0 : index
    %186 = vector.load %arg1[%c0_291, %c18_292, %c1_293, %c0_294] : memref<1x52x7x32xbf16, #tpu.memory_space<vmem>>, vector<1x1x6x16xbf16>
    %187 = vector.shape_cast %186 : vector<1x1x6x16xbf16> to vector<6x16xbf16>
    %c0_295 = arith.constant 0 : index
    %c19_296 = arith.constant 19 : index
    %c0_297 = arith.constant 0 : index
    %c0_298 = arith.constant 0 : index
    %188 = vector.load %arg1[%c0_295, %c19_296, %c0_297, %c0_298] : memref<1x52x7x32xbf16, #tpu.memory_space<vmem>>, vector<1x1x6x32xbf16>
    %189 = vector.shape_cast %188 : vector<1x1x6x32xbf16> to vector<6x32xbf16>
    %c0_299 = arith.constant 0 : index
    %c19_300 = arith.constant 19 : index
    %c1_301 = arith.constant 1 : index
    %c0_302 = arith.constant 0 : index
    %190 = vector.load %arg1[%c0_299, %c19_300, %c1_301, %c0_302] : memref<1x52x7x32xbf16, #tpu.memory_space<vmem>>, vector<1x1x6x16xbf16>
    %191 = vector.shape_cast %190 : vector<1x1x6x16xbf16> to vector<6x16xbf16>
    %c0_303 = arith.constant 0 : index
    %c20 = arith.constant 20 : index
    %c0_304 = arith.constant 0 : index
    %c0_305 = arith.constant 0 : index
    %192 = vector.load %arg1[%c0_303, %c20, %c0_304, %c0_305] : memref<1x52x7x32xbf16, #tpu.memory_space<vmem>>, vector<1x1x6x32xbf16>
    %193 = vector.shape_cast %192 : vector<1x1x6x32xbf16> to vector<6x32xbf16>
    %c0_306 = arith.constant 0 : index
    %c20_307 = arith.constant 20 : index
    %c1_308 = arith.constant 1 : index
    %c0_309 = arith.constant 0 : index
    %194 = vector.load %arg1[%c0_306, %c20_307, %c1_308, %c0_309] : memref<1x52x7x32xbf16, #tpu.memory_space<vmem>>, vector<1x1x6x16xbf16>
    %195 = vector.shape_cast %194 : vector<1x1x6x16xbf16> to vector<6x16xbf16>
    %c0_310 = arith.constant 0 : index
    %c21 = arith.constant 21 : index
    %c0_311 = arith.constant 0 : index
    %c0_312 = arith.constant 0 : index
    %196 = vector.load %arg1[%c0_310, %c21, %c0_311, %c0_312] : memref<1x52x7x32xbf16, #tpu.memory_space<vmem>>, vector<1x1x6x32xbf16>
    %197 = vector.shape_cast %196 : vector<1x1x6x32xbf16> to vector<6x32xbf16>
    %c0_313 = arith.constant 0 : index
    %c21_314 = arith.constant 21 : index
    %c1_315 = arith.constant 1 : index
    %c0_316 = arith.constant 0 : index
    %198 = vector.load %arg1[%c0_313, %c21_314, %c1_315, %c0_316] : memref<1x52x7x32xbf16, #tpu.memory_space<vmem>>, vector<1x1x6x16xbf16>
    %199 = vector.shape_cast %198 : vector<1x1x6x16xbf16> to vector<6x16xbf16>
    %c0_317 = arith.constant 0 : index
    %c22 = arith.constant 22 : index
    %c0_318 = arith.constant 0 : index
    %c0_319 = arith.constant 0 : index
    %200 = vector.load %arg1[%c0_317, %c22, %c0_318, %c0_319] : memref<1x52x7x32xbf16, #tpu.memory_space<vmem>>, vector<1x1x6x32xbf16>
    %201 = vector.shape_cast %200 : vector<1x1x6x32xbf16> to vector<6x32xbf16>
    %c0_320 = arith.constant 0 : index
    %c22_321 = arith.constant 22 : index
    %c1_322 = arith.constant 1 : index
    %c0_323 = arith.constant 0 : index
    %202 = vector.load %arg1[%c0_320, %c22_321, %c1_322, %c0_323] : memref<1x52x7x32xbf16, #tpu.memory_space<vmem>>, vector<1x1x6x16xbf16>
    %203 = vector.shape_cast %202 : vector<1x1x6x16xbf16> to vector<6x16xbf16>
    %c0_324 = arith.constant 0 : index
    %c23 = arith.constant 23 : index
    %c0_325 = arith.constant 0 : index
    %c0_326 = arith.constant 0 : index
    %204 = vector.load %arg1[%c0_324, %c23, %c0_325, %c0_326] : memref<1x52x7x32xbf16, #tpu.memory_space<vmem>>, vector<1x1x6x32xbf16>
    %205 = vector.shape_cast %204 : vector<1x1x6x32xbf16> to vector<6x32xbf16>
    %c0_327 = arith.constant 0 : index
    %c23_328 = arith.constant 23 : index
    %c1_329 = arith.constant 1 : index
    %c0_330 = arith.constant 0 : index
    %206 = vector.load %arg1[%c0_327, %c23_328, %c1_329, %c0_330] : memref<1x52x7x32xbf16, #tpu.memory_space<vmem>>, vector<1x1x6x16xbf16>
    %207 = vector.shape_cast %206 : vector<1x1x6x16xbf16> to vector<6x16xbf16>
    %208 = tpu.concatenate %177, %179, %181, %183, %185, %187, %189, %191, %193, %195, %197, %199, %201, %203, %205, %207 in 1 : vector<6x32xbf16>, vector<6x16xbf16>, vector<6x32xbf16>, vector<6x16xbf16>, vector<6x32xbf16>, vector<6x16xbf16>, vector<6x32xbf16>, vector<6x16xbf16>, vector<6x32xbf16>, vector<6x16xbf16>, vector<6x32xbf16>, vector<6x16xbf16>, vector<6x32xbf16>, vector<6x16xbf16>, vector<6x32xbf16>, vector<6x16xbf16> -> vector<6x384xbf16>
    %c0_331 = arith.constant 0 : index
    %c0_332 = arith.constant 0 : index
    %209 = vector.load %arg2[%c0_331, %c0_332] : memref<384x64xbf16, #tpu.memory_space<vmem>>, vector<384x64xbf16>
    %cst_333 = arith.constant dense<0.000000e+00> : vector<6x64xf32>
    %210 = tpu.matmul %208, %209, %cst_333 {dimension_numbers = #tpu.dot_dimension_numbers<[1], [0], [0], [1], [0, 0, 1, 1], [], []>} : vector<6x384xbf16>, vector<384x64xbf16>, vector<6x64xf32> -> vector<6x64xf32>
    %c0_334 = arith.constant 0 : index
    %c0_335 = arith.constant 0 : index
    %211 = vector.load %arg3[%c0_334, %c0_335] : memref<1x64xf32, #tpu.memory_space<vmem>>, vector<1x64xf32>
    %212 = vector.broadcast %211 : vector<1x64xf32> to vector<6x64xf32>
    %213 = arith.addf %210, %212 : vector<6x64xf32>
    %cst_336 = arith.constant 0.000000e+00 : f32
    %214 = vector.broadcast %cst_336 : f32 to vector<6x64xf32>
    %215 = arith.maximumf %213, %214 : vector<6x64xf32>
    %216 = arith.truncf %215 : vector<6x64xf32> to vector<6x64xbf16>
    %c4_337 = arith.constant 4 : index
    %c0_338 = arith.constant 0 : index
    %c0_339 = arith.constant 0 : index
    %217 = vector.load %arg13[%c4_337, %c0_338, %c0_339] : memref<12x6x64xbf16, #tpu.memory_space<vmem>>, vector<1x6x64xbf16>
    %218 = vector.shape_cast %217 : vector<1x6x64xbf16> to vector<6x64xbf16>
    %219 = vector.shape_cast %216 : vector<6x64xbf16> to vector<1x6x64xbf16>
    tpu.vector_store %arg13[%c4_337, %c0_338, %c0_339], %219 {strides = array<i32>} : memref<12x6x64xbf16, #tpu.memory_space<vmem>>, vector<1x6x64xbf16>,
    %c0_340 = arith.constant 0 : index
    %c20_341 = arith.constant 20 : index
    %c0_342 = arith.constant 0 : index
    %c0_343 = arith.constant 0 : index
    %220 = vector.load %arg1[%c0_340, %c20_341, %c0_342, %c0_343] : memref<1x52x7x32xbf16, #tpu.memory_space<vmem>>, vector<1x1x6x32xbf16>
    %221 = vector.shape_cast %220 : vector<1x1x6x32xbf16> to vector<6x32xbf16>
    %c0_344 = arith.constant 0 : index
    %c20_345 = arith.constant 20 : index
    %c1_346 = arith.constant 1 : index
    %c0_347 = arith.constant 0 : index
    %222 = vector.load %arg1[%c0_344, %c20_345, %c1_346, %c0_347] : memref<1x52x7x32xbf16, #tpu.memory_space<vmem>>, vector<1x1x6x16xbf16>
    %223 = vector.shape_cast %222 : vector<1x1x6x16xbf16> to vector<6x16xbf16>
    %c0_348 = arith.constant 0 : index
    %c21_349 = arith.constant 21 : index
    %c0_350 = arith.constant 0 : index
    %c0_351 = arith.constant 0 : index
    %224 = vector.load %arg1[%c0_348, %c21_349, %c0_350, %c0_351] : memref<1x52x7x32xbf16, #tpu.memory_space<vmem>>, vector<1x1x6x32xbf16>
    %225 = vector.shape_cast %224 : vector<1x1x6x32xbf16> to vector<6x32xbf16>
    %c0_352 = arith.constant 0 : index
    %c21_353 = arith.constant 21 : index
    %c1_354 = arith.constant 1 : index
    %c0_355 = arith.constant 0 : index
    %226 = vector.load %arg1[%c0_352, %c21_353, %c1_354, %c0_355] : memref<1x52x7x32xbf16, #tpu.memory_space<vmem>>, vector<1x1x6x16xbf16>
    %227 = vector.shape_cast %226 : vector<1x1x6x16xbf16> to vector<6x16xbf16>
    %c0_356 = arith.constant 0 : index
    %c22_357 = arith.constant 22 : index
    %c0_358 = arith.constant 0 : index
    %c0_359 = arith.constant 0 : index
    %228 = vector.load %arg1[%c0_356, %c22_357, %c0_358, %c0_359] : memref<1x52x7x32xbf16, #tpu.memory_space<vmem>>, vector<1x1x6x32xbf16>
    %229 = vector.shape_cast %228 : vector<1x1x6x32xbf16> to vector<6x32xbf16>
    %c0_360 = arith.constant 0 : index
    %c22_361 = arith.constant 22 : index
    %c1_362 = arith.constant 1 : index
    %c0_363 = arith.constant 0 : index
    %230 = vector.load %arg1[%c0_360, %c22_361, %c1_362, %c0_363] : memref<1x52x7x32xbf16, #tpu.memory_space<vmem>>, vector<1x1x6x16xbf16>
    %231 = vector.shape_cast %230 : vector<1x1x6x16xbf16> to vector<6x16xbf16>
    %c0_364 = arith.constant 0 : index
    %c23_365 = arith.constant 23 : index
    %c0_366 = arith.constant 0 : index
    %c0_367 = arith.constant 0 : index
    %232 = vector.load %arg1[%c0_364, %c23_365, %c0_366, %c0_367] : memref<1x52x7x32xbf16, #tpu.memory_space<vmem>>, vector<1x1x6x32xbf16>
    %233 = vector.shape_cast %232 : vector<1x1x6x32xbf16> to vector<6x32xbf16>
    %c0_368 = arith.constant 0 : index
    %c23_369 = arith.constant 23 : index
    %c1_370 = arith.constant 1 : index
    %c0_371 = arith.constant 0 : index
    %234 = vector.load %arg1[%c0_368, %c23_369, %c1_370, %c0_371] : memref<1x52x7x32xbf16, #tpu.memory_space<vmem>>, vector<1x1x6x16xbf16>
    %235 = vector.shape_cast %234 : vector<1x1x6x16xbf16> to vector<6x16xbf16>
    %c0_372 = arith.constant 0 : index
    %c24 = arith.constant 24 : index
    %c0_373 = arith.constant 0 : index
    %c0_374 = arith.constant 0 : index
    %236 = vector.load %arg1[%c0_372, %c24, %c0_373, %c0_374] : memref<1x52x7x32xbf16, #tpu.memory_space<vmem>>, vector<1x1x6x32xbf16>
    %237 = vector.shape_cast %236 : vector<1x1x6x32xbf16> to vector<6x32xbf16>
    %c0_375 = arith.constant 0 : index
    %c24_376 = arith.constant 24 : index
    %c1_377 = arith.constant 1 : index
    %c0_378 = arith.constant 0 : index
    %238 = vector.load %arg1[%c0_375, %c24_376, %c1_377, %c0_378] : memref<1x52x7x32xbf16, #tpu.memory_space<vmem>>, vector<1x1x6x16xbf16>
    %239 = vector.shape_cast %238 : vector<1x1x6x16xbf16> to vector<6x16xbf16>
    %c0_379 = arith.constant 0 : index
    %c25 = arith.constant 25 : index
    %c0_380 = arith.constant 0 : index
    %c0_381 = arith.constant 0 : index
    %240 = vector.load %arg1[%c0_379, %c25, %c0_380, %c0_381] : memref<1x52x7x32xbf16, #tpu.memory_space<vmem>>, vector<1x1x6x32xbf16>
    %241 = vector.shape_cast %240 : vector<1x1x6x32xbf16> to vector<6x32xbf16>
    %c0_382 = arith.constant 0 : index
    %c25_383 = arith.constant 25 : index
    %c1_384 = arith.constant 1 : index
    %c0_385 = arith.constant 0 : index
    %242 = vector.load %arg1[%c0_382, %c25_383, %c1_384, %c0_385] : memref<1x52x7x32xbf16, #tpu.memory_space<vmem>>, vector<1x1x6x16xbf16>
    %243 = vector.shape_cast %242 : vector<1x1x6x16xbf16> to vector<6x16xbf16>
    %c0_386 = arith.constant 0 : index
    %c26 = arith.constant 26 : index
    %c0_387 = arith.constant 0 : index
    %c0_388 = arith.constant 0 : index
    %244 = vector.load %arg1[%c0_386, %c26, %c0_387, %c0_388] : memref<1x52x7x32xbf16, #tpu.memory_space<vmem>>, vector<1x1x6x32xbf16>
    %245 = vector.shape_cast %244 : vector<1x1x6x32xbf16> to vector<6x32xbf16>
    %c0_389 = arith.constant 0 : index
    %c26_390 = arith.constant 26 : index
    %c1_391 = arith.constant 1 : index
    %c0_392 = arith.constant 0 : index
    %246 = vector.load %arg1[%c0_389, %c26_390, %c1_391, %c0_392] : memref<1x52x7x32xbf16, #tpu.memory_space<vmem>>, vector<1x1x6x16xbf16>
    %247 = vector.shape_cast %246 : vector<1x1x6x16xbf16> to vector<6x16xbf16>
    %c0_393 = arith.constant 0 : index
    %c27 = arith.constant 27 : index
    %c0_394 = arith.constant 0 : index
    %c0_395 = arith.constant 0 : index
    %248 = vector.load %arg1[%c0_393, %c27, %c0_394, %c0_395] : memref<1x52x7x32xbf16, #tpu.memory_space<vmem>>, vector<1x1x6x32xbf16>
    %249 = vector.shape_cast %248 : vector<1x1x6x32xbf16> to vector<6x32xbf16>
    %c0_396 = arith.constant 0 : index
    %c27_397 = arith.constant 27 : index
    %c1_398 = arith.constant 1 : index
    %c0_399 = arith.constant 0 : index
    %250 = vector.load %arg1[%c0_396, %c27_397, %c1_398, %c0_399] : memref<1x52x7x32xbf16, #tpu.memory_space<vmem>>, vector<1x1x6x16xbf16>
    %251 = vector.shape_cast %250 : vector<1x1x6x16xbf16> to vector<6x16xbf16>
    %252 = tpu.concatenate %221, %223, %225, %227, %229, %231, %233, %235, %237, %239, %241, %243, %245, %247, %249, %251 in 1 : vector<6x32xbf16>, vector<6x16xbf16>, vector<6x32xbf16>, vector<6x16xbf16>, vector<6x32xbf16>, vector<6x16xbf16>, vector<6x32xbf16>, vector<6x16xbf16>, vector<6x32xbf16>, vector<6x16xbf16>, vector<6x32xbf16>, vector<6x16xbf16>, vector<6x32xbf16>, vector<6x16xbf16>, vector<6x32xbf16>, vector<6x16xbf16> -> vector<6x384xbf16>
    %c0_400 = arith.constant 0 : index
    %c0_401 = arith.constant 0 : index
    %253 = vector.load %arg2[%c0_400, %c0_401] : memref<384x64xbf16, #tpu.memory_space<vmem>>, vector<384x64xbf16>
    %cst_402 = arith.constant dense<0.000000e+00> : vector<6x64xf32>
    %254 = tpu.matmul %252, %253, %cst_402 {dimension_numbers = #tpu.dot_dimension_numbers<[1], [0], [0], [1], [0, 0, 1, 1], [], []>} : vector<6x384xbf16>, vector<384x64xbf16>, vector<6x64xf32> -> vector<6x64xf32>
    %c0_403 = arith.constant 0 : index
    %c0_404 = arith.constant 0 : index
    %255 = vector.load %arg3[%c0_403, %c0_404] : memref<1x64xf32, #tpu.memory_space<vmem>>, vector<1x64xf32>
    %256 = vector.broadcast %255 : vector<1x64xf32> to vector<6x64xf32>
    %257 = arith.addf %254, %256 : vector<6x64xf32>
    %cst_405 = arith.constant 0.000000e+00 : f32
    %258 = vector.broadcast %cst_405 : f32 to vector<6x64xf32>
    %259 = arith.maximumf %257, %258 : vector<6x64xf32>
    %260 = arith.truncf %259 : vector<6x64xf32> to vector<6x64xbf16>
    %c5_406 = arith.constant 5 : index
    %c0_407 = arith.constant 0 : index
    %c0_408 = arith.constant 0 : index
    %261 = vector.load %arg13[%c5_406, %c0_407, %c0_408] : memref<12x6x64xbf16, #tpu.memory_space<vmem>>, vector<1x6x64xbf16>
    %262 = vector.shape_cast %261 : vector<1x6x64xbf16> to vector<6x64xbf16>
    %263 = vector.shape_cast %260 : vector<6x64xbf16> to vector<1x6x64xbf16>
    tpu.vector_store %arg13[%c5_406, %c0_407, %c0_408], %263 {strides = array<i32>} : memref<12x6x64xbf16, #tpu.memory_space<vmem>>, vector<1x6x64xbf16>,
    %c0_409 = arith.constant 0 : index
    %c24_410 = arith.constant 24 : index
    %c0_411 = arith.constant 0 : index
    %c0_412 = arith.constant 0 : index
    %264 = vector.load %arg1[%c0_409, %c24_410, %c0_411, %c0_412] : memref<1x52x7x32xbf16, #tpu.memory_space<vmem>>, vector<1x1x6x32xbf16>
    %265 = vector.shape_cast %264 : vector<1x1x6x32xbf16> to vector<6x32xbf16>
    %c0_413 = arith.constant 0 : index
    %c24_414 = arith.constant 24 : index
    %c1_415 = arith.constant 1 : index
    %c0_416 = arith.constant 0 : index
    %266 = vector.load %arg1[%c0_413, %c24_414, %c1_415, %c0_416] : memref<1x52x7x32xbf16, #tpu.memory_space<vmem>>, vector<1x1x6x16xbf16>
    %267 = vector.shape_cast %266 : vector<1x1x6x16xbf16> to vector<6x16xbf16>
    %c0_417 = arith.constant 0 : index
    %c25_418 = arith.constant 25 : index
    %c0_419 = arith.constant 0 : index
    %c0_420 = arith.constant 0 : index
    %268 = vector.load %arg1[%c0_417, %c25_418, %c0_419, %c0_420] : memref<1x52x7x32xbf16, #tpu.memory_space<vmem>>, vector<1x1x6x32xbf16>
    %269 = vector.shape_cast %268 : vector<1x1x6x32xbf16> to vector<6x32xbf16>
    %c0_421 = arith.constant 0 : index
    %c25_422 = arith.constant 25 : index
    %c1_423 = arith.constant 1 : index
    %c0_424 = arith.constant 0 : index
    %270 = vector.load %arg1[%c0_421, %c25_422, %c1_423, %c0_424] : memref<1x52x7x32xbf16, #tpu.memory_space<vmem>>, vector<1x1x6x16xbf16>
    %271 = vector.shape_cast %270 : vector<1x1x6x16xbf16> to vector<6x16xbf16>
    %c0_425 = arith.constant 0 : index
    %c26_426 = arith.constant 26 : index
    %c0_427 = arith.constant 0 : index
    %c0_428 = arith.constant 0 : index
    %272 = vector.load %arg1[%c0_425, %c26_426, %c0_427, %c0_428] : memref<1x52x7x32xbf16, #tpu.memory_space<vmem>>, vector<1x1x6x32xbf16>
    %273 = vector.shape_cast %272 : vector<1x1x6x32xbf16> to vector<6x32xbf16>
    %c0_429 = arith.constant 0 : index
    %c26_430 = arith.constant 26 : index
    %c1_431 = arith.constant 1 : index
    %c0_432 = arith.constant 0 : index
    %274 = vector.load %arg1[%c0_429, %c26_430, %c1_431, %c0_432] : memref<1x52x7x32xbf16, #tpu.memory_space<vmem>>, vector<1x1x6x16xbf16>
    %275 = vector.shape_cast %274 : vector<1x1x6x16xbf16> to vector<6x16xbf16>
    %c0_433 = arith.constant 0 : index
    %c27_434 = arith.constant 27 : index
    %c0_435 = arith.constant 0 : index
    %c0_436 = arith.constant 0 : index
    %276 = vector.load %arg1[%c0_433, %c27_434, %c0_435, %c0_436] : memref<1x52x7x32xbf16, #tpu.memory_space<vmem>>, vector<1x1x6x32xbf16>
    %277 = vector.shape_cast %276 : vector<1x1x6x32xbf16> to vector<6x32xbf16>
    %c0_437 = arith.constant 0 : index
    %c27_438 = arith.constant 27 : index
    %c1_439 = arith.constant 1 : index
    %c0_440 = arith.constant 0 : index
    %278 = vector.load %arg1[%c0_437, %c27_438, %c1_439, %c0_440] : memref<1x52x7x32xbf16, #tpu.memory_space<vmem>>, vector<1x1x6x16xbf16>
    %279 = vector.shape_cast %278 : vector<1x1x6x16xbf16> to vector<6x16xbf16>
    %c0_441 = arith.constant 0 : index
    %c28 = arith.constant 28 : index
    %c0_442 = arith.constant 0 : index
    %c0_443 = arith.constant 0 : index
    %280 = vector.load %arg1[%c0_441, %c28, %c0_442, %c0_443] : memref<1x52x7x32xbf16, #tpu.memory_space<vmem>>, vector<1x1x6x32xbf16>
    %281 = vector.shape_cast %280 : vector<1x1x6x32xbf16> to vector<6x32xbf16>
    %c0_444 = arith.constant 0 : index
    %c28_445 = arith.constant 28 : index
    %c1_446 = arith.constant 1 : index
    %c0_447 = arith.constant 0 : index
    %282 = vector.load %arg1[%c0_444, %c28_445, %c1_446, %c0_447] : memref<1x52x7x32xbf16, #tpu.memory_space<vmem>>, vector<1x1x6x16xbf16>
    %283 = vector.shape_cast %282 : vector<1x1x6x16xbf16> to vector<6x16xbf16>
    %c0_448 = arith.constant 0 : index
    %c29 = arith.constant 29 : index
    %c0_449 = arith.constant 0 : index
    %c0_450 = arith.constant 0 : index
    %284 = vector.load %arg1[%c0_448, %c29, %c0_449, %c0_450] : memref<1x52x7x32xbf16, #tpu.memory_space<vmem>>, vector<1x1x6x32xbf16>
    %285 = vector.shape_cast %284 : vector<1x1x6x32xbf16> to vector<6x32xbf16>
    %c0_451 = arith.constant 0 : index
    %c29_452 = arith.constant 29 : index
    %c1_453 = arith.constant 1 : index
    %c0_454 = arith.constant 0 : index
    %286 = vector.load %arg1[%c0_451, %c29_452, %c1_453, %c0_454] : memref<1x52x7x32xbf16, #tpu.memory_space<vmem>>, vector<1x1x6x16xbf16>
    %287 = vector.shape_cast %286 : vector<1x1x6x16xbf16> to vector<6x16xbf16>
    %c0_455 = arith.constant 0 : index
    %c30 = arith.constant 30 : index
    %c0_456 = arith.constant 0 : index
    %c0_457 = arith.constant 0 : index
    %288 = vector.load %arg1[%c0_455, %c30, %c0_456, %c0_457] : memref<1x52x7x32xbf16, #tpu.memory_space<vmem>>, vector<1x1x6x32xbf16>
    %289 = vector.shape_cast %288 : vector<1x1x6x32xbf16> to vector<6x32xbf16>
    %c0_458 = arith.constant 0 : index
    %c30_459 = arith.constant 30 : index
    %c1_460 = arith.constant 1 : index
    %c0_461 = arith.constant 0 : index
    %290 = vector.load %arg1[%c0_458, %c30_459, %c1_460, %c0_461] : memref<1x52x7x32xbf16, #tpu.memory_space<vmem>>, vector<1x1x6x16xbf16>
    %291 = vector.shape_cast %290 : vector<1x1x6x16xbf16> to vector<6x16xbf16>
    %c0_462 = arith.constant 0 : index
    %c31 = arith.constant 31 : index
    %c0_463 = arith.constant 0 : index
    %c0_464 = arith.constant 0 : index
    %292 = vector.load %arg1[%c0_462, %c31, %c0_463, %c0_464] : memref<1x52x7x32xbf16, #tpu.memory_space<vmem>>, vector<1x1x6x32xbf16>
    %293 = vector.shape_cast %292 : vector<1x1x6x32xbf16> to vector<6x32xbf16>
    %c0_465 = arith.constant 0 : index
    %c31_466 = arith.constant 31 : index
    %c1_467 = arith.constant 1 : index
    %c0_468 = arith.constant 0 : index
    %294 = vector.load %arg1[%c0_465, %c31_466, %c1_467, %c0_468] : memref<1x52x7x32xbf16, #tpu.memory_space<vmem>>, vector<1x1x6x16xbf16>
    %295 = vector.shape_cast %294 : vector<1x1x6x16xbf16> to vector<6x16xbf16>
    %296 = tpu.concatenate %265, %267, %269, %271, %273, %275, %277, %279, %281, %283, %285, %287, %289, %291, %293, %295 in 1 : vector<6x32xbf16>, vector<6x16xbf16>, vector<6x32xbf16>, vector<6x16xbf16>, vector<6x32xbf16>, vector<6x16xbf16>, vector<6x32xbf16>, vector<6x16xbf16>, vector<6x32xbf16>, vector<6x16xbf16>, vector<6x32xbf16>, vector<6x16xbf16>, vector<6x32xbf16>, vector<6x16xbf16>, vector<6x32xbf16>, vector<6x16xbf16> -> vector<6x384xbf16>
    %c0_469 = arith.constant 0 : index
    %c0_470 = arith.constant 0 : index
    %297 = vector.load %arg2[%c0_469, %c0_470] : memref<384x64xbf16, #tpu.memory_space<vmem>>, vector<384x64xbf16>
    %cst_471 = arith.constant dense<0.000000e+00> : vector<6x64xf32>
    %298 = tpu.matmul %296, %297, %cst_471 {dimension_numbers = #tpu.dot_dimension_numbers<[1], [0], [0], [1], [0, 0, 1, 1], [], []>} : vector<6x384xbf16>, vector<384x64xbf16>, vector<6x64xf32> -> vector<6x64xf32>
    %c0_472 = arith.constant 0 : index
    %c0_473 = arith.constant 0 : index
    %299 = vector.load %arg3[%c0_472, %c0_473] : memref<1x64xf32, #tpu.memory_space<vmem>>, vector<1x64xf32>
    %300 = vector.broadcast %299 : vector<1x64xf32> to vector<6x64xf32>
    %301 = arith.addf %298, %300 : vector<6x64xf32>
    %cst_474 = arith.constant 0.000000e+00 : f32
    %302 = vector.broadcast %cst_474 : f32 to vector<6x64xf32>
    %303 = arith.maximumf %301, %302 : vector<6x64xf32>
    %304 = arith.truncf %303 : vector<6x64xf32> to vector<6x64xbf16>
    %c6_475 = arith.constant 6 : index
    %c0_476 = arith.constant 0 : index
    %c0_477 = arith.constant 0 : index
    %305 = vector.load %arg13[%c6_475, %c0_476, %c0_477] : memref<12x6x64xbf16, #tpu.memory_space<vmem>>, vector<1x6x64xbf16>
    %306 = vector.shape_cast %305 : vector<1x6x64xbf16> to vector<6x64xbf16>
    %307 = vector.shape_cast %304 : vector<6x64xbf16> to vector<1x6x64xbf16>
    tpu.vector_store %arg13[%c6_475, %c0_476, %c0_477], %307 {strides = array<i32>} : memref<12x6x64xbf16, #tpu.memory_space<vmem>>, vector<1x6x64xbf16>,
    %c0_478 = arith.constant 0 : index
    %c28_479 = arith.constant 28 : index
    %c0_480 = arith.constant 0 : index
    %c0_481 = arith.constant 0 : index
    %308 = vector.load %arg1[%c0_478, %c28_479, %c0_480, %c0_481] : memref<1x52x7x32xbf16, #tpu.memory_space<vmem>>, vector<1x1x6x32xbf16>
    %309 = vector.shape_cast %308 : vector<1x1x6x32xbf16> to vector<6x32xbf16>
    %c0_482 = arith.constant 0 : index
    %c28_483 = arith.constant 28 : index
    %c1_484 = arith.constant 1 : index
    %c0_485 = arith.constant 0 : index
    %310 = vector.load %arg1[%c0_482, %c28_483, %c1_484, %c0_485] : memref<1x52x7x32xbf16, #tpu.memory_space<vmem>>, vector<1x1x6x16xbf16>
    %311 = vector.shape_cast %310 : vector<1x1x6x16xbf16> to vector<6x16xbf16>
    %c0_486 = arith.constant 0 : index
    %c29_487 = arith.constant 29 : index
    %c0_488 = arith.constant 0 : index
    %c0_489 = arith.constant 0 : index
    %312 = vector.load %arg1[%c0_486, %c29_487, %c0_488, %c0_489] : memref<1x52x7x32xbf16, #tpu.memory_space<vmem>>, vector<1x1x6x32xbf16>
    %313 = vector.shape_cast %312 : vector<1x1x6x32xbf16> to vector<6x32xbf16>
    %c0_490 = arith.constant 0 : index
    %c29_491 = arith.constant 29 : index
    %c1_492 = arith.constant 1 : index
    %c0_493 = arith.constant 0 : index
    %314 = vector.load %arg1[%c0_490, %c29_491, %c1_492, %c0_493] : memref<1x52x7x32xbf16, #tpu.memory_space<vmem>>, vector<1x1x6x16xbf16>
    %315 = vector.shape_cast %314 : vector<1x1x6x16xbf16> to vector<6x16xbf16>
    %c0_494 = arith.constant 0 : index
    %c30_495 = arith.constant 30 : index
    %c0_496 = arith.constant 0 : index
    %c0_497 = arith.constant 0 : index
    %316 = vector.load %arg1[%c0_494, %c30_495, %c0_496, %c0_497] : memref<1x52x7x32xbf16, #tpu.memory_space<vmem>>, vector<1x1x6x32xbf16>
    %317 = vector.shape_cast %316 : vector<1x1x6x32xbf16> to vector<6x32xbf16>
    %c0_498 = arith.constant 0 : index
    %c30_499 = arith.constant 30 : index
    %c1_500 = arith.constant 1 : index
    %c0_501 = arith.constant 0 : index
    %318 = vector.load %arg1[%c0_498, %c30_499, %c1_500, %c0_501] : memref<1x52x7x32xbf16, #tpu.memory_space<vmem>>, vector<1x1x6x16xbf16>
    %319 = vector.shape_cast %318 : vector<1x1x6x16xbf16> to vector<6x16xbf16>
    %c0_502 = arith.constant 0 : index
    %c31_503 = arith.constant 31 : index
    %c0_504 = arith.constant 0 : index
    %c0_505 = arith.constant 0 : index
    %320 = vector.load %arg1[%c0_502, %c31_503, %c0_504, %c0_505] : memref<1x52x7x32xbf16, #tpu.memory_space<vmem>>, vector<1x1x6x32xbf16>
    %321 = vector.shape_cast %320 : vector<1x1x6x32xbf16> to vector<6x32xbf16>
    %c0_506 = arith.constant 0 : index
    %c31_507 = arith.constant 31 : index
    %c1_508 = arith.constant 1 : index
    %c0_509 = arith.constant 0 : index
    %322 = vector.load %arg1[%c0_506, %c31_507, %c1_508, %c0_509] : memref<1x52x7x32xbf16, #tpu.memory_space<vmem>>, vector<1x1x6x16xbf16>
    %323 = vector.shape_cast %322 : vector<1x1x6x16xbf16> to vector<6x16xbf16>
    %c0_510 = arith.constant 0 : index
    %c32 = arith.constant 32 : index
    %c0_511 = arith.constant 0 : index
    %c0_512 = arith.constant 0 : index
    %324 = vector.load %arg1[%c0_510, %c32, %c0_511, %c0_512] : memref<1x52x7x32xbf16, #tpu.memory_space<vmem>>, vector<1x1x6x32xbf16>
    %325 = vector.shape_cast %324 : vector<1x1x6x32xbf16> to vector<6x32xbf16>
    %c0_513 = arith.constant 0 : index
    %c32_514 = arith.constant 32 : index
    %c1_515 = arith.constant 1 : index
    %c0_516 = arith.constant 0 : index
    %326 = vector.load %arg1[%c0_513, %c32_514, %c1_515, %c0_516] : memref<1x52x7x32xbf16, #tpu.memory_space<vmem>>, vector<1x1x6x16xbf16>
    %327 = vector.shape_cast %326 : vector<1x1x6x16xbf16> to vector<6x16xbf16>
    %c0_517 = arith.constant 0 : index
    %c33 = arith.constant 33 : index
    %c0_518 = arith.constant 0 : index
    %c0_519 = arith.constant 0 : index
    %328 = vector.load %arg1[%c0_517, %c33, %c0_518, %c0_519] : memref<1x52x7x32xbf16, #tpu.memory_space<vmem>>, vector<1x1x6x32xbf16>
    %329 = vector.shape_cast %328 : vector<1x1x6x32xbf16> to vector<6x32xbf16>
    %c0_520 = arith.constant 0 : index
    %c33_521 = arith.constant 33 : index
    %c1_522 = arith.constant 1 : index
    %c0_523 = arith.constant 0 : index
    %330 = vector.load %arg1[%c0_520, %c33_521, %c1_522, %c0_523] : memref<1x52x7x32xbf16, #tpu.memory_space<vmem>>, vector<1x1x6x16xbf16>
    %331 = vector.shape_cast %330 : vector<1x1x6x16xbf16> to vector<6x16xbf16>
    %c0_524 = arith.constant 0 : index
    %c34 = arith.constant 34 : index
    %c0_525 = arith.constant 0 : index
    %c0_526 = arith.constant 0 : index
    %332 = vector.load %arg1[%c0_524, %c34, %c0_525, %c0_526] : memref<1x52x7x32xbf16, #tpu.memory_space<vmem>>, vector<1x1x6x32xbf16>
    %333 = vector.shape_cast %332 : vector<1x1x6x32xbf16> to vector<6x32xbf16>
    %c0_527 = arith.constant 0 : index
    %c34_528 = arith.constant 34 : index
    %c1_529 = arith.constant 1 : index
    %c0_530 = arith.constant 0 : index
    %334 = vector.load %arg1[%c0_527, %c34_528, %c1_529, %c0_530] : memref<1x52x7x32xbf16, #tpu.memory_space<vmem>>, vector<1x1x6x16xbf16>
    %335 = vector.shape_cast %334 : vector<1x1x6x16xbf16> to vector<6x16xbf16>
    %c0_531 = arith.constant 0 : index
    %c35 = arith.constant 35 : index
    %c0_532 = arith.constant 0 : index
    %c0_533 = arith.constant 0 : index
    %336 = vector.load %arg1[%c0_531, %c35, %c0_532, %c0_533] : memref<1x52x7x32xbf16, #tpu.memory_space<vmem>>, vector<1x1x6x32xbf16>
    %337 = vector.shape_cast %336 : vector<1x1x6x32xbf16> to vector<6x32xbf16>
    %c0_534 = arith.constant 0 : index
    %c35_535 = arith.constant 35 : index
    %c1_536 = arith.constant 1 : index
    %c0_537 = arith.constant 0 : index
    %338 = vector.load %arg1[%c0_534, %c35_535, %c1_536, %c0_537] : memref<1x52x7x32xbf16, #tpu.memory_space<vmem>>, vector<1x1x6x16xbf16>
    %339 = vector.shape_cast %338 : vector<1x1x6x16xbf16> to vector<6x16xbf16>
    %340 = tpu.concatenate %309, %311, %313, %315, %317, %319, %321, %323, %325, %327, %329, %331, %333, %335, %337, %339 in 1 : vector<6x32xbf16>, vector<6x16xbf16>, vector<6x32xbf16>, vector<6x16xbf16>, vector<6x32xbf16>, vector<6x16xbf16>, vector<6x32xbf16>, vector<6x16xbf16>, vector<6x32xbf16>, vector<6x16xbf16>, vector<6x32xbf16>, vector<6x16xbf16>, vector<6x32xbf16>, vector<6x16xbf16>, vector<6x32xbf16>, vector<6x16xbf16> -> vector<6x384xbf16>
    %c0_538 = arith.constant 0 : index
    %c0_539 = arith.constant 0 : index
    %341 = vector.load %arg2[%c0_538, %c0_539] : memref<384x64xbf16, #tpu.memory_space<vmem>>, vector<384x64xbf16>
    %cst_540 = arith.constant dense<0.000000e+00> : vector<6x64xf32>
    %342 = tpu.matmul %340, %341, %cst_540 {dimension_numbers = #tpu.dot_dimension_numbers<[1], [0], [0], [1], [0, 0, 1, 1], [], []>} : vector<6x384xbf16>, vector<384x64xbf16>, vector<6x64xf32> -> vector<6x64xf32>
    %c0_541 = arith.constant 0 : index
    %c0_542 = arith.constant 0 : index
    %343 = vector.load %arg3[%c0_541, %c0_542] : memref<1x64xf32, #tpu.memory_space<vmem>>, vector<1x64xf32>
    %344 = vector.broadcast %343 : vector<1x64xf32> to vector<6x64xf32>
    %345 = arith.addf %342, %344 : vector<6x64xf32>
    %cst_543 = arith.constant 0.000000e+00 : f32
    %346 = vector.broadcast %cst_543 : f32 to vector<6x64xf32>
    %347 = arith.maximumf %345, %346 : vector<6x64xf32>
    %348 = arith.truncf %347 : vector<6x64xf32> to vector<6x64xbf16>
    %c7_544 = arith.constant 7 : index
    %c0_545 = arith.constant 0 : index
    %c0_546 = arith.constant 0 : index
    %349 = vector.load %arg13[%c7_544, %c0_545, %c0_546] : memref<12x6x64xbf16, #tpu.memory_space<vmem>>, vector<1x6x64xbf16>
    %350 = vector.shape_cast %349 : vector<1x6x64xbf16> to vector<6x64xbf16>
    %351 = vector.shape_cast %348 : vector<6x64xbf16> to vector<1x6x64xbf16>
    tpu.vector_store %arg13[%c7_544, %c0_545, %c0_546], %351 {strides = array<i32>} : memref<12x6x64xbf16, #tpu.memory_space<vmem>>, vector<1x6x64xbf16>,
    %c0_547 = arith.constant 0 : index
    %c32_548 = arith.constant 32 : index
    %c0_549 = arith.constant 0 : index
    %c0_550 = arith.constant 0 : index
    %352 = vector.load %arg1[%c0_547, %c32_548, %c0_549, %c0_550] : memref<1x52x7x32xbf16, #tpu.memory_space<vmem>>, vector<1x1x6x32xbf16>
    %353 = vector.shape_cast %352 : vector<1x1x6x32xbf16> to vector<6x32xbf16>
    %c0_551 = arith.constant 0 : index
    %c32_552 = arith.constant 32 : index
    %c1_553 = arith.constant 1 : index
    %c0_554 = arith.constant 0 : index
    %354 = vector.load %arg1[%c0_551, %c32_552, %c1_553, %c0_554] : memref<1x52x7x32xbf16, #tpu.memory_space<vmem>>, vector<1x1x6x16xbf16>
    %355 = vector.shape_cast %354 : vector<1x1x6x16xbf16> to vector<6x16xbf16>
    %c0_555 = arith.constant 0 : index
    %c33_556 = arith.constant 33 : index
    %c0_557 = arith.constant 0 : index
    %c0_558 = arith.constant 0 : index
    %356 = vector.load %arg1[%c0_555, %c33_556, %c0_557, %c0_558] : memref<1x52x7x32xbf16, #tpu.memory_space<vmem>>, vector<1x1x6x32xbf16>
    %357 = vector.shape_cast %356 : vector<1x1x6x32xbf16> to vector<6x32xbf16>
    %c0_559 = arith.constant 0 : index
    %c33_560 = arith.constant 33 : index
    %c1_561 = arith.constant 1 : index
    %c0_562 = arith.constant 0 : index
    %358 = vector.load %arg1[%c0_559, %c33_560, %c1_561, %c0_562] : memref<1x52x7x32xbf16, #tpu.memory_space<vmem>>, vector<1x1x6x16xbf16>
    %359 = vector.shape_cast %358 : vector<1x1x6x16xbf16> to vector<6x16xbf16>
    %c0_563 = arith.constant 0 : index
    %c34_564 = arith.constant 34 : index
    %c0_565 = arith.constant 0 : index
    %c0_566 = arith.constant 0 : index
    %360 = vector.load %arg1[%c0_563, %c34_564, %c0_565, %c0_566] : memref<1x52x7x32xbf16, #tpu.memory_space<vmem>>, vector<1x1x6x32xbf16>
    %361 = vector.shape_cast %360 : vector<1x1x6x32xbf16> to vector<6x32xbf16>
    %c0_567 = arith.constant 0 : index
    %c34_568 = arith.constant 34 : index
    %c1_569 = arith.constant 1 : index
    %c0_570 = arith.constant 0 : index
    %362 = vector.load %arg1[%c0_567, %c34_568, %c1_569, %c0_570] : memref<1x52x7x32xbf16, #tpu.memory_space<vmem>>, vector<1x1x6x16xbf16>
    %363 = vector.shape_cast %362 : vector<1x1x6x16xbf16> to vector<6x16xbf16>
    %c0_571 = arith.constant 0 : index
    %c35_572 = arith.constant 35 : index
    %c0_573 = arith.constant 0 : index
    %c0_574 = arith.constant 0 : index
    %364 = vector.load %arg1[%c0_571, %c35_572, %c0_573, %c0_574] : memref<1x52x7x32xbf16, #tpu.memory_space<vmem>>, vector<1x1x6x32xbf16>
    %365 = vector.shape_cast %364 : vector<1x1x6x32xbf16> to vector<6x32xbf16>
    %c0_575 = arith.constant 0 : index
    %c35_576 = arith.constant 35 : index
    %c1_577 = arith.constant 1 : index
    %c0_578 = arith.constant 0 : index
    %366 = vector.load %arg1[%c0_575, %c35_576, %c1_577, %c0_578] : memref<1x52x7x32xbf16, #tpu.memory_space<vmem>>, vector<1x1x6x16xbf16>
    %367 = vector.shape_cast %366 : vector<1x1x6x16xbf16> to vector<6x16xbf16>
    %c0_579 = arith.constant 0 : index
    %c36 = arith.constant 36 : index
    %c0_580 = arith.constant 0 : index
    %c0_581 = arith.constant 0 : index
    %368 = vector.load %arg1[%c0_579, %c36, %c0_580, %c0_581] : memref<1x52x7x32xbf16, #tpu.memory_space<vmem>>, vector<1x1x6x32xbf16>
    %369 = vector.shape_cast %368 : vector<1x1x6x32xbf16> to vector<6x32xbf16>
    %c0_582 = arith.constant 0 : index
    %c36_583 = arith.constant 36 : index
    %c1_584 = arith.constant 1 : index
    %c0_585 = arith.constant 0 : index
    %370 = vector.load %arg1[%c0_582, %c36_583, %c1_584, %c0_585] : memref<1x52x7x32xbf16, #tpu.memory_space<vmem>>, vector<1x1x6x16xbf16>
    %371 = vector.shape_cast %370 : vector<1x1x6x16xbf16> to vector<6x16xbf16>
    %c0_586 = arith.constant 0 : index
    %c37 = arith.constant 37 : index
    %c0_587 = arith.constant 0 : index
    %c0_588 = arith.constant 0 : index
    %372 = vector.load %arg1[%c0_586, %c37, %c0_587, %c0_588] : memref<1x52x7x32xbf16, #tpu.memory_space<vmem>>, vector<1x1x6x32xbf16>
    %373 = vector.shape_cast %372 : vector<1x1x6x32xbf16> to vector<6x32xbf16>
    %c0_589 = arith.constant 0 : index
    %c37_590 = arith.constant 37 : index
    %c1_591 = arith.constant 1 : index
    %c0_592 = arith.constant 0 : index
    %374 = vector.load %arg1[%c0_589, %c37_590, %c1_591, %c0_592] : memref<1x52x7x32xbf16, #tpu.memory_space<vmem>>, vector<1x1x6x16xbf16>
    %375 = vector.shape_cast %374 : vector<1x1x6x16xbf16> to vector<6x16xbf16>
    %c0_593 = arith.constant 0 : index
    %c38 = arith.constant 38 : index
    %c0_594 = arith.constant 0 : index
    %c0_595 = arith.constant 0 : index
    %376 = vector.load %arg1[%c0_593, %c38, %c0_594, %c0_595] : memref<1x52x7x32xbf16, #tpu.memory_space<vmem>>, vector<1x1x6x32xbf16>
    %377 = vector.shape_cast %376 : vector<1x1x6x32xbf16> to vector<6x32xbf16>
    %c0_596 = arith.constant 0 : index
    %c38_597 = arith.constant 38 : index
    %c1_598 = arith.constant 1 : index
    %c0_599 = arith.constant 0 : index
    %378 = vector.load %arg1[%c0_596, %c38_597, %c1_598, %c0_599] : memref<1x52x7x32xbf16, #tpu.memory_space<vmem>>, vector<1x1x6x16xbf16>
    %379 = vector.shape_cast %378 : vector<1x1x6x16xbf16> to vector<6x16xbf16>
    %c0_600 = arith.constant 0 : index
    %c39 = arith.constant 39 : index
    %c0_601 = arith.constant 0 : index
    %c0_602 = arith.constant 0 : index
    %380 = vector.load %arg1[%c0_600, %c39, %c0_601, %c0_602] : memref<1x52x7x32xbf16, #tpu.memory_space<vmem>>, vector<1x1x6x32xbf16>
    %381 = vector.shape_cast %380 : vector<1x1x6x32xbf16> to vector<6x32xbf16>
    %c0_603 = arith.constant 0 : index
    %c39_604 = arith.constant 39 : index
    %c1_605 = arith.constant 1 : index
    %c0_606 = arith.constant 0 : index
    %382 = vector.load %arg1[%c0_603, %c39_604, %c1_605, %c0_606] : memref<1x52x7x32xbf16, #tpu.memory_space<vmem>>, vector<1x1x6x16xbf16>
    %383 = vector.shape_cast %382 : vector<1x1x6x16xbf16> to vector<6x16xbf16>
    %384 = tpu.concatenate %353, %355, %357, %359, %361, %363, %365, %367, %369, %371, %373, %375, %377, %379, %381, %383 in 1 : vector<6x32xbf16>, vector<6x16xbf16>, vector<6x32xbf16>, vector<6x16xbf16>, vector<6x32xbf16>, vector<6x16xbf16>, vector<6x32xbf16>, vector<6x16xbf16>, vector<6x32xbf16>, vector<6x16xbf16>, vector<6x32xbf16>, vector<6x16xbf16>, vector<6x32xbf16>, vector<6x16xbf16>, vector<6x32xbf16>, vector<6x16xbf16> -> vector<6x384xbf16>
    %c0_607 = arith.constant 0 : index
    %c0_608 = arith.constant 0 : index
    %385 = vector.load %arg2[%c0_607, %c0_608] : memref<384x64xbf16, #tpu.memory_space<vmem>>, vector<384x64xbf16>
    %cst_609 = arith.constant dense<0.000000e+00> : vector<6x64xf32>
    %386 = tpu.matmul %384, %385, %cst_609 {dimension_numbers = #tpu.dot_dimension_numbers<[1], [0], [0], [1], [0, 0, 1, 1], [], []>} : vector<6x384xbf16>, vector<384x64xbf16>, vector<6x64xf32> -> vector<6x64xf32>
    %c0_610 = arith.constant 0 : index
    %c0_611 = arith.constant 0 : index
    %387 = vector.load %arg3[%c0_610, %c0_611] : memref<1x64xf32, #tpu.memory_space<vmem>>, vector<1x64xf32>
    %388 = vector.broadcast %387 : vector<1x64xf32> to vector<6x64xf32>
    %389 = arith.addf %386, %388 : vector<6x64xf32>
    %cst_612 = arith.constant 0.000000e+00 : f32
    %390 = vector.broadcast %cst_612 : f32 to vector<6x64xf32>
    %391 = arith.maximumf %389, %390 : vector<6x64xf32>
    %392 = arith.truncf %391 : vector<6x64xf32> to vector<6x64xbf16>
    %c8_613 = arith.constant 8 : index
    %c0_614 = arith.constant 0 : index
    %c0_615 = arith.constant 0 : index
    %393 = vector.load %arg13[%c8_613, %c0_614, %c0_615] : memref<12x6x64xbf16, #tpu.memory_space<vmem>>, vector<1x6x64xbf16>
    %394 = vector.shape_cast %393 : vector<1x6x64xbf16> to vector<6x64xbf16>
    %395 = vector.shape_cast %392 : vector<6x64xbf16> to vector<1x6x64xbf16>
    tpu.vector_store %arg13[%c8_613, %c0_614, %c0_615], %395 {strides = array<i32>} : memref<12x6x64xbf16, #tpu.memory_space<vmem>>, vector<1x6x64xbf16>,
    %c0_616 = arith.constant 0 : index
    %c36_617 = arith.constant 36 : index
    %c0_618 = arith.constant 0 : index
    %c0_619 = arith.constant 0 : index
    %396 = vector.load %arg1[%c0_616, %c36_617, %c0_618, %c0_619] : memref<1x52x7x32xbf16, #tpu.memory_space<vmem>>, vector<1x1x6x32xbf16>
    %397 = vector.shape_cast %396 : vector<1x1x6x32xbf16> to vector<6x32xbf16>
    %c0_620 = arith.constant 0 : index
    %c36_621 = arith.constant 36 : index
    %c1_622 = arith.constant 1 : index
    %c0_623 = arith.constant 0 : index
    %398 = vector.load %arg1[%c0_620, %c36_621, %c1_622, %c0_623] : memref<1x52x7x32xbf16, #tpu.memory_space<vmem>>, vector<1x1x6x16xbf16>
    %399 = vector.shape_cast %398 : vector<1x1x6x16xbf16> to vector<6x16xbf16>
    %c0_624 = arith.constant 0 : index
    %c37_625 = arith.constant 37 : index
    %c0_626 = arith.constant 0 : index
    %c0_627 = arith.constant 0 : index
    %400 = vector.load %arg1[%c0_624, %c37_625, %c0_626, %c0_627] : memref<1x52x7x32xbf16, #tpu.memory_space<vmem>>, vector<1x1x6x32xbf16>
    %401 = vector.shape_cast %400 : vector<1x1x6x32xbf16> to vector<6x32xbf16>
    %c0_628 = arith.constant 0 : index
    %c37_629 = arith.constant 37 : index
    %c1_630 = arith.constant 1 : index
    %c0_631 = arith.constant 0 : index
    %402 = vector.load %arg1[%c0_628, %c37_629, %c1_630, %c0_631] : memref<1x52x7x32xbf16, #tpu.memory_space<vmem>>, vector<1x1x6x16xbf16>
    %403 = vector.shape_cast %402 : vector<1x1x6x16xbf16> to vector<6x16xbf16>
    %c0_632 = arith.constant 0 : index
    %c38_633 = arith.constant 38 : index
    %c0_634 = arith.constant 0 : index
    %c0_635 = arith.constant 0 : index
    %404 = vector.load %arg1[%c0_632, %c38_633, %c0_634, %c0_635] : memref<1x52x7x32xbf16, #tpu.memory_space<vmem>>, vector<1x1x6x32xbf16>
    %405 = vector.shape_cast %404 : vector<1x1x6x32xbf16> to vector<6x32xbf16>
    %c0_636 = arith.constant 0 : index
    %c38_637 = arith.constant 38 : index
    %c1_638 = arith.constant 1 : index
    %c0_639 = arith.constant 0 : index
    %406 = vector.load %arg1[%c0_636, %c38_637, %c1_638, %c0_639] : memref<1x52x7x32xbf16, #tpu.memory_space<vmem>>, vector<1x1x6x16xbf16>
    %407 = vector.shape_cast %406 : vector<1x1x6x16xbf16> to vector<6x16xbf16>
    %c0_640 = arith.constant 0 : index
    %c39_641 = arith.constant 39 : index
    %c0_642 = arith.constant 0 : index
    %c0_643 = arith.constant 0 : index
    %408 = vector.load %arg1[%c0_640, %c39_641, %c0_642, %c0_643] : memref<1x52x7x32xbf16, #tpu.memory_space<vmem>>, vector<1x1x6x32xbf16>
    %409 = vector.shape_cast %408 : vector<1x1x6x32xbf16> to vector<6x32xbf16>
    %c0_644 = arith.constant 0 : index
    %c39_645 = arith.constant 39 : index
    %c1_646 = arith.constant 1 : index
    %c0_647 = arith.constant 0 : index
    %410 = vector.load %arg1[%c0_644, %c39_645, %c1_646, %c0_647] : memref<1x52x7x32xbf16, #tpu.memory_space<vmem>>, vector<1x1x6x16xbf16>
    %411 = vector.shape_cast %410 : vector<1x1x6x16xbf16> to vector<6x16xbf16>
    %c0_648 = arith.constant 0 : index
    %c40 = arith.constant 40 : index
    %c0_649 = arith.constant 0 : index
    %c0_650 = arith.constant 0 : index
    %412 = vector.load %arg1[%c0_648, %c40, %c0_649, %c0_650] : memref<1x52x7x32xbf16, #tpu.memory_space<vmem>>, vector<1x1x6x32xbf16>
    %413 = vector.shape_cast %412 : vector<1x1x6x32xbf16> to vector<6x32xbf16>
    %c0_651 = arith.constant 0 : index
    %c40_652 = arith.constant 40 : index
    %c1_653 = arith.constant 1 : index
    %c0_654 = arith.constant 0 : index
    %414 = vector.load %arg1[%c0_651, %c40_652, %c1_653, %c0_654] : memref<1x52x7x32xbf16, #tpu.memory_space<vmem>>, vector<1x1x6x16xbf16>
    %415 = vector.shape_cast %414 : vector<1x1x6x16xbf16> to vector<6x16xbf16>
    %c0_655 = arith.constant 0 : index
    %c41 = arith.constant 41 : index
    %c0_656 = arith.constant 0 : index
    %c0_657 = arith.constant 0 : index
    %416 = vector.load %arg1[%c0_655, %c41, %c0_656, %c0_657] : memref<1x52x7x32xbf16, #tpu.memory_space<vmem>>, vector<1x1x6x32xbf16>
    %417 = vector.shape_cast %416 : vector<1x1x6x32xbf16> to vector<6x32xbf16>
    %c0_658 = arith.constant 0 : index
    %c41_659 = arith.constant 41 : index
    %c1_660 = arith.constant 1 : index
    %c0_661 = arith.constant 0 : index
    %418 = vector.load %arg1[%c0_658, %c41_659, %c1_660, %c0_661] : memref<1x52x7x32xbf16, #tpu.memory_space<vmem>>, vector<1x1x6x16xbf16>
    %419 = vector.shape_cast %418 : vector<1x1x6x16xbf16> to vector<6x16xbf16>
    %c0_662 = arith.constant 0 : index
    %c42 = arith.constant 42 : index
    %c0_663 = arith.constant 0 : index
    %c0_664 = arith.constant 0 : index
    %420 = vector.load %arg1[%c0_662, %c42, %c0_663, %c0_664] : memref<1x52x7x32xbf16, #tpu.memory_space<vmem>>, vector<1x1x6x32xbf16>
    %421 = vector.shape_cast %420 : vector<1x1x6x32xbf16> to vector<6x32xbf16>
    %c0_665 = arith.constant 0 : index
    %c42_666 = arith.constant 42 : index
    %c1_667 = arith.constant 1 : index
    %c0_668 = arith.constant 0 : index
    %422 = vector.load %arg1[%c0_665, %c42_666, %c1_667, %c0_668] : memref<1x52x7x32xbf16, #tpu.memory_space<vmem>>, vector<1x1x6x16xbf16>
    %423 = vector.shape_cast %422 : vector<1x1x6x16xbf16> to vector<6x16xbf16>
    %c0_669 = arith.constant 0 : index
    %c43 = arith.constant 43 : index
    %c0_670 = arith.constant 0 : index
    %c0_671 = arith.constant 0 : index
    %424 = vector.load %arg1[%c0_669, %c43, %c0_670, %c0_671] : memref<1x52x7x32xbf16, #tpu.memory_space<vmem>>, vector<1x1x6x32xbf16>
    %425 = vector.shape_cast %424 : vector<1x1x6x32xbf16> to vector<6x32xbf16>
    %c0_672 = arith.constant 0 : index
    %c43_673 = arith.constant 43 : index
    %c1_674 = arith.constant 1 : index
    %c0_675 = arith.constant 0 : index
    %426 = vector.load %arg1[%c0_672, %c43_673, %c1_674, %c0_675] : memref<1x52x7x32xbf16, #tpu.memory_space<vmem>>, vector<1x1x6x16xbf16>
    %427 = vector.shape_cast %426 : vector<1x1x6x16xbf16> to vector<6x16xbf16>
    %428 = tpu.concatenate %397, %399, %401, %403, %405, %407, %409, %411, %413, %415, %417, %419, %421, %423, %425, %427 in 1 : vector<6x32xbf16>, vector<6x16xbf16>, vector<6x32xbf16>, vector<6x16xbf16>, vector<6x32xbf16>, vector<6x16xbf16>, vector<6x32xbf16>, vector<6x16xbf16>, vector<6x32xbf16>, vector<6x16xbf16>, vector<6x32xbf16>, vector<6x16xbf16>, vector<6x32xbf16>, vector<6x16xbf16>, vector<6x32xbf16>, vector<6x16xbf16> -> vector<6x384xbf16>
    %c0_676 = arith.constant 0 : index
    %c0_677 = arith.constant 0 : index
    %429 = vector.load %arg2[%c0_676, %c0_677] : memref<384x64xbf16, #tpu.memory_space<vmem>>, vector<384x64xbf16>
    %cst_678 = arith.constant dense<0.000000e+00> : vector<6x64xf32>
    %430 = tpu.matmul %428, %429, %cst_678 {dimension_numbers = #tpu.dot_dimension_numbers<[1], [0], [0], [1], [0, 0, 1, 1], [], []>} : vector<6x384xbf16>, vector<384x64xbf16>, vector<6x64xf32> -> vector<6x64xf32>
    %c0_679 = arith.constant 0 : index
    %c0_680 = arith.constant 0 : index
    %431 = vector.load %arg3[%c0_679, %c0_680] : memref<1x64xf32, #tpu.memory_space<vmem>>, vector<1x64xf32>
    %432 = vector.broadcast %431 : vector<1x64xf32> to vector<6x64xf32>
    %433 = arith.addf %430, %432 : vector<6x64xf32>
    %cst_681 = arith.constant 0.000000e+00 : f32
    %434 = vector.broadcast %cst_681 : f32 to vector<6x64xf32>
    %435 = arith.maximumf %433, %434 : vector<6x64xf32>
    %436 = arith.truncf %435 : vector<6x64xf32> to vector<6x64xbf16>
    %c9_682 = arith.constant 9 : index
    %c0_683 = arith.constant 0 : index
    %c0_684 = arith.constant 0 : index
    %437 = vector.load %arg13[%c9_682, %c0_683, %c0_684] : memref<12x6x64xbf16, #tpu.memory_space<vmem>>, vector<1x6x64xbf16>
    %438 = vector.shape_cast %437 : vector<1x6x64xbf16> to vector<6x64xbf16>
    %439 = vector.shape_cast %436 : vector<6x64xbf16> to vector<1x6x64xbf16>
    tpu.vector_store %arg13[%c9_682, %c0_683, %c0_684], %439 {strides = array<i32>} : memref<12x6x64xbf16, #tpu.memory_space<vmem>>, vector<1x6x64xbf16>,
    %c0_685 = arith.constant 0 : index
    %c40_686 = arith.constant 40 : index
    %c0_687 = arith.constant 0 : index
    %c0_688 = arith.constant 0 : index
    %440 = vector.load %arg1[%c0_685, %c40_686, %c0_687, %c0_688] : memref<1x52x7x32xbf16, #tpu.memory_space<vmem>>, vector<1x1x6x32xbf16>
    %441 = vector.shape_cast %440 : vector<1x1x6x32xbf16> to vector<6x32xbf16>
    %c0_689 = arith.constant 0 : index
    %c40_690 = arith.constant 40 : index
    %c1_691 = arith.constant 1 : index
    %c0_692 = arith.constant 0 : index
    %442 = vector.load %arg1[%c0_689, %c40_690, %c1_691, %c0_692] : memref<1x52x7x32xbf16, #tpu.memory_space<vmem>>, vector<1x1x6x16xbf16>
    %443 = vector.shape_cast %442 : vector<1x1x6x16xbf16> to vector<6x16xbf16>
    %c0_693 = arith.constant 0 : index
    %c41_694 = arith.constant 41 : index
    %c0_695 = arith.constant 0 : index
    %c0_696 = arith.constant 0 : index
    %444 = vector.load %arg1[%c0_693, %c41_694, %c0_695, %c0_696] : memref<1x52x7x32xbf16, #tpu.memory_space<vmem>>, vector<1x1x6x32xbf16>
    %445 = vector.shape_cast %444 : vector<1x1x6x32xbf16> to vector<6x32xbf16>
    %c0_697 = arith.constant 0 : index
    %c41_698 = arith.constant 41 : index
    %c1_699 = arith.constant 1 : index
    %c0_700 = arith.constant 0 : index
    %446 = vector.load %arg1[%c0_697, %c41_698, %c1_699, %c0_700] : memref<1x52x7x32xbf16, #tpu.memory_space<vmem>>, vector<1x1x6x16xbf16>
    %447 = vector.shape_cast %446 : vector<1x1x6x16xbf16> to vector<6x16xbf16>
    %c0_701 = arith.constant 0 : index
    %c42_702 = arith.constant 42 : index
    %c0_703 = arith.constant 0 : index
    %c0_704 = arith.constant 0 : index
    %448 = vector.load %arg1[%c0_701, %c42_702, %c0_703, %c0_704] : memref<1x52x7x32xbf16, #tpu.memory_space<vmem>>, vector<1x1x6x32xbf16>
    %449 = vector.shape_cast %448 : vector<1x1x6x32xbf16> to vector<6x32xbf16>
    %c0_705 = arith.constant 0 : index
    %c42_706 = arith.constant 42 : index
    %c1_707 = arith.constant 1 : index
    %c0_708 = arith.constant 0 : index
    %450 = vector.load %arg1[%c0_705, %c42_706, %c1_707, %c0_708] : memref<1x52x7x32xbf16, #tpu.memory_space<vmem>>, vector<1x1x6x16xbf16>
    %451 = vector.shape_cast %450 : vector<1x1x6x16xbf16> to vector<6x16xbf16>
    %c0_709 = arith.constant 0 : index
    %c43_710 = arith.constant 43 : index
    %c0_711 = arith.constant 0 : index
    %c0_712 = arith.constant 0 : index
    %452 = vector.load %arg1[%c0_709, %c43_710, %c0_711, %c0_712] : memref<1x52x7x32xbf16, #tpu.memory_space<vmem>>, vector<1x1x6x32xbf16>
    %453 = vector.shape_cast %452 : vector<1x1x6x32xbf16> to vector<6x32xbf16>
    %c0_713 = arith.constant 0 : index
    %c43_714 = arith.constant 43 : index
    %c1_715 = arith.constant 1 : index
    %c0_716 = arith.constant 0 : index
    %454 = vector.load %arg1[%c0_713, %c43_714, %c1_715, %c0_716] : memref<1x52x7x32xbf16, #tpu.memory_space<vmem>>, vector<1x1x6x16xbf16>
    %455 = vector.shape_cast %454 : vector<1x1x6x16xbf16> to vector<6x16xbf16>
    %c0_717 = arith.constant 0 : index
    %c44 = arith.constant 44 : index
    %c0_718 = arith.constant 0 : index
    %c0_719 = arith.constant 0 : index
    %456 = vector.load %arg1[%c0_717, %c44, %c0_718, %c0_719] : memref<1x52x7x32xbf16, #tpu.memory_space<vmem>>, vector<1x1x6x32xbf16>
    %457 = vector.shape_cast %456 : vector<1x1x6x32xbf16> to vector<6x32xbf16>
    %c0_720 = arith.constant 0 : index
    %c44_721 = arith.constant 44 : index
    %c1_722 = arith.constant 1 : index
    %c0_723 = arith.constant 0 : index
    %458 = vector.load %arg1[%c0_720, %c44_721, %c1_722, %c0_723] : memref<1x52x7x32xbf16, #tpu.memory_space<vmem>>, vector<1x1x6x16xbf16>
    %459 = vector.shape_cast %458 : vector<1x1x6x16xbf16> to vector<6x16xbf16>
    %c0_724 = arith.constant 0 : index
    %c45 = arith.constant 45 : index
    %c0_725 = arith.constant 0 : index
    %c0_726 = arith.constant 0 : index
    %460 = vector.load %arg1[%c0_724, %c45, %c0_725, %c0_726] : memref<1x52x7x32xbf16, #tpu.memory_space<vmem>>, vector<1x1x6x32xbf16>
    %461 = vector.shape_cast %460 : vector<1x1x6x32xbf16> to vector<6x32xbf16>
    %c0_727 = arith.constant 0 : index
    %c45_728 = arith.constant 45 : index
    %c1_729 = arith.constant 1 : index
    %c0_730 = arith.constant 0 : index
    %462 = vector.load %arg1[%c0_727, %c45_728, %c1_729, %c0_730] : memref<1x52x7x32xbf16, #tpu.memory_space<vmem>>, vector<1x1x6x16xbf16>
    %463 = vector.shape_cast %462 : vector<1x1x6x16xbf16> to vector<6x16xbf16>
    %c0_731 = arith.constant 0 : index
    %c46 = arith.constant 46 : index
    %c0_732 = arith.constant 0 : index
    %c0_733 = arith.constant 0 : index
    %464 = vector.load %arg1[%c0_731, %c46, %c0_732, %c0_733] : memref<1x52x7x32xbf16, #tpu.memory_space<vmem>>, vector<1x1x6x32xbf16>
    %465 = vector.shape_cast %464 : vector<1x1x6x32xbf16> to vector<6x32xbf16>
    %c0_734 = arith.constant 0 : index
    %c46_735 = arith.constant 46 : index
    %c1_736 = arith.constant 1 : index
    %c0_737 = arith.constant 0 : index
    %466 = vector.load %arg1[%c0_734, %c46_735, %c1_736, %c0_737] : memref<1x52x7x32xbf16, #tpu.memory_space<vmem>>, vector<1x1x6x16xbf16>
    %467 = vector.shape_cast %466 : vector<1x1x6x16xbf16> to vector<6x16xbf16>
    %c0_738 = arith.constant 0 : index
    %c47 = arith.constant 47 : index
    %c0_739 = arith.constant 0 : index
    %c0_740 = arith.constant 0 : index
    %468 = vector.load %arg1[%c0_738, %c47, %c0_739, %c0_740] : memref<1x52x7x32xbf16, #tpu.memory_space<vmem>>, vector<1x1x6x32xbf16>
    %469 = vector.shape_cast %468 : vector<1x1x6x32xbf16> to vector<6x32xbf16>
    %c0_741 = arith.constant 0 : index
    %c47_742 = arith.constant 47 : index
    %c1_743 = arith.constant 1 : index
    %c0_744 = arith.constant 0 : index
    %470 = vector.load %arg1[%c0_741, %c47_742, %c1_743, %c0_744] : memref<1x52x7x32xbf16, #tpu.memory_space<vmem>>, vector<1x1x6x16xbf16>
    %471 = vector.shape_cast %470 : vector<1x1x6x16xbf16> to vector<6x16xbf16>
    %472 = tpu.concatenate %441, %443, %445, %447, %449, %451, %453, %455, %457, %459, %461, %463, %465, %467, %469, %471 in 1 : vector<6x32xbf16>, vector<6x16xbf16>, vector<6x32xbf16>, vector<6x16xbf16>, vector<6x32xbf16>, vector<6x16xbf16>, vector<6x32xbf16>, vector<6x16xbf16>, vector<6x32xbf16>, vector<6x16xbf16>, vector<6x32xbf16>, vector<6x16xbf16>, vector<6x32xbf16>, vector<6x16xbf16>, vector<6x32xbf16>, vector<6x16xbf16> -> vector<6x384xbf16>
    %c0_745 = arith.constant 0 : index
    %c0_746 = arith.constant 0 : index
    %473 = vector.load %arg2[%c0_745, %c0_746] : memref<384x64xbf16, #tpu.memory_space<vmem>>, vector<384x64xbf16>
    %cst_747 = arith.constant dense<0.000000e+00> : vector<6x64xf32>
    %474 = tpu.matmul %472, %473, %cst_747 {dimension_numbers = #tpu.dot_dimension_numbers<[1], [0], [0], [1], [0, 0, 1, 1], [], []>} : vector<6x384xbf16>, vector<384x64xbf16>, vector<6x64xf32> -> vector<6x64xf32>
    %c0_748 = arith.constant 0 : index
    %c0_749 = arith.constant 0 : index
    %475 = vector.load %arg3[%c0_748, %c0_749] : memref<1x64xf32, #tpu.memory_space<vmem>>, vector<1x64xf32>
    %476 = vector.broadcast %475 : vector<1x64xf32> to vector<6x64xf32>
    %477 = arith.addf %474, %476 : vector<6x64xf32>
    %cst_750 = arith.constant 0.000000e+00 : f32
    %478 = vector.broadcast %cst_750 : f32 to vector<6x64xf32>
    %479 = arith.maximumf %477, %478 : vector<6x64xf32>
    %480 = arith.truncf %479 : vector<6x64xf32> to vector<6x64xbf16>
    %c10_751 = arith.constant 10 : index
    %c0_752 = arith.constant 0 : index
    %c0_753 = arith.constant 0 : index
    %481 = vector.load %arg13[%c10_751, %c0_752, %c0_753] : memref<12x6x64xbf16, #tpu.memory_space<vmem>>, vector<1x6x64xbf16>
    %482 = vector.shape_cast %481 : vector<1x6x64xbf16> to vector<6x64xbf16>
    %483 = vector.shape_cast %480 : vector<6x64xbf16> to vector<1x6x64xbf16>
    tpu.vector_store %arg13[%c10_751, %c0_752, %c0_753], %483 {strides = array<i32>} : memref<12x6x64xbf16, #tpu.memory_space<vmem>>, vector<1x6x64xbf16>,
    %c0_754 = arith.constant 0 : index
    %c44_755 = arith.constant 44 : index
    %c0_756 = arith.constant 0 : index
    %c0_757 = arith.constant 0 : index
    %484 = vector.load %arg1[%c0_754, %c44_755, %c0_756, %c0_757] : memref<1x52x7x32xbf16, #tpu.memory_space<vmem>>, vector<1x1x6x32xbf16>
    %485 = vector.shape_cast %484 : vector<1x1x6x32xbf16> to vector<6x32xbf16>
    %c0_758 = arith.constant 0 : index
    %c44_759 = arith.constant 44 : index
    %c1_760 = arith.constant 1 : index
    %c0_761 = arith.constant 0 : index
    %486 = vector.load %arg1[%c0_758, %c44_759, %c1_760, %c0_761] : memref<1x52x7x32xbf16, #tpu.memory_space<vmem>>, vector<1x1x6x16xbf16>
    %487 = vector.shape_cast %486 : vector<1x1x6x16xbf16> to vector<6x16xbf16>
    %c0_762 = arith.constant 0 : index
    %c45_763 = arith.constant 45 : index
    %c0_764 = arith.constant 0 : index
    %c0_765 = arith.constant 0 : index
    %488 = vector.load %arg1[%c0_762, %c45_763, %c0_764, %c0_765] : memref<1x52x7x32xbf16, #tpu.memory_space<vmem>>, vector<1x1x6x32xbf16>
    %489 = vector.shape_cast %488 : vector<1x1x6x32xbf16> to vector<6x32xbf16>
    %c0_766 = arith.constant 0 : index
    %c45_767 = arith.constant 45 : index
    %c1_768 = arith.constant 1 : index
    %c0_769 = arith.constant 0 : index
    %490 = vector.load %arg1[%c0_766, %c45_767, %c1_768, %c0_769] : memref<1x52x7x32xbf16, #tpu.memory_space<vmem>>, vector<1x1x6x16xbf16>
    %491 = vector.shape_cast %490 : vector<1x1x6x16xbf16> to vector<6x16xbf16>
    %c0_770 = arith.constant 0 : index
    %c46_771 = arith.constant 46 : index
    %c0_772 = arith.constant 0 : index
    %c0_773 = arith.constant 0 : index
    %492 = vector.load %arg1[%c0_770, %c46_771, %c0_772, %c0_773] : memref<1x52x7x32xbf16, #tpu.memory_space<vmem>>, vector<1x1x6x32xbf16>
    %493 = vector.shape_cast %492 : vector<1x1x6x32xbf16> to vector<6x32xbf16>
    %c0_774 = arith.constant 0 : index
    %c46_775 = arith.constant 46 : index
    %c1_776 = arith.constant 1 : index
    %c0_777 = arith.constant 0 : index
    %494 = vector.load %arg1[%c0_774, %c46_775, %c1_776, %c0_777] : memref<1x52x7x32xbf16, #tpu.memory_space<vmem>>, vector<1x1x6x16xbf16>
    %495 = vector.shape_cast %494 : vector<1x1x6x16xbf16> to vector<6x16xbf16>
    %c0_778 = arith.constant 0 : index
    %c47_779 = arith.constant 47 : index
    %c0_780 = arith.constant 0 : index
    %c0_781 = arith.constant 0 : index
    %496 = vector.load %arg1[%c0_778, %c47_779, %c0_780, %c0_781] : memref<1x52x7x32xbf16, #tpu.memory_space<vmem>>, vector<1x1x6x32xbf16>
    %497 = vector.shape_cast %496 : vector<1x1x6x32xbf16> to vector<6x32xbf16>
    %c0_782 = arith.constant 0 : index
    %c47_783 = arith.constant 47 : index
    %c1_784 = arith.constant 1 : index
    %c0_785 = arith.constant 0 : index
    %498 = vector.load %arg1[%c0_782, %c47_783, %c1_784, %c0_785] : memref<1x52x7x32xbf16, #tpu.memory_space<vmem>>, vector<1x1x6x16xbf16>
    %499 = vector.shape_cast %498 : vector<1x1x6x16xbf16> to vector<6x16xbf16>
    %c0_786 = arith.constant 0 : index
    %c48 = arith.constant 48 : index
    %c0_787 = arith.constant 0 : index
    %c0_788 = arith.constant 0 : index
    %500 = vector.load %arg1[%c0_786, %c48, %c0_787, %c0_788] : memref<1x52x7x32xbf16, #tpu.memory_space<vmem>>, vector<1x1x6x32xbf16>
    %501 = vector.shape_cast %500 : vector<1x1x6x32xbf16> to vector<6x32xbf16>
    %c0_789 = arith.constant 0 : index
    %c48_790 = arith.constant 48 : index
    %c1_791 = arith.constant 1 : index
    %c0_792 = arith.constant 0 : index
    %502 = vector.load %arg1[%c0_789, %c48_790, %c1_791, %c0_792] : memref<1x52x7x32xbf16, #tpu.memory_space<vmem>>, vector<1x1x6x16xbf16>
    %503 = vector.shape_cast %502 : vector<1x1x6x16xbf16> to vector<6x16xbf16>
    %c0_793 = arith.constant 0 : index
    %c49 = arith.constant 49 : index
    %c0_794 = arith.constant 0 : index
    %c0_795 = arith.constant 0 : index
    %504 = vector.load %arg1[%c0_793, %c49, %c0_794, %c0_795] : memref<1x52x7x32xbf16, #tpu.memory_space<vmem>>, vector<1x1x6x32xbf16>
    %505 = vector.shape_cast %504 : vector<1x1x6x32xbf16> to vector<6x32xbf16>
    %c0_796 = arith.constant 0 : index
    %c49_797 = arith.constant 49 : index
    %c1_798 = arith.constant 1 : index
    %c0_799 = arith.constant 0 : index
    %506 = vector.load %arg1[%c0_796, %c49_797, %c1_798, %c0_799] : memref<1x52x7x32xbf16, #tpu.memory_space<vmem>>, vector<1x1x6x16xbf16>
    %507 = vector.shape_cast %506 : vector<1x1x6x16xbf16> to vector<6x16xbf16>
    %c0_800 = arith.constant 0 : index
    %c50 = arith.constant 50 : index
    %c0_801 = arith.constant 0 : index
    %c0_802 = arith.constant 0 : index
    %508 = vector.load %arg1[%c0_800, %c50, %c0_801, %c0_802] : memref<1x52x7x32xbf16, #tpu.memory_space<vmem>>, vector<1x1x6x32xbf16>
    %509 = vector.shape_cast %508 : vector<1x1x6x32xbf16> to vector<6x32xbf16>
    %c0_803 = arith.constant 0 : index
    %c50_804 = arith.constant 50 : index
    %c1_805 = arith.constant 1 : index
    %c0_806 = arith.constant 0 : index
    %510 = vector.load %arg1[%c0_803, %c50_804, %c1_805, %c0_806] : memref<1x52x7x32xbf16, #tpu.memory_space<vmem>>, vector<1x1x6x16xbf16>
    %511 = vector.shape_cast %510 : vector<1x1x6x16xbf16> to vector<6x16xbf16>
    %c0_807 = arith.constant 0 : index
    %c51 = arith.constant 51 : index
    %c0_808 = arith.constant 0 : index
    %c0_809 = arith.constant 0 : index
    %512 = vector.load %arg1[%c0_807, %c51, %c0_808, %c0_809] : memref<1x52x7x32xbf16, #tpu.memory_space<vmem>>, vector<1x1x6x32xbf16>
    %513 = vector.shape_cast %512 : vector<1x1x6x32xbf16> to vector<6x32xbf16>
    %c0_810 = arith.constant 0 : index
    %c51_811 = arith.constant 51 : index
    %c1_812 = arith.constant 1 : index
    %c0_813 = arith.constant 0 : index
    %514 = vector.load %arg1[%c0_810, %c51_811, %c1_812, %c0_813] : memref<1x52x7x32xbf16, #tpu.memory_space<vmem>>, vector<1x1x6x16xbf16>
    %515 = vector.shape_cast %514 : vector<1x1x6x16xbf16> to vector<6x16xbf16>
    %516 = tpu.concatenate %485, %487, %489, %491, %493, %495, %497, %499, %501, %503, %505, %507, %509, %511, %513, %515 in 1 : vector<6x32xbf16>, vector<6x16xbf16>, vector<6x32xbf16>, vector<6x16xbf16>, vector<6x32xbf16>, vector<6x16xbf16>, vector<6x32xbf16>, vector<6x16xbf16>, vector<6x32xbf16>, vector<6x16xbf16>, vector<6x32xbf16>, vector<6x16xbf16>, vector<6x32xbf16>, vector<6x16xbf16>, vector<6x32xbf16>, vector<6x16xbf16> -> vector<6x384xbf16>
    %c0_814 = arith.constant 0 : index
    %c0_815 = arith.constant 0 : index
    %517 = vector.load %arg2[%c0_814, %c0_815] : memref<384x64xbf16, #tpu.memory_space<vmem>>, vector<384x64xbf16>
    %cst_816 = arith.constant dense<0.000000e+00> : vector<6x64xf32>
    %518 = tpu.matmul %516, %517, %cst_816 {dimension_numbers = #tpu.dot_dimension_numbers<[1], [0], [0], [1], [0, 0, 1, 1], [], []>} : vector<6x384xbf16>, vector<384x64xbf16>, vector<6x64xf32> -> vector<6x64xf32>
    %c0_817 = arith.constant 0 : index
    %c0_818 = arith.constant 0 : index
    %519 = vector.load %arg3[%c0_817, %c0_818] : memref<1x64xf32, #tpu.memory_space<vmem>>, vector<1x64xf32>
    %520 = vector.broadcast %519 : vector<1x64xf32> to vector<6x64xf32>
    %521 = arith.addf %518, %520 : vector<6x64xf32>
    %cst_819 = arith.constant 0.000000e+00 : f32
    %522 = vector.broadcast %cst_819 : f32 to vector<6x64xf32>
    %523 = arith.maximumf %521, %522 : vector<6x64xf32>
    %524 = arith.truncf %523 : vector<6x64xf32> to vector<6x64xbf16>
    %c11_820 = arith.constant 11 : index
    %c0_821 = arith.constant 0 : index
    %c0_822 = arith.constant 0 : index
    %525 = vector.load %arg13[%c11_820, %c0_821, %c0_822] : memref<12x6x64xbf16, #tpu.memory_space<vmem>>, vector<1x6x64xbf16>
    %526 = vector.shape_cast %525 : vector<1x6x64xbf16> to vector<6x64xbf16>
    %527 = vector.shape_cast %524 : vector<6x64xbf16> to vector<1x6x64xbf16>
    tpu.vector_store %arg13[%c11_820, %c0_821, %c0_822], %527 {strides = array<i32>} : memref<12x6x64xbf16, #tpu.memory_space<vmem>>, vector<1x6x64xbf16>,
    %c0_823 = arith.constant 0 : index
    %c0_824 = arith.constant 0 : index
    %c0_825 = arith.constant 0 : index
    %528 = vector.load %arg13[%c0_823, %c0_824, %c0_825] : memref<12x6x64xbf16, #tpu.memory_space<vmem>>, vector<1x5x64xbf16>
    %529 = vector.shape_cast %528 : vector<1x5x64xbf16> to vector<5x64xbf16>
    %c0_826 = arith.constant 0 : index
    %c1_827 = arith.constant 1 : index
    %c0_828 = arith.constant 0 : index
    %530 = vector.load %arg13[%c0_826, %c1_827, %c0_828] : memref<12x6x64xbf16, #tpu.memory_space<vmem>>, vector<1x5x64xbf16>
    %531 = vector.shape_cast %530 : vector<1x5x64xbf16> to vector<5x64xbf16>
    %c1_829 = arith.constant 1 : index
    %c0_830 = arith.constant 0 : index
    %c0_831 = arith.constant 0 : index
    %532 = vector.load %arg13[%c1_829, %c0_830, %c0_831] : memref<12x6x64xbf16, #tpu.memory_space<vmem>>, vector<1x5x64xbf16>
    %533 = vector.shape_cast %532 : vector<1x5x64xbf16> to vector<5x64xbf16>
    %c1_832 = arith.constant 1 : index
    %c1_833 = arith.constant 1 : index
    %c0_834 = arith.constant 0 : index
    %534 = vector.load %arg13[%c1_832, %c1_833, %c0_834] : memref<12x6x64xbf16, #tpu.memory_space<vmem>>, vector<1x5x64xbf16>
    %535 = vector.shape_cast %534 : vector<1x5x64xbf16> to vector<5x64xbf16>
    %c2_835 = arith.constant 2 : index
    %c0_836 = arith.constant 0 : index
    %c0_837 = arith.constant 0 : index
    %536 = vector.load %arg13[%c2_835, %c0_836, %c0_837] : memref<12x6x64xbf16, #tpu.memory_space<vmem>>, vector<1x5x64xbf16>
    %537 = vector.shape_cast %536 : vector<1x5x64xbf16> to vector<5x64xbf16>
    %c2_838 = arith.constant 2 : index
    %c1_839 = arith.constant 1 : index
    %c0_840 = arith.constant 0 : index
    %538 = vector.load %arg13[%c2_838, %c1_839, %c0_840] : memref<12x6x64xbf16, #tpu.memory_space<vmem>>, vector<1x5x64xbf16>
    %539 = vector.shape_cast %538 : vector<1x5x64xbf16> to vector<5x64xbf16>
    %c3_841 = arith.constant 3 : index
    %c0_842 = arith.constant 0 : index
    %c0_843 = arith.constant 0 : index
    %540 = vector.load %arg13[%c3_841, %c0_842, %c0_843] : memref<12x6x64xbf16, #tpu.memory_space<vmem>>, vector<1x5x64xbf16>
    %541 = vector.shape_cast %540 : vector<1x5x64xbf16> to vector<5x64xbf16>
    %c3_844 = arith.constant 3 : index
    %c1_845 = arith.constant 1 : index
    %c0_846 = arith.constant 0 : index
    %542 = vector.load %arg13[%c3_844, %c1_845, %c0_846] : memref<12x6x64xbf16, #tpu.memory_space<vmem>>, vector<1x5x64xbf16>
    %543 = vector.shape_cast %542 : vector<1x5x64xbf16> to vector<5x64xbf16>
    %544 = tpu.concatenate %529, %531, %533, %535, %537, %539, %541, %543 in 1 : vector<5x64xbf16>, vector<5x64xbf16>, vector<5x64xbf16>, vector<5x64xbf16>, vector<5x64xbf16>, vector<5x64xbf16>, vector<5x64xbf16>, vector<5x64xbf16> -> vector<5x512xbf16>
    %c0_847 = arith.constant 0 : index
    %c0_848 = arith.constant 0 : index
    %545 = vector.load %arg4[%c0_847, %c0_848] : memref<512x64xbf16, #tpu.memory_space<vmem>>, vector<512x64xbf16>
    %cst_849 = arith.constant dense<0.000000e+00> : vector<5x64xf32>
    %546 = tpu.matmul %544, %545, %cst_849 {dimension_numbers = #tpu.dot_dimension_numbers<[1], [0], [0], [1], [0, 0, 1, 1], [], []>} : vector<5x512xbf16>, vector<512x64xbf16>, vector<5x64xf32> -> vector<5x64xf32>
    %c0_850 = arith.constant 0 : index
    %c0_851 = arith.constant 0 : index
    %547 = vector.load %arg5[%c0_850, %c0_851] : memref<1x64xf32, #tpu.memory_space<vmem>>, vector<1x64xf32>
    %548 = vector.broadcast %547 : vector<1x64xf32> to vector<5x64xf32>
    %549 = arith.addf %546, %548 : vector<5x64xf32>
    %cst_852 = arith.constant 0.000000e+00 : f32
    %550 = vector.broadcast %cst_852 : f32 to vector<5x64xf32>
    %551 = arith.maximumf %549, %550 : vector<5x64xf32>
    %552 = arith.truncf %551 : vector<5x64xf32> to vector<5x64xbf16>
    %c0_853 = arith.constant 0 : index
    %c0_854 = arith.constant 0 : index
    %c0_855 = arith.constant 0 : index
    %553 = vector.load %arg14[%c0_853, %c0_854, %c0_855] : memref<5x5x64xbf16, #tpu.memory_space<vmem>>, vector<1x5x64xbf16>
    %554 = vector.shape_cast %553 : vector<1x5x64xbf16> to vector<5x64xbf16>
    %555 = vector.shape_cast %552 : vector<5x64xbf16> to vector<1x5x64xbf16>
    tpu.vector_store %arg14[%c0_853, %c0_854, %c0_855], %555 {strides = array<i32>} : memref<5x5x64xbf16, #tpu.memory_space<vmem>>, vector<1x5x64xbf16>,
    %c2_856 = arith.constant 2 : index
    %c0_857 = arith.constant 0 : index
    %c0_858 = arith.constant 0 : index
    %556 = vector.load %arg13[%c2_856, %c0_857, %c0_858] : memref<12x6x64xbf16, #tpu.memory_space<vmem>>, vector<1x5x64xbf16>
    %557 = vector.shape_cast %556 : vector<1x5x64xbf16> to vector<5x64xbf16>
    %c2_859 = arith.constant 2 : index
    %c1_860 = arith.constant 1 : index
    %c0_861 = arith.constant 0 : index
    %558 = vector.load %arg13[%c2_859, %c1_860, %c0_861] : memref<12x6x64xbf16, #tpu.memory_space<vmem>>, vector<1x5x64xbf16>
    %559 = vector.shape_cast %558 : vector<1x5x64xbf16> to vector<5x64xbf16>
    %c3_862 = arith.constant 3 : index
    %c0_863 = arith.constant 0 : index
    %c0_864 = arith.constant 0 : index
    %560 = vector.load %arg13[%c3_862, %c0_863, %c0_864] : memref<12x6x64xbf16, #tpu.memory_space<vmem>>, vector<1x5x64xbf16>
    %561 = vector.shape_cast %560 : vector<1x5x64xbf16> to vector<5x64xbf16>
    %c3_865 = arith.constant 3 : index
    %c1_866 = arith.constant 1 : index
    %c0_867 = arith.constant 0 : index
    %562 = vector.load %arg13[%c3_865, %c1_866, %c0_867] : memref<12x6x64xbf16, #tpu.memory_space<vmem>>, vector<1x5x64xbf16>
    %563 = vector.shape_cast %562 : vector<1x5x64xbf16> to vector<5x64xbf16>
    %c4_868 = arith.constant 4 : index
    %c0_869 = arith.constant 0 : index
    %c0_870 = arith.constant 0 : index
    %564 = vector.load %arg13[%c4_868, %c0_869, %c0_870] : memref<12x6x64xbf16, #tpu.memory_space<vmem>>, vector<1x5x64xbf16>
    %565 = vector.shape_cast %564 : vector<1x5x64xbf16> to vector<5x64xbf16>
    %c4_871 = arith.constant 4 : index
    %c1_872 = arith.constant 1 : index
    %c0_873 = arith.constant 0 : index
    %566 = vector.load %arg13[%c4_871, %c1_872, %c0_873] : memref<12x6x64xbf16, #tpu.memory_space<vmem>>, vector<1x5x64xbf16>
    %567 = vector.shape_cast %566 : vector<1x5x64xbf16> to vector<5x64xbf16>
    %c5_874 = arith.constant 5 : index
    %c0_875 = arith.constant 0 : index
    %c0_876 = arith.constant 0 : index
    %568 = vector.load %arg13[%c5_874, %c0_875, %c0_876] : memref<12x6x64xbf16, #tpu.memory_space<vmem>>, vector<1x5x64xbf16>
    %569 = vector.shape_cast %568 : vector<1x5x64xbf16> to vector<5x64xbf16>
    %c5_877 = arith.constant 5 : index
    %c1_878 = arith.constant 1 : index
    %c0_879 = arith.constant 0 : index
    %570 = vector.load %arg13[%c5_877, %c1_878, %c0_879] : memref<12x6x64xbf16, #tpu.memory_space<vmem>>, vector<1x5x64xbf16>
    %571 = vector.shape_cast %570 : vector<1x5x64xbf16> to vector<5x64xbf16>
    %572 = tpu.concatenate %557, %559, %561, %563, %565, %567, %569, %571 in 1 : vector<5x64xbf16>, vector<5x64xbf16>, vector<5x64xbf16>, vector<5x64xbf16>, vector<5x64xbf16>, vector<5x64xbf16>, vector<5x64xbf16>, vector<5x64xbf16> -> vector<5x512xbf16>
    %c0_880 = arith.constant 0 : index
    %c0_881 = arith.constant 0 : index
    %573 = vector.load %arg4[%c0_880, %c0_881] : memref<512x64xbf16, #tpu.memory_space<vmem>>, vector<512x64xbf16>
    %cst_882 = arith.constant dense<0.000000e+00> : vector<5x64xf32>
    %574 = tpu.matmul %572, %573, %cst_882 {dimension_numbers = #tpu.dot_dimension_numbers<[1], [0], [0], [1], [0, 0, 1, 1], [], []>} : vector<5x512xbf16>, vector<512x64xbf16>, vector<5x64xf32> -> vector<5x64xf32>
    %c0_883 = arith.constant 0 : index
    %c0_884 = arith.constant 0 : index
    %575 = vector.load %arg5[%c0_883, %c0_884] : memref<1x64xf32, #tpu.memory_space<vmem>>, vector<1x64xf32>
    %576 = vector.broadcast %575 : vector<1x64xf32> to vector<5x64xf32>
    %577 = arith.addf %574, %576 : vector<5x64xf32>
    %cst_885 = arith.constant 0.000000e+00 : f32
    %578 = vector.broadcast %cst_885 : f32 to vector<5x64xf32>
    %579 = arith.maximumf %577, %578 : vector<5x64xf32>
    %580 = arith.truncf %579 : vector<5x64xf32> to vector<5x64xbf16>
    %c1_886 = arith.constant 1 : index
    %c0_887 = arith.constant 0 : index
    %c0_888 = arith.constant 0 : index
    %581 = vector.load %arg14[%c1_886, %c0_887, %c0_888] : memref<5x5x64xbf16, #tpu.memory_space<vmem>>, vector<1x5x64xbf16>
    %582 = vector.shape_cast %581 : vector<1x5x64xbf16> to vector<5x64xbf16>
    %583 = vector.shape_cast %580 : vector<5x64xbf16> to vector<1x5x64xbf16>
    tpu.vector_store %arg14[%c1_886, %c0_887, %c0_888], %583 {strides = array<i32>} : memref<5x5x64xbf16, #tpu.memory_space<vmem>>, vector<1x5x64xbf16>,
    %c4_889 = arith.constant 4 : index
    %c0_890 = arith.constant 0 : index
    %c0_891 = arith.constant 0 : index
    %584 = vector.load %arg13[%c4_889, %c0_890, %c0_891] : memref<12x6x64xbf16, #tpu.memory_space<vmem>>, vector<1x5x64xbf16>
    %585 = vector.shape_cast %584 : vector<1x5x64xbf16> to vector<5x64xbf16>
    %c4_892 = arith.constant 4 : index
    %c1_893 = arith.constant 1 : index
    %c0_894 = arith.constant 0 : index
    %586 = vector.load %arg13[%c4_892, %c1_893, %c0_894] : memref<12x6x64xbf16, #tpu.memory_space<vmem>>, vector<1x5x64xbf16>
    %587 = vector.shape_cast %586 : vector<1x5x64xbf16> to vector<5x64xbf16>
    %c5_895 = arith.constant 5 : index
    %c0_896 = arith.constant 0 : index
    %c0_897 = arith.constant 0 : index
    %588 = vector.load %arg13[%c5_895, %c0_896, %c0_897] : memref<12x6x64xbf16, #tpu.memory_space<vmem>>, vector<1x5x64xbf16>
    %589 = vector.shape_cast %588 : vector<1x5x64xbf16> to vector<5x64xbf16>
    %c5_898 = arith.constant 5 : index
    %c1_899 = arith.constant 1 : index
    %c0_900 = arith.constant 0 : index
    %590 = vector.load %arg13[%c5_898, %c1_899, %c0_900] : memref<12x6x64xbf16, #tpu.memory_space<vmem>>, vector<1x5x64xbf16>
    %591 = vector.shape_cast %590 : vector<1x5x64xbf16> to vector<5x64xbf16>
    %c6_901 = arith.constant 6 : index
    %c0_902 = arith.constant 0 : index
    %c0_903 = arith.constant 0 : index
    %592 = vector.load %arg13[%c6_901, %c0_902, %c0_903] : memref<12x6x64xbf16, #tpu.memory_space<vmem>>, vector<1x5x64xbf16>
    %593 = vector.shape_cast %592 : vector<1x5x64xbf16> to vector<5x64xbf16>
    %c6_904 = arith.constant 6 : index
    %c1_905 = arith.constant 1 : index
    %c0_906 = arith.constant 0 : index
    %594 = vector.load %arg13[%c6_904, %c1_905, %c0_906] : memref<12x6x64xbf16, #tpu.memory_space<vmem>>, vector<1x5x64xbf16>
    %595 = vector.shape_cast %594 : vector<1x5x64xbf16> to vector<5x64xbf16>
    %c7_907 = arith.constant 7 : index
    %c0_908 = arith.constant 0 : index
    %c0_909 = arith.constant 0 : index
    %596 = vector.load %arg13[%c7_907, %c0_908, %c0_909] : memref<12x6x64xbf16, #tpu.memory_space<vmem>>, vector<1x5x64xbf16>
    %597 = vector.shape_cast %596 : vector<1x5x64xbf16> to vector<5x64xbf16>
    %c7_910 = arith.constant 7 : index
    %c1_911 = arith.constant 1 : index
    %c0_912 = arith.constant 0 : index
    %598 = vector.load %arg13[%c7_910, %c1_911, %c0_912] : memref<12x6x64xbf16, #tpu.memory_space<vmem>>, vector<1x5x64xbf16>
    %599 = vector.shape_cast %598 : vector<1x5x64xbf16> to vector<5x64xbf16>
    %600 = tpu.concatenate %585, %587, %589, %591, %593, %595, %597, %599 in 1 : vector<5x64xbf16>, vector<5x64xbf16>, vector<5x64xbf16>, vector<5x64xbf16>, vector<5x64xbf16>, vector<5x64xbf16>, vector<5x64xbf16>, vector<5x64xbf16> -> vector<5x512xbf16>
    %c0_913 = arith.constant 0 : index
    %c0_914 = arith.constant 0 : index
    %601 = vector.load %arg4[%c0_913, %c0_914] : memref<512x64xbf16, #tpu.memory_space<vmem>>, vector<512x64xbf16>
    %cst_915 = arith.constant dense<0.000000e+00> : vector<5x64xf32>
    %602 = tpu.matmul %600, %601, %cst_915 {dimension_numbers = #tpu.dot_dimension_numbers<[1], [0], [0], [1], [0, 0, 1, 1], [], []>} : vector<5x512xbf16>, vector<512x64xbf16>, vector<5x64xf32> -> vector<5x64xf32>
    %c0_916 = arith.constant 0 : index
    %c0_917 = arith.constant 0 : index
    %603 = vector.load %arg5[%c0_916, %c0_917] : memref<1x64xf32, #tpu.memory_space<vmem>>, vector<1x64xf32>
    %604 = vector.broadcast %603 : vector<1x64xf32> to vector<5x64xf32>
    %605 = arith.addf %602, %604 : vector<5x64xf32>
    %cst_918 = arith.constant 0.000000e+00 : f32
    %606 = vector.broadcast %cst_918 : f32 to vector<5x64xf32>
    %607 = arith.maximumf %605, %606 : vector<5x64xf32>
    %608 = arith.truncf %607 : vector<5x64xf32> to vector<5x64xbf16>
    %c2_919 = arith.constant 2 : index
    %c0_920 = arith.constant 0 : index
    %c0_921 = arith.constant 0 : index
    %609 = vector.load %arg14[%c2_919, %c0_920, %c0_921] : memref<5x5x64xbf16, #tpu.memory_space<vmem>>, vector<1x5x64xbf16>
    %610 = vector.shape_cast %609 : vector<1x5x64xbf16> to vector<5x64xbf16>
    %611 = vector.shape_cast %608 : vector<5x64xbf16> to vector<1x5x64xbf16>
    tpu.vector_store %arg14[%c2_919, %c0_920, %c0_921], %611 {strides = array<i32>} : memref<5x5x64xbf16, #tpu.memory_space<vmem>>, vector<1x5x64xbf16>,
    %c6_922 = arith.constant 6 : index
    %c0_923 = arith.constant 0 : index
    %c0_924 = arith.constant 0 : index
    %612 = vector.load %arg13[%c6_922, %c0_923, %c0_924] : memref<12x6x64xbf16, #tpu.memory_space<vmem>>, vector<1x5x64xbf16>
    %613 = vector.shape_cast %612 : vector<1x5x64xbf16> to vector<5x64xbf16>
    %c6_925 = arith.constant 6 : index
    %c1_926 = arith.constant 1 : index
    %c0_927 = arith.constant 0 : index
    %614 = vector.load %arg13[%c6_925, %c1_926, %c0_927] : memref<12x6x64xbf16, #tpu.memory_space<vmem>>, vector<1x5x64xbf16>
    %615 = vector.shape_cast %614 : vector<1x5x64xbf16> to vector<5x64xbf16>
    %c7_928 = arith.constant 7 : index
    %c0_929 = arith.constant 0 : index
    %c0_930 = arith.constant 0 : index
    %616 = vector.load %arg13[%c7_928, %c0_929, %c0_930] : memref<12x6x64xbf16, #tpu.memory_space<vmem>>, vector<1x5x64xbf16>
    %617 = vector.shape_cast %616 : vector<1x5x64xbf16> to vector<5x64xbf16>
    %c7_931 = arith.constant 7 : index
    %c1_932 = arith.constant 1 : index
    %c0_933 = arith.constant 0 : index
    %618 = vector.load %arg13[%c7_931, %c1_932, %c0_933] : memref<12x6x64xbf16, #tpu.memory_space<vmem>>, vector<1x5x64xbf16>
    %619 = vector.shape_cast %618 : vector<1x5x64xbf16> to vector<5x64xbf16>
    %c8_934 = arith.constant 8 : index
    %c0_935 = arith.constant 0 : index
    %c0_936 = arith.constant 0 : index
    %620 = vector.load %arg13[%c8_934, %c0_935, %c0_936] : memref<12x6x64xbf16, #tpu.memory_space<vmem>>, vector<1x5x64xbf16>
    %621 = vector.shape_cast %620 : vector<1x5x64xbf16> to vector<5x64xbf16>
    %c8_937 = arith.constant 8 : index
    %c1_938 = arith.constant 1 : index
    %c0_939 = arith.constant 0 : index
    %622 = vector.load %arg13[%c8_937, %c1_938, %c0_939] : memref<12x6x64xbf16, #tpu.memory_space<vmem>>, vector<1x5x64xbf16>
    %623 = vector.shape_cast %622 : vector<1x5x64xbf16> to vector<5x64xbf16>
    %c9_940 = arith.constant 9 : index
    %c0_941 = arith.constant 0 : index
    %c0_942 = arith.constant 0 : index
    %624 = vector.load %arg13[%c9_940, %c0_941, %c0_942] : memref<12x6x64xbf16, #tpu.memory_space<vmem>>, vector<1x5x64xbf16>
    %625 = vector.shape_cast %624 : vector<1x5x64xbf16> to vector<5x64xbf16>
    %c9_943 = arith.constant 9 : index
    %c1_944 = arith.constant 1 : index
    %c0_945 = arith.constant 0 : index
    %626 = vector.load %arg13[%c9_943, %c1_944, %c0_945] : memref<12x6x64xbf16, #tpu.memory_space<vmem>>, vector<1x5x64xbf16>
    %627 = vector.shape_cast %626 : vector<1x5x64xbf16> to vector<5x64xbf16>
    %628 = tpu.concatenate %613, %615, %617, %619, %621, %623, %625, %627 in 1 : vector<5x64xbf16>, vector<5x64xbf16>, vector<5x64xbf16>, vector<5x64xbf16>, vector<5x64xbf16>, vector<5x64xbf16>, vector<5x64xbf16>, vector<5x64xbf16> -> vector<5x512xbf16>
    %c0_946 = arith.constant 0 : index
    %c0_947 = arith.constant 0 : index
    %629 = vector.load %arg4[%c0_946, %c0_947] : memref<512x64xbf16, #tpu.memory_space<vmem>>, vector<512x64xbf16>
    %cst_948 = arith.constant dense<0.000000e+00> : vector<5x64xf32>
    %630 = tpu.matmul %628, %629, %cst_948 {dimension_numbers = #tpu.dot_dimension_numbers<[1], [0], [0], [1], [0, 0, 1, 1], [], []>} : vector<5x512xbf16>, vector<512x64xbf16>, vector<5x64xf32> -> vector<5x64xf32>
    %c0_949 = arith.constant 0 : index
    %c0_950 = arith.constant 0 : index
    %631 = vector.load %arg5[%c0_949, %c0_950] : memref<1x64xf32, #tpu.memory_space<vmem>>, vector<1x64xf32>
    %632 = vector.broadcast %631 : vector<1x64xf32> to vector<5x64xf32>
    %633 = arith.addf %630, %632 : vector<5x64xf32>
    %cst_951 = arith.constant 0.000000e+00 : f32
    %634 = vector.broadcast %cst_951 : f32 to vector<5x64xf32>
    %635 = arith.maximumf %633, %634 : vector<5x64xf32>
    %636 = arith.truncf %635 : vector<5x64xf32> to vector<5x64xbf16>
    %c3_952 = arith.constant 3 : index
    %c0_953 = arith.constant 0 : index
    %c0_954 = arith.constant 0 : index
    %637 = vector.load %arg14[%c3_952, %c0_953, %c0_954] : memref<5x5x64xbf16, #tpu.memory_space<vmem>>, vector<1x5x64xbf16>
    %638 = vector.shape_cast %637 : vector<1x5x64xbf16> to vector<5x64xbf16>
    %639 = vector.shape_cast %636 : vector<5x64xbf16> to vector<1x5x64xbf16>
    tpu.vector_store %arg14[%c3_952, %c0_953, %c0_954], %639 {strides = array<i32>} : memref<5x5x64xbf16, #tpu.memory_space<vmem>>, vector<1x5x64xbf16>,
    %c8_955 = arith.constant 8 : index
    %c0_956 = arith.constant 0 : index
    %c0_957 = arith.constant 0 : index
    %640 = vector.load %arg13[%c8_955, %c0_956, %c0_957] : memref<12x6x64xbf16, #tpu.memory_space<vmem>>, vector<1x5x64xbf16>
    %641 = vector.shape_cast %640 : vector<1x5x64xbf16> to vector<5x64xbf16>
    %c8_958 = arith.constant 8 : index
    %c1_959 = arith.constant 1 : index
    %c0_960 = arith.constant 0 : index
    %642 = vector.load %arg13[%c8_958, %c1_959, %c0_960] : memref<12x6x64xbf16, #tpu.memory_space<vmem>>, vector<1x5x64xbf16>
    %643 = vector.shape_cast %642 : vector<1x5x64xbf16> to vector<5x64xbf16>
    %c9_961 = arith.constant 9 : index
    %c0_962 = arith.constant 0 : index
    %c0_963 = arith.constant 0 : index
    %644 = vector.load %arg13[%c9_961, %c0_962, %c0_963] : memref<12x6x64xbf16, #tpu.memory_space<vmem>>, vector<1x5x64xbf16>
    %645 = vector.shape_cast %644 : vector<1x5x64xbf16> to vector<5x64xbf16>
    %c9_964 = arith.constant 9 : index
    %c1_965 = arith.constant 1 : index
    %c0_966 = arith.constant 0 : index
    %646 = vector.load %arg13[%c9_964, %c1_965, %c0_966] : memref<12x6x64xbf16, #tpu.memory_space<vmem>>, vector<1x5x64xbf16>
    %647 = vector.shape_cast %646 : vector<1x5x64xbf16> to vector<5x64xbf16>
    %c10_967 = arith.constant 10 : index
    %c0_968 = arith.constant 0 : index
    %c0_969 = arith.constant 0 : index
    %648 = vector.load %arg13[%c10_967, %c0_968, %c0_969] : memref<12x6x64xbf16, #tpu.memory_space<vmem>>, vector<1x5x64xbf16>
    %649 = vector.shape_cast %648 : vector<1x5x64xbf16> to vector<5x64xbf16>
    %c10_970 = arith.constant 10 : index
    %c1_971 = arith.constant 1 : index
    %c0_972 = arith.constant 0 : index
    %650 = vector.load %arg13[%c10_970, %c1_971, %c0_972] : memref<12x6x64xbf16, #tpu.memory_space<vmem>>, vector<1x5x64xbf16>
    %651 = vector.shape_cast %650 : vector<1x5x64xbf16> to vector<5x64xbf16>
    %c11_973 = arith.constant 11 : index
    %c0_974 = arith.constant 0 : index
    %c0_975 = arith.constant 0 : index
    %652 = vector.load %arg13[%c11_973, %c0_974, %c0_975] : memref<12x6x64xbf16, #tpu.memory_space<vmem>>, vector<1x5x64xbf16>
    %653 = vector.shape_cast %652 : vector<1x5x64xbf16> to vector<5x64xbf16>
    %c11_976 = arith.constant 11 : index
    %c1_977 = arith.constant 1 : index
    %c0_978 = arith.constant 0 : index
    %654 = vector.load %arg13[%c11_976, %c1_977, %c0_978] : memref<12x6x64xbf16, #tpu.memory_space<vmem>>, vector<1x5x64xbf16>
    %655 = vector.shape_cast %654 : vector<1x5x64xbf16> to vector<5x64xbf16>
    %656 = tpu.concatenate %641, %643, %645, %647, %649, %651, %653, %655 in 1 : vector<5x64xbf16>, vector<5x64xbf16>, vector<5x64xbf16>, vector<5x64xbf16>, vector<5x64xbf16>, vector<5x64xbf16>, vector<5x64xbf16>, vector<5x64xbf16> -> vector<5x512xbf16>
    %c0_979 = arith.constant 0 : index
    %c0_980 = arith.constant 0 : index
    %657 = vector.load %arg4[%c0_979, %c0_980] : memref<512x64xbf16, #tpu.memory_space<vmem>>, vector<512x64xbf16>
    %cst_981 = arith.constant dense<0.000000e+00> : vector<5x64xf32>
    %658 = tpu.matmul %656, %657, %cst_981 {dimension_numbers = #tpu.dot_dimension_numbers<[1], [0], [0], [1], [0, 0, 1, 1], [], []>} : vector<5x512xbf16>, vector<512x64xbf16>, vector<5x64xf32> -> vector<5x64xf32>
    %c0_982 = arith.constant 0 : index
    %c0_983 = arith.constant 0 : index
    %659 = vector.load %arg5[%c0_982, %c0_983] : memref<1x64xf32, #tpu.memory_space<vmem>>, vector<1x64xf32>
    %660 = vector.broadcast %659 : vector<1x64xf32> to vector<5x64xf32>
    %661 = arith.addf %658, %660 : vector<5x64xf32>
    %cst_984 = arith.constant 0.000000e+00 : f32
    %662 = vector.broadcast %cst_984 : f32 to vector<5x64xf32>
    %663 = arith.maximumf %661, %662 : vector<5x64xf32>
    %664 = arith.truncf %663 : vector<5x64xf32> to vector<5x64xbf16>
    %c4_985 = arith.constant 4 : index
    %c0_986 = arith.constant 0 : index
    %c0_987 = arith.constant 0 : index
    %665 = vector.load %arg14[%c4_985, %c0_986, %c0_987] : memref<5x5x64xbf16, #tpu.memory_space<vmem>>, vector<1x5x64xbf16>
    %666 = vector.shape_cast %665 : vector<1x5x64xbf16> to vector<5x64xbf16>
    %667 = vector.shape_cast %664 : vector<5x64xbf16> to vector<1x5x64xbf16>
    tpu.vector_store %arg14[%c4_985, %c0_986, %c0_987], %667 {strides = array<i32>} : memref<5x5x64xbf16, #tpu.memory_space<vmem>>, vector<1x5x64xbf16>,
    %c0_988 = arith.constant 0 : index
    %c0_989 = arith.constant 0 : index
    %c0_990 = arith.constant 0 : index
    %668 = vector.load %arg14[%c0_988, %c0_989, %c0_990] : memref<5x5x64xbf16, #tpu.memory_space<vmem>>, vector<1x3x64xbf16>
    %669 = vector.shape_cast %668 : vector<1x3x64xbf16> to vector<3x64xbf16>
    %c0_991 = arith.constant 0 : index
    %c1_992 = arith.constant 1 : index
    %c0_993 = arith.constant 0 : index
    %670 = vector.load %arg14[%c0_991, %c1_992, %c0_993] : memref<5x5x64xbf16, #tpu.memory_space<vmem>>, vector<1x3x64xbf16>
    %671 = vector.shape_cast %670 : vector<1x3x64xbf16> to vector<3x64xbf16>
    %c0_994 = arith.constant 0 : index
    %c2_995 = arith.constant 2 : index
    %c0_996 = arith.constant 0 : index
    %672 = vector.load %arg14[%c0_994, %c2_995, %c0_996] : memref<5x5x64xbf16, #tpu.memory_space<vmem>>, vector<1x3x64xbf16>
    %673 = vector.shape_cast %672 : vector<1x3x64xbf16> to vector<3x64xbf16>
    %c1_997 = arith.constant 1 : index
    %c0_998 = arith.constant 0 : index
    %c0_999 = arith.constant 0 : index
    %674 = vector.load %arg14[%c1_997, %c0_998, %c0_999] : memref<5x5x64xbf16, #tpu.memory_space<vmem>>, vector<1x3x64xbf16>
    %675 = vector.shape_cast %674 : vector<1x3x64xbf16> to vector<3x64xbf16>
    %c1_1000 = arith.constant 1 : index
    %c1_1001 = arith.constant 1 : index
    %c0_1002 = arith.constant 0 : index
    %676 = vector.load %arg14[%c1_1000, %c1_1001, %c0_1002] : memref<5x5x64xbf16, #tpu.memory_space<vmem>>, vector<1x3x64xbf16>
    %677 = vector.shape_cast %676 : vector<1x3x64xbf16> to vector<3x64xbf16>
    %c1_1003 = arith.constant 1 : index
    %c2_1004 = arith.constant 2 : index
    %c0_1005 = arith.constant 0 : index
    %678 = vector.load %arg14[%c1_1003, %c2_1004, %c0_1005] : memref<5x5x64xbf16, #tpu.memory_space<vmem>>, vector<1x3x64xbf16>
    %679 = vector.shape_cast %678 : vector<1x3x64xbf16> to vector<3x64xbf16>
    %c2_1006 = arith.constant 2 : index
    %c0_1007 = arith.constant 0 : index
    %c0_1008 = arith.constant 0 : index
    %680 = vector.load %arg14[%c2_1006, %c0_1007, %c0_1008] : memref<5x5x64xbf16, #tpu.memory_space<vmem>>, vector<1x3x64xbf16>
    %681 = vector.shape_cast %680 : vector<1x3x64xbf16> to vector<3x64xbf16>
    %c2_1009 = arith.constant 2 : index
    %c1_1010 = arith.constant 1 : index
    %c0_1011 = arith.constant 0 : index
    %682 = vector.load %arg14[%c2_1009, %c1_1010, %c0_1011] : memref<5x5x64xbf16, #tpu.memory_space<vmem>>, vector<1x3x64xbf16>
    %683 = vector.shape_cast %682 : vector<1x3x64xbf16> to vector<3x64xbf16>
    %c2_1012 = arith.constant 2 : index
    %c2_1013 = arith.constant 2 : index
    %c0_1014 = arith.constant 0 : index
    %684 = vector.load %arg14[%c2_1012, %c2_1013, %c0_1014] : memref<5x5x64xbf16, #tpu.memory_space<vmem>>, vector<1x3x64xbf16>
    %685 = vector.shape_cast %684 : vector<1x3x64xbf16> to vector<3x64xbf16>
    %686 = tpu.concatenate %669, %671, %673, %675, %677, %679, %681, %683, %685 in 1 : vector<3x64xbf16>, vector<3x64xbf16>, vector<3x64xbf16>, vector<3x64xbf16>, vector<3x64xbf16>, vector<3x64xbf16>, vector<3x64xbf16>, vector<3x64xbf16>, vector<3x64xbf16> -> vector<3x576xbf16>
    %c0_1015 = arith.constant 0 : index
    %c0_1016 = arith.constant 0 : index
    %687 = vector.load %arg6[%c0_1015, %c0_1016] : memref<576x64xbf16, #tpu.memory_space<vmem>>, vector<576x64xbf16>
    %cst_1017 = arith.constant dense<0.000000e+00> : vector<3x64xf32>
    %688 = tpu.matmul %686, %687, %cst_1017 {dimension_numbers = #tpu.dot_dimension_numbers<[1], [0], [0], [1], [0, 0, 1, 1], [], []>} : vector<3x576xbf16>, vector<576x64xbf16>, vector<3x64xf32> -> vector<3x64xf32>
    %c0_1018 = arith.constant 0 : index
    %c0_1019 = arith.constant 0 : index
    %689 = vector.load %arg7[%c0_1018, %c0_1019] : memref<1x64xf32, #tpu.memory_space<vmem>>, vector<1x64xf32>
    %690 = vector.broadcast %689 : vector<1x64xf32> to vector<3x64xf32>
    %691 = arith.addf %688, %690 : vector<3x64xf32>
    %cst_1020 = arith.constant 0.000000e+00 : f32
    %692 = vector.broadcast %cst_1020 : f32 to vector<3x64xf32>
    %693 = arith.maximumf %691, %692 : vector<3x64xf32>
    %694 = arith.truncf %693 : vector<3x64xf32> to vector<3x64xbf16>
    %c0_1021 = arith.constant 0 : index
    %c0_1022 = arith.constant 0 : index
    %c0_1023 = arith.constant 0 : index
    %695 = vector.load %arg15[%c0_1021, %c0_1022, %c0_1023] : memref<3x3x64xbf16, #tpu.memory_space<vmem>>, vector<1x3x64xbf16>
    %696 = vector.shape_cast %695 : vector<1x3x64xbf16> to vector<3x64xbf16>
    %697 = vector.shape_cast %694 : vector<3x64xbf16> to vector<1x3x64xbf16>
    tpu.vector_store %arg15[%c0_1021, %c0_1022, %c0_1023], %697 {strides = array<i32>} : memref<3x3x64xbf16, #tpu.memory_space<vmem>>, vector<1x3x64xbf16>,
    %c1_1024 = arith.constant 1 : index
    %c0_1025 = arith.constant 0 : index
    %c0_1026 = arith.constant 0 : index
    %698 = vector.load %arg14[%c1_1024, %c0_1025, %c0_1026] : memref<5x5x64xbf16, #tpu.memory_space<vmem>>, vector<1x3x64xbf16>
    %699 = vector.shape_cast %698 : vector<1x3x64xbf16> to vector<3x64xbf16>
    %c1_1027 = arith.constant 1 : index
    %c1_1028 = arith.constant 1 : index
    %c0_1029 = arith.constant 0 : index
    %700 = vector.load %arg14[%c1_1027, %c1_1028, %c0_1029] : memref<5x5x64xbf16, #tpu.memory_space<vmem>>, vector<1x3x64xbf16>
    %701 = vector.shape_cast %700 : vector<1x3x64xbf16> to vector<3x64xbf16>
    %c1_1030 = arith.constant 1 : index
    %c2_1031 = arith.constant 2 : index
    %c0_1032 = arith.constant 0 : index
    %702 = vector.load %arg14[%c1_1030, %c2_1031, %c0_1032] : memref<5x5x64xbf16, #tpu.memory_space<vmem>>, vector<1x3x64xbf16>
    %703 = vector.shape_cast %702 : vector<1x3x64xbf16> to vector<3x64xbf16>
    %c2_1033 = arith.constant 2 : index
    %c0_1034 = arith.constant 0 : index
    %c0_1035 = arith.constant 0 : index
    %704 = vector.load %arg14[%c2_1033, %c0_1034, %c0_1035] : memref<5x5x64xbf16, #tpu.memory_space<vmem>>, vector<1x3x64xbf16>
    %705 = vector.shape_cast %704 : vector<1x3x64xbf16> to vector<3x64xbf16>
    %c2_1036 = arith.constant 2 : index
    %c1_1037 = arith.constant 1 : index
    %c0_1038 = arith.constant 0 : index
    %706 = vector.load %arg14[%c2_1036, %c1_1037, %c0_1038] : memref<5x5x64xbf16, #tpu.memory_space<vmem>>, vector<1x3x64xbf16>
    %707 = vector.shape_cast %706 : vector<1x3x64xbf16> to vector<3x64xbf16>
    %c2_1039 = arith.constant 2 : index
    %c2_1040 = arith.constant 2 : index
    %c0_1041 = arith.constant 0 : index
    %708 = vector.load %arg14[%c2_1039, %c2_1040, %c0_1041] : memref<5x5x64xbf16, #tpu.memory_space<vmem>>, vector<1x3x64xbf16>
    %709 = vector.shape_cast %708 : vector<1x3x64xbf16> to vector<3x64xbf16>
    %c3_1042 = arith.constant 3 : index
    %c0_1043 = arith.constant 0 : index
    %c0_1044 = arith.constant 0 : index
    %710 = vector.load %arg14[%c3_1042, %c0_1043, %c0_1044] : memref<5x5x64xbf16, #tpu.memory_space<vmem>>, vector<1x3x64xbf16>
    %711 = vector.shape_cast %710 : vector<1x3x64xbf16> to vector<3x64xbf16>
    %c3_1045 = arith.constant 3 : index
    %c1_1046 = arith.constant 1 : index
    %c0_1047 = arith.constant 0 : index
    %712 = vector.load %arg14[%c3_1045, %c1_1046, %c0_1047] : memref<5x5x64xbf16, #tpu.memory_space<vmem>>, vector<1x3x64xbf16>
    %713 = vector.shape_cast %712 : vector<1x3x64xbf16> to vector<3x64xbf16>
    %c3_1048 = arith.constant 3 : index
    %c2_1049 = arith.constant 2 : index
    %c0_1050 = arith.constant 0 : index
    %714 = vector.load %arg14[%c3_1048, %c2_1049, %c0_1050] : memref<5x5x64xbf16, #tpu.memory_space<vmem>>, vector<1x3x64xbf16>
    %715 = vector.shape_cast %714 : vector<1x3x64xbf16> to vector<3x64xbf16>
    %716 = tpu.concatenate %699, %701, %703, %705, %707, %709, %711, %713, %715 in 1 : vector<3x64xbf16>, vector<3x64xbf16>, vector<3x64xbf16>, vector<3x64xbf16>, vector<3x64xbf16>, vector<3x64xbf16>, vector<3x64xbf16>, vector<3x64xbf16>, vector<3x64xbf16> -> vector<3x576xbf16>
    %c0_1051 = arith.constant 0 : index
    %c0_1052 = arith.constant 0 : index
    %717 = vector.load %arg6[%c0_1051, %c0_1052] : memref<576x64xbf16, #tpu.memory_space<vmem>>, vector<576x64xbf16>
    %cst_1053 = arith.constant dense<0.000000e+00> : vector<3x64xf32>
    %718 = tpu.matmul %716, %717, %cst_1053 {dimension_numbers = #tpu.dot_dimension_numbers<[1], [0], [0], [1], [0, 0, 1, 1], [], []>} : vector<3x576xbf16>, vector<576x64xbf16>, vector<3x64xf32> -> vector<3x64xf32>
    %c0_1054 = arith.constant 0 : index
    %c0_1055 = arith.constant 0 : index
    %719 = vector.load %arg7[%c0_1054, %c0_1055] : memref<1x64xf32, #tpu.memory_space<vmem>>, vector<1x64xf32>
    %720 = vector.broadcast %719 : vector<1x64xf32> to vector<3x64xf32>
    %721 = arith.addf %718, %720 : vector<3x64xf32>
    %cst_1056 = arith.constant 0.000000e+00 : f32
    %722 = vector.broadcast %cst_1056 : f32 to vector<3x64xf32>
    %723 = arith.maximumf %721, %722 : vector<3x64xf32>
    %724 = arith.truncf %723 : vector<3x64xf32> to vector<3x64xbf16>
    %c1_1057 = arith.constant 1 : index
    %c0_1058 = arith.constant 0 : index
    %c0_1059 = arith.constant 0 : index
    %725 = vector.load %arg15[%c1_1057, %c0_1058, %c0_1059] : memref<3x3x64xbf16, #tpu.memory_space<vmem>>, vector<1x3x64xbf16>
    %726 = vector.shape_cast %725 : vector<1x3x64xbf16> to vector<3x64xbf16>
    %727 = vector.shape_cast %724 : vector<3x64xbf16> to vector<1x3x64xbf16>
    tpu.vector_store %arg15[%c1_1057, %c0_1058, %c0_1059], %727 {strides = array<i32>} : memref<3x3x64xbf16, #tpu.memory_space<vmem>>, vector<1x3x64xbf16>,
    %c2_1060 = arith.constant 2 : index
    %c0_1061 = arith.constant 0 : index
    %c0_1062 = arith.constant 0 : index
    %728 = vector.load %arg14[%c2_1060, %c0_1061, %c0_1062] : memref<5x5x64xbf16, #tpu.memory_space<vmem>>, vector<1x3x64xbf16>
    %729 = vector.shape_cast %728 : vector<1x3x64xbf16> to vector<3x64xbf16>
    %c2_1063 = arith.constant 2 : index
    %c1_1064 = arith.constant 1 : index
    %c0_1065 = arith.constant 0 : index
    %730 = vector.load %arg14[%c2_1063, %c1_1064, %c0_1065] : memref<5x5x64xbf16, #tpu.memory_space<vmem>>, vector<1x3x64xbf16>
    %731 = vector.shape_cast %730 : vector<1x3x64xbf16> to vector<3x64xbf16>
    %c2_1066 = arith.constant 2 : index
    %c2_1067 = arith.constant 2 : index
    %c0_1068 = arith.constant 0 : index
    %732 = vector.load %arg14[%c2_1066, %c2_1067, %c0_1068] : memref<5x5x64xbf16, #tpu.memory_space<vmem>>, vector<1x3x64xbf16>
    %733 = vector.shape_cast %732 : vector<1x3x64xbf16> to vector<3x64xbf16>
    %c3_1069 = arith.constant 3 : index
    %c0_1070 = arith.constant 0 : index
    %c0_1071 = arith.constant 0 : index
    %734 = vector.load %arg14[%c3_1069, %c0_1070, %c0_1071] : memref<5x5x64xbf16, #tpu.memory_space<vmem>>, vector<1x3x64xbf16>
    %735 = vector.shape_cast %734 : vector<1x3x64xbf16> to vector<3x64xbf16>
    %c3_1072 = arith.constant 3 : index
    %c1_1073 = arith.constant 1 : index
    %c0_1074 = arith.constant 0 : index
    %736 = vector.load %arg14[%c3_1072, %c1_1073, %c0_1074] : memref<5x5x64xbf16, #tpu.memory_space<vmem>>, vector<1x3x64xbf16>
    %737 = vector.shape_cast %736 : vector<1x3x64xbf16> to vector<3x64xbf16>
    %c3_1075 = arith.constant 3 : index
    %c2_1076 = arith.constant 2 : index
    %c0_1077 = arith.constant 0 : index
    %738 = vector.load %arg14[%c3_1075, %c2_1076, %c0_1077] : memref<5x5x64xbf16, #tpu.memory_space<vmem>>, vector<1x3x64xbf16>
    %739 = vector.shape_cast %738 : vector<1x3x64xbf16> to vector<3x64xbf16>
    %c4_1078 = arith.constant 4 : index
    %c0_1079 = arith.constant 0 : index
    %c0_1080 = arith.constant 0 : index
    %740 = vector.load %arg14[%c4_1078, %c0_1079, %c0_1080] : memref<5x5x64xbf16, #tpu.memory_space<vmem>>, vector<1x3x64xbf16>
    %741 = vector.shape_cast %740 : vector<1x3x64xbf16> to vector<3x64xbf16>
    %c4_1081 = arith.constant 4 : index
    %c1_1082 = arith.constant 1 : index
    %c0_1083 = arith.constant 0 : index
    %742 = vector.load %arg14[%c4_1081, %c1_1082, %c0_1083] : memref<5x5x64xbf16, #tpu.memory_space<vmem>>, vector<1x3x64xbf16>
    %743 = vector.shape_cast %742 : vector<1x3x64xbf16> to vector<3x64xbf16>
    %c4_1084 = arith.constant 4 : index
    %c2_1085 = arith.constant 2 : index
    %c0_1086 = arith.constant 0 : index
    %744 = vector.load %arg14[%c4_1084, %c2_1085, %c0_1086] : memref<5x5x64xbf16, #tpu.memory_space<vmem>>, vector<1x3x64xbf16>
    %745 = vector.shape_cast %744 : vector<1x3x64xbf16> to vector<3x64xbf16>
    %746 = tpu.concatenate %729, %731, %733, %735, %737, %739, %741, %743, %745 in 1 : vector<3x64xbf16>, vector<3x64xbf16>, vector<3x64xbf16>, vector<3x64xbf16>, vector<3x64xbf16>, vector<3x64xbf16>, vector<3x64xbf16>, vector<3x64xbf16>, vector<3x64xbf16> -> vector<3x576xbf16>
    %c0_1087 = arith.constant 0 : index
    %c0_1088 = arith.constant 0 : index
    %747 = vector.load %arg6[%c0_1087, %c0_1088] : memref<576x64xbf16, #tpu.memory_space<vmem>>, vector<576x64xbf16>
    %cst_1089 = arith.constant dense<0.000000e+00> : vector<3x64xf32>
    %748 = tpu.matmul %746, %747, %cst_1089 {dimension_numbers = #tpu.dot_dimension_numbers<[1], [0], [0], [1], [0, 0, 1, 1], [], []>} : vector<3x576xbf16>, vector<576x64xbf16>, vector<3x64xf32> -> vector<3x64xf32>
    %c0_1090 = arith.constant 0 : index
    %c0_1091 = arith.constant 0 : index
    %749 = vector.load %arg7[%c0_1090, %c0_1091] : memref<1x64xf32, #tpu.memory_space<vmem>>, vector<1x64xf32>
    %750 = vector.broadcast %749 : vector<1x64xf32> to vector<3x64xf32>
    %751 = arith.addf %748, %750 : vector<3x64xf32>
    %cst_1092 = arith.constant 0.000000e+00 : f32
    %752 = vector.broadcast %cst_1092 : f32 to vector<3x64xf32>
    %753 = arith.maximumf %751, %752 : vector<3x64xf32>
    %754 = arith.truncf %753 : vector<3x64xf32> to vector<3x64xbf16>
    %c2_1093 = arith.constant 2 : index
    %c0_1094 = arith.constant 0 : index
    %c0_1095 = arith.constant 0 : index
    %755 = vector.load %arg15[%c2_1093, %c0_1094, %c0_1095] : memref<3x3x64xbf16, #tpu.memory_space<vmem>>, vector<1x3x64xbf16>
    %756 = vector.shape_cast %755 : vector<1x3x64xbf16> to vector<3x64xbf16>
    %757 = vector.shape_cast %754 : vector<3x64xbf16> to vector<1x3x64xbf16>
    tpu.vector_store %arg15[%c2_1093, %c0_1094, %c0_1095], %757 {strides = array<i32>} : memref<3x3x64xbf16, #tpu.memory_space<vmem>>, vector<1x3x64xbf16>,
    %c0_1096 = arith.constant 0 : index
    %c0_1097 = arith.constant 0 : index
    %c0_1098 = arith.constant 0 : index
    %758 = vector.load %arg15[%c0_1096, %c0_1097, %c0_1098] : memref<3x3x64xbf16, #tpu.memory_space<vmem>>, vector<1x1x64xbf16>
    %759 = vector.shape_cast %758 : vector<1x1x64xbf16> to vector<1x64xbf16>
    %c0_1099 = arith.constant 0 : index
    %c1_1100 = arith.constant 1 : index
    %c0_1101 = arith.constant 0 : index
    %760 = vector.load %arg15[%c0_1099, %c1_1100, %c0_1101] : memref<3x3x64xbf16, #tpu.memory_space<vmem>>, vector<1x1x64xbf16>
    %761 = vector.shape_cast %760 : vector<1x1x64xbf16> to vector<1x64xbf16>
    %c0_1102 = arith.constant 0 : index
    %c2_1103 = arith.constant 2 : index
    %c0_1104 = arith.constant 0 : index
    %762 = vector.load %arg15[%c0_1102, %c2_1103, %c0_1104] : memref<3x3x64xbf16, #tpu.memory_space<vmem>>, vector<1x1x64xbf16>
    %763 = vector.shape_cast %762 : vector<1x1x64xbf16> to vector<1x64xbf16>
    %c1_1105 = arith.constant 1 : index
    %c0_1106 = arith.constant 0 : index
    %c0_1107 = arith.constant 0 : index
    %764 = vector.load %arg15[%c1_1105, %c0_1106, %c0_1107] : memref<3x3x64xbf16, #tpu.memory_space<vmem>>, vector<1x1x64xbf16>
    %765 = vector.shape_cast %764 : vector<1x1x64xbf16> to vector<1x64xbf16>
    %c1_1108 = arith.constant 1 : index
    %c1_1109 = arith.constant 1 : index
    %c0_1110 = arith.constant 0 : index
    %766 = vector.load %arg15[%c1_1108, %c1_1109, %c0_1110] : memref<3x3x64xbf16, #tpu.memory_space<vmem>>, vector<1x1x64xbf16>
    %767 = vector.shape_cast %766 : vector<1x1x64xbf16> to vector<1x64xbf16>
    %c1_1111 = arith.constant 1 : index
    %c2_1112 = arith.constant 2 : index
    %c0_1113 = arith.constant 0 : index
    %768 = vector.load %arg15[%c1_1111, %c2_1112, %c0_1113] : memref<3x3x64xbf16, #tpu.memory_space<vmem>>, vector<1x1x64xbf16>
    %769 = vector.shape_cast %768 : vector<1x1x64xbf16> to vector<1x64xbf16>
    %c2_1114 = arith.constant 2 : index
    %c0_1115 = arith.constant 0 : index
    %c0_1116 = arith.constant 0 : index
    %770 = vector.load %arg15[%c2_1114, %c0_1115, %c0_1116] : memref<3x3x64xbf16, #tpu.memory_space<vmem>>, vector<1x1x64xbf16>
    %771 = vector.shape_cast %770 : vector<1x1x64xbf16> to vector<1x64xbf16>
    %c2_1117 = arith.constant 2 : index
    %c1_1118 = arith.constant 1 : index
    %c0_1119 = arith.constant 0 : index
    %772 = vector.load %arg15[%c2_1117, %c1_1118, %c0_1119] : memref<3x3x64xbf16, #tpu.memory_space<vmem>>, vector<1x1x64xbf16>
    %773 = vector.shape_cast %772 : vector<1x1x64xbf16> to vector<1x64xbf16>
    %c2_1120 = arith.constant 2 : index
    %c2_1121 = arith.constant 2 : index
    %c0_1122 = arith.constant 0 : index
    %774 = vector.load %arg15[%c2_1120, %c2_1121, %c0_1122] : memref<3x3x64xbf16, #tpu.memory_space<vmem>>, vector<1x1x64xbf16>
    %775 = vector.shape_cast %774 : vector<1x1x64xbf16> to vector<1x64xbf16>
    %776 = tpu.concatenate %759, %761, %763, %765, %767, %769, %771, %773, %775 in 1 : vector<1x64xbf16>, vector<1x64xbf16>, vector<1x64xbf16>, vector<1x64xbf16>, vector<1x64xbf16>, vector<1x64xbf16>, vector<1x64xbf16>, vector<1x64xbf16>, vector<1x64xbf16> -> vector<1x576xbf16>
    %c0_1123 = arith.constant 0 : index
    %c0_1124 = arith.constant 0 : index
    %777 = vector.load %arg8[%c0_1123, %c0_1124] : memref<576x512xbf16, #tpu.memory_space<vmem>>, vector<576x512xbf16>
    %cst_1125 = arith.constant dense<0.000000e+00> : vector<1x512xf32>
    %778 = tpu.matmul %776, %777, %cst_1125 {dimension_numbers = #tpu.dot_dimension_numbers<[1], [0], [0], [1], [0, 0, 1, 1], [], []>} : vector<1x576xbf16>, vector<576x512xbf16>, vector<1x512xf32> -> vector<1x512xf32>
    %c0_1126 = arith.constant 0 : index
    %c0_1127 = arith.constant 0 : index
    %779 = vector.load %arg9[%c0_1126, %c0_1127] : memref<1x512xf32, #tpu.memory_space<vmem>>, vector<1x512xf32>
    %780 = arith.addf %778, %779 : vector<1x512xf32>
    %cst_1128 = arith.constant 0.000000e+00 : f32
    %781 = vector.broadcast %cst_1128 : f32 to vector<1x512xf32>
    %782 = arith.maximumf %780, %781 : vector<1x512xf32>
    %783 = arith.truncf %782 : vector<1x512xf32> to vector<1x512xbf16>
    %c0_1129 = arith.constant 0 : index
    %c0_1130 = arith.constant 0 : index
    %784 = vector.load %arg10[%c0_1129, %c0_1130] : memref<512x128xbf16, #tpu.memory_space<vmem>>, vector<512x128xbf16>
    %cst_1131 = arith.constant dense<0.000000e+00> : vector<1x128xf32>
    %785 = tpu.matmul %783, %784, %cst_1131 {dimension_numbers = #tpu.dot_dimension_numbers<[1], [0], [0], [1], [0, 0, 1, 1], [], []>} : vector<1x512xbf16>, vector<512x128xbf16>, vector<1x128xf32> -> vector<1x128xf32>
    %c0_1132 = arith.constant 0 : index
    %c0_1133 = arith.constant 0 : index
    %786 = vector.load %arg11[%c0_1132, %c0_1133] : memref<1x128xf32, #tpu.memory_space<vmem>>, vector<1x128xf32>
    %787 = arith.addf %785, %786 : vector<1x128xf32>
    %c0_1134 = arith.constant 0 : index
    %c0_1135 = arith.constant 0 : index
    %c0_1136 = arith.constant 0 : index
    %788 = vector.load %arg12[%c0_1134, %c0_1135, %c0_1136] : memref<1x1x128xf32, #tpu.memory_space<vmem>>, vector<1x1x128xf32>
    %789 = vector.shape_cast %788 : vector<1x1x128xf32> to vector<1x128xf32>
    %790 = vector.shape_cast %787 : vector<1x128xf32> to vector<1x1x128xf32>
    tpu.vector_store %arg12[%c0_1134, %c0_1135, %c0_1136], %790 {strides = array<i32>} : memref<1x1x128xf32, #tpu.memory_space<vmem>>, vector<1x1x128xf32>,
    return
  }
  func.func @transform_0(%arg0: i32) -> (i32, i32, i32, i32) {
    %c0_i32 = arith.constant 0 : i32
    %c0_i32_0 = arith.constant 0 : i32
    %c0_i32_1 = arith.constant 0 : i32
    %c0_i32_2 = arith.constant 0 : i32
    return %arg0, %c0_i32, %c0_i32_0, %c0_i32_1 : i32, i32, i32, i32
  }
  func.func @transform_1(%arg0: i32) -> (i32, i32) {
    %c0_i32 = arith.constant 0 : i32
    %c0_i32_0 = arith.constant 0 : i32
    %c0_i32_1 = arith.constant 0 : i32
    return %c0_i32, %c0_i32_0 : i32, i32
  }
  func.func @transform_2(%arg0: i32) -> (i32, i32) {
    %c0_i32 = arith.constant 0 : i32
    %c0_i32_0 = arith.constant 0 : i32
    %c0_i32_1 = arith.constant 0 : i32
    return %c0_i32, %c0_i32_0 : i32, i32
  }
  func.func @transform_3(%arg0: i32) -> (i32, i32) {
    %c0_i32 = arith.constant 0 : i32
    %c0_i32_0 = arith.constant 0 : i32
    %c0_i32_1 = arith.constant 0 : i32
    return %c0_i32, %c0_i32_0 : i32, i32
  }
  func.func @transform_4(%arg0: i32) -> (i32, i32) {
    %c0_i32 = arith.constant 0 : i32
    %c0_i32_0 = arith.constant 0 : i32
    %c0_i32_1 = arith.constant 0 : i32
    return %c0_i32, %c0_i32_0 : i32, i32
  }
  func.func @transform_5(%arg0: i32) -> (i32, i32) {
    %c0_i32 = arith.constant 0 : i32
    %c0_i32_0 = arith.constant 0 : i32
    %c0_i32_1 = arith.constant 0 : i32
    return %c0_i32, %c0_i32_0 : i32, i32
  }
  func.func @transform_6(%arg0: i32) -> (i32, i32) {
    %c0_i32 = arith.constant 0 : i32
    %c0_i32_0 = arith.constant 0 : i32
    %c0_i32_1 = arith.constant 0 : i32
    return %c0_i32, %c0_i32_0 : i32, i32
  }
  func.func @transform_7(%arg0: i32) -> (i32, i32) {
    %c0_i32 = arith.constant 0 : i32
    %c0_i32_0 = arith.constant 0 : i32
    %c0_i32_1 = arith.constant 0 : i32
    return %c0_i32, %c0_i32_0 : i32, i32
  }
  func.func @transform_8(%arg0: i32) -> (i32, i32) {
    %c0_i32 = arith.constant 0 : i32
    %c0_i32_0 = arith.constant 0 : i32
    %c0_i32_1 = arith.constant 0 : i32
    return %c0_i32, %c0_i32_0 : i32, i32
  }
  func.func @transform_9(%arg0: i32) -> (i32, i32) {
    %c0_i32 = arith.constant 0 : i32
    %c0_i32_0 = arith.constant 0 : i32
    %c0_i32_1 = arith.constant 0 : i32
    return %c0_i32, %c0_i32_0 : i32, i32
  }
  func.func @transform_10(%arg0: i32) -> (i32, i32) {
    %c0_i32 = arith.constant 0 : i32
    %c0_i32_0 = arith.constant 0 : i32
    %c0_i32_1 = arith.constant 0 : i32
    return %c0_i32, %c0_i32_0 : i32, i32
  }
  func.func @transform_11(%arg0: i32) -> (i32, i32, i32) {
    %c0_i32 = arith.constant 0 : i32
    %c0_i32_0 = arith.constant 0 : i32
    %c0_i32_1 = arith.constant 0 : i32
    return %arg0, %c0_i32, %c0_i32_0 : i32, i32, i32
  }
}

</mosaic_0001>

<bundles_post_ra>
// kernel: deep_q_net_forward.1
= control target key start
LH: loop header
LB: loop body
LE: loop exit
PB: predicated region body
PF: predicated region fallthrough
CT: control target
= control target key end

     0   :  { %s18203_s0 = inlined_call_operand.vmem [shape: bf16[4,52,7,32], index: 0, kind: input, shape index: {}]   ;;  %s18204_s1 = inlined_call_operand.vmem [shape: bf16[384,64], index: 1, kind: input, shape index: {}]   ;;  %s18205_s2 = inlined_call_operand.vmem [shape: f32[1,64], index: 2, kind: input, shape index: {}]   ;;  %s18206_s3 = inlined_call_operand.vmem [shape: bf16[512,64], index: 3, kind: input, shape index: {}]   ;;  %s18207_s4 = inlined_call_operand.vmem [shape: f32[1,64], index: 4, kind: input, shape index: {}]   ;;  %s18208_s5 = inlined_call_operand.vmem [shape: bf16[576,64], index: 5, kind: input, shape index: {}]   ;;  %s18209_s6 = inlined_call_operand.vmem [shape: f32[1,64], index: 6, kind: input, shape index: {}]   ;;  %s18210_s7 = inlined_call_operand.vmem [shape: bf16[576,512], index: 7, kind: input, shape index: {}]   ;;  %s18211_s8 = inlined_call_operand.vmem [shape: f32[1,512], index: 8, kind: input, shape index: {}]   ;;  %s18212_s9 = inlined_call_operand.vmem [shape: bf16[512,128], index: 9, kind: input, shape index: {}]   ;;  %s18213_s10 = inlined_call_operand.vmem [shape: f32[1,128], index: 10, kind: input, shape index: {}]   ;;  %s18214_s11 = inlined_call_operand.hbm [shape: f32[4,1,128], index: 11, kind: output, shape index: {}]  }
   0x1   :  { %18234 = sst [smem:[#allocation13_spill]] %s18203_s0 }
   0x2   :  { %16 = vsyncpa [#allocation6], 0 }
   0x3   :  { %18 = vsyncpa [#allocation6 + $0x1], 0  ;;  %s14654_s17 = smov 0   ;;  %s14656_s18 = smov 0  }
   0x4   :  { %s14658_s19 = smov 0   ;;  %s14660_s20 = smov 0  }
   0x5 LB: > { %18235 = sst [smem:[#allocation8_spill]] %s14568_s17  ;;  %s14675_s21 = sadd.s32 4294967295, %s14580_s20   ;;  %s14580_s20 = sphi %s14660_s20, %s18256_s20   ;;  %s14576_s19 = sphi %s14658_s19, %s18261_s19   ;;  %s14572_s18 = sphi %s14656_s18, %s18260_s18   ;;  %s14568_s17 = sphi %s14654_s17, %s18259_s17  }
   0x6   : > { %18236 = sst [smem:[#allocation9_spill]] %s14576_s19  ;;  %s11191_s22 = sadd.s32 4294967294, %s14580_s20  }
   0x7   : > { %s14679_s23 = sadd.s32 1, %s14580_s20   ;;  %s267_s24 = sadd.s32 1, %s14576_s19 }
   0x8   : > { %18237 = sst [smem:[#allocation10_spill]] %s14679_s23  ;;  %s264_s25 = ssub.s32 %s14580_s20, %s14679_s23 }
   0x9   : > { %p277_p0 = scmp.ne.s32.totalorder %s14576_s19, %s14572_s18  ;;  %p265_p1 = scmp.eq.s32.totalorder %s264_s25, 0 }
   0xa   : > { %p278_p2 = scmp.eq.s32.totalorder %s14675_s21, 3  ;;  %p283_p3 = scmp.ne.s32.totalorder %s14572_s18, %s14568_s17 }
   0xb   : > { %p284_p4 = scmp.eq.s32.totalorder %s11191_s22, 3  ;;  %p11194_p7 = scmp.ge.s32.totalorder %s14580_s20, 1 }
   0xc   : > { %s14690_s26 = scalar_select %p265_p1, %s14576_s19, %s267_s24  }
   0xd   : > { %p14692_p5 = por %p278_p2, %p277_p0  ;;  %p14696_p6 = por %p284_p4, %p283_p3 }
   0xe   : > { %18238 = sst [smem:[#allocation11_spill]] %s14690_s26  ;;  %p340_p8 = scmp.lt.s32.totalorder %s14580_s20, 5 }
   0xf   : > { %s18240_s28 = scalar_select %p14696_p6, 1, 0 }
  0x10   : > { %p341_p9 = pnand %p11194_p7, %p340_p8 }
  0x11   : > { %18241 = sst [smem:[#allocation12_spill]] %s18240_s28  ;;  %p379_p10 = scmp.lt.s32.totalorder (!%p341_p9), %s14675_s21, 3 }
  0x12   : > { %344 = sbr.rel (%p341_p9) target bundleno = 2022 (0x7e6), region = 64  ;;  %s18242_s0 = sld [smem:[#allocation13_spill]] (!%p341_p9) }
  0x13   : > { %s18223_s29 = smov (!%p341_p9), 16   ;;  %s18215_s24 = smov (!%p341_p9), 112  }
  0x14   : > { %s18217_s25 = smov (!%p341_p9), 48   ;;  %s18227_s15 = smov (!%p341_p9), 32  }
  0x15   : > { %s18225_s30 = smov (!%p341_p9), 80   ;;  %s18244_s12 = smov (!%p341_p9), 48  }
  0x16   : > { %s18245_s26 = smov (!%p341_p9), 96   ;;  %s18249_s23 = smov (!%p341_p9), 32  }
  0x17   : > { %v13527_v0 = vld [vmem:[%s18204_s1 + $0x78] sm:$0xff]   ;;  %s380_s14 = scalar_select %p379_p10, %s14675_s21, 3  ;;  %v13531_v2 = vld [vmem:[%s18204_s1 + $0x70] sm:$0xff]   ;;  %v13534_v4 = vld [vmem:[%s18204_s1 + $0x68] sm:$0xff]   ;;  %v14582_v5 = vmov 0.0   ;;  %vm14590_vm0 = vmmov 0  }
  0x18   : > { %v13529_v1 = vld [vmem:[%s18204_s1 + $0x38] sm:$0xff]   ;;  %12368 = vmatprep.subr.bf16.mxu0 %v13527_v0  ;;  %v13532_v3 = vld [vmem:[%s18204_s1 + $0x30] sm:$0xff]   ;;  %13151 = vmatprep.subr.bf16.mxu1 %v14582_v5  ;;  %v13536_v9 = vld [vmem:[%s18204_s1 + $0x28] sm:$0xff]   ;;  %vm551_vm1 = vcmask 130048   ;;  %vm537_vm2 = vcmask 261120   ;;  %vm541_vm3 = vcmask 392192  }
  0x19   : > { %s13427_s22 = smul.u32 208, %s380_s14  ;;  %12369 = vmatpush3.bf16.msra.mxu0 %v13529_v1  ;;  %v13537_v7 = vld [vmem:[%s18204_s1 + $0xb8] sm:$0xff]   ;;  %v13539_v11 = vld [vmem:[%s18204_s1 + $0x60] sm:$0xff]   ;;  %v13542_v13 = vld [vmem:[%s18204_s1 + $0xb0] sm:$0xff]   ;;  %s18219_s14 = smov 96   ;;  %13167 = vmatprep.mubr.msk.bf16.mxu1 %vm14590_vm0, %v14582_v5  ;;  %vm547_vm4 = vcmask 785408  }
  0x1a   : > { %12370 = vmatprep.subr.bf16.mxu0 %v13531_v2  ;;  %13152 = vmatpush3.bf16.msra.mxu1 %v13537_v7  ;;  %v13541_v14 = vld [vmem:[%s18204_s1 + $0x20] sm:$0xff]   ;;  %v13545_v15 = vld [vmem:[%s18204_s1 + $0x58] sm:$0xff]   ;;  %v13547_v45 = vld [vmem:[%s18204_s1 + $0xa8] sm:$0xff]   ;;  %vm557_vm5 = vcmask 523264   ;;  %vm544_vm6 = vcmask 654336   ;;  %vm562_vm7 = vcmask 916480  }
  0x1b   : > { %s14722_s13 = scalar_lea.vmem %s18242_s0, %s13427_s22  ;;  %s18221_s22 = smov 64   ;;  %13153 = vmatprep.subr.bf16.mxu1 %v14582_v5  ;;  %v13546_v30 = vld [vmem:[%s18204_s1 + $0x18] sm:$0xff]   ;;  %v13549_v48 = vld [vmem:[%s18204_s1 + $0x50] sm:$0xff]   ;;  %v13552_v54 = vld [vmem:[%s18204_s1 + $0xa0] sm:$0xff]   ;;  %vm858_vm8 = vcmask 518144   ;;  %vm8554_vm11 = vcmask 517120  }
  0x1c   : > { %v13478_v6 = vld [vmem:[%s14722_s13 + $0x10] ss:$0 sps:$4 sm:$0x77]   ;;  %v13479_v8 = vld [vmem:[%s14722_s13 + $0xc] ss:$0 sps:$4 sm:$0x77]  }
  0x1d   : > { %12371 = vmatpush3.bf16.msra.mxu0 %v13532_v3  ;;  %472 = vrot.lane.b32.xlu1 %v13478_v6, %s18221_s22  ;;  %v13480_v10 = vld [vmem:[%s14722_s13 + $0x14] ss:$0 sps:$4 sm:$0x77]   ;;  %v13481_v12 = vld [vmem:[%s14722_s13 + $0x4] ss:$0 sps:$4 sm:$0x77]  }
  0x1e   : > { %12372 = vmatprep.subr.bf16.mxu0 %v13534_v4  ;;  %455 = vrot.lane.b32.xlu0 %v13479_v8, %s18223_s29  ;;  %v13482_v16 = vld [vmem:[%s14722_s13 + $0x8] ss:$0 sps:$4 sm:$0x77]   ;;  %v13483_v17 = vld [vmem:[%s14722_s13] ss:$0 sps:$4 sm:$0xff]   ;;  %v13551_v52 = vld [vmem:[%s18204_s1 + $0x10] sm:$0xff]  }
  0x1f   : > { %v13484_v18 = vld [vmem:[%s14722_s13 + $0xc] ss:$0 sps:$4 sm:$0xff]   ;;  %v13485_v19 = vld [vmem:[%s14722_s13 + $0x10] ss:$0 sps:$4 sm:$0xff]   ;;  %v412_v20 = vshrl.u32 %v13483_v17, 16  ;;  %v414_v21 = vshll.u32 %v13483_v17, 16  ;;  %13154 = vmatpush3.bf16.msra.mxu1 %v13542_v13 }
  0x20   : > { %v13486_v22 = vld [vmem:[%s14722_s13 + $0x4] ss:$0 sps:$4 sm:$0xff]   ;;  %v461_v23 = vshrl.u32 %v13484_v18, 16  ;;  %v463_v24 = vshll.u32 %v13484_v18, 16  ;;  %v480_v25 = vshll.u32 %v13485_v19, 16  ;;  %13155 = vmatprep.subr.bf16.mxu1 %v14582_v5  ;;  %v478_v27 = vshrl.u32 %v13485_v19, 16 }
  0x21   : > { %12373 = vmatpush3.bf16.msra.mxu0 %v13536_v9  ;;  %489 = vrot.lane.b32.xlu1 %v13480_v10, %s18215_s24  ;;  %v416_v26 = vrot.slane %v414_v21, 1  ;;  %v431_v28 = vshll.u32 %v13486_v22, 16  ;;  %v13487_v29 = vld [vmem:[%s14722_s13 + $0x14] ss:$0 sps:$4 sm:$0xff]   ;;  %v429_v34 = vshrl.u32 %v13486_v22, 16  ;;  %v13554_v62 = vld [vmem:[%s18204_s1 + $0x48] sm:$0xff]  }
  0x22   : > { %12374 = vmatprep.subr.bf16.mxu0 %v13539_v11  ;;  %423 = vrot.lane.b32.xlu0 %v13481_v12, %s18217_s25  ;;  %v465_v31 = vrot.slane %v463_v24, 1  ;;  %v482_v32 = vrot.slane %v480_v25, 1  ;;  %v497_v36 = vshll.u32 %v13487_v29, 16  ;;  %v13489_v38 = vld [vmem:[%s14722_s13 + $0x18] ss:$0 sps:$4 sm:$0xff]   ;;  %v495_v40 = vshrl.u32 %v13487_v29, 16 }
  0x23   : > { %v417_v33 = vor.u32 %v416_v26, %v412_v20  ;;  %v433_v35 = vrot.slane %v431_v28, 1  ;;  %v13491_v42 = vld [vmem:[%s14722_s13 + $0x1c] ss:$0 sps:$4 sm:$0xff]   ;;  %v514_v43 = vshll.u32 %v13489_v38, 16  ;;  %v512_v46 = vshrl.u32 %v13489_v38, 16  ;;  %13156 = vmatpush3.bf16.msra.mxu1 %v13547_v45  ;;  %v13556_v3 = vld [vmem:[%s18204_s1 + $0x8] sm:$0xff]  }
  0x24   : > { %v466_v37 = vor.u32 %v465_v31, %v461_v23  ;;  %v483_v39 = vor.u32 %v482_v32, %v478_v27  ;;  %v499_v41 = vrot.slane %v497_v36, 1  ;;  %v531_v47 = vshll.u32 %v13491_v42, 16  ;;  %v13493_v51 = vld [vmem:[%s14722_s13 + $0x1c] ss:$0 sps:$4 sm:$0xff]   ;;  %13157 = vmatprep.subr.bf16.mxu1 %v14582_v5  ;;  %v13494_v55 = vld [vmem:[%s14722_s13 + $0x10] ss:$0 sps:$4 sm:$0xff]  }
  0x25   : > { %12375 = vmatpush3.bf16.msra.mxu0 %v13541_v14  ;;  %418 = vrot.lane.b32.xlu1 %v417_v33, %s18227_s15  ;;  %v434_v44 = vor.u32 %v433_v35, %v429_v34  ;;  %v516_v50 = vrot.slane %v514_v43, 1  ;;  %v13488_v53 = vld [vmem:[%s14722_s13 + $0x18] ss:$0 sps:$4 sm:$0x77]   ;;  %v529_v57 = vshrl.u32 %v13491_v42, 16  ;;  %v935_v59 = vshll.u32 %v13493_v51, 16 }
  0x26   : > { %12376 = vmatprep.subr.bf16.mxu0 %v13545_v15  ;;  %440 = vrot.lane.b32.xlu0 %v13482_v16, %s18219_s14  ;;  %v500_v49 = vor.u32 %v499_v41, %v495_v40  ;;  %v533_v58 = vrot.slane %v531_v47, 1  ;;  %v13490_v60 = vld [vmem:[%s14722_s13 + $0x1c] ss:$0 sps:$4 sm:$0x77]   ;;  %v886_v61 = vshll.u32 %v13494_v55, 16  ;;  %v933_v63 = vshrl.u32 %v13493_v51, 16 }
  0x27   : > { %v517_v56 = vor.u32 %v516_v50, %v512_v46  ;;  %13158 = vmatpush3.bf16.msra.mxu1 %v13552_v54  ;;  %v937_v1 = vrot.slane %v935_v59, 1  ;;  %v13497_v2 = vld [vmem:[%s14722_s13 + $0x20] ss:$0 sps:$4 sm:$0xff]   ;;  %v13492_v4 = vld [vmem:[%s14722_s13 + $0x1c] ss:$0 sps:$4 sm:$0x77]  }
  0x28   : > { %13159 = vmatprep.subr.bf16.mxu1 %v14582_v5  ;;  %v534_v0 = vor.u32 %v533_v58, %v529_v57  ;;  %v13557_v6 = vld [vmem:[%s18204_s1 + $0x98] sm:$0xff]   ;;  %v884_v7 = vshrl.u32 %v13494_v55, 16  ;;  %v888_v8 = vrot.slane %v886_v61, 1  ;;  %v13498_v9 = vld [vmem:[%s14722_s13 + $0x14] ss:$0 sps:$4 sm:$0xff]   ;;  %s18243_s24 = smov 112  }
  0x29   : > { %12377 = vmatpush3.bf16.msra.mxu0 %v13546_v30  ;;  %484 = vrot.lane.b32.xlu1 %v483_v39, %s18219_s14  ;;  %v938_v10 = vor.u32 %v937_v1, %v933_v63  ;;  %v952_v11 = vshll.u32 %v13497_v2, 16  ;;  %v903_v13 = vshll.u32 %v13498_v9, 16  ;;  %v13559_v14 = vld [vmem:[%s18204_s1 + $0x40] sm:$0xff]   ;;  %v950_v16 = vshrl.u32 %v13497_v2, 16  ;;  %v13503_v23 = vld [vmem:[%s14722_s13 + $0x28] ss:$0 sps:$4 sm:$0xff]  }
  0x2a   : > { %467 = vrot.lane.b32.xlu0 %v466_v37, %s18217_s25  ;;  %12378 = vmatprep.subr.bf16.mxu0 %v13549_v48  ;;  %v889_v12 = vor.u32 %v888_v8, %v884_v7  ;;  %v13495_v15 = vld [vmem:[%s14722_s13 + $0x20] ss:$0 sps:$4 sm:$0x77]   ;;  %v13501_v18 = vld [vmem:[%s14722_s13 + $0x24] ss:$0 sps:$4 sm:$0xff]   ;;  %v901_v20 = vshrl.u32 %v13498_v9, 16 }
  0x2b   : > { %13160 = vmatpush3.bf16.msra.mxu1 %v13557_v6  ;;  %v954_v17 = vrot.slane %v952_v11, 1  ;;  %v13496_v19 = vld [vmem:[%s14722_s13 + $0x14] ss:$0 sps:$4 sm:$0x77]   ;;  %v905_v21 = vrot.slane %v903_v13, 1  ;;  %v13561_v22 = vld [vmem:[%s18204_s1] sm:$0xff]  }
  0x2c   : > { %13161 = vmatprep.subr.bf16.mxu1 %v14582_v5  ;;  %v969_v25 = vshll.u32 %v13501_v18, 16  ;;  %v13562_v26 = vld [vmem:[%s18204_s1 + $0x90] sm:$0xff]   ;;  %v13499_v28 = vld [vmem:[%s14722_s13 + $0x24] ss:$0 sps:$4 sm:$0x77]   ;;  %v986_v29 = vshll.u32 %v13503_v23, 16 }
  0x2d   : > { %12379 = vmatpush3.bf16.msra.mxu0 %v13551_v52  ;;  %501 = vrot.lane.b32.xlu1 %v500_v49, %s18223_s29  ;;  %v955_v24 = vor.u32 %v954_v17, %v950_v16  ;;  %v906_v27 = vor.u32 %v905_v21, %v901_v20  ;;  %v13505_v30 = vld [vmem:[%s14722_s13 + $0x2c] ss:$0 sps:$4 sm:$0xff]   ;;  %v967_v31 = vshrl.u32 %v13501_v18, 16  ;;  %v13500_v33 = vld [vmem:[%s14722_s13 + $0x18] ss:$0 sps:$4 sm:$0x77]  }
  0x2e   : > { %435 = vrot.lane.b32.xlu0 %v434_v44, %s18225_s30  ;;  %12380 = vmatprep.subr.bf16.mxu0 %v13554_v62  ;;  %v971_v32 = vrot.slane %v969_v25, 1  ;;  %v13564_v34 = vld [vmem:[%s18204_s1 + $0x78] sm:$0xff]   ;;  %v984_v35 = vshrl.u32 %v13503_v23, 16  ;;  %v988_v36 = vrot.slane %v986_v29, 1  ;;  %v1003_v37 = vshll.u32 %v13505_v30, 16  ;;  %v13566_v38 = vld [vmem:[%s18204_s1 + $0x88] sm:$0xff]  }
  0x2f   : > { %13162 = vmatpush3.bf16.msra.mxu1 %v13562_v26  ;;  %v13507_v40 = vld [vmem:[%s14722_s13 + $0x2c] ss:$0 sps:$4 sm:$0xff]   ;;  %v13502_v41 = vld [vmem:[%s14722_s13 + $0x28] ss:$0 sps:$4 sm:$0x77]   ;;  %v1001_v44 = vshrl.u32 %v13505_v30, 16 }
  0x30   : > { %13163 = vmatprep.subr.bf16.mxu1 %v14582_v5  ;;  %v972_v39 = vor.u32 %v971_v32, %v967_v31  ;;  %v13508_v42 = vld [vmem:[%s14722_s13 + $0x20] ss:$0 sps:$4 sm:$0xff]   ;;  %v989_v43 = vor.u32 %v988_v36, %v984_v35  ;;  %v1005_v45 = vrot.slane %v1003_v37, 1  ;;  %v1400_v46 = vshll.u32 %v13507_v40, 16  ;;  %v13511_v49 = vld [vmem:[%s14722_s13 + $0x30] ss:$0 sps:$4 sm:$0xff]  }
  0x31   : > { %518 = vrot.lane.b32.xlu1 %v517_v56, %s18221_s22  ;;  %12381 = vmatpush3.bf16.msra.mxu0 %v13556_v3  ;;  %v13504_v47 = vld [vmem:[%s14722_s13 + $0x2c] ss:$0 sps:$4 sm:$0x77]   ;;  %v1351_v48 = vshll.u32 %v13508_v42, 16  ;;  %v1398_v51 = vshrl.u32 %v13507_v40, 16  ;;  %v13570_v54 = vld [vmem:[%s18204_s1 + $0x80] sm:$0xff]  }
  0x32   : > { %506 = vrot.lane.b32.xlu0 %v13488_v53, %s18227_s15  ;;  %12382 = vmatprep.subr.bf16.mxu0 %v13559_v14  ;;  %v1006_v50 = vor.u32 %v1005_v45, %v1001_v44  ;;  %v1402_v52 = vrot.slane %v1400_v46, 1  ;;  %v13506_v53 = vld [vmem:[%s14722_s13 + $0x2c] ss:$0 sps:$4 sm:$0x77]   ;;  %v1349_v55 = vshrl.u32 %v13508_v42, 16  ;;  %v1417_v58 = vshll.u32 %v13511_v49, 16 }
  0x33   : > { %13164 = vmatpush3.bf16.msra.mxu1 %v13566_v38  ;;  %v1353_v56 = vrot.slane %v1351_v48, 1  ;;  %v13512_v57 = vld [vmem:[%s14722_s13 + $0x24] ss:$0 sps:$4 sm:$0xff]   ;;  %v13509_v63 = vld [vmem:[%s14722_s13 + $0x30] ss:$0 sps:$4 sm:$0x77]  }
  0x34   : > { %13165 = vmatprep.subr.bf16.mxu1 %v14582_v5  ;;  %v1403_v59 = vor.u32 %v1402_v52, %v1398_v51  ;;  %v1368_v62 = vshll.u32 %v13512_v57, 16  ;;  %v1419_v1 = vrot.slane %v1417_v58, 1  ;;  %v13510_v2 = vld [vmem:[%s14722_s13 + $0x24] ss:$0 sps:$4 sm:$0x77]   ;;  %v1366_v3 = vshrl.u32 %v13512_v57, 16 }
  0x35   : > { %535 = vrot.lane.b32.xlu1 %v534_v0, %s18243_s24  ;;  %12383 = vmatpush3.bf16.msra.mxu0 %v13561_v22  ;;  %v1354_v61 = vor.u32 %v1353_v56, %v1349_v55  ;;  %v1415_v0 = vshrl.u32 %v13511_v49, 16  ;;  %v13517_v7 = vld [vmem:[%s14722_s13 + $0x38] ss:$0 sps:$4 sm:$0xff]   ;;  %v13514_v14 = vld [vmem:[%s14722_s13 + $0x28] ss:$0 sps:$4 sm:$0x77]  }
  0x36   : > { %523 = vrot.lane.b32.xlu0 %v13490_v60, %s18225_s30  ;;  %12399 = vmatprep.subr.bf16.mxu0 %v13564_v34  ;;  %v13515_v60 = vld [vmem:[%s14722_s13 + $0x34] ss:$0 sps:$4 sm:$0xff]   ;;  %v1451_v13 = vshll.u32 %v13517_v7, 16  ;;  %v13521_v16 = vld [vmem:[%s14722_s13 + $0x3c] ss:$0 sps:$4 sm:$0xff]   ;;  %s18247_s0 = smov 80  }
  0x37   : > { %13166 = vmatpush3.bf16.msra.mxu1 %v13570_v54  ;;  %v1434_v6 = vshll.u32 %v13515_v60, 16  ;;  %v1420_v8 = vor.u32 %v1419_v1, %v1415_v0  ;;  %v1432_v11 = vshrl.u32 %v13515_v60, 16  ;;  %v13516_v18 = vld [vmem:[%s14722_s13 + $0x38] ss:$0 sps:$4 sm:$0x77]   ;;  %v1863_v29 = vshrl.u32 %v13521_v16, 16 }
  0x38   : > { %13171 = vmatprep.subr.bf16.mxu1 %v14582_v5  ;;  %v1453_v20 = vrot.slane %v1451_v13, 1  ;;  %v13522_v22 = vld [vmem:[%s14722_s13 + $0x30] ss:$0 sps:$4 sm:$0xff]   ;;  %v13518_v26 = vld [vmem:[%s14722_s13 + $0x3c] ss:$0 sps:$4 sm:$0x77]  }
  0x39   : > { %939 = vrot.lane.b32.xlu1 %v938_v10, %s18244_s12  ;;  %v13513_v10 = vld [vmem:[%s14722_s13 + $0x34] ss:$0 sps:$4 sm:$0x77]   ;;  %v13525_v30 = vld [vmem:[%s14722_s13 + $0x40] ss:$0 sps:$4 sm:$0xff]   ;;  %v1814_v34 = vshrl.u32 %v13522_v22, 16 }
  0x3a   : > { %927 = vrot.lane.b32.xlu0 %v13492_v4, %s18223_s29  ;;  %v1370_v4 = vrot.slane %v1368_v62, 1  ;;  %v13520_v32 = vld [vmem:[%s14722_s13 + $0x3c] ss:$0 sps:$4 sm:$0x77]   ;;  %v13526_v36 = vld [vmem:[%s14722_s13 + $0x34] ss:$0 sps:$4 sm:$0xff]  }
  0x3b   : > { %v1882_v37 = vshll.u32 %v13525_v30, 16  ;;  %v1880_v42 = vshrl.u32 %v13525_v30, 16  ;;  %v13524_v44 = vld [vmem:[%s14722_s13 + $0x34] ss:$0 sps:$4 sm:$0x77]   ;;  %v1831_v46 = vshrl.u32 %v13526_v36, 16 }
  0x3c   : > { %v1371_v9 = vor.u32 %v1370_v4, %v1366_v3  ;;  %v13533_v45 = vld [vmem:[%s14722_s13 + $0x44] ss:$0 sps:$4 sm:$0xff]   ;;  %v13538_v48 = vld [vmem:[%s14722_s13 + $0x48] ss:$0 sps:$4 sm:$0xff]   ;;  %v13543_v54 = vld [vmem:[%s14722_s13 + $0x4c] ss:$0 sps:$4 sm:$0xff]  }
  0x3d   : > { %944 = vrot.lane.b32.xlu1 %v13495_v15, %s18221_s22  ;;  %s18246_s22 = smov 64   ;;  %v13519_v15 = vld [vmem:[%s14722_s13 + $0x3c] ss:$0 sps:$4 sm:$0xff]   ;;  %v13528_v52 = vld [vmem:[%s14722_s13 + $0x44] ss:$0 sps:$4 sm:$0x77]  }
  0x3e   : > { %890 = vrot.lane.b32.xlu0 %v889_v12, %s18227_s15  ;;  %v1436_v12 = vrot.slane %v1434_v6, 1  ;;  %v1468_v21 = vshll.u32 %v13519_v15, 16  ;;  %v1466_v23 = vshrl.u32 %v13519_v15, 16  ;;  %v13530_v55 = vld [vmem:[%s14722_s13 + $0x38] ss:$0 sps:$4 sm:$0x77]  }
  0x3f   : > { %v1897_v56 = vshrl.u32 %v13533_v45, 16  ;;  %v1914_v58 = vshrl.u32 %v13538_v48, 16  ;;  %v1933_v60 = vshll.u32 %v13543_v54, 16  ;;  %v13535_v0 = vld [vmem:[%s14722_s13 + $0x48] ss:$0 sps:$4 sm:$0x77]  }
  0x40   : > { %v1437_v17 = vor.u32 %v1436_v12, %v1432_v11  ;;  %v1931_v3 = vshrl.u32 %v13543_v54, 16  ;;  %v13548_v11 = vld [vmem:[%s14722_s13 + $0x4c] ss:$0 sps:$4 sm:$0x77]   ;;  %vm6389_vm9 = vsmask.f32 2304 }
  0x41   : > { %956 = vrot.lane.b32.xlu1 %v955_v24, %s18245_s26  ;;  %v1865_v24 = vshll.u32 %v13521_v16, 16  ;;  %v1935_v4 = vrot.slane %v1933_v60, 1  ;;  %v13563_v16 = vld [vmem:[%s14722_s13 + $0x44] ss:$0 sps:$4 sm:$0xff]   ;;  %vm17090_vm10 = vmand %vm858_vm8, %vm6389_vm9  ;;  %vm8555_vm12 = vsmask.f32 1280 }
  0x42   : > { %895 = vrot.lane.b32.xlu0 %v13496_v19, %s18244_s12  ;;  %v1449_v19 = vshrl.u32 %v13517_v7, 16  ;;  %v13573_v54 = vld [vmem:[%s14722_s13 + $0x58] ss:$0 sps:$4 sm:$0x77]   ;;  %vm17567_vm13 = vmand %vm8554_vm11, %vm8555_vm12  ;;  %s12365_s14 = sshll.u32 %s14675_s21, 4  ;;  %s14593_s21 = smov [#allocation5]  }
  0x44   : > { %v1454_v25 = vor.u32 %v1453_v20, %v1449_v19 }
  0x45   : > { %961 = vrot.lane.b32.xlu1 %v13499_v28, %s18243_s24  ;;  %v1816_v28 = vshll.u32 %v13522_v22, 16  ;;  %v2298_v22 = vshll.u32 %v13563_v16, 16 }
  0x46   : > { %907 = vrot.lane.b32.xlu0 %v906_v27, %s18225_s30  ;;  %v1470_v27 = vrot.slane %v1468_v21, 1  ;;  %v13555_v21 = vld [vmem:[%s14722_s13 + $0x50] ss:$0 sps:$4 sm:$0x77]  }
  0x47   : > { %v1818_v35 = vrot.slane %v1816_v28, 1  ;;  %v13558_v28 = vld [vmem:[%s14722_s13 + $0x44] ss:$0 sps:$4 sm:$0x77]   ;;  %v2300_v30 = vrot.slane %v2298_v22, 1 }
  0x48   : > { %v1471_v31 = vor.u32 %v1470_v27, %v1466_v23  ;;  %v13571_v23 = vld [vmem:[%s14722_s13 + $0x54] ss:$0 sps:$4 sm:$0xff]  }
  0x49   : > { %973 = vrot.lane.b32.xlu1 %v972_v39, %s18223_s29  ;;  %v1833_v39 = vshll.u32 %v13526_v36, 16  ;;  %v1819_v40 = vor.u32 %v1818_v35, %v1814_v34 }
  0x4a   : > { %912 = vrot.lane.b32.xlu0 %v13500_v33, %s18245_s26  ;;  %v1867_v33 = vrot.slane %v1865_v24, 1 }
  0x4c   : > { %v1868_v38 = vor.u32 %v1867_v33, %v1863_v29  ;;  %v2296_v29 = vshrl.u32 %v13563_v16, 16  ;;  %v13574_v16 = vld [vmem:[%s18204_s1 + $0x68] sm:$0xff]  }
  0x4d   : > { %990 = vrot.lane.b32.xlu1 %v989_v43, %s18246_s22  ;;  %v1884_v43 = vrot.slane %v1882_v37, 1 }
  0x4e   : > { %978 = vrot.lane.b32.xlu0 %v13502_v41, %s18227_s15  ;;  %v13523_v41 = vld [vmem:[%s14722_s13 + $0x40] ss:$0 sps:$4 sm:$0x77]  }
  0x4f   : > { %v1885_v49 = vor.u32 %v1884_v43, %v1880_v42 }
  0x51   : > { %1007 = vrot.lane.b32.xlu1 %v1006_v50, %s18243_s24  ;;  %v1899_v50 = vshll.u32 %v13533_v45, 16  ;;  %v13568_v45 = vld [vmem:[%s14722_s13 + $0x48] ss:$0 sps:$4 sm:$0x77]  }
  0x52   : > { %995 = vrot.lane.b32.xlu0 %v13504_v47, %s18225_s30  ;;  %v1835_v47 = vrot.slane %v1833_v39, 1  ;;  %v13565_v39 = vld [vmem:[%s14722_s13 + $0x54] ss:$0 sps:$4 sm:$0x77]  }
  0x53   : > { %v1901_v57 = vrot.slane %v1899_v50, 1 }
  0x54   : > { %v1836_v51 = vor.u32 %v1835_v47, %v1831_v46  ;;  %v13581_v46 = vld [vmem:[%s14722_s13 + $0x5c] ss:$0 sps:$4 sm:$0xff]  }
  0x55   : > { %1404 = vrot.lane.b32.xlu1 %v1403_v59, %s18244_s12  ;;  %v1902_v62 = vor.u32 %v1901_v57, %v1897_v56  ;;  %v13588_v56 = vld [vmem:[%s14722_s13 + $0x5c] ss:$0 sps:$4 sm:$0xff]   ;;  %v2396_v60 = vshrl.u32 %v13581_v46, 16 }
  0x56   : > { %1392 = vrot.lane.b32.xlu0 %v13506_v53, %s18223_s29  ;;  %v1916_v53 = vshll.u32 %v13538_v48, 16  ;;  %v385_v48 = vld [vmem:[%s14722_s13] sm:$0x7]  ;;  %v2793_v22 = vshrl.u32 %v13588_v56, 16 }
  0x58   : > { %v1918_v59 = vrot.slane %v1916_v53, 1 }
  0x59   : > { %1409 = vrot.lane.b32.xlu1 %v13509_v63, %s18246_s22  ;;  %v13553_v63 = vld [vmem:[%s14722_s13 + $0x40] ss:$0 sps:$4 sm:$0xff]  }
  0x5a   : > { %1355 = vrot.lane.b32.xlu0 %v1354_v61, %s18227_s15  ;;  %v13550_v61 = vld [vmem:[%s14722_s13 + $0x4c] ss:$0 sps:$4 sm:$0xff]   ;;  %v1919_v1 = vor.u32 %v1918_v59, %v1914_v58  ;;  %v2281_v7 = vshll.u32 %v13553_v63, 16  ;;  %v14937_v59 = vld [vmem:[%s14722_s13 + $0x18] ss:$0 sps:$4 sm:$0xff]  }
  0x5b   : > { %v2330_v6 = vshll.u32 %v13550_v61, 16  ;;  %v2328_v12 = vshrl.u32 %v13550_v61, 16 }
  0x5c   : > { %v2283_v15 = vrot.slane %v2281_v7, 1  ;;  %v13579_v7 = vld [vmem:[%s14722_s13 + $0x5c] ss:$0 sps:$4 sm:$0x77]  }
  0x5d   : > { %1421 = vrot.lane.b32.xlu1 %v1420_v8, %s18245_s26  ;;  %v13560_v8 = vld [vmem:[%s14722_s13 + $0x50] ss:$0 sps:$4 sm:$0xff]   ;;  %v2332_v13 = vrot.slane %v2330_v6, 1 }
  0x5e   : > { %1360 = vrot.lane.b32.xlu0 %v13510_v2, %s18244_s12  ;;  %v13540_v2 = vld [vmem:[%s14722_s13 + $0x4c] ss:$0 sps:$4 sm:$0x77]  }
  0x61   : > { %1426 = vrot.lane.b32.xlu1 %v13513_v10, %s18243_s24  ;;  %v13544_v10 = vld [vmem:[%s14722_s13 + $0x8] ss:$0 sps:$4 sm:$0xff]  }
  0x62   : > { %1372 = vrot.lane.b32.xlu0 %v1371_v9, %s18225_s30  ;;  %v1936_v9 = vor.u32 %v1935_v4, %v1931_v3  ;;  %v448_v19 = vshll.u32 %v13544_v10, 16  ;;  %v446_v33 = vshrl.u32 %v13544_v10, 16 }
  0x64   : > { %v450_v34 = vrot.slane %v448_v19, 1 }
  0x65   : > { %1438 = vrot.lane.b32.xlu1 %v1437_v17, %s18223_s29  ;;  %v2347_v17 = vshll.u32 %v13560_v8, 16 }
  0x66   : > { %1377 = vrot.lane.b32.xlu0 %v13514_v14, %s18245_s26  ;;  %v2279_v14 = vshrl.u32 %v13553_v63, 16  ;;  %v451_v43 = vor.u32 %v450_v34, %v446_v33  ;;  %v13567_v63 = vld [vmem:[%s18204_s1 + $0x38] sm:$0xff]  }
  0x67   : > { %v13577_v33 = vld [vmem:[%s18204_s1 + $0xb8] sm:$0xff]  }
  0x68   : > { %v2284_v20 = vor.u32 %v2283_v15, %v2279_v14  ;;  %v13572_v15 = vld [vmem:[%s18204_s1 + $0x30] sm:$0xff]  }
  0x69   : > { %1455 = vrot.lane.b32.xlu1 %v1454_v25, %s18246_s22  ;;  %v2345_v25 = vshrl.u32 %v13560_v8, 16 }
  0x6a   : > { %1443 = vrot.lane.b32.xlu0 %v13516_v18, %s18227_s15  ;;  %v2333_v18 = vor.u32 %v2332_v13, %v2328_v12 }
  0x6d   : > { %1472 = vrot.lane.b32.xlu1 %v1471_v31, %s18243_s24  ;;  %v2364_v31 = vshll.u32 %v13571_v23, 16 }
  0x6e   : > { %1460 = vrot.lane.b32.xlu0 %v13518_v26, %s18225_s30  ;;  %v2349_v26 = vrot.slane %v2347_v17, 1  ;;  %v920_v17 = vshll.u32 %v14937_v59, 16 }
  0x70   : > { %v2350_v37 = vor.u32 %v2349_v26, %v2345_v25  ;;  %v13598_v25 = vld [vmem:[%s14722_s13 + $0x60] ss:$0 sps:$4 sm:$0xff]  }
  0x71   : > { %1869 = vrot.lane.b32.xlu1 %v1868_v38, %s18244_s12  ;;  %v2301_v38 = vor.u32 %v2300_v30, %v2296_v29  ;;  %v13602_v29 = vld [vmem:[%s14722_s13 + $0x54] ss:$0 sps:$4 sm:$0xff]  }
  0x72   : > { %1857 = vrot.lane.b32.xlu0 %v13520_v32, %s18223_s29  ;;  %v13575_v32 = vld [vmem:[%s14722_s13 + $0x58] ss:$0 sps:$4 sm:$0xff]  }
  0x73   : > { %v2381_v42 = vshll.u32 %v13575_v32, 16 }
  0x75   : > { %1874 = vrot.lane.b32.xlu1 %v13523_v41, %s18246_s22  ;;  %v2366_v41 = vrot.slane %v2364_v31, 1  ;;  %v2383_v50 = vrot.slane %v2381_v42, 1 }
  0x76   : > { %1820 = vrot.lane.b32.xlu0 %v1819_v40, %s18227_s15  ;;  %v2362_v40 = vshrl.u32 %v13571_v23, 16 }
  0x78   : > { %v2367_v53 = vor.u32 %v2366_v41, %v2362_v40  ;;  %v2763_v41 = vshll.u32 %v13602_v29, 16 }
  0x79   : > { %1886 = vrot.lane.b32.xlu1 %v1885_v49, %s18245_s26  ;;  %v2379_v49 = vshrl.u32 %v13575_v32, 16  ;;  %v13576_v32 = vld [vmem:[%s18204_s1 + $0x28] sm:$0xff]  }
  0x7a   : > { %1825 = vrot.lane.b32.xlu0 %v13524_v44, %s18244_s12 }
  0x7d   : > { %1891 = vrot.lane.b32.xlu1 %v13528_v52, %s18243_s24 }
  0x7e   : > { %1837 = vrot.lane.b32.xlu0 %v1836_v51, %s18225_s30 }
  0x81   : > { %1903 = vrot.lane.b32.xlu1 %v1902_v62, %s18223_s29 }
  0x82   : > { %1842 = vrot.lane.b32.xlu0 %v13530_v55, %s18245_s26  ;;  %v2398_v55 = vshll.u32 %v13581_v46, 16  ;;  %v13593_v46 = vld [vmem:[%s14722_s13 + $0x60] ss:$0 sps:$4 sm:$0x77]  }
  0x84   : > { %v2400_v8 = vrot.slane %v2398_v55, 1  ;;  %v13585_v55 = vld [vmem:[%s18204_s1 + $0x18] sm:$0xff]  }
  0x85   : > { %1920 = vrot.lane.b32.xlu1 %v1919_v1, %s18246_s22 }
  0x86   : > { %1908 = vrot.lane.b32.xlu0 %v13535_v0, %s18227_s15  ;;  %v13592_v0 = vld [vmem:[%s14722_s13 + $0x50] ss:$0 sps:$4 sm:$0xff]  }
  0x87   : > { %v2746_v14 = vshll.u32 %v13592_v0, 16 }
  0x89   : > { %1937 = vrot.lane.b32.xlu1 %v1936_v9, %s18243_s24  ;;  %v2795_v9 = vshll.u32 %v13588_v56, 16  ;;  %v2761_v56 = vshrl.u32 %v13602_v29, 16 }
  0x8a   : > { %1925 = vrot.lane.b32.xlu0 %v13540_v2, %s18225_s30  ;;  %v2384_v2 = vor.u32 %v2383_v50, %v2379_v49  ;;  %v13584_v49 = vld [vmem:[%s18204_s1 + $0x58] sm:$0xff]   ;;  %v13597_v50 = vld [vmem:[%s14722_s13 + $0x54] ss:$0 sps:$4 sm:$0x77]  }
  0x8b   : > { %v2797_v23 = vrot.slane %v2795_v9, 1 }
  0x8d   : > { %2334 = vrot.lane.b32.xlu1 %v2333_v18, %s18244_s12  ;;  %v2798_v40 = vor.u32 %v2797_v23, %v2793_v22  ;;  %v15050_v22 = vld [vmem:[%s14722_s13 + $0x60] ss:$0 sps:$4 sm:$0xff]   ;;  %v13596_v23 = vld [vmem:[%s18204_s1 + $0x98] sm:$0xff]  }
  0x8e   : > { %2322 = vrot.lane.b32.xlu0 %v13548_v11, %s18223_s29  ;;  %v13569_v11 = vld [vmem:[%s18204_s1 + $0x70] sm:$0xff]  }
  0x8f   : > { %v473_v24 = vpop.permute.xlu1 %472 }
  0x90   : > { %v456_v27 = vpop.permute.xlu0 %455 }
  0x91   : > { %2339 = vrot.lane.b32.xlu1 %v13555_v21, %s18246_s22  ;;  %v554_v51 = vsel %vm551_vm1, %v451_v43, %v456_v27  ;;  %v13587_v21 = vld [vmem:[%s14722_s13 + $0x5c] ss:$0 sps:$4 sm:$0x77]   ;;  %v2744_v27 = vshrl.u32 %v13592_v0, 16 }
  0x92   : > { %2285 = vrot.lane.b32.xlu0 %v2284_v20, %s18227_s15  ;;  %v2401_v20 = vor.u32 %v2400_v8, %v2396_v60  ;;  %v13586_v60 = vld [vmem:[%s18204_s1 + $0xa8] sm:$0xff]  }
  0x93   : > { %v14920_v35 = vpop.permute.xlu1 %489 }
  0x94   : > { %v424_v36 = vpop.permute.xlu0 %423 }
  0x95   : > { %2351 = vrot.lane.b32.xlu1 %v2350_v37, %s18245_s26  ;;  %v13580_v37 = vld [vmem:[%s18204_s1 + $0x60] sm:$0xff]  }
  0x96   : > { %2290 = vrot.lane.b32.xlu0 %v13558_v28, %s18244_s12  ;;  %v2748_v28 = vrot.slane %v2746_v14, 1  ;;  %v13595_v14 = vld [vmem:[%s18204_s1 + $0x8] sm:$0xff]  }
  0x97   : > { %v419_v47 = vpop.permute.xlu1 %418 }
  0x98   : > { %v441_v44 = vpop.permute.xlu0 %440  ;;  %v540_v57 = vsel %vm537_vm2, %v385_v48, %v419_v47  ;;  %v2749_v43 = vor.u32 %v2748_v28, %v2744_v27  ;;  %v13583_v48 = vld [vmem:[%s18204_s1 + $0xb0] sm:$0xff]  }
  0x99   : > { %2356 = vrot.lane.b32.xlu1 %v13565_v39, %s18243_s24  ;;  %v543_v4 = vsel %vm541_vm3, %v540_v57, %v424_v36  ;;  %v922_v36 = vrot.slane %v920_v17, 1  ;;  %v2765_v57 = vrot.slane %v2763_v41, 1  ;;  %v15041_v17 = vld [vmem:[%s14722_s13 + $0x6c] ss:$0 sps:$4 sm:$0xff]  }
  0x9a   : > { %2302 = vrot.lane.b32.xlu0 %v2301_v38, %s18225_s30  ;;  %v2812_v38 = vshll.u32 %v13598_v25, 16 }
  0x9b   : > { %v485_v62 = vpop.permute.xlu1 %484 }
  0x9c   : > { %v468_v52 = vpop.permute.xlu0 %467 }
  0x9d   : > { %v556_v58 = vsel %vm541_vm3, %v554_v51, %v468_v52  ;;  %2368 = vrot.lane.b32.xlu1 %v2367_v53, %s18223_s29  ;;  %s18248_s29 = smov 16   ;;  %v2810_v51 = vshrl.u32 %v13598_v25, 16  ;;  %v2814_v52 = vrot.slane %v2812_v38, 1  ;;  %v13609_v53 = vld [vmem:[%s14722_s13 + $0x64] ss:$0 sps:$4 sm:$0xff]  }
  0x9e   : > { %v559_v61 = vsel %vm557_vm5, %v556_v58, %v473_v24  ;;  %2307 = vrot.lane.b32.xlu0 %v13568_v45, %s18245_s26  ;;  %v13582_v45 = vld [vmem:[%s18204_s1 + $0x20] sm:$0xff]  }
  0x9f   : > { %v561_v1 = vsel %vm547_vm4, %v559_v61, %v485_v62  ;;  %v502_v12 = vpop.permute.xlu1 %501  ;;  %v13589_v61 = vld [vmem:[%s18204_s1 + $0x50] sm:$0xff]   ;;  %v2815_v0 = vor.u32 %v2814_v52, %v2810_v51 }
  0xa0   : > { %v436_v3 = vpop.permute.xlu0 %435  ;;  %v564_v6 = vsel %vm562_vm7, %v561_v1, %v14920_v35  ;;  %v567_v18 = vsel %vm551_vm1, %v14920_v35, %v502_v12  ;;  %v918_v35 = vshrl.u32 %v14937_v59, 16  ;;  %v2829_v1 = vshll.u32 %v13609_v53, 16  ;;  %v15033_v12 = vld [vmem:[%s14722_s13 + $0x28] ss:$0 sps:$4 sm:$0xff]  }
  0xa1   : > { %v546_v10 = vsel %vm544_vm6, %v543_v4, %v436_v3  ;;  %808 = vmatprep.mubr.bf16.mxu0 %v564_v6  ;;  %2385 = vrot.lane.b32.xlu1 %v2384_v2, %s18246_s22  ;;  %v13615_v2 = vld [vmem:[%s14722_s13 + $0x68] ss:$0 sps:$4 sm:$0xff]   ;;  %v13591_v3 = vld [vmem:[%s18204_s1 + $0xa0] sm:$0xff]   ;;  %v2766_v6 = vor.u32 %v2765_v57, %v2761_v56  ;;  %v1385_v25 = vshll.u32 %v15033_v12, 16  ;;  %v1383_v41 = vshrl.u32 %v15033_v12, 16 }
  0xa2   : > { %v549_v13 = vsel %vm547_vm4, %v546_v10, %v441_v44  ;;  %2373 = vrot.lane.b32.xlu0 %v13573_v54, %s18227_s15  ;;  %v923_v47 = vor.u32 %v922_v36, %v918_v35  ;;  %v13594_v4 = vld [vmem:[%s18204_s1 + $0x48] sm:$0xff]   ;;  %v13603_v10 = vld [vmem:[%s14722_s13 + $0x64] ss:$0 sps:$4 sm:$0x77]   ;;  %v13601_v36 = vld [vmem:[%s18204_s1 + $0x90] sm:$0xff]   ;;  %s14524_s15 = sshll.u32 %s14593_s21, 4  ;;  %s14525_s15 = int_to_ptr.vmem [resolvable:$false] %s14524_s15 }
  0xa3   : > { %809 = vmatmul.mubr.bf16.vlgmr.msra.gmra.mxu0 %v549_v13  ;;  %v519_v26 = vpop.permute.xlu1 %518  ;;  %s14526_s25 = scalar_lea.vmem %s14525_s15, 32 }
  0xa4   : > { %12400 = vmatpush3.bf16.msra.mxu0 %v13567_v63  ;;  %v507_v19 = vpop.permute.xlu0 %506  ;;  %v13590_v63 = vld [vmem:[%s18204_s1 + $0x10] sm:$0xff]  }
  0xa5   : > { %v569_v24 = vsel %vm537_vm2, %v567_v18, %v507_v19  ;;  %12401 = vmatprep.subr.bf16.mxu0 %v13569_v11  ;;  %2402 = vrot.lane.b32.xlu1 %v2401_v20, %s18243_s24  ;;  %v13607_v11 = vld [vmem:[%s14722_s13 + $0x58] ss:$0 sps:$4 sm:$0x77]   ;;  %v15046_v19 = vld [vmem:[%s14722_s13 + $0x6c] ss:$0 sps:$4 sm:$0xff]  }
  0xa6   : > { %2390 = vrot.lane.b32.xlu0 %v13579_v7, %s18247_s0  ;;  %v571_v30 = vsel %vm557_vm5, %v569_v24, %v519_v26  ;;  %v2827_v7 = vshrl.u32 %v13609_v53, 16  ;;  %v11250_v20 = vld [vmem:[%s14722_s13 + $0x10] sm:$0x7]  ;;  %v13599_v24 = vld [vmem:[%s18204_s1 + $0x40] sm:$0xff]   ;;  %v2844_v26 = vshrl.u32 %v13615_v2, 16  ;;  %v3260_v38 = vshll.u32 %v15046_v19, 16 }
  0xa7   : > { %v536_v39 = vpop.permute.xlu1 %535  ;;  %v13608_v53 = vld [vmem:[%s18204_s1 + $0x70] sm:$0xff]  }
  0xa8   : > { %12402 = vmatpush3.bf16.msra.mxu0 %v13572_v15  ;;  %v524_v31 = vpop.permute.xlu0 %523  ;;  %v2831_v15 = vrot.slane %v2829_v1, 1  ;;  %v13610_v1 = vld [vmem:[%s18204_s1 + $0x80] sm:$0xff]  }
  0xa9   : > { %v573_v34 = vsel %vm544_vm6, %v571_v30, %v524_v31  ;;  %12403 = vmatprep.subr.bf16.mxu0 %v13574_v16  ;;  %2799 = vrot.lane.b32.xlu1 %v2798_v40, %s18244_s12  ;;  %v2846_v16 = vshll.u32 %v13615_v2, 16  ;;  %v2863_v31 = vshll.u32 %v15041_v17, 16 }
  0xaa   : > { %2787 = vrot.lane.b32.xlu0 %v13587_v21, %s18248_s29  ;;  %v575_v42 = vsel %vm562_vm7, %v573_v34, %v536_v39  ;;  %v2832_v29 = vor.u32 %v2831_v15, %v2827_v7  ;;  %v13613_v34 = vld [vmem:[%s14722_s13 + $0x68] ss:$0 sps:$4 sm:$0x77]   ;;  %v3211_v39 = vshll.u32 %v15050_v22, 16 }
  0xab   : > { %13168 = vmatmul.mubr.bf16.vlgmr.msra.gmra.mxu1 %v575_v42  ;;  %v940_v54 = vpop.permute.xlu1 %939  ;;  %v2848_v30 = vrot.slane %v2846_v16, 1  ;;  %v1387_v42 = vrot.slane %v1385_v25, 1 }
  0xac   : > { %12404 = vmatpush3.bf16.msra.mxu0 %v13576_v32  ;;  %v928_v44 = vpop.permute.xlu0 %927  ;;  %13172 = vmatpush3.bf16.msra.mxu1 %v13577_v33  ;;  %v13600_v33 = vld [vmem:[%s18204_s1] sm:$0xff]   ;;  %v3213_v56 = vrot.slane %v3211_v39, 1 }
  0xad   : > { %12405 = vmatprep.subr.bf16.mxu0 %v13580_v37  ;;  %13173 = vmatprep.subr.bf16.mxu1 %v14582_v5  ;;  %v1021_v59 = vsel %vm551_vm1, %v923_v47, %v928_v44  ;;  %v13604_v37 = vld [vmem:[%s18204_s1 + $0x78] sm:$0xff]   ;;  %v2865_v47 = vrot.slane %v2863_v31, 1  ;;  %v1388_v12 = vor.u32 %v1387_v42, %v1383_v41  ;;  %v13622_v31 = vld [vmem:[%s18204_s1 + $0xb0] sm:$0xff]   ;;  %v13625_v41 = vld [vmem:[%s18204_s1 + $0xa8] sm:$0xff]  }
  0xae   : > { %2750 = vrot.lane.b32.xlu0 %v2749_v43, %s18249_s23  ;;  %13187 = vmatprep.mubr.msk.bf16.mxu1 %vm14590_vm0, %v14582_v5  ;;  %v1023_v8 = vsel %vm541_vm3, %v1021_v59, %v940_v54  ;;  %v13606_v44 = vld [vmem:[%s18204_s1 + $0x38] sm:$0xff]   ;;  %v3262_v54 = vrot.slane %v3260_v38, 1  ;;  %v15100_v59 = vld [vmem:[%s14722_s13 + $0x70] ss:$0 sps:$4 sm:$0xff]  }
  0xaf   : > { %v945_v62 = vpop.permute.xlu1 %944  ;;  %2804 = vrot.lane.b32.xlu1 %v13593_v46, %s18246_s22  ;;  %v2861_v46 = vshrl.u32 %v15041_v17, 16  ;;  %v13642_v42 = vld [vmem:[%s14722_s13 + $0x74] ss:$0 sps:$4 sm:$0x77]  }
  0xb0   : > { %12406 = vmatpush3.bf16.msra.mxu0 %v13582_v45  ;;  %v15007_v58 = vpop.permute.xlu0 %890  ;;  %13174 = vmatpush3.bf16.msra.mxu1 %v13583_v48  ;;  %v1025_v18 = vsel %vm557_vm5, %v1023_v8, %v945_v62  ;;  %v2849_v45 = vor.u32 %v2848_v30, %v2844_v26  ;;  %v13605_v48 = vld [vmem:[%s18204_s1 + $0x88] sm:$0xff]   ;;  %v13621_v30 = vld [vmem:[%s18204_s1 + $0x20] sm:$0xff]  }
  0xb1   : > { %12407 = vmatprep.subr.bf16.mxu0 %v13584_v49  ;;  %13175 = vmatprep.subr.bf16.mxu1 %v14582_v5  ;;  %v1011_v40 = vsel %vm537_vm2, %v11250_v20, %v15007_v58  ;;  %v13618_v49 = vld [vmem:[%s14722_s13 + $0x6c] ss:$0 sps:$4 sm:$0x77]   ;;  %v2866_v62 = vor.u32 %v2865_v47, %v2861_v46  ;;  %v13636_v20 = vld [vmem:[%s14722_s13 + $0x64] ss:$0 sps:$4 sm:$0x77]  }
  0xb2   : > { %2755 = vrot.lane.b32.xlu0 %v13597_v50, %s18244_s12  ;;  %v3258_v50 = vshrl.u32 %v15046_v19, 16  ;;  %v13626_v58 = vld [vmem:[%s14722_s13 + $0x6c] ss:$0 sps:$4 sm:$0x77]  }
  0xb3   : > { %v957_v13 = vpop.permute.xlu1 %956  ;;  %2816 = vrot.lane.b32.xlu1 %v2815_v0, %s18245_s26  ;;  %v13632_v19 = vld [vmem:[%s14722_s13 + $0x70] ss:$0 sps:$4 sm:$0x77]  }
  0xb4   : > { %12408 = vmatpush3.bf16.msra.mxu0 %v13585_v55  ;;  %v896_v9 = vpop.permute.xlu0 %895  ;;  %13176 = vmatpush3.bf16.msra.mxu1 %v13586_v60  ;;  %v1027_v27 = vsel %vm547_vm4, %v1025_v18, %v957_v13  ;;  %v3209_v55 = vshrl.u32 %v15050_v22, 16  ;;  %v3263_v8 = vor.u32 %v3262_v54, %v3258_v50  ;;  %v13616_v13 = vld [vmem:[%s18204_s1 + $0x28] sm:$0xff]   ;;  %v13619_v18 = vld [vmem:[%s18204_s1 + $0x60] sm:$0xff]  }
  0xb5   : > { %12409 = vmatprep.subr.bf16.mxu0 %v13589_v61  ;;  %13177 = vmatprep.subr.bf16.mxu1 %v14582_v5  ;;  %v1013_v51 = vsel %vm541_vm3, %v1011_v40, %v896_v9  ;;  %v3277_v9 = vshll.u32 %v15100_v59, 16  ;;  %v11306_v54 = vld [vmem:[%s14722_s13 + $0x20] sm:$0x7] }
  0xb6   : > { %2767 = vrot.lane.b32.xlu0 %v2766_v6, %s18247_s0  ;;  %v13614_v6 = vld [vmem:[%s18204_s1 + $0x68] sm:$0xff]   ;;  %v3214_v15 = vor.u32 %v3213_v56, %v3209_v55 }
  0xb7   : > { %v962_v28 = vpop.permute.xlu1 %961  ;;  %2821 = vrot.lane.b32.xlu1 %v13603_v10, %s18243_s24 }
  0xb8   : > { %12410 = vmatpush3.bf16.msra.mxu0 %v13590_v63  ;;  %v908_v21 = vpop.permute.xlu0 %907  ;;  %13178 = vmatpush3.bf16.msra.mxu1 %v13591_v3  ;;  %v1029_v32 = vsel %vm562_vm7, %v1027_v27, %v962_v28  ;;  %v13641_v63 = vld [vmem:[%s14722_s13 + $0x64] ss:$0 sps:$4 sm:$0xff]  }
  0xb9   : > { %12411 = vmatprep.subr.bf16.mxu0 %v13594_v4  ;;  %13179 = vmatprep.subr.bf16.mxu1 %v14582_v5  ;;  %v1015_v57 = vsel %vm544_vm6, %v1013_v51, %v908_v21  ;;  %v13611_v4 = vld [vmem:[%s18204_s1 + $0x30] sm:$0xff]   ;;  %v3228_v10 = vshll.u32 %v13641_v63, 16  ;;  %v3226_v25 = vshrl.u32 %v13641_v63, 16  ;;  %v13634_v63 = vld [vmem:[%s18204_s1 + $0x8] sm:$0xff]  }
  0xba   : > { %2772 = vrot.lane.b32.xlu0 %v13607_v11, %s18245_s26  ;;  %1273 = vmatprep.mubr.bf16.mxu0 %v1029_v32  ;;  %v15136_v21 = vld [vmem:[%s14722_s13 + $0x74] ss:$0 sps:$4 sm:$0xff]   ;;  %v13623_v32 = vld [vmem:[%s18204_s1 + $0x58] sm:$0xff]  }
  0xbb   : > { %v974_v43 = vpop.permute.xlu1 %973  ;;  %2833 = vrot.lane.b32.xlu1 %v2832_v29, %s18248_s29  ;;  %v3230_v26 = vrot.slane %v3228_v10, 1  ;;  %v3292_v46 = vshrl.u32 %v15136_v21, 16  ;;  %v13629_v51 = vld [vmem:[%s18204_s1 + $0x10] sm:$0xff]  }
  0xbc   : > { %12412 = vmatpush3.bf16.msra.mxu0 %v13595_v14  ;;  %v913_v35 = vpop.permute.xlu0 %912  ;;  %13180 = vmatpush3.bf16.msra.mxu1 %v13596_v23  ;;  %v1032_v0 = vsel %vm551_vm1, %v962_v28, %v974_v43  ;;  %v13617_v14 = vld [vmem:[%s18204_s1 + $0xb8] sm:$0xff]   ;;  %v3275_v23 = vshrl.u32 %v15100_v59, 16 }
  0xbd   : > { %12413 = vmatprep.subr.bf16.mxu0 %v13599_v24  ;;  %13181 = vmatprep.subr.bf16.mxu1 %v14582_v5  ;;  %v1017_v60 = vsel %vm547_vm4, %v1015_v57, %v913_v35  ;;  %v3279_v24 = vrot.slane %v3277_v9, 1  ;;  %v3231_v39 = vor.u32 %v3230_v26, %v3226_v25  ;;  %v13633_v57 = vld [vmem:[%s18204_s1 + $0x48] sm:$0xff]  }
  0xbe   : > { %2838 = vrot.lane.b32.xlu0 %v13613_v34, %s18249_s23  ;;  %v13654_v34 = vld [vmem:[%s14722_s13 + $0x78] ss:$0 sps:$4 sm:$0xff]  }
  0xbf   : > { %v991_v61 = vpop.permute.xlu1 %990  ;;  %2850 = vrot.lane.b32.xlu1 %v2849_v45, %s18246_s22  ;;  %v3280_v38 = vor.u32 %v3279_v24, %v3275_v23  ;;  %v13646_v45 = vld [vmem:[%s14722_s13 + $0x68] ss:$0 sps:$4 sm:$0x77]   ;;  %v3309_v59 = vshrl.u32 %v13654_v34, 16 }
  0xc0   : > { %12414 = vmatpush3.bf16.msra.mxu0 %v13600_v33  ;;  %v979_v52 = vpop.permute.xlu0 %978  ;;  %13182 = vmatpush3.bf16.msra.mxu1 %v13601_v36  ;;  %v3294_v33 = vshll.u32 %v15136_v21, 16  ;;  %v13643_v21 = vld [vmem:[%s18204_s1 + $0x78] sm:$0xff]  }
  0xc1   : > { %12430 = vmatprep.subr.bf16.mxu0 %v13604_v37  ;;  %13183 = vmatprep.subr.bf16.mxu1 %v14582_v5  ;;  %v1034_v2 = vsel %vm537_vm2, %v1032_v0, %v979_v52  ;;  %v13624_v37 = vld [vmem:[%s18204_s1 + $0x18] sm:$0xff]   ;;  %v13630_v52 = vld [vmem:[%s18204_s1 + $0xa0] sm:$0xff]  }
  0xc2   : > { %2855 = vrot.lane.b32.xlu0 %v13618_v49, %s18247_s0  ;;  %v1036_v11 = vsel %vm557_vm5, %v1034_v2, %v991_v61  ;;  %v3296_v47 = vrot.slane %v3294_v33, 1  ;;  %v13659_v49 = vld [vmem:[%s14722_s13 + $0x7c] ss:$0 sps:$4 sm:$0xff]   ;;  %v15200_v2 = vld [vmem:[%s14722_s13 + $0x70] ss:$0 sps:$4 sm:$0xff]  }
  0xc3   : > { %1274 = vmatmul.mubr.bf16.vlgmr.msra.gmra.mxu0 %v1017_v60  ;;  %v1008_v7 = vpop.permute.xlu1 %1007  ;;  %2867 = vrot.lane.b32.xlu1 %v2866_v62, %s18243_s24  ;;  %v3328_v61 = vshll.u32 %v13659_v49, 16  ;;  %v13665_v24 = vld [vmem:[%s14722_s13 + $0x7c] ss:$0 sps:$4 sm:$0x77]  }
  0xc4   : > { %12431 = vmatpush3.bf16.msra.mxu0 %v13606_v44  ;;  %v996_v3 = vpop.permute.xlu0 %995  ;;  %13184 = vmatpush3.bf16.msra.mxu1 %v13605_v48  ;;  %v13628_v44 = vld [vmem:[%s18204_s1 + $0x50] sm:$0xff]   ;;  %v3311_v48 = vshll.u32 %v13654_v34, 16  ;;  %v3297_v0 = vor.u32 %v3296_v47, %v3292_v46 }
  0xc5   : > { %12432 = vmatprep.subr.bf16.mxu0 %v13608_v53  ;;  %13185 = vmatprep.subr.bf16.mxu1 %v14582_v5  ;;  %v1038_v16 = vsel %vm544_vm6, %v1036_v11, %v996_v3  ;;  %v15185_v53 = vld [vmem:[%s14722_s13 + $0x38] ss:$0 sps:$4 sm:$0xff]   ;;  %v13657_v11 = vld [vmem:[%s14722_s13 + $0x7c] ss:$0 sps:$4 sm:$0x77]   ;;  %v13651_v46 = vld [vmem:[%s18204_s1 + $0x30] sm:$0xff]  }
  0xc6   : > { %3252 = vrot.lane.b32.xlu0 %v13626_v58, %s18248_s29  ;;  %v1040_v27 = vsel %vm562_vm7, %v1038_v16, %v1008_v7  ;;  %v13652_v58 = vld [vmem:[%s14722_s13 + $0x78] ss:$0 sps:$4 sm:$0x77]   ;;  %v3313_v60 = vrot.slane %v3311_v48, 1  ;;  %v1850_v9 = vshll.u32 %v15185_v53, 16 }
  0xc7   : > { %v1405_v22 = vpop.permute.xlu1 %1404  ;;  %3264 = vrot.lane.b32.xlu1 %v3263_v8, %s18244_s12  ;;  %v13638_v8 = vld [vmem:[%s18204_s1 + $0x40] sm:$0xff]   ;;  %v13680_v34 = vld [vmem:[%s14722_s13 + $0x74] ss:$0 sps:$4 sm:$0xff]  }
  0xc8   : > { %12433 = vmatpush3.bf16.msra.mxu0 %v13611_v4  ;;  %v1393_v17 = vpop.permute.xlu0 %1392  ;;  %13186 = vmatpush3.bf16.msra.mxu1 %v13610_v1  ;;  %v13666_v1 = vld [vmem:[%s14722_s13 + $0x7c] ss:$0 sps:$4 sm:$0xff]   ;;  %v3314_v10 = vor.u32 %v3313_v60, %v3309_v59  ;;  %v1852_v23 = vrot.slane %v1850_v9, 1  ;;  %v3693_v48 = vshll.u32 %v13680_v34, 16  ;;  %v3691_v60 = vshrl.u32 %v13680_v34, 16 }
  0xc9   : > { %12434 = vmatprep.subr.bf16.mxu0 %v13614_v6  ;;  %13191 = vmatprep.subr.bf16.mxu1 %v14582_v5  ;;  %v1486_v28 = vsel %vm551_vm1, %v1388_v12, %v1393_v17  ;;  %v13635_v4 = vld [vmem:[%s18204_s1 + $0x98] sm:$0xff]   ;;  %v3725_v16 = vshll.u32 %v13666_v1, 16  ;;  %v3676_v17 = vshll.u32 %v15200_v2, 16 }
  0xca   : > { %3215 = vrot.lane.b32.xlu0 %v3214_v15, %s18249_s23  ;;  %v1488_v35 = vsel %vm541_vm3, %v1486_v28, %v1405_v22  ;;  %v3330_v15 = vrot.slane %v3328_v61, 1  ;;  %v1848_v22 = vshrl.u32 %v15185_v53, 16  ;;  %v13675_v53 = vld [vmem:[%s14722_s13 + $0x74] ss:$0 sps:$4 sm:$0x77]   ;;  %v3695_v61 = vrot.slane %v3693_v48, 1 }
  0xcb   : > { %13188 = vmatmul.mubr.bf16.vlgmr.msra.gmra.mxu1 %v1040_v27  ;;  %v1410_v36 = vpop.permute.xlu1 %1409  ;;  %3269 = vrot.lane.b32.xlu1 %v13632_v19, %s18246_s22  ;;  %v3723_v27 = vshrl.u32 %v13666_v1, 16  ;;  %v3727_v28 = vrot.slane %v3725_v16, 1  ;;  %v3678_v33 = vrot.slane %v3676_v17, 1  ;;  %v13656_v1 = vld [vmem:[%s18204_s1 + $0xb8] sm:$0xff]  }
  0xcc   : > { %12435 = vmatpush3.bf16.msra.mxu0 %v13616_v13  ;;  %v1356_v29 = vpop.permute.xlu0 %1355  ;;  %13192 = vmatpush3.bf16.msra.mxu1 %v13617_v14  ;;  %v1490_v43 = vsel %vm557_vm5, %v1488_v35, %v1410_v36  ;;  %v13639_v13 = vld [vmem:[%s18204_s1] sm:$0xff]   ;;  %v3326_v14 = vshrl.u32 %v13659_v49, 16  ;;  %v13644_v36 = vld [vmem:[%s18204_s1 + $0x88] sm:$0xff]   ;;  %v13662_v17 = vld [vmem:[%s18204_s1 + $0x58] sm:$0xff]  }
  0xcd   : > { %12436 = vmatprep.subr.bf16.mxu0 %v13619_v18  ;;  %13193 = vmatprep.subr.bf16.mxu1 %v14582_v5  ;;  %v1476_v7 = vsel %vm537_vm2, %v11306_v54, %v1356_v29  ;;  %v13676_v29 = vld [vmem:[%s14722_s13 + $0x80] ss:$0 sps:$4 sm:$0xff]   ;;  %v15264_v54 = vld [vmem:[%s14722_s13 + $0x84] ss:$0 sps:$4 sm:$0xff]  }
  0xce   : > { %3220 = vrot.lane.b32.xlu0 %v13636_v20, %s18244_s12  ;;  %13207 = vmatprep.mubr.msk.bf16.mxu1 %vm14590_vm0, %v14582_v5  ;;  %v13640_v20 = vld [vmem:[%s18204_s1 + $0x90] sm:$0xff]   ;;  %v3331_v26 = vor.u32 %v3330_v15, %v3326_v14  ;;  %v13681_v15 = vld [vmem:[%s14722_s13 + $0x84] ss:$0 sps:$4 sm:$0x77]  }
  0xcf   : > { %v1422_v50 = vpop.permute.xlu1 %1421  ;;  %3281 = vrot.lane.b32.xlu1 %v3280_v38, %s18245_s26  ;;  %v13647_v38 = vld [vmem:[%s18204_s1 + $0x70] sm:$0xff]  }
  0xd0   : > { %12437 = vmatpush3.bf16.msra.mxu0 %v13621_v30  ;;  %v1361_v40 = vpop.permute.xlu0 %1360  ;;  %13194 = vmatpush3.bf16.msra.mxu1 %v13622_v31  ;;  %v1492_v55 = vsel %vm547_vm4, %v1490_v43, %v1422_v50  ;;  %v3742_v43 = vshll.u32 %v13676_v29, 16  ;;  %v13653_v50 = vld [vmem:[%s18204_s1 + $0x68] sm:$0xff]  }
  0xd1   : > { %12438 = vmatprep.subr.bf16.mxu0 %v13623_v32  ;;  %13195 = vmatprep.subr.bf16.mxu1 %v14582_v5  ;;  %v1478_v18 = vsel %vm541_vm3, %v1476_v7, %v1361_v40  ;;  %v3674_v32 = vshrl.u32 %v15200_v2, 16  ;;  %v13658_v2 = vld [vmem:[%s18204_s1 + $0x60] sm:$0xff]  }
  0xd2   : > { %3232 = vrot.lane.b32.xlu0 %v3231_v39, %s18247_s0  ;;  %v13660_v7 = vld [vmem:[%s18204_s1 + $0x20] sm:$0xff]  }
  0xd3   : > { %v1427_v62 = vpop.permute.xlu1 %1426  ;;  %3286 = vrot.lane.b32.xlu1 %v13642_v42, %s18243_s24  ;;  %v3728_v42 = vor.u32 %v3727_v28, %v3723_v27  ;;  %v3679_v47 = vor.u32 %v3678_v33, %v3674_v32  ;;  %v13668_v33 = vld [vmem:[%s18204_s1 + $0x10] sm:$0xff]  }
  0xd4   : > { %12439 = vmatpush3.bf16.msra.mxu0 %v13624_v37  ;;  %v1373_v56 = vpop.permute.xlu0 %1372  ;;  %13196 = vmatpush3.bf16.msra.mxu1 %v13625_v41  ;;  %v1494_v3 = vsel %vm562_vm7, %v1492_v55, %v1427_v62  ;;  %v13645_v37 = vld [vmem:[%s18204_s1 + $0x38] sm:$0xff]  }
  0xd5   : > { %12440 = vmatprep.subr.bf16.mxu0 %v13628_v44  ;;  %13197 = vmatprep.subr.bf16.mxu1 %v14582_v5  ;;  %v1480_v30 = vsel %vm544_vm6, %v1478_v18, %v1373_v56  ;;  %v1853_v44 = vor.u32 %v1852_v23, %v1848_v22  ;;  %v13655_v56 = vld [vmem:[%s18204_s1 + $0x28] sm:$0xff]   ;;  %v13685_v18 = vld [vmem:[%s14722_s13 + $0x78] ss:$0 sps:$4 sm:$0x77]  }
  0xd6   : > { %3237 = vrot.lane.b32.xlu0 %v13646_v45, %s18245_s26  ;;  %1738 = vmatprep.mubr.bf16.mxu0 %v1494_v3  ;;  %v13650_v45 = vld [vmem:[%s18204_s1 + $0x80] sm:$0xff]   ;;  %v3759_v3 = vshll.u32 %v15264_v54, 16  ;;  %v15316_v23 = vld [vmem:[%s14722_s13 + $0x48] ss:$0 sps:$4 sm:$0xff]  }
  0xd7   : > { %v1439_v12 = vpop.permute.xlu1 %1438  ;;  %3298 = vrot.lane.b32.xlu1 %v3297_v0, %s18248_s29 }
  0xd8   : > { %12441 = vmatpush3.bf16.msra.mxu0 %v13629_v51  ;;  %v1378_v6 = vpop.permute.xlu0 %1377  ;;  %13198 = vmatpush3.bf16.msra.mxu1 %v13630_v52  ;;  %v1497_v31 = vsel %vm551_vm1, %v1427_v62, %v1439_v12  ;;  %v13671_v51 = vld [vmem:[%s14722_s13 + $0x80] ss:$0 sps:$4 sm:$0x77]   ;;  %v15274_v62 = vld [vmem:[%s14722_s13 + $0x88] ss:$0 sps:$4 sm:$0xff]   ;;  %v3761_v22 = vrot.slane %v3759_v3, 1 }
  0xd9   : > { %12442 = vmatprep.subr.bf16.mxu0 %v13633_v57  ;;  %13199 = vmatprep.subr.bf16.mxu1 %v14582_v5  ;;  %v1482_v39 = vsel %vm547_vm4, %v1480_v30, %v1378_v6  ;;  %v3740_v57 = vshrl.u32 %v13676_v29, 16  ;;  %v3776_v12 = vshll.u32 %v15274_v62, 16  ;;  %v13678_v3 = vld [vmem:[%s18204_s1] sm:$0xff]  }
  0xda   : > { %3303 = vrot.lane.b32.xlu0 %v13652_v58, %s18249_s23  ;;  %v3744_v58 = vrot.slane %v3742_v43, 1  ;;  %v2313_v43 = vshrl.u32 %v15316_v23, 16 }
  0xdb   : > { %v1456_v25 = vpop.permute.xlu1 %1455  ;;  %3315 = vrot.lane.b32.xlu1 %v3314_v10, %s18246_s22  ;;  %v13661_v10 = vld [vmem:[%s18204_s1 + $0xb0] sm:$0xff]   ;;  %v3778_v29 = vrot.slane %v3776_v12, 1 }
  0xdc   : > { %12443 = vmatpush3.bf16.msra.mxu0 %v13634_v63  ;;  %v1444_v19 = vpop.permute.xlu0 %1443  ;;  %13200 = vmatpush3.bf16.msra.mxu1 %v13635_v4 }
  0xdd   : > { %12444 = vmatprep.subr.bf16.mxu0 %v13638_v8  ;;  %13201 = vmatprep.subr.bf16.mxu1 %v14582_v5  ;;  %v1499_v40 = vsel %vm537_vm2, %v1497_v31, %v1444_v19  ;;  %v3745_v8 = vor.u32 %v3744_v58, %v3740_v57  ;;  %v15333_v31 = vld [vmem:[%s14722_s13 + $0x8c] ss:$0 sps:$4 sm:$0xff]  }
  0xde   : > { %3320 = vrot.lane.b32.xlu0 %v13657_v11, %s18247_s0  ;;  %v1501_v52 = vsel %vm557_vm5, %v1499_v40, %v1456_v25  ;;  %v3696_v11 = vor.u32 %v3695_v61, %v3691_v60  ;;  %v13667_v25 = vld [vmem:[%s18204_s1 + $0x50] sm:$0xff]   ;;  %v4188_v57 = vshrl.u32 %v15333_v31, 16 }
  0xdf   : > { %v1473_v41 = vpop.permute.xlu1 %1472  ;;  %3332 = vrot.lane.b32.xlu1 %v3331_v26, %s18243_s24  ;;  %v3774_v26 = vshrl.u32 %v15274_v62, 16  ;;  %v11362_v40 = vld [vmem:[%s14722_s13 + $0x30] sm:$0x7] }
  0xe0   : > { %12445 = vmatpush3.bf16.msra.mxu0 %v13639_v13  ;;  %v1461_v35 = vpop.permute.xlu0 %1460  ;;  %13202 = vmatpush3.bf16.msra.mxu1 %v13640_v20  ;;  %v15299_v13 = vld [vmem:[%s14722_s13 + $0x8c] ss:$0 sps:$4 sm:$0xff]   ;;  %v13663_v20 = vld [vmem:[%s18204_s1 + $0x18] sm:$0xff]  }
  0xe1   : > { %12461 = vmatprep.subr.bf16.mxu0 %v13643_v21  ;;  %13203 = vmatprep.subr.bf16.mxu1 %v14582_v5  ;;  %v1503_v63 = vsel %vm544_vm6, %v1501_v52, %v1461_v35  ;;  %v3757_v21 = vshrl.u32 %v15264_v54, 16  ;;  %v3793_v30 = vshll.u32 %v15299_v13, 16  ;;  %v15343_v35 = vld [vmem:[%s14722_s13 + $0x80] ss:$0 sps:$4 sm:$0xff]   ;;  %v3791_v48 = vshrl.u32 %v15299_v13, 16 }
  0xe2   : > { %3717 = vrot.lane.b32.xlu0 %v13665_v24, %s18248_s29  ;;  %v1505_v9 = vsel %vm562_vm7, %v1503_v63, %v1473_v41  ;;  %v13664_v24 = vld [vmem:[%s18204_s1 + $0xa8] sm:$0xff]   ;;  %v13677_v52 = vld [vmem:[%s18204_s1 + $0x40] sm:$0xff]   ;;  %v4139_v62 = vshrl.u32 %v15343_v35, 16 }
  0xe3   : > { %1739 = vmatmul.mubr.bf16.vlgmr.msra.gmra.mxu0 %v1482_v39  ;;  %v1870_v55 = vpop.permute.xlu1 %1869  ;;  %3729 = vrot.lane.b32.xlu1 %v3728_v42, %s18244_s12  ;;  %v3762_v34 = vor.u32 %v3761_v22, %v3757_v21  ;;  %v13691_v39 = vld [vmem:[%s14722_s13 + $0x88] ss:$0 sps:$4 sm:$0x77]   ;;  %v13696_v54 = vld [vmem:[%s14722_s13 + $0x8c] ss:$0 sps:$4 sm:$0x77]  }
  0xe4   : > { %12462 = vmatpush3.bf16.msra.mxu0 %v13645_v37  ;;  %v1858_v49 = vpop.permute.xlu0 %1857  ;;  %13204 = vmatpush3.bf16.msra.mxu1 %v13644_v36  ;;  %v13669_v37 = vld [vmem:[%s18204_s1 + $0xa0] sm:$0xff]   ;;  %v13672_v42 = vld [vmem:[%s18204_s1 + $0x48] sm:$0xff]  }
  0xe5   : > { %12463 = vmatprep.subr.bf16.mxu0 %v13647_v38  ;;  %13205 = vmatprep.subr.bf16.mxu1 %v14582_v5  ;;  %v1951_v59 = vsel %vm551_vm1, %v1853_v44, %v1858_v49  ;;  %v2315_v38 = vshll.u32 %v15316_v23, 16  ;;  %v4190_v44 = vshll.u32 %v15333_v31, 16  ;;  %v3795_v49 = vrot.slane %v3793_v30, 1  ;;  %v13715_v21 = vld [vmem:[%s14722_s13 + $0x84] ss:$0 sps:$4 sm:$0x77]  }
  0xe6   : > { %3680 = vrot.lane.b32.xlu0 %v3679_v47, %s18249_s23  ;;  %v1953_v4 = vsel %vm541_vm3, %v1951_v59, %v1870_v55  ;;  %v3779_v47 = vor.u32 %v3778_v29, %v3774_v26  ;;  %v13705_v59 = vld [vmem:[%s14722_s13 + $0x8c] ss:$0 sps:$4 sm:$0x77]   ;;  %v13690_v31 = vld [vmem:[%s18204_s1 + $0x30] sm:$0xff]  }
  0xe7   : > { %v1875_v6 = vpop.permute.xlu1 %1874  ;;  %3734 = vrot.lane.b32.xlu1 %v13671_v51, %s18246_s22  ;;  %v13674_v51 = vld [vmem:[%s18204_s1 + $0x98] sm:$0xff]   ;;  %v4192_v58 = vrot.slane %v4190_v44, 1  ;;  %v3796_v61 = vor.u32 %v3795_v49, %v3791_v48 }
  0xe8   : > { %12464 = vmatpush3.bf16.msra.mxu0 %v13651_v46  ;;  %v15277_v0 = vpop.permute.xlu0 %1820  ;;  %13206 = vmatpush3.bf16.msra.mxu1 %v13650_v45  ;;  %v1955_v16 = vsel %vm557_vm5, %v1953_v4, %v1875_v6  ;;  %v13673_v46 = vld [vmem:[%s18204_s1 + $0x8] sm:$0xff]   ;;  %v13679_v4 = vld [vmem:[%s18204_s1 + $0x90] sm:$0xff]  }
  0xe9   : > { %12465 = vmatprep.subr.bf16.mxu0 %v13653_v50  ;;  %13211 = vmatprep.subr.bf16.mxu1 %v14582_v5  ;;  %v4141_v50 = vshll.u32 %v15343_v35, 16  ;;  %v13689_v35 = vld [vmem:[%s18204_s1 + $0x80] sm:$0xff]  }
  0xea   : > { %3685 = vrot.lane.b32.xlu0 %v13675_v53, %s18244_s12  ;;  %v2317_v53 = vrot.slane %v2315_v38, 1  ;;  %v13694_v38 = vld [vmem:[%s18204_s1 + $0x28] sm:$0xff]  }
  0xeb   : > { %13208 = vmatmul.mubr.bf16.vlgmr.msra.gmra.mxu1 %v1505_v9  ;;  %v1887_v19 = vpop.permute.xlu1 %1886  ;;  %3746 = vrot.lane.b32.xlu1 %v3745_v8, %s18245_s26  ;;  %v4143_v63 = vrot.slane %v4141_v50, 1 }
  0xec   : > { %12466 = vmatpush3.bf16.msra.mxu0 %v13655_v56  ;;  %v15301_v14 = vpop.permute.xlu0 %1825  ;;  %13212 = vmatpush3.bf16.msra.mxu1 %v13656_v1  ;;  %v1957_v27 = vsel %vm547_vm4, %v1955_v16, %v1887_v19  ;;  %v1941_v56 = vsel %vm537_vm2, %v11362_v40, %v15277_v0  ;;  %v13711_v1 = vld [vmem:[%s14722_s13 + $0x90] ss:$0 sps:$4 sm:$0xff]   ;;  %v2318_v9 = vor.u32 %v2317_v53, %v2313_v43  ;;  %v13698_v43 = vld [vmem:[%s18204_s1 + $0x60] sm:$0xff]  }
  0xed   : > { %12467 = vmatprep.subr.bf16.mxu0 %v13658_v2  ;;  %13213 = vmatprep.subr.bf16.mxu1 %v14582_v5  ;;  %v13720_v2 = vld [vmem:[%s14722_s13 + $0x84] ss:$0 sps:$4 sm:$0xff]   ;;  %v1943_v0 = vsel %vm541_vm3, %v1941_v56, %v15301_v14  ;;  %v13683_v14 = vld [vmem:[%s18204_s1 + $0x88] sm:$0xff]   ;;  %v13706_v19 = vld [vmem:[%s14722_s13 + $0x90] ss:$0 sps:$4 sm:$0x77]  }
  0xee   : > { %3697 = vrot.lane.b32.xlu0 %v3696_v11, %s18247_s0  ;;  %13227 = vmatprep.mubr.msk.bf16.mxu1 %vm14590_vm0, %v14582_v5  ;;  %v4207_v11 = vshll.u32 %v13711_v1, 16  ;;  %v4158_v16 = vshll.u32 %v13720_v2, 16  ;;  %v4156_v29 = vshrl.u32 %v13720_v2, 16  ;;  %v13703_v2 = vld [vmem:[%s18204_s1 + $0x18] sm:$0xff]  }
  0xef   : > { %v15336_v32 = vpop.permute.xlu1 %1891  ;;  %3751 = vrot.lane.b32.xlu1 %v13681_v15, %s18243_s24  ;;  %v4144_v15 = vor.u32 %v4143_v63, %v4139_v62 }
  0xf0   : > { %12468 = vmatpush3.bf16.msra.mxu0 %v13660_v7  ;;  %v15329_v28 = vpop.permute.xlu0 %1837  ;;  %13214 = vmatpush3.bf16.msra.mxu1 %v13661_v10  ;;  %v1959_v36 = vsel %vm562_vm7, %v1957_v27, %v15336_v32  ;;  %v13682_v7 = vld [vmem:[%s18204_s1 + $0x78] sm:$0xff]   ;;  %v4193_v10 = vor.u32 %v4192_v58, %v4188_v57  ;;  %v4209_v26 = vrot.slane %v4207_v11, 1  ;;  %v13721_v27 = vld [vmem:[%s14722_s13 + $0x94] ss:$0 sps:$4 sm:$0xff]   ;;  %v4160_v30 = vrot.slane %v4158_v16, 1 }
  0xf1   : > { %12469 = vmatprep.subr.bf16.mxu0 %v13662_v17  ;;  %13215 = vmatprep.subr.bf16.mxu1 %v14582_v5  ;;  %v1945_v12 = vsel %vm544_vm6, %v1943_v0, %v15329_v28  ;;  %v13684_v17 = vld [vmem:[%s18204_s1 + $0x38] sm:$0xff]   ;;  %v4222_v48 = vshrl.u32 %v13721_v27, 16  ;;  %v13700_v57 = vld [vmem:[%s18204_s1 + $0xb0] sm:$0xff]  }
  0xf2   : > { %3702 = vrot.lane.b32.xlu0 %v13685_v18, %s18245_s26  ;;  %2203 = vmatprep.mubr.bf16.mxu0 %v1959_v36  ;;  %v13693_v36 = vld [vmem:[%s18204_s1 + $0x68] sm:$0xff]   ;;  %v4161_v44 = vor.u32 %v4160_v30, %v4156_v29  ;;  %v13750_v30 = vld [vmem:[%s14722_s13 + $0x90] ss:$0 sps:$4 sm:$0xff]  }
  0xf3   : > { %v1904_v45 = vpop.permute.xlu1 %1903  ;;  %3763 = vrot.lane.b32.xlu1 %v3762_v34, %s18248_s29  ;;  %v13713_v29 = vld [vmem:[%s18204_s1 + $0x8] sm:$0xff]  }
  0xf4   : > { %12470 = vmatpush3.bf16.msra.mxu0 %v13663_v20  ;;  %v15354_v41 = vpop.permute.xlu0 %1842  ;;  %13216 = vmatpush3.bf16.msra.mxu1 %v13664_v24  ;;  %v1962_v13 = vsel %vm551_vm1, %v15336_v32, %v1904_v45  ;;  %v13687_v20 = vld [vmem:[%s18204_s1 + $0x70] sm:$0xff]  }
  0xf5   : > { %12471 = vmatprep.subr.bf16.mxu0 %v13667_v25  ;;  %13217 = vmatprep.subr.bf16.mxu1 %v14582_v5  ;;  %v1947_v22 = vsel %vm547_vm4, %v1945_v12, %v15354_v41  ;;  %v4205_v25 = vshrl.u32 %v13711_v1, 16  ;;  %v4224_v41 = vshll.u32 %v13721_v27, 16  ;;  %v13737_v1 = vld [vmem:[%s14722_s13 + $0x9c] ss:$0 sps:$4 sm:$0xff]   ;;  %v13708_v12 = vld [vmem:[%s18204_s1 + $0x10] sm:$0xff]  }
  0xf6   : > { %3768 = vrot.lane.b32.xlu0 %v13691_v39, %s18249_s23  ;;  %v4655_v11 = vshll.u32 %v13737_v1, 16 }
  0xf7   : > { %v1921_v60 = vpop.permute.xlu1 %1920  ;;  %3780 = vrot.lane.b32.xlu1 %v3779_v47, %s18246_s22  ;;  %v4210_v40 = vor.u32 %v4209_v26, %v4205_v25  ;;  %v13716_v47 = vld [vmem:[%s14722_s13 + $0x94] ss:$0 sps:$4 sm:$0x77]   ;;  %v13745_v25 = vld [vmem:[%s14722_s13 + $0x9c] ss:$0 sps:$4 sm:$0x77]  }
  0xf8   : > { %12472 = vmatpush3.bf16.msra.mxu0 %v13668_v33  ;;  %v1909_v55 = vpop.permute.xlu0 %1908  ;;  %13218 = vmatpush3.bf16.msra.mxu1 %v13669_v37  ;;  %v15431_v33 = vld [vmem:[%s14722_s13 + $0x98] ss:$0 sps:$4 sm:$0xff]  }
  0xf9   : > { %12473 = vmatprep.subr.bf16.mxu0 %v13672_v42  ;;  %13219 = vmatprep.subr.bf16.mxu1 %v14582_v5  ;;  %v1964_v23 = vsel %vm537_vm2, %v1962_v13, %v1909_v55  ;;  %v13695_v42 = vld [vmem:[%s18204_s1 + $0xb8] sm:$0xff]   ;;  %v4241_v49 = vshll.u32 %v15431_v33, 16  ;;  %v13725_v55 = vld [vmem:[%s14722_s13 + $0x88] ss:$0 sps:$4 sm:$0x77]  }
  0xfa   : > { %3785 = vrot.lane.b32.xlu0 %v13696_v54, %s18247_s0  ;;  %v1966_v34 = vsel %vm557_vm5, %v1964_v23, %v1921_v60  ;;  %v4226_v54 = vrot.slane %v4224_v41, 1  ;;  %v4653_v23 = vshrl.u32 %v13737_v1, 16  ;;  %v13760_v1 = vld [vmem:[%s14722_s13 + $0x94] ss:$0 sps:$4 sm:$0xff]  }
  0xfb   : > { %v15398_v8 = vpop.permute.xlu1 %1937  ;;  %3797 = vrot.lane.b32.xlu1 %v3796_v61, %s18243_s24  ;;  %v4239_v61 = vshrl.u32 %v15431_v33, 16  ;;  %v4243_v62 = vrot.slane %v4241_v49, 1  ;;  %v13717_v33 = vld [vmem:[%s18204_s1 + $0x40] sm:$0xff]  }
  0xfc   : > { %12474 = vmatpush3.bf16.msra.mxu0 %v13673_v46  ;;  %v1926_v6 = vpop.permute.xlu0 %1925  ;;  %13220 = vmatpush3.bf16.msra.mxu1 %v13674_v51  ;;  %v15460_v51 = vld [vmem:[%s14722_s13 + $0x9c] ss:$0 sps:$4 sm:$0xff]   ;;  %v13741_v49 = vld [vmem:[%s14722_s13 + $0xa0] ss:$0 sps:$4 sm:$0x77]  }
  0xfd   : > { %12475 = vmatprep.subr.bf16.mxu0 %v13677_v52  ;;  %13221 = vmatprep.subr.bf16.mxu1 %v14582_v5  ;;  %v1968_v45 = vsel %vm544_vm6, %v1966_v34, %v1926_v6  ;;  %v13699_v52 = vld [vmem:[%s18204_s1 + $0x20] sm:$0xff]   ;;  %v4258_v63 = vshll.u32 %v15460_v51, 16 }
  0xfe   : > { %4182 = vrot.lane.b32.xlu0 %v13705_v59, %s18248_s29  ;;  %v1970_v56 = vsel %vm562_vm7, %v1968_v45, %v15398_v8  ;;  %v13702_v59 = vld [vmem:[%s18204_s1 + $0x58] sm:$0xff]  }
  0xff   : > { %v2335_v24 = vpop.permute.xlu1 %2334  ;;  %4194 = vrot.lane.b32.xlu1 %v4193_v10, %s18244_s12  ;;  %v13707_v10 = vld [vmem:[%s18204_s1 + $0x50] sm:$0xff]   ;;  %v4260_v16 = vrot.slane %v4258_v63, 1 }
 0x100   : > { %12476 = vmatpush3.bf16.msra.mxu0 %v13678_v3  ;;  %v2323_v18 = vpop.permute.xlu0 %2322  ;;  %13222 = vmatpush3.bf16.msra.mxu1 %v13679_v4  ;;  %v4227_v3 = vor.u32 %v4226_v54, %v4222_v48  ;;  %v13704_v4 = vld [vmem:[%s18204_s1 + $0xa8] sm:$0xff]  }
 0x101   : > { %12492 = vmatprep.subr.bf16.mxu0 %v13682_v7  ;;  %13223 = vmatprep.subr.bf16.mxu1 %v14582_v5  ;;  %v2416_v28 = vsel %vm551_vm1, %v2318_v9, %v2323_v18  ;;  %v13731_v7 = vld [vmem:[%s14722_s13 + $0x98] ss:$0 sps:$4 sm:$0x77]   ;;  %v13736_v18 = vld [vmem:[%s14722_s13 + $0x9c] ss:$0 sps:$4 sm:$0x77]  }
 0x102   : > { %4145 = vrot.lane.b32.xlu0 %v4144_v15, %s18249_s23  ;;  %v2418_v37 = vsel %vm541_vm3, %v2416_v28, %v2335_v24  ;;  %v13728_v9 = vld [vmem:[%s14722_s13 + $0x58] ss:$0 sps:$4 sm:$0xff]   ;;  %v4256_v15 = vshrl.u32 %v15460_v51, 16  ;;  %v4657_v24 = vrot.slane %v4655_v11, 1  ;;  %v13746_v28 = vld [vmem:[%s14722_s13 + $0xa0] ss:$0 sps:$4 sm:$0xff]  }
 0x103   : > { %2204 = vmatmul.mubr.bf16.vlgmr.msra.gmra.mxu0 %v1947_v22  ;;  %v2340_v39 = vpop.permute.xlu1 %2339  ;;  %4199 = vrot.lane.b32.xlu1 %v13706_v19, %s18246_s22  ;;  %v11418_v19 = vld [vmem:[%s14722_s13 + $0x40] sm:$0x7]  ;;  %v2780_v22 = vshll.u32 %v13728_v9, 16 }
 0x104   : > { %12493 = vmatpush3.bf16.msra.mxu0 %v13684_v17  ;;  %v15428_v32 = vpop.permute.xlu0 %2285  ;;  %13224 = vmatpush3.bf16.msra.mxu1 %v13683_v14  ;;  %v2420_v50 = vsel %vm557_vm5, %v2418_v37, %v2340_v39  ;;  %v4244_v14 = vor.u32 %v4243_v62, %v4239_v61  ;;  %v13709_v17 = vld [vmem:[%s18204_s1 + $0xa0] sm:$0xff]   ;;  %v4261_v27 = vor.u32 %v4260_v16, %v4256_v15  ;;  %v4606_v39 = vshll.u32 %v13750_v30, 16 }
 0x105   : > { %12494 = vmatprep.subr.bf16.mxu0 %v13687_v20  ;;  %13225 = vmatprep.subr.bf16.mxu1 %v14582_v5  ;;  %v13712_v20 = vld [vmem:[%s18204_s1 + $0x48] sm:$0xff]   ;;  %v2406_v37 = vsel %vm537_vm2, %v11418_v19, %v15428_v32  ;;  %v4658_v41 = vor.u32 %v4657_v24, %v4653_v23  ;;  %v13719_v32 = vld [vmem:[%s18204_s1 + $0x90] sm:$0xff]  }
 0x106   : > { %4150 = vrot.lane.b32.xlu0 %v13715_v21, %s18244_s12  ;;  %v13734_v24 = vld [vmem:[%s18204_s1 + $0x28] sm:$0xff]  }
 0x107   : > { %v2352_v53 = vpop.permute.xlu1 %2351  ;;  %4211 = vrot.lane.b32.xlu1 %v4210_v40, %s18245_s26  ;;  %v13718_v40 = vld [vmem:[%s18204_s1] sm:$0xff]  }
 0x108   : > { %12495 = vmatpush3.bf16.msra.mxu0 %v13690_v31  ;;  %v15454_v46 = vpop.permute.xlu0 %2290  ;;  %13226 = vmatpush3.bf16.msra.mxu1 %v13689_v35  ;;  %v2422_v58 = vsel %vm547_vm4, %v2420_v50, %v2352_v53  ;;  %v13714_v31 = vld [vmem:[%s18204_s1 + $0x98] sm:$0xff]   ;;  %v2778_v35 = vshrl.u32 %v13728_v9, 16  ;;  %v4623_v9 = vshll.u32 %v13760_v1, 16 }
 0x109   : > { %12496 = vmatprep.subr.bf16.mxu0 %v13693_v36  ;;  %13231 = vmatprep.subr.bf16.mxu1 %v14582_v5  ;;  %v2782_v36 = vrot.slane %v2780_v22, 1  ;;  %v13766_v22 = vld [vmem:[%s14722_s13 + $0xac] ss:$0 sps:$4 sm:$0xff]  }
 0x10a   : > { %4162 = vrot.lane.b32.xlu0 %v4161_v44, %s18247_s0  ;;  %v2408_v44 = vsel %vm541_vm3, %v2406_v37, %v15454_v46  ;;  %v4670_v46 = vshrl.u32 %v13746_v28, 16  ;;  %v4625_v16 = vrot.slane %v4623_v9, 1 }
 0x10b   : > { %13228 = vmatmul.mubr.bf16.vlgmr.msra.gmra.mxu1 %v1970_v56  ;;  %v15487_v0 = vpop.permute.xlu1 %2356  ;;  %4216 = vrot.lane.b32.xlu1 %v13716_v47, %s18243_s24  ;;  %v13722_v47 = vld [vmem:[%s18204_s1 + $0x78] sm:$0xff]   ;;  %v2783_v50 = vor.u32 %v2782_v36, %v2778_v35  ;;  %v13723_v56 = vld [vmem:[%s18204_s1 + $0x88] sm:$0xff]   ;;  %v13740_v35 = vld [vmem:[%s18204_s1 + $0xb0] sm:$0xff]  }
 0x10c   : > { %12497 = vmatpush3.bf16.msra.mxu0 %v13694_v38  ;;  %v15478_v60 = vpop.permute.xlu0 %2302  ;;  %13232 = vmatpush3.bf16.msra.mxu1 %v13695_v42  ;;  %v2424_v6 = vsel %vm562_vm7, %v2422_v58, %v15487_v0  ;;  %v4604_v38 = vshrl.u32 %v13750_v30, 16  ;;  %v4672_v42 = vshll.u32 %v13746_v28, 16  ;;  %v13755_v58 = vld [vmem:[%s14722_s13 + $0x94] ss:$0 sps:$4 sm:$0x77]  }
 0x10d   : > { %12498 = vmatprep.subr.bf16.mxu0 %v13698_v43  ;;  %13233 = vmatprep.subr.bf16.mxu1 %v14582_v5  ;;  %v4608_v43 = vrot.slane %v4606_v39, 1  ;;  %v2410_v54 = vsel %vm544_vm6, %v2408_v44, %v15478_v60  ;;  %v13727_v60 = vld [vmem:[%s18204_s1 + $0x70] sm:$0xff]   ;;  %v13742_v39 = vld [vmem:[%s18204_s1 + $0x58] sm:$0xff]   ;;  %v4721_v44 = vshrl.u32 %v13766_v22, 16 }
 0x10e   : > { %4167 = vrot.lane.b32.xlu0 %v13725_v55, %s18245_s26  ;;  %13247 = vmatprep.mubr.msk.bf16.mxu1 %vm14590_vm0, %v14582_v5  ;;  %v4674_v53 = vrot.slane %v4672_v42, 1 }
 0x10f   : > { %2668 = vmatprep.mubr.bf16.mxu0 %v2424_v6  ;;  %v2369_v13 = vpop.permute.xlu1 %2368  ;;  %4228 = vrot.lane.b32.xlu1 %v4227_v3, %s18248_s29  ;;  %v4609_v51 = vor.u32 %v4608_v43, %v4604_v38  ;;  %v13729_v6 = vld [vmem:[%s18204_s1 + $0x80] sm:$0xff]   ;;  %v13765_v38 = vld [vmem:[%s14722_s13 + $0x98] ss:$0 sps:$4 sm:$0x77]   ;;  %v13768_v43 = vld [vmem:[%s14722_s13 + $0x68] ss:$0 sps:$4 sm:$0xff]  }
 0x110   : > { %12499 = vmatpush3.bf16.msra.mxu0 %v13699_v52  ;;  %v15499_v8 = vpop.permute.xlu0 %2307  ;;  %13234 = vmatpush3.bf16.msra.mxu1 %v13700_v57  ;;  %v15561_v52 = vld [vmem:[%s14722_s13 + $0xa4] ss:$0 sps:$4 sm:$0xff]   ;;  %v2427_v55 = vsel %vm551_vm1, %v15487_v0, %v2369_v13  ;;  %v13724_v57 = vld [vmem:[%s18204_s1 + $0x38] sm:$0xff]   ;;  %v4675_v3 = vor.u32 %v4674_v53, %v4670_v46  ;;  %v13747_v46 = vld [vmem:[%s18204_s1 + $0x50] sm:$0xff]  }
 0x111   : > { %12500 = vmatprep.subr.bf16.mxu0 %v13702_v59  ;;  %13235 = vmatprep.subr.bf16.mxu1 %v14582_v5  ;;  %v4689_v63 = vshll.u32 %v15561_v52, 16 }
 0x112   : > { %4233 = vrot.lane.b32.xlu0 %v13731_v7, %s18249_s23  ;;  %v4621_v7 = vshrl.u32 %v13760_v1, 16 }
 0x113   : > { %v15524_v26 = vpop.permute.xlu1 %2385  ;;  %4245 = vrot.lane.b32.xlu1 %v4244_v14, %s18246_s22  ;;  %v13733_v14 = vld [vmem:[%s18204_s1 + $0x68] sm:$0xff]  }
 0x114   : > { %12501 = vmatpush3.bf16.msra.mxu0 %v13703_v2  ;;  %v15520_v21 = vpop.permute.xlu0 %2373  ;;  %13236 = vmatpush3.bf16.msra.mxu1 %v13704_v4  ;;  %v2412_v2 = vsel %vm547_vm4, %v2410_v54, %v15499_v8  ;;  %v13761_v4 = vld [vmem:[%s14722_s13 + $0xa8] ss:$0 sps:$4 sm:$0xff]   ;;  %v13730_v8 = vld [vmem:[%s18204_s1 + $0x30] sm:$0xff]   ;;  %v3245_v54 = vshll.u32 %v13768_v43, 16 }
 0x115   : > { %12502 = vmatprep.subr.bf16.mxu0 %v13707_v10  ;;  %13237 = vmatprep.subr.bf16.mxu1 %v14582_v5  ;;  %v2429_v0 = vsel %vm537_vm2, %v2427_v55, %v15520_v21  ;;  %v4706_v19 = vshll.u32 %v13761_v4, 16  ;;  %v4626_v21 = vor.u32 %v4625_v16, %v4621_v7  ;;  %v13748_v55 = vld [vmem:[%s18204_s1 + $0x10] sm:$0xff]   ;;  %v13758_v16 = vld [vmem:[%s18204_s1] sm:$0xff]  }
 0x116   : > { %4250 = vrot.lane.b32.xlu0 %v13736_v18, %s18247_s0  ;;  %v2431_v13 = vsel %vm557_vm5, %v2429_v0, %v15524_v26  ;;  %v4691_v18 = vrot.slane %v4689_v63, 1  ;;  %v13735_v26 = vld [vmem:[%s18204_s1 + $0xb8] sm:$0xff]   ;;  %v11474_v63 = vld [vmem:[%s14722_s13 + $0x50] sm:$0x7]  ;;  %v3243_v0 = vshrl.u32 %v13768_v43, 16 }
 0x117   : > { %4262 = vrot.lane.b32.xlu1 %v4261_v27, %s18243_s24  ;;  %v15554_v45 = vpop.permute.xlu1 %2402  ;;  %v13738_v27 = vld [vmem:[%s18204_s1 + $0x60] sm:$0xff]   ;;  %v4708_v37 = vrot.slane %v4706_v19, 1 }
 0x118   : > { %12503 = vmatpush3.bf16.msra.mxu0 %v13708_v12  ;;  %v15539_v34 = vpop.permute.xlu0 %2390  ;;  %13238 = vmatpush3.bf16.msra.mxu1 %v13709_v17  ;;  %v13751_v12 = vld [vmem:[%s14722_s13 + $0xa4] ss:$0 sps:$4 sm:$0x77]   ;;  %v4687_v17 = vshrl.u32 %v15561_v52, 16  ;;  %v13744_v52 = vld [vmem:[%s18204_s1 + $0xa8] sm:$0xff]  }
 0x119   : > { %12504 = vmatprep.subr.bf16.mxu0 %v13712_v20  ;;  %13239 = vmatprep.subr.bf16.mxu1 %v14582_v5  ;;  %v2433_v23 = vsel %vm544_vm6, %v2431_v13, %v15539_v34 }
 0x11a   : > { %4647 = vrot.lane.b32.xlu0 %v13745_v25, %s18248_s29  ;;  %v2435_v34 = vsel %vm562_vm7, %v2433_v23, %v15554_v45  ;;  %v4692_v36 = vor.u32 %v4691_v18, %v4687_v17  ;;  %v13777_v17 = vld [vmem:[%s14722_s13 + $0xb0] ss:$0 sps:$4 sm:$0x77]   ;;  %v13785_v18 = vld [vmem:[%s14722_s13 + $0xac] ss:$0 sps:$4 sm:$0x77]  }
 0x11b   : > { %4659 = vrot.lane.b32.xlu1 %v4658_v41, %s18244_s12  ;;  %v2800_v59 = vpop.permute.xlu1 %2799  ;;  %v13772_v41 = vld [vmem:[%s14722_s13 + $0xac] ss:$0 sps:$4 sm:$0xff]   ;;  %v13762_v23 = vld [vmem:[%s18204_s1 + $0x78] sm:$0xff]  }
 0x11c   : > { %12505 = vmatpush3.bf16.msra.mxu0 %v13713_v29  ;;  %v2788_v48 = vpop.permute.xlu0 %2787  ;;  %13240 = vmatpush3.bf16.msra.mxu1 %v13714_v31  ;;  %v13739_v29 = vld [vmem:[%s18204_s1 + $0x20] sm:$0xff]   ;;  %v4704_v31 = vshrl.u32 %v13761_v4, 16  ;;  %v13781_v4 = vld [vmem:[%s14722_s13 + $0xb0] ss:$0 sps:$4 sm:$0xff]  }
 0x11d   : > { %12506 = vmatprep.subr.bf16.mxu0 %v13717_v33  ;;  %13241 = vmatprep.subr.bf16.mxu1 %v14582_v5  ;;  %v2881_v61 = vsel %vm551_vm1, %v2783_v50, %v2788_v48  ;;  %v4723_v33 = vshll.u32 %v13766_v22, 16  ;;  %v13771_v48 = vld [vmem:[%s14722_s13 + $0xa8] ss:$0 sps:$4 sm:$0x77]   ;;  %v13743_v50 = vld [vmem:[%s18204_s1 + $0x18] sm:$0xff]   ;;  %v5137_v9 = vshll.u32 %v13781_v4, 16 }
 0x11e   : > { %4610 = vrot.lane.b32.xlu0 %v4609_v51, %s18249_s23  ;;  %v2883_v10 = vsel %vm541_vm3, %v2881_v61, %v2800_v59 }
 0x11f   : > { %4664 = vrot.lane.b32.xlu1 %v13741_v49, %s18246_s22  ;;  %v4725_v45 = vrot.slane %v4723_v33, 1  ;;  %v5120_v49 = vshll.u32 %v13772_v41, 16  ;;  %v5139_v19 = vrot.slane %v5137_v9, 1  ;;  %v13764_v33 = vld [vmem:[%s18204_s1 + $0x38] sm:$0xff]  }
 0x120   : > { %12507 = vmatpush3.bf16.msra.mxu0 %v13718_v40  ;;  %13242 = vmatpush3.bf16.msra.mxu1 %v13719_v32  ;;  %v15581_v62 = vpop.permute.xlu0 %2750 }
 0x121   : > { %12523 = vmatprep.subr.bf16.mxu0 %v13722_v47  ;;  %13243 = vmatprep.subr.bf16.mxu1 %v14582_v5  ;;  %v2805_v11 = vpop.permute.xlu1 %2804  ;;  %v4709_v47 = vor.u32 %v4708_v37, %v4704_v31  ;;  %v4726_v59 = vor.u32 %v4725_v45, %v4721_v44  ;;  %v5122_v61 = vrot.slane %v5120_v49, 1  ;;  %v13763_v31 = vld [vmem:[%s18204_s1 + $0x88] sm:$0xff]   ;;  %v13767_v37 = vld [vmem:[%s18204_s1 + $0x70] sm:$0xff]   ;;  %v13769_v44 = vld [vmem:[%s18204_s1 + $0x80] sm:$0xff]  }
 0x122   : > { %4615 = vrot.lane.b32.xlu0 %v13755_v58, %s18244_s12  ;;  %v2885_v20 = vsel %vm557_vm5, %v2883_v10, %v2805_v11  ;;  %v13752_v58 = vld [vmem:[%s18204_s1 + $0x48] sm:$0xff]   ;;  %v2871_v11 = vsel %vm537_vm2, %v11474_v63, %v15581_v62  ;;  %v5135_v62 = vshrl.u32 %v13781_v4, 16  ;;  %v13770_v45 = vld [vmem:[%s18204_s1 + $0x30] sm:$0xff]   ;;  %v13801_v4 = vld [vmem:[%s14722_s13 + $0xbc] ss:$0 sps:$4 sm:$0xff]  }
 0x123   : > { %2669 = vmatmul.mubr.bf16.vlgmr.msra.gmra.mxu0 %v2412_v2  ;;  %4676 = vrot.lane.b32.xlu1 %v4675_v3, %s18245_s26  ;;  %v3247_v3 = vrot.slane %v3245_v54, 1  ;;  %v13795_v54 = vld [vmem:[%s14722_s13 + $0xa4] ss:$0 sps:$4 sm:$0x77]  }
 0x124   : > { %12524 = vmatpush3.bf16.msra.mxu0 %v13724_v57  ;;  %13244 = vmatpush3.bf16.msra.mxu1 %v13723_v56  ;;  %v15606_v15 = vpop.permute.xlu0 %2755  ;;  %v13776_v56 = vld [vmem:[%s14722_s13 + $0xac] ss:$0 sps:$4 sm:$0x77]   ;;  %v13749_v57 = vld [vmem:[%s18204_s1 + $0xa0] sm:$0xff]  }
 0x125   : > { %12525 = vmatprep.subr.bf16.mxu0 %v13727_v60  ;;  %13245 = vmatprep.subr.bf16.mxu1 %v14582_v5  ;;  %v2817_v25 = vpop.permute.xlu1 %2816  ;;  %v5118_v60 = vshrl.u32 %v13772_v41, 16  ;;  %v3248_v13 = vor.u32 %v3247_v3, %v3243_v0 }
 0x126   : > { %v2887_v30 = vsel %vm547_vm4, %v2885_v20, %v2817_v25  ;;  %4627 = vrot.lane.b32.xlu0 %v4626_v21, %s18247_s0  ;;  %v2873_v20 = vsel %vm541_vm3, %v2871_v11, %v15606_v15  ;;  %v13759_v21 = vld [vmem:[%s18204_s1 + $0x90] sm:$0xff]   ;;  %v13790_v15 = vld [vmem:[%s14722_s13 + $0xa0] ss:$0 sps:$4 sm:$0xff]  }
 0x127   : > { %4681 = vrot.lane.b32.xlu1 %v13751_v12, %s18243_s24  ;;  %v5123_v7 = vor.u32 %v5122_v61, %v5118_v60  ;;  %v13757_v12 = vld [vmem:[%s18204_s1 + $0x40] sm:$0xff]  }
 0x128   : > { %12526 = vmatpush3.bf16.msra.mxu0 %v13730_v8  ;;  %13246 = vmatpush3.bf16.msra.mxu1 %v13729_v6  ;;  %v15624_v28 = vpop.permute.xlu0 %2767  ;;  %v13753_v6 = vld [vmem:[%s18204_s1 + $0x8] sm:$0xff]   ;;  %v13754_v8 = vld [vmem:[%s18204_s1 + $0x98] sm:$0xff]   ;;  %v13800_v61 = vld [vmem:[%s14722_s13 + $0xa4] ss:$0 sps:$4 sm:$0xff]  }
 0x129   : > { %12527 = vmatprep.subr.bf16.mxu0 %v13733_v14  ;;  %13251 = vmatprep.subr.bf16.mxu1 %v14582_v5  ;;  %v15642_v40 = vpop.permute.xlu1 %2821  ;;  %v5086_v9 = vshrl.u32 %v13800_v61, 16 }
 0x12a   : > { %v2889_v42 = vsel %vm562_vm7, %v2887_v30, %v15642_v40  ;;  %4632 = vrot.lane.b32.xlu0 %v13765_v38, %s18245_s26  ;;  %v13791_v30 = vld [vmem:[%s14722_s13 + $0xb4] ss:$0 sps:$4 sm:$0xff]  }
 0x12b   : > { %13248 = vmatmul.mubr.bf16.vlgmr.msra.gmra.mxu1 %v2435_v34  ;;  %3133 = vmatprep.mubr.bf16.mxu0 %v2889_v42 }
 0x12c   : > { %12528 = vmatpush3.bf16.msra.mxu0 %v13734_v24  ;;  %13252 = vmatpush3.bf16.msra.mxu1 %v13735_v26  ;;  %v15647_v32 = vpop.permute.xlu0 %2772  ;;  %v2875_v26 = vsel %vm544_vm6, %v2873_v20, %v15624_v28 }
 0x12d   : > { %12529 = vmatprep.subr.bf16.mxu0 %v13738_v27  ;;  %13253 = vmatprep.subr.bf16.mxu1 %v14582_v5  ;;  %v15657_v51 = vpop.permute.xlu1 %2833  ;;  %v2877_v41 = vsel %vm547_vm4, %v2875_v26, %v15647_v32  ;;  %v5152_v32 = vshrl.u32 %v13791_v30, 16 }
 0x12e   : > { %4693 = vrot.lane.b32.xlu1 %v4692_v36, %s18248_s29  ;;  %13267 = vmatprep.mubr.msk.bf16.mxu1 %vm14590_vm0, %v14582_v5  ;;  %v2892_v27 = vsel %vm551_vm1, %v15642_v40, %v15657_v51  ;;  %v5071_v36 = vshll.u32 %v13790_v15, 16  ;;  %v5154_v40 = vshll.u32 %v13791_v30, 16  ;;  %v13796_v51 = vld [vmem:[%s14722_s13 + $0xb8] ss:$0 sps:$4 sm:$0xff]   ;;  %v13784_v30 = vld [vmem:[%s18204_s1 + $0xa8] sm:$0xff]  }
 0x12f   : > { %4698 = vrot.lane.b32.xlu0 %v13771_v48, %s18249_s23 }
 0x130   : > { %12530 = vmatpush3.bf16.msra.mxu0 %v13739_v29  ;;  %13254 = vmatpush3.bf16.msra.mxu1 %v13740_v35  ;;  %v15667_v53 = vpop.permute.xlu0 %2838  ;;  %v5140_v29 = vor.u32 %v5139_v19, %v5135_v62  ;;  %v5069_v35 = vshrl.u32 %v13790_v15, 16  ;;  %v5073_v43 = vrot.slane %v5071_v36, 1  ;;  %v5156_v48 = vrot.slane %v5154_v40, 1  ;;  %v13782_v62 = vld [vmem:[%s18204_s1 + $0x58] sm:$0xff]   ;;  %v13788_v40 = vld [vmem:[%s18204_s1 + $0x10] sm:$0xff]  }
 0x131   : > { %12531 = vmatprep.subr.bf16.mxu0 %v13742_v39  ;;  %13255 = vmatprep.subr.bf16.mxu1 %v14582_v5  ;;  %v15683_v1 = vpop.permute.xlu1 %2850  ;;  %v13786_v39 = vld [vmem:[%s14722_s13 + $0xb4] ss:$0 sps:$4 sm:$0x77]   ;;  %v2894_v42 = vsel %vm537_vm2, %v2892_v27, %v15667_v53  ;;  %v13808_v15 = vld [vmem:[%s14722_s13 + $0x78] ss:$0 sps:$4 sm:$0xff]  }
 0x132   : > { %4710 = vrot.lane.b32.xlu1 %v4709_v47, %s18246_s22  ;;  %v5157_v60 = vor.u32 %v5156_v48, %v5152_v32  ;;  %v13793_v32 = vld [vmem:[%s18204_s1 + $0x8] sm:$0xff]   ;;  %v13794_v48 = vld [vmem:[%s18204_s1 + $0x98] sm:$0xff]  }
 0x133   : > { %4715 = vrot.lane.b32.xlu0 %v13776_v56, %s18247_s0 }
 0x134   : > { %12532 = vmatpush3.bf16.msra.mxu0 %v13743_v50  ;;  %13256 = vmatpush3.bf16.msra.mxu1 %v13744_v52  ;;  %v15685_v2 = vpop.permute.xlu0 %2855  ;;  %v5074_v50 = vor.u32 %v5073_v43, %v5069_v35  ;;  %v2896_v52 = vsel %vm557_vm5, %v2894_v42, %v15683_v1  ;;  %v13778_v1 = vld [vmem:[%s18204_s1 + $0x60] sm:$0xff]  }
 0x135   : > { %12533 = vmatprep.subr.bf16.mxu0 %v13747_v46  ;;  %13257 = vmatprep.subr.bf16.mxu1 %v14582_v5  ;;  %v15697_v10 = vpop.permute.xlu1 %2867  ;;  %v13773_v46 = vld [vmem:[%s18204_s1 + $0x68] sm:$0xff]   ;;  %v2898_v63 = vsel %vm544_vm6, %v2896_v52, %v15685_v2  ;;  %v5188_v2 = vshll.u32 %v13801_v4, 16  ;;  %v13789_v43 = vld [vmem:[%s18204_s1 + $0xa0] sm:$0xff]   ;;  %v13816_v52 = vld [vmem:[%s14722_s13 + $0xbc] ss:$0 sps:$4 sm:$0x77]  }
 0x136   : > { %4727 = vrot.lane.b32.xlu1 %v4726_v59, %s18243_s24  ;;  %v13775_v59 = vld [vmem:[%s18204_s1 + $0xb8] sm:$0xff]   ;;  %v2900_v11 = vsel %vm562_vm7, %v2898_v63, %v15697_v10  ;;  %v13799_v63 = vld [vmem:[%s18204_s1 + $0x90] sm:$0xff]  }
 0x137   : > { %5112 = vrot.lane.b32.xlu0 %v13785_v18, %s18248_s29  ;;  %v5190_v18 = vrot.slane %v5188_v2, 1 }
 0x138   : > { %12534 = vmatpush3.bf16.msra.mxu0 %v13748_v55  ;;  %13258 = vmatpush3.bf16.msra.mxu1 %v13749_v57  ;;  %v3253_v14 = vpop.permute.xlu0 %3252  ;;  %v13774_v55 = vld [vmem:[%s18204_s1 + $0x28] sm:$0xff]   ;;  %v5169_v57 = vshrl.u32 %v13796_v51, 16 }
 0x139   : > { %12535 = vmatprep.subr.bf16.mxu0 %v13752_v58  ;;  %13259 = vmatprep.subr.bf16.mxu1 %v14582_v5  ;;  %v3265_v22 = vpop.permute.xlu1 %3264  ;;  %v3346_v24 = vsel %vm551_vm1, %v3248_v13, %v3253_v14  ;;  %v5171_v58 = vshll.u32 %v13796_v51, 16 }
 0x13a   : > { %5124 = vrot.lane.b32.xlu1 %v5123_v7, %s18244_s12  ;;  %v3348_v28 = vsel %vm541_vm3, %v3346_v24, %v3265_v22  ;;  %v13783_v22 = vld [vmem:[%s18204_s1 + $0x18] sm:$0xff]  }
 0x13b   : > { %5075 = vrot.lane.b32.xlu0 %v5074_v50, %s18249_s23  ;;  %v5173_v3 = vrot.slane %v5171_v58, 1  ;;  %v13797_v50 = vld [vmem:[%s18204_s1 + $0x40] sm:$0xff]  }
 0x13c   : > { %12536 = vmatpush3.bf16.msra.mxu0 %v13753_v6  ;;  %13260 = vmatpush3.bf16.msra.mxu1 %v13754_v8  ;;  %v15721_v25 = vpop.permute.xlu0 %3215  ;;  %v5088_v8 = vshll.u32 %v13800_v61, 16 }
 0x13d   : > { %12537 = vmatprep.subr.bf16.mxu0 %v13757_v12  ;;  %13261 = vmatprep.subr.bf16.mxu1 %v14582_v5  ;;  %v3270_v34 = vpop.permute.xlu1 %3269  ;;  %v13779_v12 = vld [vmem:[%s18204_s1 + $0x20] sm:$0xff]   ;;  %v5174_v13 = vor.u32 %v5173_v3, %v5169_v57 }
 0x13e   : > { %5129 = vrot.lane.b32.xlu1 %v13777_v17, %s18246_s22  ;;  %v3350_v47 = vsel %vm557_vm5, %v3348_v28, %v3270_v34  ;;  %v5090_v14 = vrot.slane %v5088_v8, 1  ;;  %v13780_v17 = vld [vmem:[%s18204_s1 + $0xb0] sm:$0xff]   ;;  %v3708_v28 = vshrl.u32 %v13808_v15, 16  ;;  %v3710_v34 = vshll.u32 %v13808_v15, 16  ;;  %v13813_v15 = vld [vmem:[%s18204_s1 + $0x68] sm:$0xff]  }
 0x13f   : > { %5080 = vrot.lane.b32.xlu0 %v13795_v54, %s18244_s12 }
 0x140   : > { %12538 = vmatpush3.bf16.msra.mxu0 %v13758_v16  ;;  %13262 = vmatpush3.bf16.msra.mxu1 %v13759_v21  ;;  %v15742_v38 = vpop.permute.xlu0 %3220  ;;  %v5186_v16 = vshrl.u32 %v13801_v4, 16  ;;  %v5091_v20 = vor.u32 %v5090_v14, %v5086_v9  ;;  %v13805_v21 = vld [vmem:[%s14722_s13 + $0xa8] ss:$0 sps:$4 sm:$0x77]   ;;  %v3712_v36 = vrot.slane %v3710_v34, 1 }
 0x141   : > { %12554 = vmatprep.subr.bf16.mxu0 %v13762_v23  ;;  %13263 = vmatprep.subr.bf16.mxu1 %v14582_v5  ;;  %v3282_v49 = vpop.permute.xlu1 %3281  ;;  %v13806_v23 = vld [vmem:[%s14722_s13 + $0xbc] ss:$0 sps:$4 sm:$0xff]   ;;  %v13803_v9 = vld [vmem:[%s18204_s1 + $0x88] sm:$0xff]  }
 0x142   : > { %5141 = vrot.lane.b32.xlu1 %v5140_v29, %s18245_s26  ;;  %v3352_v56 = vsel %vm547_vm4, %v3350_v47, %v3282_v49  ;;  %v5191_v24 = vor.u32 %v5190_v18, %v5186_v16  ;;  %v5583_v27 = vshrl.u32 %v13806_v23, 16  ;;  %v5585_v29 = vshll.u32 %v13806_v23, 16  ;;  %v13812_v49 = vld [vmem:[%s14722_s13 + $0xc0] ss:$0 sps:$4 sm:$0x77]  }
 0x143   : > { %3134 = vmatmul.mubr.bf16.vlgmr.msra.gmra.mxu0 %v2877_v41  ;;  %5092 = vrot.lane.b32.xlu0 %v5091_v20, %s18247_s0  ;;  %v13825_v14 = vld [vmem:[%s14722_s13 + $0xbc] ss:$0 sps:$4 sm:$0x77]   ;;  %v13826_v18 = vld [vmem:[%s14722_s13 + $0xc4] ss:$0 sps:$4 sm:$0xff]  }
 0x144   : > { %12555 = vmatpush3.bf16.msra.mxu0 %v13764_v33  ;;  %13264 = vmatpush3.bf16.msra.mxu1 %v13763_v31  ;;  %v15764_v53 = vpop.permute.xlu0 %3232  ;;  %v13787_v31 = vld [vmem:[%s18204_s1 + $0x50] sm:$0xff]   ;;  %v5587_v35 = vrot.slane %v5585_v29, 1  ;;  %v13809_v20 = vld [vmem:[%s18204_s1 + $0x80] sm:$0xff]   ;;  %v13831_v34 = vld [vmem:[%s14722_s13 + $0xc8] ss:$0 sps:$4 sm:$0xff]  }
 0x145   : > { %12556 = vmatprep.subr.bf16.mxu0 %v13767_v37  ;;  %13265 = vmatprep.subr.bf16.mxu1 %v14582_v5  ;;  %v15783_v0 = vpop.permute.xlu1 %3286  ;;  %v13811_v37 = vld [vmem:[%s14722_s13 + $0xb8] ss:$0 sps:$4 sm:$0x77]  }
 0x146   : > { %5146 = vrot.lane.b32.xlu1 %v13786_v39, %s18243_s24  ;;  %v3354_v6 = vsel %vm562_vm7, %v3352_v56, %v15783_v0  ;;  %v11530_v39 = vld [vmem:[%s14722_s13 + $0x60] sm:$0x7]  ;;  %v5588_v42 = vor.u32 %v5587_v35, %v5583_v27 }
 0x147   : > { %3598 = vmatprep.mubr.bf16.mxu0 %v3354_v6  ;;  %5097 = vrot.lane.b32.xlu0 %v13805_v21, %s18245_s26  ;;  %v13817_v56 = vld [vmem:[%s14722_s13 + $0xc0] ss:$0 sps:$4 sm:$0xff]   ;;  %v5617_v21 = vshrl.u32 %v13826_v18, 16 }
 0x148   : > { %12557 = vmatpush3.bf16.msra.mxu0 %v13770_v45  ;;  %13266 = vmatpush3.bf16.msra.mxu1 %v13769_v44  ;;  %v15788_v7 = vpop.permute.xlu0 %3237  ;;  %v13792_v44 = vld [vmem:[%s18204_s1 + $0x48] sm:$0xff]   ;;  %v3713_v45 = vor.u32 %v3712_v36, %v3708_v28  ;;  %v5600_v57 = vshrl.u32 %v13817_v56, 16  ;;  %v5602_v58 = vshll.u32 %v13817_v56, 16 }
 0x149   : > { %12558 = vmatprep.subr.bf16.mxu0 %v13773_v46  ;;  %13271 = vmatprep.subr.bf16.mxu1 %v14582_v5  ;;  %v15801_v10 = vpop.permute.xlu1 %3298  ;;  %v3336_v46 = vsel %vm537_vm2, %v11530_v39, %v15721_v25  ;;  %v13798_v25 = vld [vmem:[%s18204_s1] sm:$0xff]   ;;  %v13836_v56 = vld [vmem:[%s14722_s13 + $0xcc] ss:$0 sps:$4 sm:$0xff]  }
 0x14a   : > { %5158 = vrot.lane.b32.xlu1 %v5157_v60, %s18248_s29  ;;  %v3357_v6 = vsel %vm551_vm1, %v15783_v0, %v15801_v10 }
 0x14b   : > { %13268 = vmatmul.mubr.bf16.vlgmr.msra.gmra.mxu1 %v2900_v11  ;;  %5163 = vrot.lane.b32.xlu0 %v13811_v37, %s18249_s23  ;;  %v13804_v11 = vld [vmem:[%s18204_s1 + $0x38] sm:$0xff]  }
 0x14c   : > { %12559 = vmatpush3.bf16.msra.mxu0 %v13774_v55  ;;  %13272 = vmatpush3.bf16.msra.mxu1 %v13775_v59  ;;  %v15806_v19 = vpop.permute.xlu0 %3303  ;;  %v3338_v59 = vsel %vm541_vm3, %v3336_v46, %v15742_v38  ;;  %v5604_v38 = vrot.slane %v5602_v58, 1  ;;  %v13815_v37 = vld [vmem:[%s18204_s1 + $0xb8] sm:$0xff]   ;;  %v13819_v46 = vld [vmem:[%s18204_s1 + $0x20] sm:$0xff]  }
 0x14d   : > { %12560 = vmatprep.subr.bf16.mxu0 %v13778_v1  ;;  %13273 = vmatprep.subr.bf16.mxu1 %v14582_v5  ;;  %v15819_v26 = vpop.permute.xlu1 %3315  ;;  %v13802_v1 = vld [vmem:[%s18204_s1 + $0x78] sm:$0xff]   ;;  %v3340_v4 = vsel %vm544_vm6, %v3338_v59, %v15764_v53  ;;  %v13807_v53 = vld [vmem:[%s18204_s1 + $0x70] sm:$0xff]  }
 0x14e   : > { %13287 = vmatprep.mubr.msk.bf16.mxu1 %vm14590_vm0, %v14582_v5  ;;  %5175 = vrot.lane.b32.xlu1 %v5174_v13, %s18246_s22  ;;  %v5605_v2 = vor.u32 %v5604_v38, %v5600_v57  ;;  %v13821_v13 = vld [vmem:[%s14722_s13 + $0xc4] ss:$0 sps:$4 sm:$0x77]   ;;  %v3342_v16 = vsel %vm547_vm4, %v3340_v4, %v15788_v7  ;;  %v13810_v7 = vld [vmem:[%s18204_s1 + $0x30] sm:$0xff]  }
 0x14f   : > { %5180 = vrot.lane.b32.xlu0 %v13816_v52, %s18247_s0  ;;  %v13835_v59 = vld [vmem:[%s14722_s13 + $0xb4] ss:$0 sps:$4 sm:$0x77]  }
 0x150   : > { %12561 = vmatpush3.bf16.msra.mxu0 %v13779_v12  ;;  %13274 = vmatpush3.bf16.msra.mxu1 %v13780_v17  ;;  %v15827_v33 = vpop.permute.xlu0 %3320  ;;  %v3359_v17 = vsel %vm537_vm2, %v3357_v6, %v15806_v19 }
 0x151   : > { %12562 = vmatprep.subr.bf16.mxu0 %v13782_v62  ;;  %13275 = vmatprep.subr.bf16.mxu1 %v14582_v5  ;;  %v15837_v41 = vpop.permute.xlu1 %3332  ;;  %v3361_v23 = vsel %vm557_vm5, %v3359_v17, %v15819_v26  ;;  %v13814_v26 = vld [vmem:[%s18204_s1 + $0x28] sm:$0xff]  }
 0x152   : > { %5192 = vrot.lane.b32.xlu1 %v5191_v24, %s18243_s24 }
 0x153   : > { %5577 = vrot.lane.b32.xlu0 %v13825_v14, %s18248_s29  ;;  %v13827_v14 = vld [vmem:[%s18204_s1 + $0x50] sm:$0xff]  }
 0x154   : > { %12563 = vmatpush3.bf16.msra.mxu0 %v13783_v22  ;;  %13276 = vmatpush3.bf16.msra.mxu1 %v13784_v30  ;;  %v3718_v47 = vpop.permute.xlu0 %3717  ;;  %v5619_v22 = vshll.u32 %v13826_v18, 16  ;;  %v13830_v30 = vld [vmem:[%s14722_s13 + $0xb0] ss:$0 sps:$4 sm:$0xff]  }
 0x155   : > { %12564 = vmatprep.subr.bf16.mxu0 %v13787_v31  ;;  %13277 = vmatprep.subr.bf16.mxu1 %v14582_v5  ;;  %v3730_v51 = vpop.permute.xlu1 %3729  ;;  %v3811_v54 = vsel %vm551_vm1, %v3713_v45, %v3718_v47  ;;  %v15933_v31 = vld [vmem:[%s18205_s2] ss:$0 sm:$0xff]  ;;  %v5534_v39 = vshrl.u32 %v13830_v30, 16  ;;  %v5634_v45 = vshrl.u32 %v13831_v34, 16  ;;  %v5636_v47 = vshll.u32 %v13831_v34, 16 }
 0x156   : > { %5589 = vrot.lane.b32.xlu1 %v5588_v42, %s18244_s12  ;;  %v3813_v60 = vsel %vm541_vm3, %v3811_v54, %v3730_v51  ;;  %v5621_v28 = vrot.slane %v5619_v22, 1  ;;  %v3363_v42 = vsel %vm544_vm6, %v3361_v23, %v15827_v33  ;;  %v13832_v23 = vld [vmem:[%s18204_s1 + $0x48] sm:$0xff]  }
 0x157   : > { %v5638_v33 = vrot.slane %v5636_v47, 1  ;;  %v3365_v51 = vsel %vm562_vm7, %v3363_v42, %v15837_v41  ;;  %v13820_v41 = vld [vmem:[%s18204_s1 + $0xb0] sm:$0xff]  }
 0x158   : > { %12565 = vmatpush3.bf16.msra.mxu0 %v13788_v40  ;;  %13278 = vmatpush3.bf16.msra.mxu1 %v13789_v43  ;;  %v15862_v55 = vpop.permute.xlu0 %3680  ;;  %v5536_v40 = vshll.u32 %v13830_v30, 16  ;;  %v5622_v43 = vor.u32 %v5621_v28, %v5617_v21  ;;  %v13829_v21 = vld [vmem:[%s18204_s1 + $0xa0] sm:$0xff]   ;;  %v13847_v30 = vld [vmem:[%s14722_s13 + $0x88] ss:$0 sps:$4 sm:$0xff]  }
 0x159   : > { %12566 = vmatprep.subr.bf16.mxu0 %v13792_v44  ;;  %13279 = vmatprep.subr.bf16.mxu1 %v14582_v5  ;;  %v3735_v61 = vpop.permute.xlu1 %3734  ;;  %v5639_v58 = vor.u32 %v5638_v33, %v5634_v45  ;;  %v13833_v28 = vld [vmem:[%s18204_s1 + $0x8] sm:$0xff]   ;;  %v4173_v34 = vshrl.u32 %v13847_v30, 16  ;;  %v13839_v33 = vld [vmem:[%s18204_s1 + $0x90] sm:$0xff]  }
 0x15a   : > { %5594 = vrot.lane.b32.xlu1 %v13812_v49, %s18246_s22  ;;  %v3815_v8 = vsel %vm557_vm5, %v3813_v60, %v3735_v61  ;;  %v5538_v49 = vrot.slane %v5536_v40, 1  ;;  %v13822_v61 = vld [vmem:[%s18204_s1 + $0x58] sm:$0xff]  }
 0x15c   : > { %12567 = vmatpush3.bf16.msra.mxu0 %v13793_v32  ;;  %13280 = vmatpush3.bf16.msra.mxu1 %v13794_v48  ;;  %v15880_v3 = vpop.permute.xlu0 %3685  ;;  %v13818_v48 = vld [vmem:[%s18204_s1 + $0x60] sm:$0xff]   ;;  %v5539_v54 = vor.u32 %v5538_v49, %v5534_v39 }
 0x15d   : > { %12568 = vmatprep.subr.bf16.mxu0 %v13797_v50  ;;  %13281 = vmatprep.subr.bf16.mxu1 %v14582_v5  ;;  %v3747_v12 = vpop.permute.xlu1 %3746  ;;  %v13837_v39 = vld [vmem:[%s18204_s1 + $0x40] sm:$0xff]  }
 0x15e   : > { %5606 = vrot.lane.b32.xlu1 %v5605_v2, %s18245_s26  ;;  %v3817_v10 = vsel %vm547_vm4, %v3815_v8, %v3747_v12  ;;  %5540 = vrot.lane.b32.xlu0 %v5539_v54, %s18249_s23  ;;  %v13840_v8 = vld [vmem:[%s14722_s13 + $0xb4] ss:$0 sps:$4 sm:$0xff]   ;;  %v13838_v49 = vld [vmem:[%s18204_s1] sm:$0xff]  }
 0x15f   : > { %v5551_v17 = vshrl.u32 %v13840_v8, 16 }
 0x160   : > { %12569 = vmatpush3.bf16.msra.mxu0 %v13798_v25  ;;  %13282 = vmatpush3.bf16.msra.mxu1 %v13799_v63  ;;  %v15899_v0 = vpop.permute.xlu0 %3697  ;;  %v5651_v63 = vshrl.u32 %v13836_v56, 16 }
 0x161   : > { %12585 = vmatprep.subr.bf16.mxu0 %v13802_v1  ;;  %13283 = vmatprep.subr.bf16.mxu1 %v14582_v5  ;;  %v15917_v19 = vpop.permute.xlu1 %3751  ;;  %v5653_v1 = vshll.u32 %v13836_v56, 16 }
 0x162   : > { %v3819_v27 = vsel %vm562_vm7, %v3817_v10, %v15917_v19  ;;  %5611 = vrot.lane.b32.xlu1 %v13821_v13, %s18243_s24  ;;  %v5553_v10 = vshll.u32 %v13840_v8, 16  ;;  %5545 = vrot.lane.b32.xlu0 %v13835_v59, %s18244_s12 }
 0x163   : > { %3599 = vmatmul.mubr.bf16.vlgmr.msra.gmra.mxu0 %v3342_v16  ;;  %v12384_v62 = vpop.f32.mrf.mxu0 }
 0x164   : > { %12586 = vmatpush3.bf16.msra.mxu0 %v13804_v11  ;;  %13284 = vmatpush3.bf16.msra.mxu1 %v13803_v9  ;;  %v15926_v29 = vpop.permute.xlu0 %3702  ;;  %v5655_v9 = vrot.slane %v5653_v1, 1  ;;  %v13823_v11 = vld [vmem:[%s18204_s1 + $0x18] sm:$0xff]   ;;  %v5555_v22 = vrot.slane %v5553_v10, 1 }
 0x165   : > { %v12385_v24 = vpop.f32.mrf.mxu0  ;;  %12587 = vmatprep.subr.bf16.mxu0 %v13807_v53  ;;  %13285 = vmatprep.subr.bf16.mxu1 %v14582_v5  ;;  %v15945_v44 = vpop.permute.xlu1 %3763  ;;  %v13824_v53 = vld [vmem:[%s18204_s1 + $0xa8] sm:$0xff]  }
 0x166   : > { %v12386_v35 = vadd.f32 %v12385_v24, %v12384_v62  ;;  %4063 = vmatprep.mubr.bf16.mxu0 %v3819_v27  ;;  %5623 = vrot.lane.b32.xlu1 %v5622_v43, %s18248_s29  ;;  %v5656_v16 = vor.u32 %v5655_v9, %v5651_v63  ;;  %v13845_v27 = vld [vmem:[%s14722_s13 + $0xb8] ss:$0 sps:$4 sm:$0x77]   ;;  %v13850_v43 = vld [vmem:[%s14722_s13 + $0xc8] ss:$0 sps:$4 sm:$0x77]   ;;  %v3822_v59 = vsel %vm551_vm1, %v15917_v19, %v15945_v44 }
 0x167   : > { %v12387_v36 = vpop.f32.mrf.mxu0  ;;  %v13846_v44 = vld [vmem:[%s18204_s1 + $0x70] sm:$0xff]  }
 0x168   : > { %12588 = vmatpush3.bf16.msra.mxu0 %v13810_v7  ;;  %13286 = vmatpush3.bf16.msra.mxu1 %v13809_v20  ;;  %v15950_v50 = vpop.permute.xlu0 %3768  ;;  %v811_v52 = vadd.f32 %v12386_v35, %v15933_v31  ;;  %v11586_v20 = vld [vmem:[%s14722_s13 + $0x70] sm:$0x7]  ;;  %v4175_v35 = vshll.u32 %v13847_v30, 16 }
 0x169   : > { %v12388_v32 = vpop.f32.mrf.mxu0  ;;  %12589 = vmatprep.subr.bf16.mxu0 %v13813_v15  ;;  %13291 = vmatprep.subr.bf16.mxu1 %v14582_v5  ;;  %v15962_v25 = vpop.permute.xlu1 %3780  ;;  %v13828_v7 = vld [vmem:[%s18204_s1 + $0x10] sm:$0xff]   ;;  %v5556_v15 = vor.u32 %v5555_v22, %v5551_v17  ;;  %v3801_v36 = vsel %vm537_vm2, %v11586_v20, %v15862_v55  ;;  %v3824_v8 = vsel %vm537_vm2, %v3822_v59, %v15950_v50  ;;  %v13853_v20 = vld [vmem:[%s18204_s1 + $0xb8] sm:$0xff]   ;;  %v13855_v22 = vld [vmem:[%s18204_s1 + $0x60] sm:$0xff]  }
 0x16a   : > { %5640 = vrot.lane.b32.xlu1 %v5639_v58, %s18246_s22  ;;  %v4177_v42 = vrot.slane %v4175_v35, 1  ;;  %v3803_v55 = vsel %vm541_vm3, %v3801_v36, %v15880_v3  ;;  %v13841_v3 = vld [vmem:[%s18204_s1 + $0x78] sm:$0xff]   ;;  %v13854_v58 = vld [vmem:[%s14722_s13 + $0xcc] ss:$0 sps:$4 sm:$0x77]   ;;  %v13857_v30 = vld [vmem:[%s18204_s1 + $0xb0] sm:$0xff]  }
 0x16b   : > { %13288 = vmatmul.mubr.bf16.vlgmr.msra.gmra.mxu1 %v3365_v51  ;;  %v850_v57 = vpop.f32.mrf.mxu1  ;;  %5557 = vrot.lane.b32.xlu0 %v5556_v15, %s18247_s0  ;;  %v3805_v56 = vsel %vm544_vm6, %v3803_v55, %v15899_v0  ;;  %v13844_v0 = vld [vmem:[%s18204_s1 + $0x38] sm:$0xff]   ;;  %v13856_v15 = vld [vmem:[%s18204_s1 + $0x20] sm:$0xff]  }
 0x16c   : > { %12590 = vmatpush3.bf16.msra.mxu0 %v13814_v26  ;;  %v851_v60 = vadd.f32 %v850_v57, %v811_v52  ;;  %13292 = vmatpush3.bf16.msra.mxu1 %v13815_v37  ;;  %v15970_v38 = vpop.permute.xlu0 %3785  ;;  %v13834_v37 = vld [vmem:[%s18204_s1 + $0x98] sm:$0xff]   ;;  %v3807_v9 = vsel %vm547_vm4, %v3805_v56, %v15926_v29  ;;  %v13849_v29 = vld [vmem:[%s18204_s1 + $0x30] sm:$0xff]  }
 0x16d   : > { %12591 = vmatprep.subr.bf16.mxu0 %v13818_v48  ;;  %v13169_v4 = vpop.f32.mrf.mxu1  ;;  %13293 = vmatprep.subr.bf16.mxu1 %v14582_v5  ;;  %v15981_v12 = vpop.permute.xlu1 %3797  ;;  %v4178_v48 = vor.u32 %v4177_v42, %v4173_v34 }
 0x16e   : > { %v856_v6 = vmax.f32 %v851_v60, 0.0  ;;  %13307 = vmatprep.mubr.msk.bf16.mxu1 %vm14590_vm0, %v14582_v5  ;;  %5657 = vrot.lane.b32.xlu1 %v5656_v16, %s18243_s24  ;;  %v13851_v16 = vld [vmem:[%s18204_s1 + $0x68] sm:$0xff]  }
 0x16f   : > { %v853_v2 = vpop.f32.mrf.mxu1  ;;  %5562 = vrot.lane.b32.xlu0 %v13845_v27, %s18245_s26  ;;  %s377_s26 = sand.u32 1, %s14572_s18  }
 0x170   : > { %12592 = vmatpush3.bf16.msra.mxu0 %v13819_v46  ;;  %v857_v13 = vpack.c.bf16 %v856_v6, %v856_v6  ;;  %13294 = vmatpush3.bf16.msra.mxu1 %v13820_v41  ;;  %v4183_v18 = vpop.permute.xlu0 %4182  ;;  %s378_s29 = scalar_lea.vmem [#allocation5], %s377_s26  ;;  %s11124_s28 = scalar_lea.sflag [#allocation6], %s377_s26 }
 0x171   : > { %12593 = vmatprep.subr.bf16.mxu0 %v13822_v61  ;;  %v13170_v62 = vpop.f32.mrf.mxu1  ;;  %13295 = vmatprep.subr.bf16.mxu1 %v14582_v5  ;;  %v4195_v24 = vpop.permute.xlu1 %4194  ;;  %v4276_v46 = vsel %vm551_vm1, %v4178_v48, %v4183_v18  ;;  %v13843_v61 = vld [vmem:[%s18204_s1 + $0x88] sm:$0xff]   ;;  %s11136_s17 = sshll.u32 %s378_s29, 4  ;;  %s11137_s17 = int_to_ptr.vmem [resolvable:$true] %s11136_s17 }
 0x172   : > { %859 = vst.msk [vmem:[#allocation2] sm:$0x7] %vm858_vm8, %v857_v13  ;;  %v4278_v57 = vsel %vm541_vm3, %v4276_v46, %v4195_v24  ;;  %v13852_v62 = vld [vmem:[%s18204_s1 + $0x28] sm:$0xff]   ;;  %s14520_s19 = scalar_lea.vmem %s11137_s17, 16  ;;  %p14527_p0 = scmp.lt.s32.totalorder %s11137_s17, %s14525_s15 }
 0x173   : > { %5628 = vrot.lane.b32.xlu0 %v13850_v43, %s18249_s23  ;;  %s18168_s23 = scalar_lea.hbm %s18214_s11, %s12365_s14  ;;  %p14521_p11 = scmp.ne.s32.totalorder %s11137_s17, %s14520_s19 }
 0x174   : > { %12594 = vmatpush3.bf16.msra.mxu0 %v13823_v11  ;;  %13296 = vmatpush3.bf16.msra.mxu1 %v13824_v53  ;;  %v16005_v26 = vpop.permute.xlu0 %4145  ;;  %v13848_v11 = vld [vmem:[%s18204_s1 + $0x80] sm:$0xff]   ;;  %v3826_v53 = vsel %vm557_vm5, %v3824_v8, %v15962_v25  ;;  %p14528_p1 = scmp.lt.s32.totalorder %s14526_s25, %s14520_s19 }
 0x175   : > { %12595 = vmatprep.subr.bf16.mxu0 %v13827_v14  ;;  %13297 = vmatprep.subr.bf16.mxu1 %v14582_v5  ;;  %v4200_v40 = vpop.permute.xlu1 %4199  ;;  %v3828_v25 = vsel %vm544_vm6, %v3826_v53, %v15970_v38  ;;  %v13868_v8 = vld [vmem:[%s18204_s1] sm:$0xff]   ;;  %p14522_p12 = pnand %p14521_p11, %p14692_p5 }
 0x176   : > { %v4280_v63 = vsel %vm557_vm5, %v4278_v57, %v4200_v40  ;;  %v3830_v38 = vsel %vm562_vm7, %v3828_v25, %v15981_v12  ;;  %v13858_v12 = vld [vmem:[%s18204_s1 + $0x58] sm:$0xff]   ;;  %v13860_v40 = vld [vmem:[%s18204_s1 + $0xa8] sm:$0xff]   ;;  %p14529_p2 = por %p14528_p1, %p14527_p0 }
 0x177   : > { %5645 = vrot.lane.b32.xlu0 %v13854_v58, %s18247_s0  ;;  %v13864_v57 = vld [vmem:[%s18204_s1 + $0x48] sm:$0xff]   ;;  %v11642_v58 = vld [vmem:[%s14722_s13 + $0x80] sm:$0x7]  ;;  %p14523_p13 = pneg %p14522_p12 }
 0x178   : > { %12596 = vmatpush3.bf16.msra.mxu0 %v13828_v7  ;;  %13298 = vmatpush3.bf16.msra.mxu1 %v13829_v21  ;;  %v16021_v45 = vpop.permute.xlu0 %4150 }
 0x179   : > { %12597 = vmatprep.subr.bf16.mxu0 %v13832_v23  ;;  %13299 = vmatprep.subr.bf16.mxu1 %v14582_v5  ;;  %v5975_v47 = vld [vmem:[#allocation2] sm:$0x7]  ;;  %v4212_v51 = vpop.permute.xlu1 %4211  ;;  %p14530_p3 = pnand %p14529_p2, %p14523_p13 }
 0x17a   : > { %v11866_v32 = vcombine.low %v5975_v47, %v5975_v47  ;;  %v4282_v1 = vsel %vm547_vm4, %v4280_v63, %v4212_v51  ;;  %v13875_v47 = vld [vmem:[%s14722_s13 + $0x98] ss:$0 sps:$4 sm:$0xff]  }
 0x17b   : > { %v4640_v51 = vshll.u32 %v13875_v47, 16 }
 0x17c   : > { %12598 = vmatpush3.bf16.msra.mxu0 %v13833_v28  ;;  %13300 = vmatpush3.bf16.msra.mxu1 %v13834_v37  ;;  %v5985_v52 = vshll.u32 %v11866_v32, 16  ;;  %v16037_v54 = vpop.permute.xlu0 %4162  ;;  %v5983_v60 = vshrl.u32 %v11866_v32, 16  ;;  %v13859_v37 = vld [vmem:[%s18204_s1 + $0x18] sm:$0xff]   ;;  %v13861_v32 = vld [vmem:[%s18204_s1 + $0x50] sm:$0xff]  }
 0x17d   : > { %12599 = vmatprep.subr.bf16.mxu0 %v13837_v39  ;;  %13301 = vmatprep.subr.bf16.mxu1 %v14582_v5  ;;  %v16056_v4 = vpop.permute.xlu1 %4216  ;;  %v4642_v56 = vrot.slane %v4640_v51, 1 }
 0x17e   : > { %v5987_v41 = vrot.slane %v5985_v52, 1  ;;  %v4284_v13 = vsel %vm562_vm7, %v4282_v1, %v16056_v4  ;;  %v13863_v52 = vld [vmem:[%s18204_s1 + $0xa0] sm:$0xff]   ;;  %v4266_v1 = vsel %vm537_vm2, %v11642_v58, %v16005_v26 }
 0x17f   : > { %v4268_v26 = vsel %vm541_vm3, %v4266_v1, %v16021_v45 }
 0x180   : > { %12600 = vmatpush3.bf16.msra.mxu0 %v13838_v49  ;;  %13302 = vmatpush3.bf16.msra.mxu1 %v13839_v33  ;;  %v5988_v19 = vor.u32 %v5987_v41, %v5983_v60  ;;  %v16061_v6 = vpop.permute.xlu0 %4167  ;;  %v4638_v33 = vshrl.u32 %v13875_v47, 16  ;;  %v13865_v60 = vld [vmem:[%s18204_s1 + $0x8] sm:$0xff]   ;;  %v13881_v47 = vld [vmem:[%s18204_s1 + $0x60] sm:$0xff]  }
 0x181   : > { %12616 = vmatprep.subr.bf16.mxu0 %v13841_v3  ;;  %13303 = vmatprep.subr.bf16.mxu1 %v14582_v5  ;;  %v16078_v50 = vpop.permute.xlu1 %4228  ;;  %v13862_v3 = vld [vmem:[%s18204_s1 + $0x10] sm:$0xff]  }
 0x182   : > { %5989 = vrot.lane.b32.xlu1 %v5988_v19, %s18246_s22  ;;  %v4643_v59 = vor.u32 %v4642_v56, %v4638_v33  ;;  %v13867_v19 = vld [vmem:[%s18204_s1 + $0x40] sm:$0xff]  }
 0x183   : > { %v12415_v2 = vpop.f32.mrf.mxu0  ;;  %4064 = vmatmul.mubr.bf16.vlgmr.msra.gmra.mxu0 %v3807_v9 }
 0x184   : > { %12617 = vmatpush3.bf16.msra.mxu0 %v13844_v0  ;;  %13304 = vmatpush3.bf16.msra.mxu1 %v13843_v61  ;;  %v16085_v17 = vpop.permute.xlu0 %4233  ;;  %v13866_v61 = vld [vmem:[%s18204_s1 + $0x98] sm:$0xff]  }
 0x185   : > { %v12416_v14 = vpop.f32.mrf.mxu0  ;;  %12618 = vmatprep.subr.bf16.mxu0 %v13846_v44  ;;  %13305 = vmatprep.subr.bf16.mxu1 %v14582_v5  ;;  %v16096_v7 = vpop.permute.xlu1 %4245 }
 0x186   : > { %4528 = vmatprep.mubr.bf16.mxu0 %v4284_v13  ;;  %v12417_v10 = vadd.f32 %v12416_v14, %v12415_v2  ;;  %v13869_v13 = vld [vmem:[%s18204_s1 + $0x90] sm:$0xff]   ;;  %v13871_v14 = vld [vmem:[%s18204_s1 + $0x78] sm:$0xff]  }
 0x187   : > { %v12418_v18 = vpop.f32.mrf.mxu0 }
 0x188   : > { %12619 = vmatpush3.bf16.msra.mxu0 %v13849_v29  ;;  %13306 = vmatpush3.bf16.msra.mxu1 %v13848_v11  ;;  %v16101_v23 = vpop.permute.xlu0 %4250  ;;  %v1276_v24 = vadd.f32 %v12417_v10, %v15933_v31  ;;  %v4270_v10 = vsel %vm544_vm6, %v4268_v26, %v16037_v54  ;;  %v4287_v18 = vsel %vm551_vm1, %v16056_v4, %v16078_v50  ;;  %v13874_v54 = vld [vmem:[%s18204_s1 + $0x70] sm:$0xff]   ;;  %v13889_v26 = vld [vmem:[%s18204_s1 + $0xa0] sm:$0xff]  }
 0x189   : > { %v12419_v21 = vpop.f32.mrf.mxu0  ;;  %12620 = vmatprep.subr.bf16.mxu0 %v13851_v16  ;;  %13311 = vmatprep.subr.bf16.mxu1 %v14582_v5  ;;  %v16113_v28 = vpop.permute.xlu1 %4262  ;;  %v4272_v50 = vsel %vm547_vm4, %v4270_v10, %v16061_v6  ;;  %v13877_v6 = vld [vmem:[%s18204_s1 + $0x30] sm:$0xff]   ;;  %v13891_v10 = vld [vmem:[%s18204_s1 + $0x8] sm:$0xff]  }
 0x18a   : > { %v13873_v21 = vld [vmem:[%s18204_s1 + $0x38] sm:$0xff]  }
 0x18b   : > { %v1315_v27 = vpop.f32.mrf.mxu1  ;;  %13308 = vmatmul.mubr.bf16.vlgmr.msra.gmra.mxu1 %v3830_v38 }
 0x18c   : > { %12621 = vmatpush3.bf16.msra.mxu0 %v13852_v62  ;;  %v1316_v34 = vadd.f32 %v1315_v27, %v1276_v24  ;;  %13312 = vmatpush3.bf16.msra.mxu1 %v13853_v20  ;;  %v4648_v35 = vpop.permute.xlu0 %4647  ;;  %v13872_v20 = vld [vmem:[%s18204_s1 + $0x88] sm:$0xff]   ;;  %v4289_v24 = vsel %vm537_vm2, %v4287_v18, %v16085_v17  ;;  %v13892_v18 = vld [vmem:[%s18204_s1 + $0x98] sm:$0xff]  }
 0x18d   : > { %12622 = vmatprep.subr.bf16.mxu0 %v13855_v22  ;;  %v13189_v36 = vpop.f32.mrf.mxu1  ;;  %13313 = vmatprep.subr.bf16.mxu1 %v14582_v5  ;;  %v4660_v43 = vpop.permute.xlu1 %4659  ;;  %v4741_v63 = vsel %vm551_vm1, %v4643_v59, %v4648_v35  ;;  %v4291_v17 = vsel %vm557_vm5, %v4289_v24, %v16096_v7 }
 0x18e   : > { %13327 = vmatprep.mubr.msk.bf16.mxu1 %vm14590_vm0, %v14582_v5  ;;  %v1321_v39 = vmax.f32 %v1316_v34, 0.0  ;;  %v4743_v44 = vsel %vm541_vm3, %v4741_v63, %v4660_v43  ;;  %v4293_v7 = vsel %vm544_vm6, %v4291_v17, %v16101_v23 }
 0x18f   : > { %v1318_v42 = vpop.f32.mrf.mxu1 }
 0x190   : > { %12623 = vmatpush3.bf16.msra.mxu0 %v13856_v15  ;;  %v1322_v55 = vpack.c.bf16 %v1321_v39, %v1321_v39  ;;  %13314 = vmatpush3.bf16.msra.mxu1 %v13857_v30  ;;  %v16131_v48 = vpop.permute.xlu0 %4610  ;;  %v13876_v30 = vld [vmem:[%s18204_s1 + $0x80] sm:$0xff]   ;;  %v13879_v39 = vld [vmem:[%s18204_s1 + $0x28] sm:$0xff]  }
 0x191   : > { %12624 = vmatprep.subr.bf16.mxu0 %v13858_v12  ;;  %v13190_v49 = vpop.f32.mrf.mxu1  ;;  %13315 = vmatprep.subr.bf16.mxu1 %v14582_v5  ;;  %v4665_v46 = vpop.permute.xlu1 %4664  ;;  %v13878_v12 = vld [vmem:[%s18204_s1 + $0x68] sm:$0xff]  }
 0x192   : > { %1324 = vst.msk [vmem:[#allocation2 + $0x4] sm:$0x7] %vm858_vm8, %v1322_v55  ;;  %v4745_v11 = vsel %vm557_vm5, %v4743_v44, %v4665_v46  ;;  %v4295_v49 = vsel %vm562_vm7, %v4293_v7, %v16113_v28  ;;  %v13883_v46 = vld [vmem:[%s18204_s1 + $0xb0] sm:$0xff]  }
 0x194   : > { %12625 = vmatpush3.bf16.msra.mxu0 %v13859_v37  ;;  %13316 = vmatpush3.bf16.msra.mxu1 %v13860_v40  ;;  %v16149_v41 = vpop.permute.xlu0 %4615  ;;  %v13880_v40 = vld [vmem:[%s18204_s1 + $0xb8] sm:$0xff]  }
 0x195   : > { %12626 = vmatprep.subr.bf16.mxu0 %v13861_v32  ;;  %13317 = vmatprep.subr.bf16.mxu1 %v14582_v5  ;;  %v4677_v0 = vpop.permute.xlu1 %4676  ;;  %v13902_v32 = vld [vmem:[%s14722_s13 + $0xa8] ss:$0 sps:$4 sm:$0xff]  }
 0x196   : > { %v4747_v45 = vsel %vm547_vm4, %v4745_v11, %v4677_v0  ;;  %v5105_v33 = vshll.u32 %v13902_v32, 16  ;;  %v5103_v56 = vshrl.u32 %v13902_v32, 16  ;;  %v13886_v0 = vld [vmem:[%s18204_s1 + $0xa8] sm:$0xff]   ;;  %v13888_v11 = vld [vmem:[%s18204_s1 + $0x10] sm:$0xff]   ;;  %v13899_v32 = vld [vmem:[%s18204_s1 + $0x38] sm:$0xff]  }
 0x198   : > { %12627 = vmatpush3.bf16.msra.mxu0 %v13862_v3  ;;  %13318 = vmatpush3.bf16.msra.mxu1 %v13863_v52  ;;  %v16176_v16 = vpop.permute.xlu0 %4627  ;;  %v13882_v3 = vld [vmem:[%s18204_s1 + $0x20] sm:$0xff]  }
 0x199   : > { %12628 = vmatprep.subr.bf16.mxu0 %v13864_v57  ;;  %13319 = vmatprep.subr.bf16.mxu1 %v14582_v5  ;;  %v5976_v9 = vld [vmem:[#allocation2 + $0x4] sm:$0x7]  ;;  %v16171_v29 = vpop.permute.xlu1 %4681  ;;  %v5107_v57 = vrot.slane %v5105_v33, 1 }
 0x19a   : > { %v11867_v2 = vcombine.low %v5976_v9, %v5976_v9  ;;  %v4749_v4 = vsel %vm562_vm7, %v4747_v45, %v16171_v29  ;;  %v11698_v45 = vld [vmem:[%s14722_s13 + $0x90] sm:$0x7] }
 0x19b   : > { %v5108_v9 = vor.u32 %v5107_v57, %v5103_v56  ;;  %v13905_v57 = vld [vmem:[%s18204_s1 + $0x68] sm:$0xff]  }
 0x19c   : > { %12629 = vmatpush3.bf16.msra.mxu0 %v13865_v60  ;;  %13320 = vmatpush3.bf16.msra.mxu1 %v13866_v61  ;;  %v5997_v53 = vshll.u32 %v11867_v2, 16  ;;  %v5995_v62 = vshrl.u32 %v11867_v2, 16  ;;  %v16203_v15 = vpop.permute.xlu0 %4632  ;;  %v13885_v61 = vld [vmem:[%s18204_s1 + $0x18] sm:$0xff]  }
 0x19d   : > { %12630 = vmatprep.subr.bf16.mxu0 %v13867_v19  ;;  %13321 = vmatprep.subr.bf16.mxu1 %v14582_v5  ;;  %v13887_v19 = vld [vmem:[%s18204_s1 + $0x50] sm:$0xff]  }
 0x19e   : > { %v5999_v25 = vrot.slane %v5997_v53, 1 }
 0x1a0   : > { %12631 = vmatpush3.bf16.msra.mxu0 %v13868_v8  ;;  %13322 = vmatpush3.bf16.msra.mxu1 %v13869_v13  ;;  %v6000_v22 = vor.u32 %v5999_v25, %v5995_v62  ;;  %v16194_v38 = vpop.permute.xlu1 %4693  ;;  %v13890_v13 = vld [vmem:[%s18204_s1 + $0x48] sm:$0xff]  }
 0x1a1   : > { %12647 = vmatprep.subr.bf16.mxu0 %v13871_v14  ;;  %13323 = vmatprep.subr.bf16.mxu1 %v14582_v5  ;;  %v16228_v42 = vpop.permute.xlu0 %4698 }
 0x1a2   : > { %6001 = vrot.lane.b32.xlu0 %v6000_v22, %s18246_s22 }
 0x1a3   : > { %v12446_v27 = vpop.f32.mrf.mxu0  ;;  %4529 = vmatmul.mubr.bf16.vlgmr.msra.gmra.mxu0 %v4272_v50 }
 0x1a4   : > { %12648 = vmatpush3.bf16.msra.mxu0 %v13873_v21  ;;  %4993 = vmatprep.mubr.bf16.mxu0 %v4749_v4  ;;  %v16217_v35 = vpop.permute.xlu1 %4710  ;;  %v13893_v21 = vld [vmem:[%s18204_s1 + $0x40] sm:$0xff]  }
 0x1a5   : > { %13324 = vmatpush3.bf16.msra.mxu1 %v13872_v20  ;;  %v12447_v34 = vpop.f32.mrf.mxu0  ;;  %12649 = vmatprep.subr.bf16.mxu0 %v13874_v54  ;;  %v16250_v59 = vpop.permute.xlu0 %4715  ;;  %v4731_v20 = vsel %vm537_vm2, %v11698_v45, %v16131_v48  ;;  %v13894_v48 = vld [vmem:[%s18204_s1] sm:$0xff]  }
 0x1a6   : > { %13325 = vmatprep.subr.bf16.mxu1 %v14582_v5  ;;  %v12448_v36 = vadd.f32 %v12447_v34, %v12446_v27  ;;  %v13897_v34 = vld [vmem:[%s18204_s1 + $0x78] sm:$0xff]  }
 0x1a7   : > { %v12449_v37 = vpop.f32.mrf.mxu0 }
 0x1a8   : > { %12650 = vmatpush3.bf16.msra.mxu0 %v13877_v6  ;;  %v16233_v55 = vpop.permute.xlu1 %4727  ;;  %v1741_v23 = vadd.f32 %v12448_v36, %v15933_v31  ;;  %v13884_v31 = vld [vmem:[%s18204_s1 + $0x58] sm:$0xff]   ;;  %v13895_v6 = vld [vmem:[%s18204_s1 + $0x90] sm:$0xff]  }
 0x1a9   : > { %13326 = vmatpush3.bf16.msra.mxu1 %v13876_v30  ;;  %v12450_v43 = vpop.f32.mrf.mxu0  ;;  %12651 = vmatprep.subr.bf16.mxu0 %v13878_v12  ;;  %v5113_v2 = vpop.permute.xlu0 %5112  ;;  %v4733_v30 = vsel %vm541_vm3, %v4731_v20, %v16149_v41 }
 0x1aa   : > { %13331 = vmatprep.subr.bf16.mxu1 %v14582_v5  ;;  %v5206_v14 = vsel %vm551_vm1, %v5108_v9, %v5113_v2  ;;  %v4735_v7 = vsel %vm544_vm6, %v4733_v30, %v16176_v16 }
 0x1ab   : > { %v1780_v51 = vpop.f32.mrf.mxu1  ;;  %v4737_v33 = vsel %vm547_vm4, %v4735_v7, %v16203_v15  ;;  %v13904_v15 = vld [vmem:[%s18204_s1 + $0x30] sm:$0xff]   ;;  %v11754_v7 = vld [vmem:[%s14722_s13 + $0xa0] sm:$0x7] }
 0x1ac   : > { %13328 = vmatmul.mubr.bf16.vlgmr.msra.gmra.mxu1 %v4295_v49  ;;  %12652 = vmatpush3.bf16.msra.mxu0 %v13879_v39  ;;  %v1781_v52 = vadd.f32 %v1780_v51, %v1741_v23  ;;  %v5125_v28 = vpop.permute.xlu1 %5124  ;;  %v4752_v39 = vsel %vm551_vm1, %v16171_v29, %v16194_v38  ;;  %v13901_v29 = vld [vmem:[%s18204_s1 + $0x70] sm:$0xff]  }
 0x1ad   : > { %13332 = vmatpush3.bf16.msra.mxu1 %v13880_v40  ;;  %12653 = vmatprep.subr.bf16.mxu0 %v13881_v47  ;;  %v13209_v58 = vpop.f32.mrf.mxu1  ;;  %v5208_v62 = vsel %vm541_vm3, %v5206_v14, %v5125_v28  ;;  %v16284_v25 = vpop.permute.xlu0 %5075  ;;  %v13898_v47 = vld [vmem:[%s18204_s1 + $0x88] sm:$0xff]   ;;  %v4754_v51 = vsel %vm537_vm2, %v4752_v39, %v16228_v42  ;;  %v13910_v14 = vld [vmem:[%s18204_s1 + $0xb0] sm:$0xff]  }
 0x1ae   : > { %13333 = vmatprep.subr.bf16.mxu1 %v14582_v5  ;;  %13347 = vmatprep.mubr.msk.bf16.mxu1 %vm14590_vm0, %v14582_v5  ;;  %v1786_v60 = vmax.f32 %v1781_v52, 0.0  ;;  %v4756_v42 = vsel %vm557_vm5, %v4754_v51, %v16217_v35  ;;  %v16357_v35 = vld [vmem:[%s18205_s2] ss:$0 sm:$0xff] }
 0x1af   : > { %v1783_v63 = vpop.f32.mrf.mxu1 }
 0x1b0   : > { %12654 = vmatpush3.bf16.msra.mxu0 %v13882_v3  ;;  %v1787_v1 = vpack.c.bf16 %v1786_v60, %v1786_v60  ;;  %v5130_v44 = vpop.permute.xlu1 %5129  ;;  %v13928_v60 = vld [vmem:[%s14722_s13 + $0xb8] ss:$0 sps:$4 sm:$0xff]  }
 0x1b1   : > { %13334 = vmatpush3.bf16.msra.mxu1 %v13883_v46  ;;  %12655 = vmatprep.subr.bf16.mxu0 %v13884_v31  ;;  %v13210_v8 = vpop.f32.mrf.mxu1  ;;  %v5210_v27 = vsel %vm557_vm5, %v5208_v62, %v5130_v44  ;;  %v16308_v41 = vpop.permute.xlu0 %5080  ;;  %v13903_v31 = vld [vmem:[%s18204_s1 + $0x80] sm:$0xff]   ;;  %v5570_v2 = vshll.u32 %v13928_v60, 16  ;;  %v5568_v62 = vshrl.u32 %v13928_v60, 16 }
 0x1b2   : > { %13335 = vmatprep.subr.bf16.mxu1 %v14582_v5  ;;  %1789 = vst.msk [vmem:[#allocation2 + $0x8] sm:$0x7] %vm858_vm8, %v1787_v1  ;;  %v4758_v1 = vsel %vm544_vm6, %v4756_v42, %v16250_v59  ;;  %v13908_v8 = vld [vmem:[%s18204_s1 + $0x60] sm:$0xff]  }
 0x1b3   : > { %v4760_v59 = vsel %vm562_vm7, %v4758_v1, %v16233_v55  ;;  %v13911_v55 = vld [vmem:[%s18204_s1 + $0x58] sm:$0xff]   ;;  %v5572_v20 = vrot.slane %v5570_v2, 1 }
 0x1b4   : > { %12656 = vmatpush3.bf16.msra.mxu0 %v13885_v61  ;;  %v5142_v53 = vpop.permute.xlu1 %5141  ;;  %v13926_v1 = vld [vmem:[%s18204_s1 + $0x38] sm:$0xff]  }
 0x1b5   : > { %13336 = vmatpush3.bf16.msra.mxu1 %v13886_v0  ;;  %12657 = vmatprep.subr.bf16.mxu0 %v13887_v19  ;;  %v5212_v37 = vsel %vm547_vm4, %v5210_v27, %v5142_v53  ;;  %v16326_v16 = vpop.permute.xlu0 %5092  ;;  %v13906_v0 = vld [vmem:[%s18204_s1 + $0x28] sm:$0xff]   ;;  %v13907_v19 = vld [vmem:[%s18204_s1 + $0xb8] sm:$0xff]   ;;  %v13914_v27 = vld [vmem:[%s18204_s1 + $0x50] sm:$0xff]  }
 0x1b6   : > { %13337 = vmatprep.subr.bf16.mxu1 %v14582_v5 }
 0x1b8   : > { %12658 = vmatpush3.bf16.msra.mxu0 %v13888_v11  ;;  %v16291_v22 = vpop.permute.xlu1 %5146 }
 0x1b9   : > { %13338 = vmatpush3.bf16.msra.mxu1 %v13889_v26  ;;  %12659 = vmatprep.subr.bf16.mxu0 %v13890_v13  ;;  %v5977_v54 = vld [vmem:[#allocation2 + $0x8] sm:$0x7]  ;;  %v5214_v38 = vsel %vm562_vm7, %v5212_v37, %v16291_v22  ;;  %v16350_v58 = vpop.permute.xlu0 %5097  ;;  %v13909_v26 = vld [vmem:[%s18204_s1 + $0x20] sm:$0xff]  }
 0x1ba   : > { %13339 = vmatprep.subr.bf16.mxu1 %v14582_v5  ;;  %v6394_v4 = vld [vmem:[#allocation2 + $0x8] sm:$0x7]  ;;  %v11868_v50 = vcombine.low %v5977_v54, %v5977_v54  ;;  %v13912_v54 = vld [vmem:[%s18204_s1 + $0x18] sm:$0xff]  }
 0x1bb   : > { %v11903_v24 = vcombine.low %v6394_v4, %v6394_v4  ;;  %v13917_v37 = vld [vmem:[%s18204_s1 + $0x48] sm:$0xff]  }
 0x1bc   : > { %12660 = vmatpush3.bf16.msra.mxu0 %v13891_v10  ;;  %v6009_v17 = vshll.u32 %v11868_v50, 16  ;;  %v16306_v36 = vpop.permute.xlu1 %5158  ;;  %v6007_v40 = vshrl.u32 %v11868_v50, 16  ;;  %v13913_v50 = vld [vmem:[%s18204_s1 + $0xa8] sm:$0xff]  }
 0x1bd   : > { %13340 = vmatpush3.bf16.msra.mxu1 %v13892_v18  ;;  %12661 = vmatprep.subr.bf16.mxu0 %v13893_v21  ;;  %v6404_v12 = vshll.u32 %v11903_v24, 16  ;;  %v6402_v46 = vshrl.u32 %v11903_v24, 16  ;;  %v16379_v13 = vpop.permute.xlu0 %5163 }
 0x1be   : > { %13341 = vmatprep.subr.bf16.mxu1 %v14582_v5  ;;  %v6011_v43 = vrot.slane %v6009_v17, 1  ;;  %v13915_v17 = vld [vmem:[%s18204_s1 + $0x10] sm:$0xff]  }
 0x1bf   : > { %v6406_v49 = vrot.slane %v6404_v12, 1 }
 0x1c0   : > { %12662 = vmatpush3.bf16.msra.mxu0 %v13894_v48  ;;  %v6012_v23 = vor.u32 %v6011_v43, %v6007_v40  ;;  %v16335_v3 = vpop.permute.xlu1 %5175  ;;  %v13918_v43 = vld [vmem:[%s18204_s1 + $0x8] sm:$0xff]  }
 0x1c1   : > { %13342 = vmatpush3.bf16.msra.mxu1 %v13895_v6  ;;  %12678 = vmatprep.subr.bf16.mxu0 %v13897_v34  ;;  %v6407_v56 = vor.u32 %v6406_v49, %v6402_v46  ;;  %v16399_v30 = vpop.permute.xlu0 %5180  ;;  %v5573_v6 = vor.u32 %v5572_v20, %v5568_v62  ;;  %v13916_v34 = vld [vmem:[%s18204_s1 + $0xa0] sm:$0xff]   ;;  %v13933_v62 = vld [vmem:[%s18204_s1 + $0x28] sm:$0xff]   ;;  %v13934_v20 = vld [vmem:[%s18204_s1 + $0xb8] sm:$0xff]  }
 0x1c2   : > { %13343 = vmatprep.subr.bf16.mxu1 %v14582_v5  ;;  %6013 = vrot.lane.b32.xlu1 %v6012_v23, %s18246_s22  ;;  %v5196_v23 = vsel %vm537_vm2, %v11754_v7, %v16284_v25  ;;  %v13920_v49 = vld [vmem:[%s18204_s1 + $0x40] sm:$0xff]  }
 0x1c3   : > { %v12477_v52 = vpop.f32.mrf.mxu0  ;;  %4994 = vmatmul.mubr.bf16.vlgmr.msra.gmra.mxu0 %v4737_v33  ;;  %v13921_v25 = vld [vmem:[%s18204_s1] sm:$0xff]  }
 0x1c4   : > { %12679 = vmatpush3.bf16.msra.mxu0 %v13899_v32  ;;  %5458 = vmatprep.mubr.bf16.mxu0 %v5214_v38  ;;  %v16367_v44 = vpop.permute.xlu1 %5192 }
 0x1c5   : > { %13344 = vmatpush3.bf16.msra.mxu1 %v13898_v47  ;;  %v12478_v28 = vpop.f32.mrf.mxu0  ;;  %12680 = vmatprep.subr.bf16.mxu0 %v13901_v29  ;;  %v5578_v39 = vpop.permute.xlu0 %5577  ;;  %v13919_v47 = vld [vmem:[%s18204_s1 + $0x98] sm:$0xff]  }
 0x1c6   : > { %13345 = vmatprep.subr.bf16.mxu1 %v14582_v5  ;;  %v12479_v61 = vadd.f32 %v12478_v28, %v12477_v52  ;;  %6408 = vrot.lane.b32.xlu1 %v6407_v56, %s18246_s22  ;;  %v5671_v40 = vsel %vm551_vm1, %v5573_v6, %v5578_v39  ;;  %v13924_v28 = vld [vmem:[%s18204_s1 + $0x78] sm:$0xff]   ;;  %v13940_v39 = vld [vmem:[%s18204_s1 + $0xa8] sm:$0xff]  }
 0x1c7   : > { %v12480_v63 = vpop.f32.mrf.mxu0 }
 0x1c8   : > { %12681 = vmatpush3.bf16.msra.mxu0 %v13904_v15  ;;  %v2206_v11 = vadd.f32 %v12479_v61, %v16357_v35  ;;  %v5590_v18 = vpop.permute.xlu1 %5589  ;;  %v13922_v15 = vld [vmem:[%s18204_s1 + $0x90] sm:$0xff]  }
 0x1c9   : > { %13346 = vmatpush3.bf16.msra.mxu1 %v13903_v31  ;;  %v12481_v9 = vpop.f32.mrf.mxu0  ;;  %12682 = vmatprep.subr.bf16.mxu0 %v13905_v57  ;;  %v5673_v32 = vsel %vm541_vm3, %v5671_v40, %v5590_v18  ;;  %v5198_v31 = vsel %vm541_vm3, %v5196_v23, %v16308_v41  ;;  %v5217_v57 = vsel %vm551_vm1, %v16291_v22, %v16306_v36  ;;  %v13929_v36 = vld [vmem:[%s18204_s1 + $0x70] sm:$0xff]   ;;  %v13943_v23 = vld [vmem:[%s18204_s1 + $0xa0] sm:$0xff]  }
 0x1ca   : > { %13351 = vmatprep.subr.bf16.mxu1 %v14582_v5  ;;  %v5200_v60 = vsel %vm544_vm6, %v5198_v31, %v16326_v16  ;;  %v5219_v2 = vsel %vm537_vm2, %v5217_v57, %v16379_v13  ;;  %v13941_v40 = vld [vmem:[%s18204_s1 + $0x50] sm:$0xff]  }
 0x1cb   : > { %v2245_v53 = vpop.f32.mrf.mxu1 }
 0x1cc   : > { %13348 = vmatmul.mubr.bf16.vlgmr.msra.gmra.mxu1 %v4760_v59  ;;  %12683 = vmatpush3.bf16.msra.mxu0 %v13906_v0  ;;  %v2246_v45 = vadd.f32 %v2245_v53, %v2206_v11  ;;  %v5595_v12 = vpop.permute.xlu1 %5594  ;;  %v13925_v0 = vld [vmem:[%s18204_s1 + $0x88] sm:$0xff]   ;;  %v13931_v53 = vld [vmem:[%s18204_s1 + $0x30] sm:$0xff]  }
 0x1cd   : > { %13352 = vmatpush3.bf16.msra.mxu1 %v13907_v19  ;;  %12684 = vmatprep.subr.bf16.mxu0 %v13908_v8  ;;  %v13229_v10 = vpop.f32.mrf.mxu1  ;;  %v5675_v46 = vsel %vm557_vm5, %v5673_v32, %v5595_v12  ;;  %v5202_v8 = vsel %vm547_vm4, %v5200_v60, %v16350_v58  ;;  %v5221_v58 = vsel %vm557_vm5, %v5219_v2, %v16335_v3  ;;  %v13939_v12 = vld [vmem:[%s18204_s1 + $0x18] sm:$0xff]   ;;  %v13942_v32 = vld [vmem:[%s18204_s1 + $0x10] sm:$0xff]  }
 0x1ce   : > { %13353 = vmatprep.subr.bf16.mxu1 %v14582_v5  ;;  %13367 = vmatprep.mubr.msk.bf16.mxu1 %vm14590_vm0, %v14582_v5  ;;  %v2251_v21 = vmax.f32 %v2246_v45, 0.0  ;;  %v13932_v45 = vld [vmem:[%s18204_s1 + $0x68] sm:$0xff]   ;;  %v5223_v3 = vsel %vm544_vm6, %v5221_v58, %v16399_v30  ;;  %v13937_v30 = vld [vmem:[%s18204_s1 + $0xb0] sm:$0xff]   ;;  %v13951_v60 = vld [vmem:[%s18206_s3 + $0x78] sm:$0xff]  }
 0x1cf   : > { %v2248_v4 = vpop.f32.mrf.mxu1 }
 0x1d0   : > { %12685 = vmatpush3.bf16.msra.mxu0 %v13909_v26  ;;  %v2252_v24 = vpack.c.bf16 %v2251_v21, %v2251_v21  ;;  %v5607_v29 = vpop.permute.xlu1 %5606  ;;  %v13930_v26 = vld [vmem:[%s18204_s1 + $0x80] sm:$0xff]   ;;  %v5541_v18 = vpop.permute.xlu0 %5540 }
 0x1d1   : > { %13354 = vmatpush3.bf16.msra.mxu1 %v13910_v14  ;;  %12686 = vmatprep.subr.bf16.mxu0 %v13911_v55  ;;  %v13230_v48 = vpop.f32.mrf.mxu1  ;;  %v5677_v41 = vsel %vm547_vm4, %v5675_v46, %v5607_v29  ;;  %v11810_v29 = vld [vmem:[%s14722_s13 + $0xb0] sm:$0x7]  ;;  %v13947_v46 = vld [vmem:[%s18204_s1 + $0x40] sm:$0xff]  }
 0x1d2   : > { %13355 = vmatprep.subr.bf16.mxu1 %v14582_v5  ;;  %2254 = vst.msk [vmem:[#allocation2 + $0xc] sm:$0x7] %vm858_vm8, %v2252_v24  ;;  %v13936_v24 = vld [vmem:[%s18204_s1 + $0x20] sm:$0xff]  }
 0x1d4   : > { %12687 = vmatpush3.bf16.msra.mxu0 %v13912_v54  ;;  %v16453_v19 = vpop.permute.xlu1 %5611  ;;  %v13935_v54 = vld [vmem:[%s18204_s1 + $0x60] sm:$0xff]   ;;  %v5546_v6 = vpop.permute.xlu0 %5545 }
 0x1d5   : > { %13356 = vmatpush3.bf16.msra.mxu1 %v13913_v50  ;;  %12688 = vmatprep.subr.bf16.mxu0 %v13914_v27  ;;  %v5679_v16 = vsel %vm562_vm7, %v5677_v41, %v16453_v19  ;;  %v5225_v50 = vsel %vm562_vm7, %v5223_v3, %v16367_v44  ;;  %v13949_v41 = vld [vmem:[%s18204_s1 + $0x90] sm:$0xff]   ;;  %v13958_v3 = vld [vmem:[%s18206_s3 + $0x68] sm:$0xff]  }
 0x1d6   : > { %13357 = vmatprep.subr.bf16.mxu1 %v14582_v5 }
 0x1d8   : > { %12689 = vmatpush3.bf16.msra.mxu0 %v13915_v17  ;;  %v13938_v17 = vld [vmem:[%s18204_s1 + $0x58] sm:$0xff]  }
 0x1d9   : > { %13358 = vmatpush3.bf16.msra.mxu1 %v13916_v34  ;;  %12690 = vmatprep.subr.bf16.mxu0 %v13917_v37  ;;  %v5978_v38 = vld [vmem:[#allocation2 + $0xc] sm:$0x7] }
 0x1da   : > { %13359 = vmatprep.subr.bf16.mxu1 %v14582_v5  ;;  %v6395_v33 = vld [vmem:[#allocation2 + $0xc] sm:$0x7]  ;;  %v11869_v51 = vcombine.low %v5978_v38, %v5978_v38 }
 0x1db   : > { %v11904_v52 = vcombine.low %v6395_v33, %v6395_v33  ;;  %v13945_v38 = vld [vmem:[%s18204_s1 + $0x8] sm:$0xff]   ;;  %v13946_v33 = vld [vmem:[%s18204_s1 + $0x98] sm:$0xff]  }
 0x1dc   : > { %12691 = vmatpush3.bf16.msra.mxu0 %v13918_v43  ;;  %v6021_v42 = vshll.u32 %v11869_v51, 16  ;;  %v6019_v61 = vshrl.u32 %v11869_v51, 16  ;;  %v5661_v51 = vsel %vm537_vm2, %v11810_v29, %v5541_v18  ;;  %v13980_v29 = vld [vmem:[%s18206_s3 + $0xa8] sm:$0xff]  }
 0x1dd   : > { %13360 = vmatpush3.bf16.msra.mxu1 %v13919_v47  ;;  %12692 = vmatprep.subr.bf16.mxu0 %v13920_v49  ;;  %v6416_v56 = vshll.u32 %v11904_v52, 16  ;;  %v6414_v59 = vshrl.u32 %v11904_v52, 16  ;;  %v5558_v47 = vpop.permute.xlu0 %5557  ;;  %v13944_v49 = vld [vmem:[%s18204_s1 + $0x48] sm:$0xff]  }
 0x1de   : > { %13361 = vmatprep.subr.bf16.mxu1 %v14582_v5  ;;  %v6023_v63 = vrot.slane %v6021_v42, 1 }
 0x1df   : > { %v6418_v22 = vrot.slane %v6416_v56, 1  ;;  %v13948_v56 = vld [vmem:[%s18204_s1] sm:$0xff]  }
 0x1e0   : > { %12693 = vmatpush3.bf16.msra.mxu0 %v13921_v25  ;;  %v6024_v9 = vor.u32 %v6023_v63, %v6019_v61  ;;  %v5624_v63 = vpop.permute.xlu1 %5623 }
 0x1e1   : > { %13362 = vmatpush3.bf16.msra.mxu1 %v13922_v15  ;;  %12709 = vmatprep.subr.bf16.mxu0 %v13924_v28  ;;  %v6419_v14 = vor.u32 %v6418_v22, %v6414_v59  ;;  %v5563_v52 = vpop.permute.xlu0 %5562  ;;  %v5663_v28 = vsel %vm541_vm3, %v5661_v51, %v5546_v6  ;;  %v13974_v6 = vld [vmem:[%s18206_s3 + $0xf0] sm:$0xff]  }
 0x1e2   : > { %13363 = vmatprep.subr.bf16.mxu1 %v14582_v5  ;;  %6025 = vrot.lane.b32.xlu0 %v6024_v9, %s18246_s22  ;;  %v13965_v51 = vld [vmem:[%s18206_s3 + $0x10] sm:$0xff]  }
 0x1e3   : > { %v12508_v11 = vpop.f32.mrf.mxu0  ;;  %5459 = vmatmul.mubr.bf16.vlgmr.msra.gmra.mxu0 %v5202_v8  ;;  %v13953_v8 = vld [vmem:[%s18206_s3 + $0x38] sm:$0xff]  }
 0x1e4   : > { %12710 = vmatpush3.bf16.msra.mxu0 %v13926_v1  ;;  %5923 = vmatprep.mubr.bf16.mxu0 %v5679_v16  ;;  %v5665_v1 = vsel %vm544_vm6, %v5663_v28, %v5558_v47  ;;  %v13952_v16 = vld [vmem:[%s18204_s1 + $0x88] sm:$0xff]   ;;  %v13963_v47 = vld [vmem:[%s18206_s3 + $0x18] sm:$0xff]  }
 0x1e5   : > { %13364 = vmatpush3.bf16.msra.mxu1 %v13925_v0  ;;  %v12509_v13 = vpop.f32.mrf.mxu0  ;;  %12711 = vmatprep.subr.bf16.mxu0 %v13929_v36  ;;  %v5682_v0 = vsel %vm551_vm1, %v16453_v19, %v5624_v63  ;;  %v5629_v9 = vpop.permute.xlu0 %5628  ;;  %v13955_v19 = vld [vmem:[%s18206_s3 + $0x70] sm:$0xff]   ;;  %v5667_v59 = vsel %vm547_vm4, %v5665_v1, %v5563_v52  ;;  %v13966_v52 = vld [vmem:[%s18206_s3 + $0x48] sm:$0xff]   ;;  %v13988_v28 = vld [vmem:[%s18206_s3 + $0xd8] sm:$0xff]  }
 0x1e6   : > { %13365 = vmatprep.subr.bf16.mxu1 %v14582_v5  ;;  %v12510_v55 = vadd.f32 %v12509_v13, %v12508_v11  ;;  %6420 = vrot.lane.b32.xlu0 %v6419_v14, %s18246_s22  ;;  %v13956_v13 = vld [vmem:[%s18204_s1 + $0x80] sm:$0xff]   ;;  %v5641_v14 = vpop.permute.xlu1 %5640 }
 0x1e7   : > { %v12511_v10 = vpop.f32.mrf.mxu0  ;;  %v13969_v1 = vld [vmem:[%s18206_s3] sm:$0xff]  }
 0x1e8   : > { %12712 = vmatpush3.bf16.msra.mxu0 %v13931_v53  ;;  %v2671_v4 = vadd.f32 %v12510_v55, %v16357_v35 }
 0x1e9   : > { %13366 = vmatpush3.bf16.msra.mxu1 %v13930_v26  ;;  %v12512_v21 = vpop.f32.mrf.mxu0  ;;  %12713 = vmatprep.subr.bf16.mxu0 %v13932_v45  ;;  %v5684_v26 = vsel %vm537_vm2, %v5682_v0, %v5629_v9  ;;  %v13957_v45 = vld [vmem:[%s18206_s3 + $0x30] sm:$0xff]   ;;  %v5646_v55 = vpop.permute.xlu0 %5645 }
 0x1ea   : > { %13371 = vmatprep.subr.bf16.mxu1 %v14582_v5  ;;  %v5686_v10 = vsel %vm557_vm5, %v5684_v26, %v5641_v14  ;;  %v13979_v26 = vld [vmem:[%s18206_s3 + $0x70] sm:$0xff]   ;;  %v14501_v14 = vld [vmem:[#allocation2] sm:$0x7] }
 0x1eb   : > { %v2710_v27 = vpop.f32.mrf.mxu1 }
 0x1ec   : > { %13368 = vmatmul.mubr.bf16.vlgmr.msra.gmra.mxu1 %v5225_v50  ;;  %12714 = vmatpush3.bf16.msra.mxu0 %v13933_v62  ;;  %v2711_v48 = vadd.f32 %v2710_v27, %v2671_v4  ;;  %v13959_v4 = vld [vmem:[%s18206_s3 + $0x28] sm:$0xff]   ;;  %v5688_v50 = vsel %vm544_vm6, %v5686_v10, %v5646_v55  ;;  %v14000_v55 = vld [vmem:[%s18206_s3 + $0xc0] sm:$0xff]  }
 0x1ed   : > { %13372 = vmatpush3.bf16.msra.mxu1 %v13934_v20  ;;  %12715 = vmatprep.subr.bf16.mxu0 %v13935_v54  ;;  %v13249_v44 = vpop.f32.mrf.mxu1  ;;  %v13972_v20 = vld [vmem:[%s18206_s3 + $0xf8] sm:$0xff]  }
 0x1ee   : > { %13373 = vmatprep.subr.bf16.mxu1 %v14582_v5  ;;  %13387 = vmatprep.mubr.msk.bf16.mxu1 %vm14590_vm0, %v14582_v5  ;;  %v2716_v34 = vmax.f32 %v2711_v48, 0.0  ;;  %v5658_v48 = vpop.permute.xlu1 %5657 }
 0x1ef   : > { %v2713_v37 = vpop.f32.mrf.mxu1  ;;  %v5690_v44 = vsel %vm562_vm7, %v5688_v50, %v5658_v48  ;;  %v13989_v48 = vld [vmem:[%s18206_s3 + $0x60] sm:$0xff]  }
 0x1f0   : > { %12716 = vmatpush3.bf16.msra.mxu0 %v13936_v24  ;;  %v2717_v7 = vpack.c.bf16 %v2716_v34, %v2716_v34  ;;  %v13960_v24 = vld [vmem:[%s18206_s3 + $0x60] sm:$0xff]   ;;  %v13962_v37 = vld [vmem:[%s18206_s3 + $0x58] sm:$0xff]  }
 0x1f1   : > { %13374 = vmatpush3.bf16.msra.mxu1 %v13937_v30  ;;  %12717 = vmatprep.subr.bf16.mxu0 %v13938_v17  ;;  %v13250_v43 = vpop.f32.mrf.mxu1  ;;  %v13973_v30 = vld [vmem:[%s18206_s3 + $0xb8] sm:$0xff]   ;;  %v13961_v34 = vld [vmem:[%s18206_s3 + $0x20] sm:$0xff]  }
 0x1f2   : > { %13375 = vmatprep.subr.bf16.mxu1 %v14582_v5  ;;  %2719 = vst.msk [vmem:[#allocation2 + $0x10] sm:$0x7] %vm858_vm8, %v2717_v7 }
 0x1f4   : > { %12718 = vmatpush3.bf16.msra.mxu0 %v13939_v12 }
 0x1f5   : > { %13376 = vmatpush3.bf16.msra.mxu1 %v13940_v39  ;;  %12719 = vmatprep.subr.bf16.mxu0 %v13941_v40  ;;  %v13978_v40 = vld [vmem:[%s18206_s3 + $0xe8] sm:$0xff]  }
 0x1f6   : > { %13377 = vmatprep.subr.bf16.mxu1 %v14582_v5 }
 0x1f8   : > { %12720 = vmatpush3.bf16.msra.mxu0 %v13942_v32 }
 0x1f9   : > { %13378 = vmatpush3.bf16.msra.mxu1 %v13943_v23  ;;  %12721 = vmatprep.subr.bf16.mxu0 %v13944_v49  ;;  %v6396_v31 = vld [vmem:[#allocation2 + $0x10] sm:$0x7] }
 0x1fa   : > { %13379 = vmatprep.subr.bf16.mxu1 %v14582_v5  ;;  %v6811_v25 = vld [vmem:[#allocation2 + $0x10] sm:$0x7]  ;;  %v11905_v15 = vcombine.low %v6396_v31, %v6396_v31  ;;  %v13985_v31 = vld [vmem:[%s18206_s3 + $0xa0] sm:$0xff]  }
 0x1fb   : > { %v11940_v42 = vcombine.low %v6811_v25, %v6811_v25  ;;  %v13964_v23 = vld [vmem:[%s18206_s3 + $0x50] sm:$0xff]   ;;  %v14500_v25 = vld [vmem:[#allocation2 + $0x4] sm:$0x7] }
 0x1fc   : > { %12722 = vmatpush3.bf16.msra.mxu0 %v13945_v38  ;;  %v6428_v57 = vshll.u32 %v11905_v15, 16  ;;  %v6426_v22 = vshrl.u32 %v11905_v15, 16 }
 0x1fd   : > { %13380 = vmatpush3.bf16.msra.mxu1 %v13946_v33  ;;  %12723 = vmatprep.subr.bf16.mxu0 %v13947_v46  ;;  %v6821_v61 = vshll.u32 %v11940_v42, 16  ;;  %v6819_v58 = vshrl.u32 %v11940_v42, 16  ;;  %v13983_v33 = vld [vmem:[%s18206_s3 + $0xe0] sm:$0xff]   ;;  %v13967_v42 = vld [vmem:[%s18206_s3 + $0x8] sm:$0xff]  }
 0x1fe   : > { %13381 = vmatprep.subr.bf16.mxu1 %v14582_v5  ;;  %v6430_v36 = vrot.slane %v6428_v57, 1  ;;  %v13992_v57 = vld [vmem:[%s18206_s3 + $0xd0] sm:$0xff]  }
 0x1ff   : > { %v6823_v11 = vrot.slane %v6821_v61, 1 }
 0x200   : > { %12724 = vmatpush3.bf16.msra.mxu0 %v13948_v56  ;;  %v6431_v2 = vor.u32 %v6430_v36, %v6426_v22  ;;  %v13968_v56 = vld [vmem:[%s18206_s3 + $0x40] sm:$0xff]   ;;  %v13975_v36 = vld [vmem:[%s18206_s3 + $0x78] sm:$0xff]  }
 0x201   : > { %13382 = vmatpush3.bf16.msra.mxu1 %v13949_v41  ;;  %12740 = vmatprep.subr.bf16.mxu0 %v13951_v60  ;;  %v6824_v62 = vor.u32 %v6823_v11, %v6819_v58  ;;  %v13990_v41 = vld [vmem:[%s18206_s3 + $0x98] sm:$0xff]  }
 0x202   : > { %13383 = vmatprep.subr.bf16.mxu1 %v14582_v5  ;;  %6432 = vrot.lane.b32.xlu1 %v6431_v2, %s18246_s22  ;;  %v5990_v2 = vpop.permute.xlu1 %5989 }
 0x203   : > { %v12539_v53 = vpop.f32.mrf.mxu0  ;;  %5924 = vmatmul.mubr.bf16.vlgmr.msra.gmra.mxu0 %v5667_v59  ;;  %v13977_v59 = vld [vmem:[%s18206_s3 + $0x38] sm:$0xff]  }
 0x204   : > { %12741 = vmatpush3.bf16.msra.mxu0 %v13953_v8  ;;  %v13996_v8 = vld [vmem:[%s18206_s3 + $0xc8] sm:$0xff]  }
 0x205   : > { %13384 = vmatpush3.bf16.msra.mxu1 %v13952_v16  ;;  %v12540_v18 = vpop.f32.mrf.mxu0  ;;  %12742 = vmatprep.subr.bf16.mxu0 %v13955_v19  ;;  %v13994_v16 = vld [vmem:[%s18206_s3 + $0x90] sm:$0xff]  }
 0x206   : > { %13385 = vmatprep.subr.bf16.mxu1 %v14582_v5  ;;  %v12541_v21 = vadd.f32 %v12540_v18, %v12539_v53  ;;  %6825 = vrot.lane.b32.xlu1 %v6824_v62, %s18246_s22  ;;  %v13981_v62 = vld [vmem:[%s18206_s3 + $0x30] sm:$0xff]  }
 0x207   : > { %v12542_v54 = vpop.f32.mrf.mxu0 }
 0x208   : > { %12743 = vmatpush3.bf16.msra.mxu0 %v13957_v45  ;;  %v3136_v17 = vadd.f32 %v12541_v21, %v16357_v35  ;;  %v13976_v35 = vld [vmem:[%s18206_s3 + $0xb0] sm:$0xff]   ;;  %v6029_v45 = vsel %vm557_vm5, %v14501_v14, %v5990_v2  ;;  %v14002_v54 = vld [vmem:[%s18206_s3 + $0x80] sm:$0xff]  }
 0x209   : > { %13386 = vmatpush3.bf16.msra.mxu1 %v13956_v13  ;;  %v12543_v27 = vpop.f32.mrf.mxu0  ;;  %12744 = vmatprep.subr.bf16.mxu0 %v13958_v3  ;;  %v13998_v13 = vld [vmem:[%s18206_s3 + $0x88] sm:$0xff]  }
 0x20a   : > { %12762 = vmatprep.subr.bf16.mxu1 %v13972_v20  ;;  %v13984_v3 = vld [vmem:[%s18206_s3 + $0x68] sm:$0xff]  }
 0x20b   : > { %v3175_v12 = vpop.f32.mrf.mxu1  ;;  %v13986_v27 = vld [vmem:[%s18206_s3 + $0x28] sm:$0xff]  }
 0x20c   : > { %13388 = vmatmul.mubr.bf16.vlgmr.msra.gmra.mxu1 %v5690_v44  ;;  %12745 = vmatpush3.bf16.msra.mxu0 %v13959_v4  ;;  %v3176_v39 = vadd.f32 %v3175_v12, %v3136_v17  ;;  %v14008_v4 = vld [vmem:[%s18206_s3 + $0xf8] sm:$0xff]  }
 0x20d   : > { %12746 = vmatprep.subr.bf16.mxu0 %v13960_v24  ;;  %12763 = vmatpush3.bf16.msra.mxu1 %v13973_v30  ;;  %v13269_v7 = vpop.f32.mrf.mxu1 }
 0x20e   : > { %12764 = vmatprep.subr.bf16.mxu1 %v13974_v6  ;;  %v3181_v43 = vmax.f32 %v3176_v39, 0.0  ;;  %v14502_v6 = vld [vmem:[%s18205_s2] ss:$0 sm:$0xff] }
 0x20f   : > { %v3178_v32 = vpop.f32.mrf.mxu1 }
 0x210   : > { %12747 = vmatpush3.bf16.msra.mxu0 %v13961_v34  ;;  %v3182_v49 = vpack.c.bf16 %v3181_v43, %v3181_v43  ;;  %v13991_v34 = vld [vmem:[%s18206_s3 + $0x20] sm:$0xff]  }
 0x211   : > { %12748 = vmatprep.subr.bf16.mxu0 %v13962_v37  ;;  %12765 = vmatpush3.bf16.msra.mxu1 %v13976_v35  ;;  %v13270_v38 = vpop.f32.mrf.mxu1  ;;  %v13993_v37 = vld [vmem:[%s18206_s3 + $0x58] sm:$0xff]  }
 0x212   : > { %12766 = vmatprep.subr.bf16.mxu1 %v13978_v40  ;;  %3184 = vst.msk [vmem:[#allocation2 + $0x14] sm:$0x7] %vm858_vm8, %v3182_v49  ;;  %v13995_v35 = vld [vmem:[%s18206_s3 + $0x18] sm:$0xff]   ;;  %v13997_v40 = vld [vmem:[%s18206_s3 + $0x50] sm:$0xff]   ;;  %v14001_v49 = vld [vmem:[%s18206_s3 + $0x48] sm:$0xff]  }
 0x213   : > { %v14004_v38 = vld [vmem:[%s18206_s3 + $0x40] sm:$0xff]  }
 0x214   : > { %12749 = vmatpush3.bf16.msra.mxu0 %v13963_v47  ;;  %v6002_v46 = vpop.permute.xlu0 %6001 }
 0x215   : > { %12750 = vmatprep.subr.bf16.mxu0 %v13964_v23  ;;  %12767 = vmatpush3.bf16.msra.mxu1 %v13980_v29  ;;  %v6033_v15 = vsel %vm557_vm5, %v14500_v25, %v6002_v46  ;;  %v13999_v23 = vld [vmem:[%s18206_s3 + $0x10] sm:$0xff]   ;;  %v14003_v29 = vld [vmem:[%s18206_s3 + $0x8] sm:$0xff]  }
 0x216   : > { %12768 = vmatprep.subr.bf16.mxu1 %v13983_v33  ;;  %6338 = vmatprep.mubr.bf16.mxu0 %v6033_v15 }
 0x218   : > { %12751 = vmatpush3.bf16.msra.mxu0 %v13965_v51 }
 0x219   : > { %12752 = vmatprep.subr.bf16.mxu0 %v13966_v52  ;;  %12769 = vmatpush3.bf16.msra.mxu1 %v13985_v31  ;;  %v6397_v60 = vld [vmem:[#allocation2 + $0x14] sm:$0x7]  ;;  %v14005_v31 = vld [vmem:[%s18206_s3] sm:$0xff]  }
 0x21a   : > { %v6812_v61 = vld [vmem:[#allocation2 + $0x14] sm:$0x7]  ;;  %12770 = vmatprep.subr.bf16.mxu1 %v13988_v28  ;;  %v11906_v63 = vcombine.low %v6397_v60, %v6397_v60  ;;  %v14011_v28 = vld [vmem:[%s18206_s3 + $0x78] sm:$0xff]  }
 0x21b   : > { %v11941_v0 = vcombine.low %v6812_v61, %v6812_v61 }
 0x21c   : > { %12753 = vmatpush3.bf16.msra.mxu0 %v13967_v42  ;;  %v6440_v9 = vshll.u32 %v11906_v63, 16  ;;  %v6438_v11 = vshrl.u32 %v11906_v63, 16 }
 0x21d   : > { %12754 = vmatprep.subr.bf16.mxu0 %v13968_v56  ;;  %v6833_v22 = vshll.u32 %v11941_v0, 16  ;;  %12771 = vmatpush3.bf16.msra.mxu1 %v13990_v41  ;;  %v6831_v18 = vshrl.u32 %v11941_v0, 16 }
 0x21e   : > { %12772 = vmatprep.subr.bf16.mxu1 %v13992_v57  ;;  %v6442_v19 = vrot.slane %v6440_v9, 1 }
 0x21f   : > { %v6835_v58 = vrot.slane %v6833_v22, 1  ;;  %v16730_v22 = vld [vmem:[%s18205_s2] ss:$0 sm:$0xff] }
 0x220   : > { %12755 = vmatpush3.bf16.msra.mxu0 %v13969_v1  ;;  %v6443_v53 = vor.u32 %v6442_v19, %v6438_v11 }
 0x221   : > { %12784 = vmatprep.subr.bf16.mxu0 %v13975_v36  ;;  %12773 = vmatpush3.bf16.msra.mxu1 %v13994_v16  ;;  %v6836_v21 = vor.u32 %v6835_v58, %v6831_v18  ;;  %v14504_v18 = vld [vmem:[#allocation2 + $0x8] sm:$0x7] }
 0x222   : > { %12774 = vmatprep.subr.bf16.mxu1 %v13996_v8  ;;  %6444 = vrot.lane.b32.xlu0 %v6443_v53, %s18246_s22 }
 0x223   : > { %v12570_v10 = vpop.f32.mrf.mxu0  ;;  %6339 = vmatmul.mubr.bf16.vlgmr.msra.gmra.mxu0 %v6029_v45  ;;  %v14503_v45 = vld [vmem:[#allocation2 + $0xc] sm:$0x7] }
 0x224   : > { %12785 = vmatpush3.bf16.msra.mxu0 %v13977_v59 }
 0x225   : > { %v12571_v20 = vpop.f32.mrf.mxu0  ;;  %12786 = vmatprep.subr.bf16.mxu0 %v13979_v26  ;;  %12775 = vmatpush3.bf16.msra.mxu1 %v13998_v13  ;;  %v14009_v13 = vld [vmem:[%s18206_s3 + $0xb8] sm:$0xff]  }
 0x226   : > { %12776 = vmatprep.subr.bf16.mxu1 %v14000_v55  ;;  %v12572_v50 = vadd.f32 %v12571_v20, %v12570_v10  ;;  %6837 = vrot.lane.b32.xlu0 %v6836_v21, %s18246_s22  ;;  %v14010_v10 = vld [vmem:[%s18206_s3 + $0xf0] sm:$0xff]   ;;  %v14013_v20 = vld [vmem:[%s18206_s3 + $0x38] sm:$0xff]  }
 0x227   : > { %v12573_v24 = vpop.f32.mrf.mxu0 }
 0x228   : > { %12787 = vmatpush3.bf16.msra.mxu0 %v13981_v62  ;;  %v3601_v17 = vadd.f32 %v14502_v6, %v12572_v50  ;;  %v14505_v24 = vld [vmem:[#allocation2 + $0xc] sm:$0x7]  ;;  %v14506_v6 = vld [vmem:[#allocation2 + $0x8] sm:$0x7] }
 0x229   : > { %v12574_v30 = vpop.f32.mrf.mxu0  ;;  %12788 = vmatprep.subr.bf16.mxu0 %v13984_v3  ;;  %12777 = vmatpush3.bf16.msra.mxu1 %v14002_v54  ;;  %v14012_v3 = vld [vmem:[%s18206_s3 + $0xb0] sm:$0xff]   ;;  %v14014_v54 = vld [vmem:[%s18206_s3 + $0xe8] sm:$0xff]  }
 0x22a   : > { %12806 = vmatprep.subr.bf16.mxu1 %v14008_v4  ;;  %v14015_v4 = vld [vmem:[%s18206_s3 + $0x70] sm:$0xff]  }
 0x22b   : > { %v3640_v44 = vpop.f32.mrf.mxu1 }
 0x22c   : > { %12789 = vmatpush3.bf16.msra.mxu0 %v13986_v27  ;;  %v3641_v12 = vadd.f32 %v3640_v44, %v3601_v17 }
 0x22d   : > { %12790 = vmatprep.subr.bf16.mxu0 %v13989_v48  ;;  %v13289_v39 = vpop.f32.mrf.mxu1 }
 0x22e   : > { %v3646_v7 = vmax.f32 %v3641_v12, 0.0  ;;  %v14016_v12 = vld [vmem:[%s18206_s3 + $0xa8] sm:$0xff]   ;;  %v14019_v39 = vld [vmem:[%s18206_s3 + $0xe0] sm:$0xff]  }
 0x22f   : > { %v3643_v43 = vpop.f32.mrf.mxu1 }
 0x230   : > { %12791 = vmatpush3.bf16.msra.mxu0 %v13991_v34  ;;  %v3647_v47 = vpack.c.bf16 %v3646_v7, %v3646_v7  ;;  %v14020_v43 = vld [vmem:[%s18206_s3 + $0x68] sm:$0xff]  }
 0x231   : > { %12792 = vmatprep.subr.bf16.mxu0 %v13993_v37  ;;  %v13290_v32 = vpop.f32.mrf.mxu1  ;;  %v14017_v37 = vld [vmem:[%s18206_s3 + $0x30] sm:$0xff]  }
 0x232   : > { %3649 = vst.msk [vmem:[#allocation2 + $0x18] sm:$0x7] %vm858_vm8, %v3647_v47 }
 0x234   : > { %12793 = vmatpush3.bf16.msra.mxu0 %v13995_v35  ;;  %v6014_v53 = vpop.permute.xlu1 %6013 }
 0x235   : > { %12794 = vmatprep.subr.bf16.mxu0 %v13997_v40  ;;  %v6037_v62 = vsel %vm557_vm5, %v14504_v18, %v6014_v53  ;;  %v14039_v53 = vld [vmem:[%s18206_s3 + $0x8] sm:$0xff]   ;;  %v14047_v18 = vld [vmem:[%s18206_s3 + $0x78] sm:$0xff]  }
 0x238   : > { %12795 = vmatpush3.bf16.msra.mxu0 %v13999_v23  ;;  %v6409_v21 = vpop.permute.xlu1 %6408  ;;  %v14021_v23 = vld [vmem:[%s18206_s3 + $0xa0] sm:$0xff]  }
 0x239   : > { %12796 = vmatprep.subr.bf16.mxu0 %v14001_v49  ;;  %v6813_v33 = vld [vmem:[#allocation2 + $0x18] sm:$0x7]  ;;  %v6448_v17 = vsel %vm557_vm5, %v14506_v6, %v6409_v21  ;;  %v14022_v49 = vld [vmem:[%s18206_s3 + $0x28] sm:$0xff]  }
 0x23a   : > { %v7228_v51 = vld [vmem:[#allocation2 + $0x18] sm:$0x7]  ;;  %v11942_v52 = vcombine.low %v6813_v33, %v6813_v33 }
 0x23b   : > { %v11977_v46 = vcombine.low %v7228_v51, %v7228_v51 }
 0x23c   : > { %12797 = vmatpush3.bf16.msra.mxu0 %v14003_v29  ;;  %v6843_v25 = vshrl.u32 %v11942_v52, 16  ;;  %v6845_v15 = vshll.u32 %v11942_v52, 16  ;;  %v14024_v29 = vld [vmem:[%s18206_s3 + $0xd8] sm:$0xff]  }
 0x23d   : > { %v7238_v42 = vshll.u32 %v11977_v46, 16  ;;  %12798 = vmatprep.subr.bf16.mxu0 %v14004_v38  ;;  %v7236_v61 = vshrl.u32 %v11977_v46, 16  ;;  %v14025_v38 = vld [vmem:[%s18206_s3 + $0x60] sm:$0xff]   ;;  %v14026_v46 = vld [vmem:[%s18206_s3 + $0x98] sm:$0xff]  }
 0x23e   : > { %v6847_v56 = vrot.slane %v6845_v15, 1  ;;  %v14029_v15 = vld [vmem:[%s18206_s3 + $0x58] sm:$0xff]  }
 0x23f   : > { %v7240_v41 = vrot.slane %v7238_v42, 1 }
 0x240   : > { %12799 = vmatpush3.bf16.msra.mxu0 %v14005_v31  ;;  %v6848_v57 = vor.u32 %v6847_v56, %v6843_v25  ;;  %v14027_v31 = vld [vmem:[%s18206_s3 + $0x20] sm:$0xff]   ;;  %v14028_v25 = vld [vmem:[%s18206_s3 + $0xd0] sm:$0xff]  }
 0x241   : > { %12828 = vmatprep.subr.bf16.mxu0 %v14011_v28  ;;  %v7241_v0 = vor.u32 %v7240_v41, %v7236_v61  ;;  %v14032_v61 = vld [vmem:[%s18206_s3 + $0xc8] sm:$0xff]  }
 0x242   : > { %6849 = vrot.lane.b32.xlu1 %v6848_v57, %s18246_s22  ;;  %v14030_v57 = vld [vmem:[%s18206_s3 + $0x90] sm:$0xff]  }
 0x243   : > { %v12601_v60 = vpop.f32.mrf.mxu0 }
 0x245   : > { %v12602_v63 = vpop.f32.mrf.mxu0 }
 0x246   : > { %v12603_v1 = vadd.f32 %v12602_v63, %v12601_v60  ;;  %7242 = vrot.lane.b32.xlu1 %v7241_v0, %s18246_s22  ;;  %v14031_v60 = vld [vmem:[%s18206_s3 + $0x18] sm:$0xff]   ;;  %v14033_v63 = vld [vmem:[%s18206_s3 + $0x50] sm:$0xff]  }
 0x247   : > { %v12604_v9 = vpop.f32.mrf.mxu0 }
 0x248   : > { %v4066_v16 = vadd.f32 %v12603_v1, %v16730_v22  ;;  %v14034_v9 = vld [vmem:[%s18206_s3 + $0x88] sm:$0xff]  }
 0x249   : > { %v12605_v36 = vpop.f32.mrf.mxu0 }
 0x24a   : > { %v14035_v36 = vld [vmem:[%s18206_s3 + $0x10] sm:$0xff]  }
 0x24b   : > { %v4105_v8 = vpop.f32.mrf.mxu1 }
 0x24c   : > { %v4106_v2 = vadd.f32 %v4105_v8, %v4066_v16  ;;  %v14036_v8 = vld [vmem:[%s18206_s3 + $0xc0] sm:$0xff]  }
 0x24d   : > { %v13309_v11 = vpop.f32.mrf.mxu1 }
 0x24e   : > { %v4111_v19 = vmax.f32 %v4106_v2, 0.0  ;;  %v14037_v2 = vld [vmem:[%s18206_s3 + $0x48] sm:$0xff]  }
 0x24f   : > { %v4108_v59 = vpop.f32.mrf.mxu1 }
 0x250   : > { %v4112_v26 = vpack.c.bf16 %v4111_v19, %v4111_v19 }
 0x251   : > { %v13310_v58 = vpop.f32.mrf.mxu1 }
 0x252   : > { %4114 = vst.msk [vmem:[#allocation2 + $0x1c] sm:$0x7] %vm858_vm8, %v4112_v26  ;;  %v14038_v26 = vld [vmem:[%s18206_s3 + $0x80] sm:$0xff]  }
 0x254   : > { %v6026_v14 = vpop.permute.xlu0 %6025 }
 0x255   : > { %v6041_v55 = vsel %vm557_vm5, %v14503_v45, %v6026_v14  ;;  %v14044_v14 = vld [vmem:[%s18206_s3 + $0xf8] sm:$0xff]  }
 0x256   : > { %6378 = vmatprep.mubr.bf16.mxu1 %v6041_v55 }
 0x257   : > { %6379 = vmatmul.mubr.bf16.vlgmr.msra.gmra.mxu1 %v6037_v62 }
 0x258   : > { %v6421_v50 = vpop.permute.xlu0 %6420  ;;  %12807 = vmatpush3.bf16.msra.mxu1 %v14009_v13  ;;  %v14040_v13 = vld [vmem:[%s18206_s3 + $0x40] sm:$0xff]  }
 0x259   : > { %v6452_v27 = vsel %vm557_vm5, %v14505_v24, %v6421_v50  ;;  %v6814_v30 = vld [vmem:[#allocation2 + $0x1c] sm:$0x7]  ;;  %12808 = vmatprep.subr.bf16.mxu1 %v14010_v10  ;;  %v14041_v10 = vld [vmem:[%s18206_s3] sm:$0xff]  }
 0x25a   : > { %v7229_v48 = vld [vmem:[#allocation2 + $0x1c] sm:$0x7]  ;;  %6757 = vmatprep.mubr.bf16.mxu0 %v6452_v27  ;;  %v11943_v44 = vcombine.low %v6814_v30, %v6814_v30 }
 0x25b   : > { %v11978_v34 = vcombine.low %v7229_v48, %v7229_v48  ;;  %6758 = vmatmul.mubr.bf16.vlgmr.msra.gmra.mxu0 %v6448_v17 }
 0x25c   : > { %v6855_v35 = vshrl.u32 %v11943_v44, 16  ;;  %v6857_v7 = vshll.u32 %v11943_v44, 16  ;;  %12809 = vmatpush3.bf16.msra.mxu1 %v14012_v3  ;;  %12829 = vmatpush3.bf16.msra.mxu0 %v14013_v20 }
 0x25d   : > { %v7250_v40 = vshll.u32 %v11978_v34, 16  ;;  %12810 = vmatprep.subr.bf16.mxu1 %v14014_v54  ;;  %12830 = vmatprep.subr.bf16.mxu0 %v14015_v4  ;;  %v7248_v52 = vshrl.u32 %v11978_v34, 16 }
 0x25e   : > { %v6859_v47 = vrot.slane %v6857_v7, 1 }
 0x25f   : > { %v7252_v32 = vrot.slane %v7250_v40, 1 }
 0x260   : > { %v6860_v33 = vor.u32 %v6859_v47, %v6855_v35  ;;  %12811 = vmatpush3.bf16.msra.mxu1 %v14016_v12  ;;  %12831 = vmatpush3.bf16.msra.mxu0 %v14017_v37 }
 0x261   : > { %12812 = vmatprep.subr.bf16.mxu1 %v14019_v39  ;;  %12832 = vmatprep.subr.bf16.mxu0 %v14020_v43  ;;  %v7253_v28 = vor.u32 %v7252_v32, %v7248_v52  ;;  %v14046_v52 = vld [vmem:[%s18206_s3 + $0xf0] sm:$0xff]  }
 0x262   : > { %6861 = vrot.lane.b32.xlu0 %v6860_v33, %s18246_s22  ;;  %v14507_v33 = vld [vmem:[#allocation2 + $0x14] sm:$0x7] }
 0x263   : > { %v12632_v51 = vpop.f32.mrf.mxu0 }
 0x264   : > { %12813 = vmatpush3.bf16.msra.mxu1 %v14021_v23  ;;  %12833 = vmatpush3.bf16.msra.mxu0 %v14022_v49 }
 0x265   : > { %v12633_v42 = vpop.f32.mrf.mxu0  ;;  %12814 = vmatprep.subr.bf16.mxu1 %v14024_v29  ;;  %12834 = vmatprep.subr.bf16.mxu0 %v14025_v38  ;;  %v14045_v29 = vld [vmem:[%s18206_s3 + $0xb8] sm:$0xff]  }
 0x266   : > { %v12634_v56 = vadd.f32 %v12633_v42, %v12632_v51  ;;  %7254 = vrot.lane.b32.xlu0 %v7253_v28, %s18246_s22  ;;  %v14050_v28 = vld [vmem:[%s18206_s3 + $0xe8] sm:$0xff]  }
 0x267   : > { %v12635_v41 = vpop.f32.mrf.mxu0 }
 0x268   : > { %12815 = vmatpush3.bf16.msra.mxu1 %v14026_v46  ;;  %12835 = vmatpush3.bf16.msra.mxu0 %v14027_v31  ;;  %v4531_v1 = vadd.f32 %v12634_v56, %v16730_v22  ;;  %v14508_v46 = vld [vmem:[#allocation2 + $0x10] sm:$0x7] }
 0x269   : > { %v12636_v0 = vpop.f32.mrf.mxu0  ;;  %12816 = vmatprep.subr.bf16.mxu1 %v14028_v25  ;;  %12836 = vmatprep.subr.bf16.mxu0 %v14029_v15  ;;  %v14048_v25 = vld [vmem:[%s18206_s3 + $0xb0] sm:$0xff]   ;;  %v14049_v15 = vld [vmem:[%s18206_s3 + $0x38] sm:$0xff]  }
 0x26a   : > { %v14051_v56 = vld [vmem:[%s18206_s3 + $0x70] sm:$0xff]  }
 0x26b   : > { %v14510_v0 = vld [vmem:[#allocation2 + $0x10] sm:$0x7] }
 0x26c   : > { %v4570_v16 = vpop.f32.mrf.mxu1  ;;  %12817 = vmatpush3.bf16.msra.mxu1 %v14030_v57  ;;  %12837 = vmatpush3.bf16.msra.mxu0 %v14031_v60  ;;  %v14509_v57 = vld [vmem:[#allocation2 + $0x14] sm:$0x7] }
 0x26d   : > { %v4571_v11 = vadd.f32 %v4570_v16, %v4531_v1  ;;  %12818 = vmatprep.subr.bf16.mxu1 %v14032_v61  ;;  %12838 = vmatprep.subr.bf16.mxu0 %v14033_v63  ;;  %v14052_v16 = vld [vmem:[%s18206_s3 + $0xa8] sm:$0xff]  }
 0x26e   : > { %v13329_v19 = vpop.f32.mrf.mxu1 }
 0x26f   : > { %v4576_v59 = vmax.f32 %v4571_v11, 0.0  ;;  %v14055_v19 = vld [vmem:[%s18206_s3 + $0xe0] sm:$0xff]  }
 0x270   : > { %v4573_v58 = vpop.f32.mrf.mxu1  ;;  %12819 = vmatpush3.bf16.msra.mxu1 %v14034_v9  ;;  %12839 = vmatpush3.bf16.msra.mxu0 %v14035_v36 }
 0x271   : > { %v4577_v45 = vpack.c.bf16 %v4576_v59, %v4576_v59  ;;  %12820 = vmatprep.subr.bf16.mxu1 %v14036_v8  ;;  %12840 = vmatprep.subr.bf16.mxu0 %v14037_v2  ;;  %v14053_v8 = vld [vmem:[%s18206_s3 + $0x30] sm:$0xff]   ;;  %v14056_v59 = vld [vmem:[%s18206_s3 + $0x68] sm:$0xff]   ;;  %v14057_v58 = vld [vmem:[%s18206_s3 + $0xa0] sm:$0xff]  }
 0x272   : > { %v13330_v55 = vpop.f32.mrf.mxu1 }
 0x273   : > { %4579 = vst.msk [vmem:[#allocation2 + $0x20] sm:$0x7] %vm858_vm8, %v4577_v45  ;;  %v14058_v45 = vld [vmem:[%s18206_s3 + $0x28] sm:$0xff]   ;;  %v14059_v55 = vld [vmem:[%s18206_s3 + $0xd8] sm:$0xff]  }
 0x274   : > { %12821 = vmatpush3.bf16.msra.mxu1 %v14038_v26  ;;  %12841 = vmatpush3.bf16.msra.mxu0 %v14039_v53  ;;  %v6433_v23 = vpop.permute.xlu1 %6432 }
 0x275   : > { %12842 = vmatprep.subr.bf16.mxu0 %v14040_v13  ;;  %12850 = vmatprep.subr.bf16.mxu1 %v14044_v14  ;;  %v6456_v31 = vsel %vm557_vm5, %v14508_v46, %v6433_v23 }
 0x278   : > { %12843 = vmatpush3.bf16.msra.mxu0 %v14041_v10  ;;  %v6826_v42 = vpop.permute.xlu1 %6825 }
 0x279   : > { %12872 = vmatprep.subr.bf16.mxu0 %v14047_v18  ;;  %v6865_v1 = vsel %vm557_vm5, %v14510_v0, %v6826_v42  ;;  %v14060_v18 = vld [vmem:[%s18206_s3 + $0x60] sm:$0xff]  }
 0x27a   : > { %v7230_v62 = vld [vmem:[#allocation2 + $0x20] sm:$0x7] }
 0x27b   : > { %v7645_v3 = vld [vmem:[#allocation2 + $0x20] sm:$0x7]  ;;  %v11979_v20 = vcombine.low %v7230_v62, %v7230_v62 }
 0x27c   : > { %v12014_v21 = vcombine.low %v7645_v3, %v7645_v3  ;;  %v14061_v3 = vld [vmem:[%s18206_s3 + $0x98] sm:$0xff]  }
 0x27d   : > { %v7262_v54 = vshll.u32 %v11979_v20, 16  ;;  %v7260_v50 = vshrl.u32 %v11979_v20, 16  ;;  %v14062_v20 = vld [vmem:[%s18206_s3 + $0x20] sm:$0xff]  }
 0x27e   : > { %v7655_v4 = vshll.u32 %v12014_v21, 16  ;;  %v7653_v6 = vshrl.u32 %v12014_v21, 16  ;;  %v14063_v21 = vld [vmem:[%s18206_s3 + $0xd0] sm:$0xff]  }
 0x27f   : > { %v7264_v24 = vrot.slane %v7262_v54, 1  ;;  %v14064_v54 = vld [vmem:[%s18206_s3 + $0x58] sm:$0xff]  }
 0x280   : > { %v7657_v30 = vrot.slane %v7655_v4, 1 }
 0x281   : > { %v7265_v27 = vor.u32 %v7264_v24, %v7260_v50 }
 0x282   : > { %v7658_v44 = vor.u32 %v7657_v30, %v7653_v6  ;;  %v14065_v30 = vld [vmem:[%s18206_s3 + $0x90] sm:$0xff]   ;;  %v14067_v6 = vld [vmem:[%s18206_s3 + $0xc8] sm:$0xff]  }
 0x283   : > { %7266 = vrot.lane.b32.xlu1 %v7265_v27, %s18246_s22  ;;  %v12663_v48 = vpop.f32.mrf.mxu0 }
 0x285   : > { %v12664_v17 = vpop.f32.mrf.mxu0 }
 0x286   : > { %v12665_v34 = vadd.f32 %v12664_v17, %v12663_v48  ;;  %v14066_v48 = vld [vmem:[%s18206_s3 + $0x18] sm:$0xff]   ;;  %v14068_v17 = vld [vmem:[%s18206_s3 + $0x50] sm:$0xff]  }
 0x287   : > { %7659 = vrot.lane.b32.xlu1 %v7658_v44, %s18246_s22  ;;  %v12666_v12 = vpop.f32.mrf.mxu0 }
 0x288   : > { %v4996_v39 = vadd.f32 %v12665_v34, %v16730_v22  ;;  %v14069_v12 = vld [vmem:[%s18206_s3 + $0x88] sm:$0xff]  }
 0x289   : > { %v12667_v37 = vpop.f32.mrf.mxu0 }
 0x28a   : > { %v14070_v37 = vld [vmem:[%s18206_s3 + $0x10] sm:$0xff]  }
 0x28c   : > { %v5035_v35 = vpop.f32.mrf.mxu1 }
 0x28d   : > { %v5036_v7 = vadd.f32 %v5035_v35, %v4996_v39  ;;  %v14071_v35 = vld [vmem:[%s18206_s3 + $0xc0] sm:$0xff]  }
 0x28e   : > { %v13349_v40 = vpop.f32.mrf.mxu1 }
 0x28f   : > { %v5041_v43 = vmax.f32 %v5036_v7, 0.0  ;;  %v14072_v7 = vld [vmem:[%s18206_s3 + $0x48] sm:$0xff]  }
 0x290   : > { %v5038_v47 = vpop.f32.mrf.mxu1 }
 0x291   : > { %v5042_v32 = vpack.c.bf16 %v5041_v43, %v5041_v43  ;;  %v14073_v47 = vld [vmem:[%s18206_s3 + $0x80] sm:$0xff]  }
 0x292   : > { %v13350_v49 = vpop.f32.mrf.mxu1 }
 0x293   : > { %5044 = vst.msk [vmem:[#allocation2 + $0x24] sm:$0x7] %vm858_vm8, %v5042_v32  ;;  %v14074_v32 = vld [vmem:[%s18206_s3 + $0x8] sm:$0xff]   ;;  %v14075_v49 = vld [vmem:[%s18206_s3 + $0x40] sm:$0xff]  }
 0x294   : > { %v6445_v38 = vpop.permute.xlu0 %6444 }
 0x295   : > { %v6460_v51 = vsel %vm557_vm5, %v14507_v33, %v6445_v38 }
 0x296   : > { %6797 = vmatprep.mubr.bf16.mxu1 %v6460_v51  ;;  %v14076_v51 = vld [vmem:[%s18206_s3] sm:$0xff]  }
 0x297   : > { %6798 = vmatmul.mubr.bf16.vlgmr.msra.gmra.mxu1 %v6456_v31 }
 0x298   : > { %v6838_v41 = vpop.permute.xlu0 %6837  ;;  %12851 = vmatpush3.bf16.msra.mxu1 %v14045_v29  ;;  %v14078_v29 = vld [vmem:[%s18206_s3 + $0xf8] sm:$0xff]  }
 0x299   : > { %v6869_v60 = vsel %vm557_vm5, %v14509_v57, %v6838_v41  ;;  %12852 = vmatprep.subr.bf16.mxu1 %v14046_v52  ;;  %v14081_v52 = vld [vmem:[%s18206_s3 + $0x78] sm:$0xff]  }
 0x29a   : > { %v7231_v61 = vld [vmem:[#allocation2 + $0x24] sm:$0x7]  ;;  %7174 = vmatprep.mubr.bf16.mxu0 %v6869_v60 }
 0x29b   : > { %v7646_v63 = vld [vmem:[#allocation2 + $0x24] sm:$0x7]  ;;  %v11980_v9 = vcombine.low %v7231_v61, %v7231_v61  ;;  %7175 = vmatmul.mubr.bf16.vlgmr.msra.gmra.mxu0 %v6865_v1 }
 0x29c   : > { %v12015_v36 = vcombine.low %v7646_v63, %v7646_v63  ;;  %12853 = vmatpush3.bf16.msra.mxu1 %v14048_v25  ;;  %12873 = vmatpush3.bf16.msra.mxu0 %v14049_v15  ;;  %v14511_v63 = vld [vmem:[%s18205_s2] ss:$0 sm:$0xff] }
 0x29d   : > { %v7274_v2 = vshll.u32 %v11980_v9, 16  ;;  %12854 = vmatprep.subr.bf16.mxu1 %v14050_v28  ;;  %12874 = vmatprep.subr.bf16.mxu0 %v14051_v56  ;;  %v7272_v26 = vshrl.u32 %v11980_v9, 16 }
 0x29e   : > { %v7667_v11 = vshll.u32 %v12015_v36, 16  ;;  %v7665_v10 = vshrl.u32 %v12015_v36, 16 }
 0x29f   : > { %v7276_v53 = vrot.slane %v7274_v2, 1 }
 0x2a0   : > { %v7669_v14 = vrot.slane %v7667_v11, 1  ;;  %12855 = vmatpush3.bf16.msra.mxu1 %v14052_v16  ;;  %12875 = vmatpush3.bf16.msra.mxu0 %v14053_v8 }
 0x2a1   : > { %v7277_v13 = vor.u32 %v7276_v53, %v7272_v26  ;;  %12856 = vmatprep.subr.bf16.mxu1 %v14055_v19  ;;  %12876 = vmatprep.subr.bf16.mxu0 %v14056_v59  ;;  %v14079_v59 = vld [vmem:[%s18206_s3 + $0xb8] sm:$0xff]   ;;  %v14080_v26 = vld [vmem:[%s18206_s3 + $0xf0] sm:$0xff]  }
 0x2a2   : > { %v7670_v50 = vor.u32 %v7669_v14, %v7665_v10  ;;  %v14513_v14 = vld [vmem:[#allocation2 + $0x18] sm:$0x7] }
 0x2a3   : > { %7278 = vrot.lane.b32.xlu0 %v7277_v13, %s18246_s22  ;;  %v12694_v62 = vpop.f32.mrf.mxu0  ;;  %v14083_v10 = vld [vmem:[%s18206_s3 + $0x38] sm:$0xff]  }
 0x2a4   : > { %12857 = vmatpush3.bf16.msra.mxu1 %v14057_v58  ;;  %12877 = vmatpush3.bf16.msra.mxu0 %v14058_v45  ;;  %v14512_v58 = vld [vmem:[#allocation2 + $0x1c] sm:$0x7] }
 0x2a5   : > { %v12695_v4 = vpop.f32.mrf.mxu0  ;;  %12858 = vmatprep.subr.bf16.mxu1 %v14059_v55  ;;  %12878 = vmatprep.subr.bf16.mxu0 %v14060_v18  ;;  %v14082_v55 = vld [vmem:[%s18206_s3 + $0xb0] sm:$0xff]  }
 0x2a6   : > { %v12696_v24 = vadd.f32 %v12695_v4, %v12694_v62  ;;  %v14084_v62 = vld [vmem:[%s18206_s3 + $0xe8] sm:$0xff]  }
 0x2a7   : > { %7671 = vrot.lane.b32.xlu0 %v7670_v50, %s18246_s22  ;;  %v12697_v27 = vpop.f32.mrf.mxu0  ;;  %v14515_v50 = vld [vmem:[#allocation2 + $0x18] sm:$0x7] }
 0x2a8   : > { %12859 = vmatpush3.bf16.msra.mxu1 %v14061_v3  ;;  %12879 = vmatpush3.bf16.msra.mxu0 %v14062_v20  ;;  %v5461_v34 = vadd.f32 %v12696_v24, %v16730_v22  ;;  %v14085_v3 = vld [vmem:[%s18206_s3 + $0x70] sm:$0xff]  }
 0x2a9   : > { %v12698_v44 = vpop.f32.mrf.mxu0  ;;  %12860 = vmatprep.subr.bf16.mxu1 %v14063_v21  ;;  %12880 = vmatprep.subr.bf16.mxu0 %v14064_v54  ;;  %v14514_v21 = vld [vmem:[#allocation2 + $0x1c] sm:$0x7] }
 0x2ac   : > { %v5500_v39 = vpop.f32.mrf.mxu1  ;;  %12861 = vmatpush3.bf16.msra.mxu1 %v14065_v30  ;;  %12881 = vmatpush3.bf16.msra.mxu0 %v14066_v48  ;;  %v14086_v30 = vld [vmem:[%s18206_s3 + $0xa8] sm:$0xff]   ;;  %v14087_v48 = vld [vmem:[%s18206_s3 + $0x30] sm:$0xff]  }
 0x2ad   : > { %v5501_v40 = vadd.f32 %v5500_v39, %v5461_v34  ;;  %12862 = vmatprep.subr.bf16.mxu1 %v14067_v6  ;;  %12882 = vmatprep.subr.bf16.mxu0 %v14068_v17  ;;  %v14088_v6 = vld [vmem:[%s18206_s3 + $0xe0] sm:$0xff]   ;;  %v14089_v17 = vld [vmem:[%s18206_s3 + $0x68] sm:$0xff]  }
 0x2ae   : > { %v13369_v22 = vpop.f32.mrf.mxu1  ;;  %v14091_v39 = vld [vmem:[%s18206_s3 + $0x28] sm:$0xff]  }
 0x2af   : > { %v5506_v43 = vmax.f32 %v5501_v40, 0.0  ;;  %v14093_v40 = vld [vmem:[%s18206_s3 + $0x60] sm:$0xff]  }
 0x2b0   : > { %v5503_v23 = vpop.f32.mrf.mxu1  ;;  %12863 = vmatpush3.bf16.msra.mxu1 %v14069_v12  ;;  %12883 = vmatpush3.bf16.msra.mxu0 %v14070_v37  ;;  %v14090_v37 = vld [vmem:[%s18206_s3 + $0xa0] sm:$0xff]  }
 0x2b1   : > { %v5507_v38 = vpack.c.bf16 %v5506_v43, %v5506_v43  ;;  %12864 = vmatprep.subr.bf16.mxu1 %v14071_v35  ;;  %12884 = vmatprep.subr.bf16.mxu0 %v14072_v7  ;;  %v14092_v35 = vld [vmem:[%s18206_s3 + $0xd8] sm:$0xff]  }
 0x2b2   : > { %v13370_v33 = vpop.f32.mrf.mxu1  ;;  %v14094_v43 = vld [vmem:[%s18206_s3 + $0x98] sm:$0xff]  }
 0x2b3   : > { %5509 = vst.msk [vmem:[#allocation2 + $0x28] sm:$0x7] %vm858_vm8, %v5507_v38  ;;  %v14097_v23 = vld [vmem:[%s18206_s3 + $0x58] sm:$0xff]   ;;  %v14098_v38 = vld [vmem:[%s18206_s3 + $0x90] sm:$0xff]  }
 0x2b4   : > { %12865 = vmatpush3.bf16.msra.mxu1 %v14073_v47  ;;  %12885 = vmatpush3.bf16.msra.mxu0 %v14074_v32  ;;  %v6850_v11 = vpop.permute.xlu1 %6849  ;;  %v14095_v47 = vld [vmem:[%s18206_s3 + $0x20] sm:$0xff]   ;;  %v14096_v32 = vld [vmem:[%s18206_s3 + $0xd0] sm:$0xff]   ;;  %v14099_v33 = vld [vmem:[%s18206_s3 + $0x18] sm:$0xff]  }
 0x2b5   : > { %12886 = vmatprep.subr.bf16.mxu0 %v14075_v49  ;;  %12894 = vmatprep.subr.bf16.mxu1 %v14078_v29  ;;  %v6873_v45 = vsel %vm557_vm5, %v14513_v14, %v6850_v11  ;;  %v14518_v14 = vld [vmem:[#allocation2 + $0x24] sm:$0x7] }
 0x2b8   : > { %12887 = vmatpush3.bf16.msra.mxu0 %v14076_v51  ;;  %v7243_v18 = vpop.permute.xlu1 %7242  ;;  %v14100_v51 = vld [vmem:[%s18206_s3 + $0xc8] sm:$0xff]  }
 0x2b9   : > { %12916 = vmatprep.subr.bf16.mxu0 %v14081_v52  ;;  %v7282_v24 = vsel %vm557_vm5, %v14515_v50, %v7243_v18  ;;  %v14101_v52 = vld [vmem:[%s18206_s3 + $0x50] sm:$0xff]   ;;  %v14519_v18 = vld [vmem:[#allocation2 + $0x20] sm:$0x7]  ;;  %v14116_v50 = vld [vmem:[%s18206_s3 + $0xa8] sm:$0xff]  }
 0x2ba   : > { %v16946_v46 = vld [vmem:[#allocation2 + $0x28] sm:$0x7] }
 0x2bb   : > { %v12016_v31 = vcombine.low %v16946_v46, %v16946_v46 }
 0x2bd   : > { %v7677_v25 = vshrl.u32 %v12016_v31, 16  ;;  %v7679_v15 = vshll.u32 %v12016_v31, 16 }
 0x2bf   : > { %v7681_v42 = vrot.slane %v7679_v15, 1  ;;  %v14103_v15 = vld [vmem:[%s18206_s3 + $0x10] sm:$0xff]  }
 0x2c1   : > { %v7682_v28 = vor.u32 %v7681_v42, %v7677_v25  ;;  %v14102_v25 = vld [vmem:[%s18206_s3 + $0x88] sm:$0xff]   ;;  %v14104_v42 = vld [vmem:[%s18206_s3 + $0xc0] sm:$0xff]  }
 0x2c3   : > { %7683 = vrot.lane.b32.xlu1 %v7682_v28, %s18246_s22  ;;  %v12725_v56 = vpop.f32.mrf.mxu0  ;;  %v14105_v28 = vld [vmem:[%s18206_s3 + $0x48] sm:$0xff]  }
 0x2c5   : > { %v12726_v41 = vpop.f32.mrf.mxu0 }
 0x2c6   : > { %v12727_v57 = vadd.f32 %v12726_v41, %v12725_v56  ;;  %v14106_v56 = vld [vmem:[%s18206_s3 + $0x80] sm:$0xff]   ;;  %v14107_v41 = vld [vmem:[%s18206_s3 + $0x8] sm:$0xff]  }
 0x2c7   : > { %v12728_v60 = vpop.f32.mrf.mxu0 }
 0x2c8   : > { %v5926_v0 = vadd.f32 %v14511_v63, %v12727_v57  ;;  %v14108_v57 = vld [vmem:[%s18206_s3 + $0x40] sm:$0xff]   ;;  %v14111_v60 = vld [vmem:[%s18206_s3 + $0xf8] sm:$0xff]  }
 0x2c9   : > { %v12729_v61 = vpop.f32.mrf.mxu0 }
 0x2ca   : > { %v14109_v61 = vld [vmem:[%s18206_s3] sm:$0xff]  }
 0x2cc   : > { %v5965_v1 = vpop.f32.mrf.mxu1 }
 0x2cd   : > { %v5966_v9 = vadd.f32 %v5965_v1, %v5926_v0  ;;  %v14112_v1 = vld [vmem:[%s18206_s3 + $0xb8] sm:$0xff]  }
 0x2ce   : > { %v13389_v36 = vpop.f32.mrf.mxu1 }
 0x2cf   : > { %v5971_v16 = vmax.f32 %v5966_v9, 0.0  ;;  %v14516_v9 = vld [vmem:[#allocation2 + $0x24] sm:$0x7] }
 0x2d0   : > { %v5968_v8 = vpop.f32.mrf.mxu1 }
 0x2d1   : > { %v5972_v2 = vpack.c.bf16 %v5971_v16, %v5971_v16  ;;  %v14113_v16 = vld [vmem:[%s18206_s3 + $0xf0] sm:$0xff]  }
 0x2d2   : > { %v13390_v19 = vpop.f32.mrf.mxu1 }
 0x2d3   : > { %5974 = vst.msk [vmem:[#allocation2 + $0x2c] sm:$0x7] %vm858_vm8, %v5972_v2  ;;  %v14517_v2 = vld [vmem:[#allocation2 + $0x20] sm:$0x7] }
 0x2d4   : > { %v6862_v53 = vpop.permute.xlu0 %6861  ;;  %v17068_v19 = vld [vmem:[%s18207_s4] ss:$0 sm:$0xff] }
 0x2d5   : > { %v6877_v13 = vsel %vm557_vm5, %v14512_v58, %v6862_v53  ;;  %v14114_v58 = vld [vmem:[%s18206_s3 + $0xb0] sm:$0xff]  }
 0x2d6   : > { %7214 = vmatprep.mubr.bf16.mxu1 %v6877_v13 }
 0x2d7   : > { %7215 = vmatmul.mubr.bf16.vlgmr.msra.gmra.mxu1 %v6873_v45 }
 0x2d8   : > { %v7255_v20 = vpop.permute.xlu0 %7254  ;;  %12895 = vmatpush3.bf16.msra.mxu1 %v14079_v59 }
 0x2d9   : > { %v7286_v54 = vsel %vm557_vm5, %v14514_v21, %v7255_v20  ;;  %12896 = vmatprep.subr.bf16.mxu1 %v14080_v26 }
 0x2da   : > { %v16976_v4 = vld [vmem:[#allocation2 + $0x2c] sm:$0x7]  ;;  %7591 = vmatprep.mubr.bf16.mxu0 %v7286_v54 }
 0x2db   : > { %v12017_v27 = vcombine.low %v16976_v4, %v16976_v4  ;;  %7592 = vmatmul.mubr.bf16.vlgmr.msra.gmra.mxu0 %v7282_v24 }
 0x2dc   : > { %12897 = vmatpush3.bf16.msra.mxu1 %v14082_v55  ;;  %12917 = vmatpush3.bf16.msra.mxu0 %v14083_v10  ;;  %v14115_v55 = vld [vmem:[%s18206_s3 + $0xe8] sm:$0xff]  }
 0x2dd   : > { %v7691_v44 = vshll.u32 %v12017_v27, 16  ;;  %12898 = vmatprep.subr.bf16.mxu1 %v14084_v62  ;;  %12918 = vmatprep.subr.bf16.mxu0 %v14085_v3  ;;  %v7689_v34 = vshrl.u32 %v12017_v27, 16 }
 0x2df   : > { %v7693_v12 = vrot.slane %v7691_v44, 1 }
 0x2e0   : > { %12899 = vmatpush3.bf16.msra.mxu1 %v14086_v30  ;;  %12919 = vmatpush3.bf16.msra.mxu0 %v14087_v48  ;;  %v14117_v30 = vld [vmem:[%s18206_s3 + $0xe0] sm:$0xff]  }
 0x2e1   : > { %v7694_v7 = vor.u32 %v7693_v12, %v7689_v34  ;;  %12900 = vmatprep.subr.bf16.mxu1 %v14088_v6  ;;  %12920 = vmatprep.subr.bf16.mxu0 %v14089_v17  ;;  %v6391_v17 = vld [vmem:[#allocation3] sm:$0x7]  ;;  %v14118_v12 = vld [vmem:[%s18206_s3 + $0xa0] sm:$0xff]  }
 0x2e3   : > { %7695 = vrot.lane.b32.xlu0 %v7694_v7, %s18246_s22  ;;  %v12756_v22 = vpop.f32.mrf.mxu0  ;;  %v14120_v7 = vld [vmem:[%s18206_s3 + $0x98] sm:$0xff]  }
 0x2e4   : > { %12901 = vmatpush3.bf16.msra.mxu1 %v14090_v37  ;;  %12921 = vmatpush3.bf16.msra.mxu0 %v14091_v39  ;;  %v14119_v39 = vld [vmem:[%s18206_s3 + $0xd8] sm:$0xff]  }
 0x2e5   : > { %v12757_v49 = vpop.f32.mrf.mxu0  ;;  %12902 = vmatprep.subr.bf16.mxu1 %v14092_v35  ;;  %12922 = vmatprep.subr.bf16.mxu0 %v14093_v40  ;;  %v14121_v40 = vld [vmem:[%s18206_s3 + $0xd0] sm:$0xff]  }
 0x2e6   : > { %v12758_v8 = vadd.f32 %v12757_v49, %v12756_v22  ;;  %v14122_v22 = vld [vmem:[%s18206_s3 + $0x90] sm:$0xff]  }
 0x2e7   : > { %v12759_v29 = vpop.f32.mrf.mxu0 }
 0x2e8   : > { %12903 = vmatpush3.bf16.msra.mxu1 %v14094_v43  ;;  %12923 = vmatpush3.bf16.msra.mxu0 %v14095_v47  ;;  %v6341_v10 = vadd.f32 %v12758_v8, %v17068_v19  ;;  %v14123_v43 = vld [vmem:[%s18206_s3 + $0xc8] sm:$0xff]   ;;  %v14125_v29 = vld [vmem:[%s18206_s3 + $0xc0] sm:$0xff]  }
 0x2e9   : > { %v12760_v31 = vpop.f32.mrf.mxu0  ;;  %12904 = vmatprep.subr.bf16.mxu1 %v14096_v32  ;;  %12924 = vmatprep.subr.bf16.mxu0 %v14097_v23  ;;  %v14124_v23 = vld [vmem:[%s18206_s3 + $0x88] sm:$0xff]  }
 0x2ea   : > { %v14134_v31 = vld [vmem:[%s18208_s5 + $0x78] sm:$0xff]  }
 0x2ec   : > { %12905 = vmatpush3.bf16.msra.mxu1 %v14098_v38  ;;  %12925 = vmatpush3.bf16.msra.mxu0 %v14099_v33 }
 0x2ed   : > { %12906 = vmatprep.subr.bf16.mxu1 %v14100_v51  ;;  %12926 = vmatprep.subr.bf16.mxu0 %v14101_v52  ;;  %v14126_v51 = vld [vmem:[%s18206_s3 + $0x80] sm:$0xff]  }
 0x2f0   : > { %12907 = vmatpush3.bf16.msra.mxu1 %v14102_v25  ;;  %12927 = vmatpush3.bf16.msra.mxu0 %v14103_v15  ;;  %v14135_v25 = vld [vmem:[%s18208_s5 + $0x38] sm:$0xff]   ;;  %v14136_v15 = vld [vmem:[%s18208_s5 + $0x70] sm:$0xff]  }
 0x2f1   : > { %12908 = vmatprep.subr.bf16.mxu1 %v14104_v42  ;;  %12928 = vmatprep.subr.bf16.mxu0 %v14105_v28  ;;  %v14137_v42 = vld [vmem:[%s18208_s5 + $0x30] sm:$0xff]   ;;  %v14138_v28 = vld [vmem:[%s18208_s5 + $0x68] sm:$0xff]  }
 0x2f4   : > { %12909 = vmatpush3.bf16.msra.mxu1 %v14106_v56  ;;  %12929 = vmatpush3.bf16.msra.mxu0 %v14107_v41  ;;  %v14139_v56 = vld [vmem:[%s18208_s5 + $0x28] sm:$0xff]   ;;  %v14140_v41 = vld [vmem:[%s18208_s5 + $0x60] sm:$0xff]  }
 0x2f5   : > { %12930 = vmatprep.subr.bf16.mxu0 %v14108_v57  ;;  %12938 = vmatprep.subr.bf16.mxu1 %v14111_v60  ;;  %v7267_v63 = vpop.permute.xlu1 %7266  ;;  %v14141_v57 = vld [vmem:[%s18208_s5 + $0x20] sm:$0xff]   ;;  %v14142_v60 = vld [vmem:[%s18208_s5 + $0x58] sm:$0xff]  }
 0x2f6   : > { %v7290_v11 = vsel %vm557_vm5, %v14517_v2, %v7267_v63  ;;  %v14144_v63 = vld [vmem:[%s18208_s5 + $0x50] sm:$0xff]  }
 0x2f8   : > { %12931 = vmatpush3.bf16.msra.mxu0 %v14109_v61  ;;  %v14143_v61 = vld [vmem:[%s18208_s5 + $0x18] sm:$0xff]  }
 0x2f9   : > { %v7660_v59 = vpop.permute.xlu1 %7659  ;;  %12960 = vmatprep.subr.bf16.mxu0 %v14134_v31 }
 0x2fa   : > { %v7699_v62 = vsel %vm557_vm5, %v14519_v18, %v7660_v59 }
 0x315   : > { %v7279_v0 = vpop.permute.xlu0 %7278 }
 0x316   : > { %v7294_v36 = vsel %vm557_vm5, %v14516_v9, %v7279_v0  ;;  %v14145_v0 = vld [vmem:[%s18208_s5 + $0x10] sm:$0xff]  }
 0x317   : > { %7631 = vmatprep.mubr.bf16.mxu1 %v7294_v36  ;;  %v12778_v26 = vpop.f32.mrf.mxu1 }
 0x318   : > { %7632 = vmatmul.mubr.bf16.vlgmr.msra.gmra.mxu1 %v7290_v11  ;;  %v14146_v11 = vld [vmem:[%s18208_s5 + $0x48] sm:$0xff]  }
 0x319   : > { %v7672_v53 = vpop.permute.xlu0 %7671  ;;  %12939 = vmatpush3.bf16.msra.mxu1 %v14112_v1  ;;  %v12779_v13 = vpop.f32.mrf.mxu1 }
 0x31a   : > { %v7703_v45 = vsel %vm557_vm5, %v14518_v14, %v7672_v53  ;;  %12940 = vmatprep.subr.bf16.mxu1 %v14113_v16  ;;  %v12780_v3 = vadd.f32 %v12779_v13, %v12778_v26  ;;  %v14147_v26 = vld [vmem:[%s18208_s5 + $0x8] sm:$0xff]   ;;  %v14148_v14 = vld [vmem:[%s18208_s5 + $0x40] sm:$0xff]  }
 0x31b   : > { %8008 = vmatprep.mubr.bf16.mxu0 %v7703_v45  ;;  %v12781_v20 = vpop.f32.mrf.mxu1  ;;  %v17079_v21 = vpop.f32.mrf.mxu0 }
 0x31c   : > { %8009 = vmatmul.mubr.bf16.vlgmr.msra.gmra.mxu0 %v7699_v62  ;;  %v6381_v54 = vadd.f32 %v12780_v3, %v6341_v10  ;;  %v14149_v10 = vld [vmem:[%s18208_s5] sm:$0xff]   ;;  %v6808_v62 = vld [vmem:[#allocation3 + $0x4] sm:$0x7] }
 0x31d   : > { %12941 = vmatpush3.bf16.msra.mxu1 %v14114_v58  ;;  %v12782_v24 = vpop.f32.mrf.mxu1  ;;  %v17084_v27 = vpop.f32.mrf.mxu0  ;;  %12961 = vmatpush3.bf16.msra.mxu0 %v14135_v25 }
 0x31e   : > { %12942 = vmatprep.subr.bf16.mxu1 %v14115_v55  ;;  %v6386_v48 = vmax.f32 %v6381_v54, 0.0  ;;  %12962 = vmatprep.subr.bf16.mxu0 %v14136_v15  ;;  %v12802_v16 = vadd.f32 %v17084_v27, %v17079_v21 }
 0x31f   : > { %v12803_v44 = vpop.f32.mrf.mxu0 }
 0x320   : > { %v6387_v34 = vpack.c.bf16 %v6386_v48, %v6386_v48 }
 0x321   : > { %12943 = vmatpush3.bf16.msra.mxu1 %v14116_v50  ;;  %v12804_v37 = vpop.f32.mrf.mxu0  ;;  %12963 = vmatpush3.bf16.msra.mxu0 %v14137_v42  ;;  %v14169_v42 = vld [vmem:[%s18208_s5 + $0xd0] sm:$0xff]  }
 0x322   : > { %12944 = vmatprep.subr.bf16.mxu1 %v14117_v30  ;;  %v6392_v35 = vsel %vm17090_vm10, %v6387_v34, %v6391_v17  ;;  %12964 = vmatprep.subr.bf16.mxu0 %v14138_v28  ;;  %v14159_v37 = vld [vmem:[%s18208_s5 + $0xf8] sm:$0xff]  }
 0x323   : > { %6393 = vst [vmem:[#allocation3] sm:$0x7] %v6392_v35  ;;  %v14161_v35 = vld [vmem:[%s18208_s5 + $0xf0] sm:$0xff]  }
 0x325   : > { %12945 = vmatpush3.bf16.msra.mxu1 %v14118_v12  ;;  %12965 = vmatpush3.bf16.msra.mxu0 %v14139_v56 }
 0x326   : > { %12946 = vmatprep.subr.bf16.mxu1 %v14119_v39  ;;  %12966 = vmatprep.subr.bf16.mxu0 %v14140_v41  ;;  %v14160_v39 = vld [vmem:[%s18208_s5 + $0xb8] sm:$0xff]   ;;  %v14170_v41 = vld [vmem:[%s18208_s5 + $0x90] sm:$0xff]  }
 0x329   : > { %12947 = vmatpush3.bf16.msra.mxu1 %v14120_v7  ;;  %12967 = vmatpush3.bf16.msra.mxu0 %v14141_v57  ;;  %v14162_v7 = vld [vmem:[%s18208_s5 + $0xb0] sm:$0xff]  }
 0x32a   : > { %12948 = vmatprep.subr.bf16.mxu1 %v14121_v40  ;;  %v17114_v47 = vld [vmem:[#allocation3] sm:$0x3]  ;;  %12968 = vmatprep.subr.bf16.mxu0 %v14142_v60  ;;  %v14163_v40 = vld [vmem:[%s18208_s5 + $0xe8] sm:$0xff]   ;;  %v7225_v60 = vld [vmem:[#allocation3 + $0x8] sm:$0x7] }
 0x32b   : > { %v12051_v32 = vcombine.low %v17114_v47, %v17114_v47 }
 0x32d   : > { %12949 = vmatpush3.bf16.msra.mxu1 %v14122_v22  ;;  %v8074_v49 = vshll.u32 %v12051_v32, 16  ;;  %v8072_v38 = vshrl.u32 %v12051_v32, 16  ;;  %12969 = vmatpush3.bf16.msra.mxu0 %v14143_v61  ;;  %v14164_v22 = vld [vmem:[%s18208_s5 + $0xa8] sm:$0xff]   ;;  %v14166_v32 = vld [vmem:[%s18208_s5 + $0xa0] sm:$0xff]  }
 0x32e   : > { %12950 = vmatprep.subr.bf16.mxu1 %v14123_v43  ;;  %12970 = vmatprep.subr.bf16.mxu0 %v14144_v63  ;;  %v14165_v43 = vld [vmem:[%s18208_s5 + $0xe0] sm:$0xff]  }
 0x32f   : > { %v8076_v33 = vrot.slane %v8074_v49, 1 }
 0x331   : > { %12951 = vmatpush3.bf16.msra.mxu1 %v14124_v23  ;;  %v8077_v52 = vor.u32 %v8076_v33, %v8072_v38  ;;  %12971 = vmatpush3.bf16.msra.mxu0 %v14145_v0  ;;  %v14168_v38 = vld [vmem:[%s18208_s5 + $0x98] sm:$0xff]   ;;  %v14171_v0 = vld [vmem:[%s18208_s5 + $0xc8] sm:$0xff]  }
 0x332   : > { %12952 = vmatprep.subr.bf16.mxu1 %v14125_v29  ;;  %12972 = vmatprep.subr.bf16.mxu0 %v14146_v11  ;;  %v14167_v29 = vld [vmem:[%s18208_s5 + $0xd8] sm:$0xff]  }
 0x333   : > { %8078 = vrot.lane.b32.xlu1 %v8077_v52, %s18246_s22 }
 0x335   : > { %12953 = vmatpush3.bf16.msra.mxu1 %v14126_v51  ;;  %v7684_v1 = vpop.permute.xlu1 %7683  ;;  %12973 = vmatpush3.bf16.msra.mxu0 %v14147_v26 }
 0x336   : > { %v7707_v8 = vsel %vm557_vm5, %v16946_v46, %v7684_v1  ;;  %12974 = vmatprep.subr.bf16.mxu0 %v14148_v14  ;;  %12982 = vmatprep.subr.bf16.mxu1 %v14159_v37 }
 0x339   : > { %12975 = vmatpush3.bf16.msra.mxu0 %v14149_v10 }
 0x33a   : > { %13391 = vmatprep.subr.bf16.mxu0 %v14582_v5 }
 0x355   : > { %v7696_v9 = vpop.permute.xlu0 %7695 }
 0x356   : > { %v7711_v36 = vsel %vm557_vm5, %v16976_v4, %v7696_v9  ;;  %v6760_v4 = vadd.f32 %v12802_v16, %v17068_v19  ;;  %v14172_v9 = vld [vmem:[%s18208_s5 + $0x88] sm:$0xff]   ;;  %v14173_v16 = vld [vmem:[%s18208_s5 + $0xc0] sm:$0xff]  }
 0x357   : > { %8048 = vmatprep.mubr.bf16.mxu1 %v7711_v36  ;;  %v12822_v2 = vpop.f32.mrf.mxu1 }
 0x358   : > { %8049 = vmatmul.mubr.bf16.vlgmr.msra.gmra.mxu1 %v7707_v8  ;;  %v14174_v8 = vld [vmem:[%s18208_s5 + $0x80] sm:$0xff]  }
 0x359   : > { %v12823_v59 = vpop.f32.mrf.mxu1  ;;  %12983 = vmatpush3.bf16.msra.mxu1 %v14160_v39 }
 0x35a   : > { %v12824_v53 = vadd.f32 %v12823_v59, %v12822_v2  ;;  %12984 = vmatprep.subr.bf16.mxu1 %v14161_v35  ;;  %v14175_v2 = vld [vmem:[%s18208_s5 + $0x78] sm:$0xff]  }
 0x35b   : > { %v12825_v58 = vpop.f32.mrf.mxu1  ;;  %v12844_v13 = vpop.f32.mrf.mxu0 }
 0x35c   : > { %v6800_v46 = vadd.f32 %v12824_v53, %v6760_v4 }
 0x35d   : > { %v12826_v45 = vpop.f32.mrf.mxu1  ;;  %v12845_v55 = vpop.f32.mrf.mxu0  ;;  %12985 = vmatpush3.bf16.msra.mxu1 %v14162_v7 }
 0x35e   : > { %v6805_v18 = vmax.f32 %v6800_v46, 0.0  ;;  %12986 = vmatprep.subr.bf16.mxu1 %v14163_v40  ;;  %v12846_v23 = vadd.f32 %v12845_v55, %v12844_v13 }
 0x35f   : > { %v12847_v3 = vpop.f32.mrf.mxu0 }
 0x360   : > { %v6806_v20 = vpack.c.bf16 %v6805_v18, %v6805_v18  ;;  %v7177_v51 = vadd.f32 %v12846_v23, %v17068_v19 }
 0x361   : > { %v12848_v21 = vpop.f32.mrf.mxu0  ;;  %12987 = vmatpush3.bf16.msra.mxu1 %v14164_v22  ;;  %v14151_v22 = vld [vmem:[%s18208_s5 + $0x118] sm:$0xff]  }
 0x362   : > { %v6809_v54 = vsel %vm17090_vm10, %v6806_v20, %v6808_v62  ;;  %12988 = vmatprep.subr.bf16.mxu1 %v14165_v43  ;;  %v7642_v43 = vld [vmem:[#allocation3 + $0xc] sm:$0x7] }
 0x363   : > { %6810 = vst [vmem:[#allocation3 + $0x4] sm:$0x7] %v6809_v54 }
 0x365   : > { %12989 = vmatpush3.bf16.msra.mxu1 %v14166_v32 }
 0x366   : > { %12990 = vmatprep.subr.bf16.mxu1 %v14167_v29 }
 0x369   : > { %12991 = vmatpush3.bf16.msra.mxu1 %v14168_v38 }
 0x36a   : > { %v17186_v50 = vld [vmem:[#allocation3 + $0x4] ss:$0 sps:$4 sm:$0x33]   ;;  %12992 = vmatprep.subr.bf16.mxu1 %v14169_v42 }
 0x36b   : > { %v14128_v24 = vld [vmem:[#allocation3 + $0x4] ss:$0 sps:$4 sm:$0x66]   ;;  %8087 = vrot.lane.b32.xlu0 %v17186_v50, %s18246_s22 }
 0x36c   : > { %v17190_v27 = vld [vmem:[#allocation3 + $0x4] sm:$0x3]  ;;  %v8099_v30 = vrot.slane %v14128_v24, 1  ;;  %v14150_v24 = vld [vmem:[#allocation3] ss:$0 sps:$4 sm:$0x66]  }
 0x36d   : > { %v12095_v48 = vcombine.low %v17190_v27, %v17190_v27  ;;  %12993 = vmatpush3.bf16.msra.mxu1 %v14170_v41  ;;  %v8083_v35 = vrot.slane %v14150_v24, 1 }
 0x36e   : > { %8100 = vrot.lane.b32.xlu1 %v8099_v30, %s18246_s22  ;;  %12994 = vmatprep.subr.bf16.mxu1 %v14171_v0 }
 0x36f   : > { %v8572_v17 = vshll.u32 %v12095_v48, 16  ;;  %v8570_v44 = vshrl.u32 %v12095_v48, 16 }
 0x371   : > { %v8574_v34 = vrot.slane %v8572_v17, 1  ;;  %12995 = vmatpush3.bf16.msra.mxu1 %v14172_v9  ;;  %v14197_v9 = vld [vmem:[%s18208_s5 + $0xb0] sm:$0xff]  }
 0x372   : > { %12996 = vmatprep.subr.bf16.mxu1 %v14173_v16 }
 0x373   : > { %v8575_v12 = vor.u32 %v8574_v34, %v8570_v44 }
 0x375   : > { %8576 = vrot.lane.b32.xlu1 %v8575_v12, %s18246_s22  ;;  %12997 = vmatpush3.bf16.msra.mxu1 %v14174_v8  ;;  %v14200_v8 = vld [vmem:[%s18208_s5 + $0xa8] sm:$0xff]  }
 0x376   : > { %13009 = vmatprep.subr.bf16.mxu1 %v14175_v2  ;;  %v14202_v2 = vld [vmem:[%s18208_s5 + $0xe0] sm:$0xff]  }
 0x397   : > { %v12866_v49 = vpop.f32.mrf.mxu1 }
 0x399   : > { %v12867_v33 = vpop.f32.mrf.mxu1 }
 0x39a   : > { %v12868_v52 = vadd.f32 %v12867_v33, %v12866_v49 }
 0x39b   : > { %v12869_v31 = vpop.f32.mrf.mxu1  ;;  %v12888_v25 = vpop.f32.mrf.mxu0 }
 0x39c   : > { %v7217_v15 = vadd.f32 %v12868_v52, %v7177_v51  ;;  %v14152_v51 = vld [vmem:[%s18208_s5 + $0x110] sm:$0xff]   ;;  %v14154_v52 = vld [vmem:[%s18208_s5 + $0x100] sm:$0xff]  }
 0x39d   : > { %v12870_v28 = vpop.f32.mrf.mxu1  ;;  %v12889_v56 = vpop.f32.mrf.mxu0 }
 0x39e   : > { %v7222_v57 = vmax.f32 %v7217_v15, 0.0  ;;  %v12890_v20 = vadd.f32 %v12889_v56, %v12888_v25  ;;  %v14193_v15 = vld [vmem:[%s18208_s5 + $0xf8] sm:$0xff]  }
 0x39f   : > { %v12891_v61 = vpop.f32.mrf.mxu0 }
 0x3a0   : > { %v7223_v63 = vpack.c.bf16 %v7222_v57, %v7222_v57  ;;  %v7594_v30 = vadd.f32 %v12890_v20, %v17068_v19  ;;  %v14194_v57 = vld [vmem:[%s18208_s5 + $0xb8] sm:$0xff]   ;;  %v14196_v61 = vld [vmem:[%s18208_s5 + $0xf0] sm:$0xff]  }
 0x3a1   : > { %v12892_v1 = vpop.f32.mrf.mxu0 }
 0x3a2   : > { %v7226_v36 = vsel %vm17090_vm10, %v7223_v63, %v7225_v60 }
 0x3a3   : > { %7227 = vst [vmem:[#allocation3 + $0x8] sm:$0x7] %v7226_v36  ;;  %v14199_v36 = vld [vmem:[%s18208_s5 + $0xe8] sm:$0xff]  }
 0x3a5   : > { %v8079_v34 = vpop.permute.xlu1 %8078 }
 0x3a6   : > { %v8120_v49 = vsel %vm557_vm5, %v17114_v47, %v8079_v34  ;;  %v14153_v47 = vld [vmem:[%s18208_s5 + $0x108] sm:$0xff]  }
 0x3aa   : > { %v14130_v11 = vld [vmem:[#allocation3 + $0x8] ss:$0 sps:$4 sm:$0x66]  }
 0x3ab   : > { %v17250_v59 = vld [vmem:[#allocation3 + $0x8] sm:$0x3]  ;;  %v8597_v4 = vrot.slane %v14130_v11, 1  ;;  %v14203_v11 = vld [vmem:[%s18208_s5 + $0xa0] sm:$0xff]  }
 0x3ac   : > { %v17252_v26 = vld [vmem:[#allocation3 + $0x8] sm:$0x3]  ;;  %v12139_v53 = vcombine.low %v17250_v59, %v17250_v59 }
 0x3ad   : > { %v12055_v58 = vcombine.low %v17252_v26, %v17252_v26  ;;  %8598 = vrot.lane.b32.xlu1 %v8597_v4, %s18246_s22  ;;  %v17261_v3 = vld [vmem:[#allocation3 + $0x8] ss:$0 sps:$4 sm:$0x33]  }
 0x3ae   : > { %v9068_v13 = vshll.u32 %v12139_v53, 16  ;;  %v9066_v14 = vshrl.u32 %v12139_v53, 16  ;;  %v14156_v31 = vld [vmem:[#allocation3 + $0x8] ss:$0 sps:$4 sm:$0x66]  }
 0x3af   : > { %v8108_v46 = vshll.u32 %v12055_v58, 16  ;;  %v8106_v55 = vshrl.u32 %v12055_v58, 16  ;;  %v8117_v60 = vrot.slane %v14156_v31, 1  ;;  %v14205_v4 = vld [vmem:[%s18208_s5 + $0xd8] sm:$0xff]   ;;  %v14208_v58 = vld [vmem:[%s18208_s5 + $0xd0] sm:$0xff]  }
 0x3b0   : > { %v9070_v45 = vrot.slane %v9068_v13, 1  ;;  %v14207_v53 = vld [vmem:[%s18208_s5 + $0x98] sm:$0xff]   ;;  %v14209_v13 = vld [vmem:[%s18208_s5 + $0x90] sm:$0xff]  }
 0x3b1   : > { %v8110_v10 = vrot.slane %v8108_v46, 1  ;;  %v14210_v46 = vld [vmem:[%s18208_s5 + $0xc8] sm:$0xff]  }
 0x3b2   : > { %v9071_v18 = vor.u32 %v9070_v45, %v9066_v14  ;;  %v14211_v14 = vld [vmem:[%s18208_s5 + $0x88] sm:$0xff]   ;;  %v14212_v45 = vld [vmem:[%s18208_s5 + $0xc0] sm:$0xff]  }
 0x3b3   : > { %v8111_v62 = vor.u32 %v8110_v10, %v8106_v55  ;;  %v14213_v55 = vld [vmem:[%s18208_s5 + $0x80] sm:$0xff]   ;;  %v14214_v10 = vld [vmem:[%s18208_s5 + $0x78] sm:$0xff]  }
 0x3b4   : > { %9072 = vrot.lane.b32.xlu1 %v9071_v18, %s18246_s22 }
 0x3b5   : > { %8112 = vrot.lane.b32.xlu0 %v8111_v62, %s18246_s22 }
 0x3b9   : > { %8585 = vrot.lane.b32.xlu0 %v17261_v3, %s18246_s22 }
 0x3d8   : > { %v12910_v21 = vpop.f32.mrf.mxu1 }
 0x3da   : > { %v12911_v54 = vpop.f32.mrf.mxu1 }
 0x3db   : > { %v12912_v48 = vadd.f32 %v12911_v54, %v12910_v21 }
 0x3dc   : > { %v12913_v17 = vpop.f32.mrf.mxu1  ;;  %v17266_v44 = vpop.f32.mrf.mxu0 }
 0x3dd   : > { %v7634_v12 = vadd.f32 %v12912_v48, %v7594_v30  ;;  %v8088_v40 = vpop.permute.xlu0 %8087  ;;  %v8092_v17 = vshll.u32 %v17186_v50, 16 }
 0x3de   : > { %v12914_v37 = vpop.f32.mrf.mxu1  ;;  %v17268_v39 = vpop.f32.mrf.mxu0  ;;  %v8124_v23 = vsel %vm557_vm5, %v8083_v35, %v8088_v40  ;;  %v14178_v40 = vld [vmem:[#allocation3 + $0x4] ss:$0 sps:$4 sm:$0x66]  }
 0x3df   : > { %v7639_v7 = vmax.f32 %v7634_v12, 0.0  ;;  %8464 = vmatprep.mubr.bf16.mxu0 %v8124_v23  ;;  %v12934_v18 = vadd.f32 %v17268_v39, %v17266_v44  ;;  %v8059_v12 = vld [vmem:[#allocation3 + $0x10] sm:$0x7]  ;;  %v8094_v35 = vrot.slane %v8092_v17, 1  ;;  %v8090_v44 = vshrl.u32 %v17186_v50, 16  ;;  %v14177_v23 = vld [vmem:[%s18208_s5 + $0x70] sm:$0xff]  }
 0x3e0   : > { %v12935_v32 = vpop.f32.mrf.mxu0  ;;  %8465 = vmatmul.mubr.bf16.vlgmr.msra.gmra.mxu0 %v8120_v49  ;;  %v8101_v39 = vpop.permute.xlu1 %8100  ;;  %v8581_v50 = vrot.slane %v14178_v40, 1 }
 0x3e1   : > { %v7640_v29 = vpack.c.bf16 %v7639_v7, %v7639_v7  ;;  %13392 = vmatpush3.bf16.msra.mxu0 %v14151_v22  ;;  %13399 = vmatprep.mubr.msk.bf16.mxu0 %vm14590_vm0, %v14582_v5  ;;  %v8011_v21 = vadd.f32 %v12934_v18, %v17068_v19  ;;  %v8095_v22 = vor.u32 %v8094_v35, %v8090_v44  ;;  %v14239_v18 = vld [vmem:[%s18208_s5 + $0xa8] sm:$0xff]  }
 0x3e2   : > { %v12936_v38 = vpop.f32.mrf.mxu0  ;;  %13393 = vmatprep.subr.bf16.mxu0 %v14582_v5 }
 0x3e3   : > { %v7643_v33 = vsel %vm17090_vm10, %v7640_v29, %v7642_v43  ;;  %v14176_v43 = vld [vmem:[%s18208_s5 + $0x38] sm:$0xff]   ;;  %v8128_v6 = vsel %vm557_vm5, %v8095_v22, %v8101_v39  ;;  %v14179_v29 = vld [vmem:[%s18208_s5 + $0x30] sm:$0xff]  }
 0x3e4   : > { %7644 = vst [vmem:[#allocation3 + $0xc] sm:$0x7] %v7643_v33  ;;  %v14180_v33 = vld [vmem:[%s18208_s5 + $0x68] sm:$0xff]   ;;  %v14247_v22 = vld [vmem:[%s18208_s5 + $0x90] sm:$0xff]  }
 0x3e5   : > { %13394 = vmatpush3.bf16.msra.mxu0 %v14152_v51 }
 0x3e6   : > { %13395 = vmatprep.subr.bf16.mxu0 %v14582_v5 }
 0x3e9   : > { %13396 = vmatpush3.bf16.msra.mxu0 %v14153_v47 }
 0x3ea   : > { %13397 = vmatprep.subr.bf16.mxu0 %v14582_v5 }
 0x3eb   : > { %v14155_v25 = vld [vmem:[#allocation3 + $0xc] ss:$0 sps:$4 sm:$0x66]  }
 0x3ec   : > { %v17295_v42 = vld [vmem:[#allocation3 + $0xc] sm:$0x3]  ;;  %v9093_v28 = vrot.slane %v14155_v25, 1 }
 0x3ed   : > { %v12099_v56 = vcombine.low %v17295_v42, %v17295_v42  ;;  %13398 = vmatpush3.bf16.msra.mxu0 %v14154_v52  ;;  %v17314_v16 = vld [vmem:[#allocation3 + $0xc] ss:$0 sps:$4 sm:$0x33]   ;;  %v14181_v52 = vld [vmem:[%s18208_s5 + $0x28] sm:$0xff]  }
 0x3ee   : > { %9094 = vrot.lane.b32.xlu1 %v9093_v28, %s18246_s22  ;;  %13031 = vmatprep.subr.bf16.mxu0 %v14193_v15  ;;  %v14183_v15 = vld [vmem:[%s18208_s5 + $0x60] sm:$0xff]  }
 0x3ef   : > { %v8606_v41 = vshll.u32 %v12099_v56, 16  ;;  %v8604_v63 = vshrl.u32 %v12099_v56, 16  ;;  %v14184_v56 = vld [vmem:[%s18208_s5 + $0x20] sm:$0xff]  }
 0x3f0   : > { %13400 = vmatmul.mubr.msk.bf16.vlgmr.msra.gmra.mxu0 %vm557_vm5, %v8117_v60  ;;  %v14187_v60 = vld [vmem:[%s18208_s5 + $0x50] sm:$0xff]  }
 0x3f1   : > { %v8608_v0 = vrot.slane %v8606_v41, 1  ;;  %13032 = vmatpush3.bf16.msra.mxu0 %v14194_v57  ;;  %v14185_v41 = vld [vmem:[%s18208_s5 + $0x58] sm:$0xff]  }
 0x3f2   : > { %13033 = vmatprep.subr.bf16.mxu0 %v14196_v61  ;;  %v14186_v57 = vld [vmem:[%s18208_s5 + $0x18] sm:$0xff]   ;;  %v14188_v61 = vld [vmem:[%s18208_s5 + $0x10] sm:$0xff]  }
 0x3f3   : > { %v8609_v1 = vor.u32 %v8608_v0, %v8604_v63  ;;  %v14189_v63 = vld [vmem:[%s18208_s5 + $0x48] sm:$0xff]  }
 0x3f4   : > { %v14190_v0 = vld [vmem:[%s18208_s5 + $0x8] sm:$0xff]  }
 0x3f5   : > { %8610 = vrot.lane.b32.xlu0 %v8609_v1, %s18246_s22  ;;  %13034 = vmatpush3.bf16.msra.mxu0 %v14197_v9  ;;  %v14191_v1 = vld [vmem:[%s18208_s5 + $0x40] sm:$0xff]  }
 0x3f6   : > { %13035 = vmatprep.subr.bf16.mxu0 %v14199_v36  ;;  %v14192_v9 = vld [vmem:[%s18208_s5] sm:$0xff]   ;;  %v8577_v36 = vpop.permute.xlu1 %8576 }
 0x3f9   : > { %9081 = vrot.lane.b32.xlu0 %v17314_v16, %s18246_s22  ;;  %13036 = vmatpush3.bf16.msra.mxu0 %v14200_v8  ;;  %v14195_v8 = vld [vmem:[%s18208_s5 + $0x118] sm:$0xff]  }
 0x3fa   : > { %13037 = vmatprep.subr.bf16.mxu0 %v14202_v2  ;;  %v8618_v2 = vsel %vm557_vm5, %v17190_v27, %v8577_v36  ;;  %v14204_v27 = vld [vmem:[%s18208_s5 + $0x100] sm:$0xff]  }
 0x3fd   : > { %13038 = vmatpush3.bf16.msra.mxu0 %v14203_v11  ;;  %v14198_v11 = vld [vmem:[%s18208_s5 + $0x110] sm:$0xff]  }
 0x3fe   : > { %13039 = vmatprep.subr.bf16.mxu0 %v14205_v4  ;;  %v14201_v4 = vld [vmem:[%s18208_s5 + $0x108] sm:$0xff]  }
 0x401   : > { %13040 = vmatpush3.bf16.msra.mxu0 %v14207_v53  ;;  %v14206_v53 = vld [vmem:[#allocation3 + $0xc] ss:$0 sps:$4 sm:$0x66]  }
 0x402   : > { %13041 = vmatprep.subr.bf16.mxu0 %v14208_v58  ;;  %v14231_v58 = vld [vmem:[%s18208_s5 + $0xf8] sm:$0xff]  }
 0x405   : > { %13042 = vmatpush3.bf16.msra.mxu0 %v14209_v13  ;;  %v14233_v13 = vld [vmem:[%s18208_s5 + $0xb8] sm:$0xff]  }
 0x406   : > { %13043 = vmatprep.subr.bf16.mxu0 %v14210_v46  ;;  %v8615_v46 = vrot.slane %v14206_v53, 1 }
 0x409   : > { %13044 = vmatpush3.bf16.msra.mxu0 %v14211_v14  ;;  %v14234_v14 = vld [vmem:[%s18208_s5 + $0xf0] sm:$0xff]  }
 0x40a   : > { %13045 = vmatprep.subr.bf16.mxu0 %v14212_v45  ;;  %v14236_v45 = vld [vmem:[%s18208_s5 + $0xb0] sm:$0xff]  }
 0x40d   : > { %13046 = vmatpush3.bf16.msra.mxu0 %v14213_v55  ;;  %v14237_v55 = vld [vmem:[%s18208_s5 + $0xe8] sm:$0xff]  }
 0x40e   : > { %13058 = vmatprep.subr.bf16.mxu0 %v14214_v10  ;;  %v8590_v10 = vshll.u32 %v17261_v3, 16 }
 0x418   : > { %v12954_v62 = vpop.f32.mrf.mxu1 }
 0x41a   : > { %v12955_v20 = vpop.f32.mrf.mxu1 }
 0x41b   : > { %v12956_v54 = vadd.f32 %v12955_v20, %v12954_v62  ;;  %v14240_v62 = vld [vmem:[%s18208_s5 + $0xe0] sm:$0xff]   ;;  %v8592_v20 = vrot.slane %v8590_v10, 1 }
 0x41c   : > { %v12957_v24 = vpop.f32.mrf.mxu1 }
 0x41d   : > { %v8051_v30 = vadd.f32 %v12956_v54, %v8011_v21  ;;  %v14242_v21 = vld [vmem:[%s18208_s5 + $0xa0] sm:$0xff]   ;;  %v14244_v54 = vld [vmem:[%s18208_s5 + $0xd8] sm:$0xff]   ;;  %v8588_v24 = vshrl.u32 %v17261_v3, 16  ;;  %v14216_v3 = vld [vmem:[%s18208_s5 + $0x70] sm:$0xff]  }
 0x41e   : > { %v12958_v48 = vpop.f32.mrf.mxu1 }
 0x41f   : > { %v8056_v34 = vmax.f32 %v8051_v30, 0.0  ;;  %v8599_v30 = vpop.permute.xlu1 %8598  ;;  %v14217_v48 = vld [vmem:[#allocation3 + $0x8] ss:$0 sps:$4 sm:$0x66]   ;;  %v8593_v17 = vor.u32 %v8592_v20, %v8588_v24 }
 0x420   : > { %v9077_v39 = vrot.slane %v14217_v48, 1 }
 0x421   : > { %v8057_v37 = vpack.c.bf16 %v8056_v34, %v8056_v34  ;;  %v8626_v44 = vsel %vm557_vm5, %v8593_v17, %v8599_v30  ;;  %v14300_v17 = vld [vmem:[%s18210_s7 + $0x460] ss:$16 sps:$4 sm:$0xff]  }
 0x423   : > { %v8060_v7 = vsel %vm17090_vm10, %v8057_v37, %v8059_v12  ;;  %v14215_v12 = vld [vmem:[%s18208_s5 + $0x38] sm:$0xff]  }
 0x424   : > { %8061 = vst [vmem:[#allocation3 + $0x10] sm:$0x7] %v8060_v7  ;;  %v14245_v37 = vld [vmem:[%s18208_s5 + $0x98] sm:$0xff]   ;;  %v14246_v7 = vld [vmem:[%s18208_s5 + $0xd0] sm:$0xff]  }
 0x427   : > { %v8113_v19 = vpop.permute.xlu0 %8112 }
 0x428   : > { %v8132_v32 = vsel %vm557_vm5, %v17252_v26, %v8113_v19 }
 0x429   : > { %8504 = vmatprep.mubr.bf16.mxu1 %v8132_v32  ;;  %v14248_v32 = vld [vmem:[%s18208_s5 + $0xc8] sm:$0xff]  }
 0x42a   : > { %8505 = vmatmul.mubr.bf16.vlgmr.msra.gmra.mxu1 %v8128_v6  ;;  %v14249_v6 = vld [vmem:[%s18208_s5 + $0x88] sm:$0xff]  }
 0x42b   : > { %13010 = vmatpush3.bf16.msra.mxu1 %v14176_v43  ;;  %v8586_v49 = vpop.permute.xlu0 %8585  ;;  %v17373_v38 = vld [vmem:[#allocation3 + $0x10] sm:$0x3]  ;;  %v14219_v43 = vld [vmem:[%s18208_s5 + $0x68] sm:$0xff]  }
 0x42c   : > { %13011 = vmatprep.subr.bf16.mxu1 %v14177_v23  ;;  %v8622_v26 = vsel %vm557_vm5, %v8581_v50, %v8586_v49  ;;  %v12143_v51 = vcombine.low %v17373_v38, %v17373_v38  ;;  %v14220_v23 = vld [vmem:[%s18208_s5 + $0x28] sm:$0xff]   ;;  %v14221_v50 = vld [vmem:[%s18208_s5 + $0x60] sm:$0xff]  }
 0x42d   : > { %8962 = vmatprep.mubr.bf16.mxu1 %v8622_v26  ;;  %v14250_v49 = vld [vmem:[%s18208_s5 + $0xc0] sm:$0xff]  }
 0x42e   : > { %v9102_v47 = vshll.u32 %v12143_v51, 16  ;;  %v9100_v31 = vshrl.u32 %v12143_v51, 16  ;;  %v14251_v26 = vld [vmem:[%s18208_s5 + $0x80] sm:$0xff]   ;;  %v14224_v51 = vld [vmem:[%s18208_s5 + $0x18] sm:$0xff]  }
 0x42f   : > { %13012 = vmatpush3.bf16.msra.mxu1 %v14179_v29  ;;  %v14222_v29 = vld [vmem:[%s18208_s5 + $0x20] sm:$0xff]  }
 0x430   : > { %13013 = vmatprep.subr.bf16.mxu1 %v14180_v33  ;;  %v9104_v25 = vrot.slane %v9102_v47, 1  ;;  %v14223_v33 = vld [vmem:[%s18208_s5 + $0x58] sm:$0xff]   ;;  %v14225_v47 = vld [vmem:[%s18208_s5 + $0x50] sm:$0xff]  }
 0x432   : > { %v9105_v28 = vor.u32 %v9104_v25, %v9100_v31  ;;  %v14227_v31 = vld [vmem:[%s18208_s5 + $0x48] sm:$0xff]  }
 0x433   : > { %13014 = vmatpush3.bf16.msra.mxu1 %v14181_v52  ;;  %v14226_v52 = vld [vmem:[%s18208_s5 + $0x10] sm:$0xff]   ;;  %v14228_v25 = vld [vmem:[%s18208_s5 + $0x8] sm:$0xff]  }
 0x434   : > { %9106 = vrot.lane.b32.xlu0 %v9105_v28, %s18246_s22  ;;  %13015 = vmatprep.subr.bf16.mxu1 %v14183_v15  ;;  %v14229_v15 = vld [vmem:[%s18208_s5 + $0x40] sm:$0xff]  }
 0x435   : > { %v14230_v28 = vld [vmem:[%s18208_s5] sm:$0xff]  }
 0x437   : > { %13016 = vmatpush3.bf16.msra.mxu1 %v14184_v56  ;;  %v9073_v56 = vpop.permute.xlu1 %9072 }
 0x438   : > { %13017 = vmatprep.subr.bf16.mxu1 %v14185_v41  ;;  %v14232_v41 = vld [vmem:[%s18208_s5 + $0x118] sm:$0xff]  }
 0x43b   : > { %13018 = vmatpush3.bf16.msra.mxu1 %v14186_v57  ;;  %v9114_v57 = vsel %vm557_vm5, %v17250_v59, %v9073_v56  ;;  %v14241_v59 = vld [vmem:[%s18208_s5 + $0x100] sm:$0xff]  }
 0x43c   : > { %13019 = vmatprep.subr.bf16.mxu1 %v14187_v60  ;;  %v14235_v60 = vld [vmem:[%s18208_s5 + $0x110] sm:$0xff]  }
 0x43d   : > { %v14270_v56 = vld [vmem:[%s18210_s7 + $0x20] ss:$16 sps:$4 sm:$0xff]  }
 0x43f   : > { %13020 = vmatpush3.bf16.msra.mxu1 %v14188_v61  ;;  %v14238_v61 = vld [vmem:[%s18208_s5 + $0x108] sm:$0xff]  }
 0x440   : > { %13021 = vmatprep.subr.bf16.mxu1 %v14189_v63  ;;  %v14243_v63 = vld [vmem:[#allocation3 + $0x10] ss:$0 sps:$4 sm:$0x66]  }
 0x443   : > { %13022 = vmatpush3.bf16.msra.mxu1 %v14190_v0  ;;  %v9111_v0 = vrot.slane %v14243_v63, 1  ;;  %v14281_v63 = vld [vmem:[%s18210_s7 + $0x1c4] ss:$16 sps:$4 sm:$0xff]  }
 0x444   : > { %13023 = vmatprep.subr.bf16.mxu1 %v14191_v1  ;;  %v9086_v1 = vshll.u32 %v17314_v16, 16 }
 0x447   : > { %13024 = vmatpush3.bf16.msra.mxu1 %v14192_v9  ;;  %v9088_v9 = vrot.slane %v9086_v1, 1  ;;  %v14279_v1 = vld [vmem:[%s18210_s7 + $0x1c0] ss:$16 sps:$4 sm:$0xff]  }
 0x448   : > { %13403 = vmatprep.subr.bf16.mxu1 %v14582_v5 }
 0x44a   : > { %8963 = vmatmul.mubr.bf16.vlgmr.msra.gmra.mxu1 %v8618_v2 }
 0x44b   : > { %13404 = vmatpush3.bf16.msra.mxu1 %v14195_v8  ;;  %13411 = vmatprep.mubr.msk.bf16.mxu1 %vm14590_vm0, %v14582_v5  ;;  %v9084_v8 = vshrl.u32 %v17314_v16, 16  ;;  %v17564_v16 = vld [vmem:[%s18209_s6] ss:$0 sm:$0xff] }
 0x44c   : > { %13405 = vmatprep.subr.bf16.mxu1 %v14582_v5 }
 0x44f   : > { %13406 = vmatpush3.bf16.msra.mxu1 %v14198_v11 }
 0x450   : > { %13407 = vmatprep.subr.bf16.mxu1 %v14582_v5 }
 0x453   : > { %13408 = vmatpush3.bf16.msra.mxu1 %v14201_v4 }
 0x454   : > { %13409 = vmatprep.subr.bf16.mxu1 %v14582_v5 }
 0x457   : > { %13410 = vmatpush3.bf16.msra.mxu1 %v14204_v27  ;;  %v9089_v27 = vor.u32 %v9088_v9, %v9084_v8  ;;  %v14284_v9 = vld [vmem:[%s18210_s7 + $0x1a4] ss:$16 sps:$4 sm:$0xff]  }
 0x458   : > { %13080 = vmatprep.subr.bf16.mxu1 %v14231_v58 }
 0x45a   : > { %13412 = vmatmul.mubr.msk.bf16.vlgmr.msra.gmra.mxu1 %vm557_vm5, %v8615_v46 }
 0x45b   : > { %13081 = vmatpush3.bf16.msra.mxu1 %v14233_v13 }
 0x45c   : > { %13082 = vmatprep.subr.bf16.mxu1 %v14234_v14 }
 0x45f   : > { %13083 = vmatpush3.bf16.msra.mxu1 %v14236_v45 }
 0x460   : > { %13084 = vmatprep.subr.bf16.mxu1 %v14237_v55  ;;  %v9095_v11 = vpop.permute.xlu1 %9094 }
 0x461   : > { %v9122_v13 = vsel %vm557_vm5, %v9089_v27, %v9095_v11  ;;  %v14287_v11 = vld [vmem:[%s18210_s7 + $0x184] ss:$16 sps:$4 sm:$0xff]   ;;  %v14285_v27 = vld [vmem:[%s18210_s7 + $0x180] ss:$16 sps:$4 sm:$0xff]  }
 0x463   : > { %13085 = vmatpush3.bf16.msra.mxu1 %v14239_v18 }
 0x464   : > { %13086 = vmatprep.subr.bf16.mxu1 %v14240_v62 }
 0x467   : > { %v8611_v34 = vpop.permute.xlu0 %8610  ;;  %13087 = vmatpush3.bf16.msra.mxu1 %v14242_v21 }
 0x468   : > { %v8630_v35 = vsel %vm557_vm5, %v17295_v42, %v8611_v34  ;;  %13088 = vmatprep.subr.bf16.mxu1 %v14244_v54  ;;  %v14218_v42 = vld [vmem:[%s18208_s5 + $0x30] sm:$0xff]   ;;  %v8557_v34 = vld [vmem:[#allocation4] sm:$0x3] }
 0x469   : > { %9002 = vmatprep.mubr.bf16.mxu0 %v8630_v35  ;;  %v9562_v35 = vlaneseq }
 0x46a   : > { %9003 = vmatmul.mubr.bf16.vlgmr.msra.gmra.mxu0 %v8626_v44  ;;  %v14252_v44 = vld [vmem:[%s18210_s7 + $0xe0] ss:$16 sps:$4 sm:$0xff]  }
 0x46b   : > { %13059 = vmatpush3.bf16.msra.mxu0 %v14215_v12  ;;  %v9082_v40 = vpop.permute.xlu0 %9081  ;;  %13089 = vmatpush3.bf16.msra.mxu1 %v14245_v37  ;;  %v14591_v12 = vmov 1983009808  }
 0x46c   : > { %13060 = vmatprep.subr.bf16.mxu0 %v14216_v3  ;;  %v9118_v19 = vsel %vm557_vm5, %v9077_v39, %v9082_v40  ;;  %13090 = vmatprep.subr.bf16.mxu1 %v14246_v7  ;;  %v9560_v37 = vunpack.c.l.s4 %v14591_v12  ;;  %v14254_v39 = vld [vmem:[%s18210_s7 + $0xe4] ss:$16 sps:$4 sm:$0xff]  }
 0x46d   : > { %9458 = vmatprep.mubr.bf16.mxu0 %v9118_v19  ;;  %v14255_v19 = vld [vmem:[%s18210_s7 + $0xc0] ss:$16 sps:$4 sm:$0xff]   ;;  %v14302_v12 = vld [vmem:[%s18210_s7 + $0x464] ss:$16 sps:$4 sm:$0xff]  }
 0x46e   : > { %v9561_v40 = vunpack.c.0.s8 %v9560_v37 }
 0x46f   : > { %13061 = vmatpush3.bf16.msra.mxu0 %v14218_v42  ;;  %13091 = vmatpush3.bf16.msra.mxu1 %v14247_v22  ;;  %v17579_v42 = vshrl.u32 %v9562_v35, 7  ;;  %v14257_v22 = vld [vmem:[%s18210_s7 + $0xc4] ss:$16 sps:$4 sm:$0xff]   ;;  %v14303_v35 = vld [vmem:[%s18210_s7 + $0x2e0] ss:$16 sps:$4 sm:$0xff]  }
 0x470   : > { %13062 = vmatprep.subr.bf16.mxu0 %v14219_v43  ;;  %13092 = vmatprep.subr.bf16.mxu1 %v14248_v32  ;;  %v14260_v43 = vld [vmem:[%s18210_s7 + $0xa4] ss:$16 sps:$4 sm:$0xff]  }
 0x471   : > { %v17591_v32 = vsub.s32 %v9561_v40, %v17579_v42  ;;  %v14315_v40 = vld [vmem:[%s18210_s7 + $0x2a0] ss:$16 sps:$4 sm:$0xff]  }
 0x473   : > { %13063 = vmatpush3.bf16.msra.mxu0 %v14220_v23  ;;  %13093 = vmatpush3.bf16.msra.mxu1 %v14249_v6  ;;  %v14258_v23 = vld [vmem:[%s18210_s7 + $0xa0] ss:$16 sps:$4 sm:$0xff]  }
 0x474   : > { %13064 = vmatprep.subr.bf16.mxu0 %v14221_v50  ;;  %13094 = vmatprep.subr.bf16.mxu1 %v14250_v49  ;;  %v14263_v50 = vld [vmem:[%s18210_s7 + $0x84] ss:$16 sps:$4 sm:$0xff]  }
 0x477   : > { %13065 = vmatpush3.bf16.msra.mxu0 %v14222_v29  ;;  %13095 = vmatpush3.bf16.msra.mxu1 %v14251_v26  ;;  %v14261_v26 = vld [vmem:[%s18210_s7 + $0x80] ss:$16 sps:$4 sm:$0xff]  }
 0x478   : > { %13066 = vmatprep.subr.bf16.mxu0 %v14223_v33  ;;  %10531 = vmatprep.subr.bf16.mxu1 %v14254_v39  ;;  %v14266_v33 = vld [vmem:[%s18210_s7 + $0x64] ss:$16 sps:$4 sm:$0xff]  }
 0x479   : > { %v14311_v39 = vld [vmem:[%s18210_s7 + $0x2c4] ss:$16 sps:$4 sm:$0xff]  }
 0x47b   : > { %13067 = vmatpush3.bf16.msra.mxu0 %v14224_v51  ;;  %v14264_v51 = vld [vmem:[%s18210_s7 + $0x60] ss:$16 sps:$4 sm:$0xff]  }
 0x47c   : > { %13068 = vmatprep.subr.bf16.mxu0 %v14225_v47  ;;  %v14269_v47 = vld [vmem:[%s18210_s7 + $0x44] ss:$16 sps:$4 sm:$0xff]  }
 0x47f   : > { %13069 = vmatpush3.bf16.msra.mxu0 %v14226_v52 }
 0x480   : > { %13070 = vmatprep.subr.bf16.mxu0 %v14227_v31  ;;  %v14267_v31 = vld [vmem:[%s18210_s7 + $0x40] ss:$16 sps:$4 sm:$0xff]  }
 0x483   : > { %13071 = vmatpush3.bf16.msra.mxu0 %v14228_v25  ;;  %v14272_v25 = vld [vmem:[%s18210_s7 + $0x24] ss:$16 sps:$4 sm:$0xff]  }
 0x484   : > { %13072 = vmatprep.subr.bf16.mxu0 %v14229_v15 }
 0x487   : > { %13073 = vmatpush3.bf16.msra.mxu0 %v14230_v28 }
 0x488   : > { %13415 = vmatprep.subr.bf16.mxu0 %v14582_v5 }
 0x48a   : > { %9459 = vmatmul.mubr.bf16.vlgmr.msra.gmra.mxu0 %v9114_v57 }
 0x48b   : > { %13416 = vmatpush3.bf16.msra.mxu0 %v14232_v41  ;;  %13423 = vmatprep.mubr.msk.bf16.mxu0 %vm14590_vm0, %v14582_v5  ;;  %v14275_v41 = vld [vmem:[%s18210_s7 + $0x4] ss:$16 sps:$4 sm:$0xff]  }
 0x48c   : > { %13417 = vmatprep.subr.bf16.mxu0 %v14582_v5 }
 0x48f   : > { %13418 = vmatpush3.bf16.msra.mxu0 %v14235_v60  ;;  %v14273_v60 = vld [vmem:[%s18210_s7] ss:$16 sps:$4 sm:$0xff]  }
 0x490   : > { %13419 = vmatprep.subr.bf16.mxu0 %v14582_v5 }
 0x493   : > { %13420 = vmatpush3.bf16.msra.mxu0 %v14238_v61  ;;  %v14278_v61 = vld [vmem:[%s18210_s7 + $0x1e4] ss:$16 sps:$4 sm:$0xff]  }
 0x494   : > { %13421 = vmatprep.subr.bf16.mxu0 %v14582_v5 }
 0x497   : > { %13422 = vmatpush3.bf16.msra.mxu0 %v14241_v59  ;;  %v14276_v59 = vld [vmem:[%s18210_s7 + $0x1e0] ss:$16 sps:$4 sm:$0xff]  }
 0x49a   : > { %13424 = vmatmul.mubr.msk.bf16.vlgmr.msra.gmra.mxu0 %vm557_vm5, %v9111_v0 }
 0x4a0   : > { %v12976_v36 = vpop.f32.mrf.mxu0 }
 0x4a2   : > { %v12977_v2 = vpop.f32.mrf.mxu0 }
 0x4a3   : > { %v12978_v4 = vadd.f32 %v12977_v2, %v12976_v36  ;;  %v14282_v2 = vld [vmem:[%s18210_s7 + $0x1a0] ss:$16 sps:$4 sm:$0xff]  }
 0x4a4   : > { %v12979_v58 = vpop.f32.mrf.mxu0 }
 0x4a5   : > { %v8467_v20 = vadd.f32 %v12978_v4, %v17564_v16  ;;  %v14288_v58 = vld [vmem:[%s18210_s7 + $0x160] ss:$16 sps:$4 sm:$0xff]  }
 0x4a6   : > { %v9107_v53 = vpop.permute.xlu0 %9106  ;;  %v12980_v46 = vpop.f32.mrf.mxu0 }
 0x4a7   : > { %v9126_v5 = vsel %vm557_vm5, %v17373_v38, %v9107_v53  ;;  %v14290_v53 = vld [vmem:[%s18210_s7 + $0x164] ss:$16 sps:$4 sm:$0xff]  }
 0x4a8   : > { %9498 = vmatprep.mubr.bf16.mxu1 %v9126_v5  ;;  %v14293_v5 = vld [vmem:[%s18210_s7 + $0x144] ss:$16 sps:$4 sm:$0xff]  }
 0x4a9   : > { %9499 = vmatmul.mubr.bf16.vlgmr.msra.gmra.mxu1 %v9122_v13 }
 0x4aa   : > { %10532 = vmatpush1.bf16.msra.mxu1 %v14252_v44  ;;  %v14309_v44 = vld [vmem:[%s18210_s7 + $0x2c0] ss:$16 sps:$4 sm:$0xff]  }
 0x4ab   : > { %10533 = vmatprep.subr.bf16.mxu1 %v14257_v22  ;;  %v14317_v22 = vld [vmem:[%s18210_s7 + $0x2a4] ss:$16 sps:$4 sm:$0xff]  }
 0x4ae   : > { %10534 = vmatpush1.bf16.msra.mxu1 %v14255_v19 }
 0x4af   : > { %10535 = vmatprep.subr.bf16.mxu1 %v14260_v43 }
 0x4b0   : > { %v8546_v14 = vpop.f32.mrf.mxu0 }
 0x4b2   : > { %v13401_v45 = vpop.f32.mrf.mxu0  ;;  %10536 = vmatpush1.bf16.msra.mxu1 %v14258_v23 }
 0x4b3   : > { %10537 = vmatprep.subr.bf16.mxu1 %v14263_v50  ;;  %v14296_v45 = vld [vmem:[%s18210_s7 + $0x124] ss:$16 sps:$4 sm:$0xff]   ;;  %v14321_v50 = vld [vmem:[%s18210_s7 + $0x280] ss:$16 sps:$4 sm:$0xff]  }
 0x4b4   : > { %v8549_v55 = vpop.f32.mrf.mxu0 }
 0x4b6   : > { %v13402_v10 = vpop.f32.mrf.mxu0  ;;  %10538 = vmatpush1.bf16.msra.mxu1 %v14261_v26  ;;  %v14329_v26 = vld [vmem:[%s18210_s7 + $0x264] ss:$16 sps:$4 sm:$0xff]  }
 0x4b7   : > { %10539 = vmatprep.subr.bf16.mxu1 %v14266_v33 }
 0x4ba   : > { %10540 = vmatpush1.bf16.msra.mxu1 %v14264_v51  ;;  %v14333_v51 = vld [vmem:[%s18210_s7 + $0x240] ss:$16 sps:$4 sm:$0xff]  }
 0x4bb   : > { %10541 = vmatprep.subr.bf16.mxu1 %v14269_v47  ;;  %v14335_v47 = vld [vmem:[%s18210_s7 + $0x244] ss:$16 sps:$4 sm:$0xff]  }
 0x4be   : > { %10542 = vmatpush1.bf16.msra.mxu1 %v14267_v31 }
 0x4bf   : > { %10543 = vmatprep.subr.bf16.mxu1 %v14272_v25  ;;  %v14339_v25 = vld [vmem:[%s18210_s7 + $0x220] ss:$16 sps:$4 sm:$0xff]  }
 0x4c2   : > { %10544 = vmatpush1.bf16.msra.mxu1 %v14270_v56  ;;  %v14345_v56 = vld [vmem:[%s18210_s7 + $0x200] ss:$16 sps:$4 sm:$0xff]  }
 0x4c3   : > { %10545 = vmatprep.subr.bf16.mxu1 %v14275_v41  ;;  %v14347_v41 = vld [vmem:[%s18210_s7 + $0x204] ss:$16 sps:$4 sm:$0xff]  }
 0x4c6   : > { %10546 = vmatpush1.bf16.msra.mxu1 %v14273_v60  ;;  %v14353_v60 = vld [vmem:[%s18210_s7 + $0x3e4] ss:$16 sps:$4 sm:$0xff]  }
 0x4c7   : > { %10547 = vmatprep.subr.bf16.mxu1 %v14278_v61 }
 0x4ca   : > { %10548 = vmatpush2.bf16.msra.mxu1 %v14276_v59  ;;  %v14357_v59 = vld [vmem:[%s18210_s7 + $0x3c0] ss:$16 sps:$4 sm:$0xff]  }
 0x4cb   : > { %10549 = vmatprep.subr.bf16.mxu1 %v14281_v63  ;;  %v14359_v63 = vld [vmem:[%s18210_s7 + $0x3c4] ss:$16 sps:$4 sm:$0xff]  }
 0x4ce   : > { %10550 = vmatpush2.bf16.msra.mxu1 %v14279_v1 }
 0x4cf   : > { %10551 = vmatprep.subr.bf16.mxu1 %v14284_v9  ;;  %v14363_v9 = vld [vmem:[%s18210_s7 + $0x3a0] ss:$16 sps:$4 sm:$0xff]  }
 0x4d2   : > { %10552 = vmatpush2.bf16.msra.mxu1 %v14282_v2  ;;  %v14369_v2 = vld [vmem:[%s18210_s7 + $0x380] ss:$16 sps:$4 sm:$0xff]  }
 0x4d3   : > { %10553 = vmatprep.subr.bf16.mxu1 %v14287_v11  ;;  %v14371_v11 = vld [vmem:[%s18210_s7 + $0x384] ss:$16 sps:$4 sm:$0xff]  }
 0x4d6   : > { %10554 = vmatpush2.bf16.msra.mxu1 %v14285_v27  ;;  %v14377_v27 = vld [vmem:[%s18210_s7 + $0x364] ss:$16 sps:$4 sm:$0xff]  }
 0x4d7   : > { %10555 = vmatprep.subr.bf16.mxu1 %v14290_v53 }
 0x4da   : > { %10556 = vmatpush2.bf16.msra.mxu1 %v14288_v58 }
 0x4db   : > { %10557 = vmatprep.subr.bf16.mxu1 %v14293_v5  ;;  %v14381_v5 = vld [vmem:[%s18210_s7 + $0x340] ss:$16 sps:$4 sm:$0xff]  }
 0x4ea   : > { %v12998_v18 = vpop.f32.mrf.mxu1 }
 0x4ec   : > { %v12999_v62 = vpop.f32.mrf.mxu1 }
 0x4ed   : > { %v13000_v21 = vadd.f32 %v12999_v62, %v12998_v18 }
 0x4ee   : > { %v13001_v38 = vpop.f32.mrf.mxu1 }
 0x4ef   : > { %v8507_v54 = vadd.f32 %v13000_v21, %v8467_v20  ;;  %v14294_v20 = vld [vmem:[%s18210_s7 + $0x120] ss:$16 sps:$4 sm:$0xff]   ;;  %v14299_v38 = vld [vmem:[%s18210_s7 + $0x104] ss:$16 sps:$4 sm:$0xff]  }
 0x4f0   : > { %v13002_v24 = vpop.f32.mrf.mxu1 }
 0x4f1   : > { %v8547_v30 = vadd.f32 %v8546_v14, %v8507_v54  ;;  %v14291_v14 = vld [vmem:[%s18210_s7 + $0x140] ss:$16 sps:$4 sm:$0xff]  }
 0x4f2   : > { %10558 = vmatpush2.bf16.msra.mxu1 %v14291_v14 }
 0x4f3   : > { %v8552_v48 = vmax.f32 %v8547_v30, 0.0  ;;  %10559 = vmatprep.subr.bf16.mxu1 %v14296_v45  ;;  %v14297_v30 = vld [vmem:[%s18210_s7 + $0x100] ss:$16 sps:$4 sm:$0xff]  }
 0x4f5   : > { %v8553_v3 = vpack.c.bf16 %v8552_v48, %v8552_v48 }
 0x4f6   : > { %10560 = vmatpush2.bf16.msra.mxu1 %v14294_v20 }
 0x4f7   : > { %v8558_v7 = vsel %vm17567_vm13, %v8553_v3, %v8557_v34  ;;  %10561 = vmatprep.subr.bf16.mxu1 %v14299_v38  ;;  %v9053_v34 = vld [vmem:[#allocation4 + $0x2] sm:$0x3] }
 0x4f8   : > { %8559 = vst [vmem:[#allocation4] sm:$0x3] %v8558_v7  ;;  %v14305_v3 = vld [vmem:[%s18210_s7 + $0x2e4] ss:$16 sps:$4 sm:$0xff]  }
 0x4f9   : > { %10572 = vmatprep.subr.bf16.mxu0 %v14305_v3 }
 0x4fa   : > { %10562 = vmatpush2.bf16.msra.mxu1 %v14297_v30  ;;  %10573 = vmatpush1.bf16.msra.mxu0 %v14303_v35 }
 0x4fb   : > { %10621 = vmatprep.subr.bf16.mxu1 %v14302_v12  ;;  %10574 = vmatprep.subr.bf16.mxu0 %v14311_v39 }
 0x4fe   : > { %10575 = vmatpush1.bf16.msra.mxu0 %v14309_v44 }
 0x4ff   : > { %v17596_v6 = vld [vmem:[#allocation4] sm:$0x1]  ;;  %10576 = vmatprep.subr.bf16.mxu0 %v14317_v22  ;;  %v12183_v3 = vld.sshfl [vmem:[#allocation4] sm:$0x2 pattern:$0x76325410] }
 0x500   : > { %v9565_v49 = vrot.slane %v17596_v6, %v17591_v32  ;;  %v9579_v44 = vrot.slane %v12183_v3, 1  ;;  %v14308_v22 = vld [vmem:[%s18210_s7 + $0x444] ss:$16 sps:$4 sm:$0xff]   ;;  %v14423_v3 = vld [vmem:[%s18210_s7 + $0x48] ss:$16 sps:$4 sm:$0xff]  }
 0x502   : > { %v9567_v29 = vshrl.u32 %v9565_v49, 16  ;;  %10577 = vmatpush1.bf16.msra.mxu0 %v14315_v40  ;;  %v14323_v49 = vld [vmem:[%s18210_s7 + $0x284] ss:$16 sps:$4 sm:$0xff]  }
 0x503   : > { %10578 = vmatprep.subr.bf16.mxu0 %v14323_v49  ;;  %v14320_v49 = vld [vmem:[%s18210_s7 + $0x404] ss:$16 sps:$4 sm:$0xff]  }
 0x504   : > { %9569 = vrot.lane.b32.xlu1 %v9567_v29, %s18246_s22  ;;  %v14327_v29 = vld [vmem:[%s18210_s7 + $0x260] ss:$16 sps:$4 sm:$0xff]  }
 0x506   : > { %10579 = vmatpush1.bf16.msra.mxu0 %v14321_v50  ;;  %v14314_v50 = vld [vmem:[%s18210_s7 + $0x424] ss:$16 sps:$4 sm:$0xff]  }
 0x507   : > { %10580 = vmatprep.subr.bf16.mxu0 %v14329_v26  ;;  %v14326_v26 = vld [vmem:[%s18210_s7 + $0x2ec] ss:$16 sps:$4 sm:$0xff]  }
 0x50a   : > { %v13025_v52 = vpop.f32.mrf.mxu1  ;;  %10581 = vmatpush1.bf16.msra.mxu0 %v14327_v29  ;;  %v14318_v29 = vld [vmem:[%s18210_s7 + $0x400] ss:$16 sps:$4 sm:$0xff]  }
 0x50b   : > { %10582 = vmatprep.subr.bf16.mxu0 %v14335_v47 }
 0x50c   : > { %v13026_v15 = vpop.f32.mrf.mxu1 }
 0x50d   : > { %v13027_v13 = vadd.f32 %v13026_v15, %v13025_v52  ;;  %v14341_v15 = vld [vmem:[%s18210_s7 + $0x224] ss:$16 sps:$4 sm:$0xff]  }
 0x50e   : > { %v13028_v28 = vpop.f32.mrf.mxu1  ;;  %10583 = vmatpush1.bf16.msra.mxu0 %v14333_v51  ;;  %v14324_v51 = vld [vmem:[%s18210_s7 + $0x2e8] ss:$16 sps:$4 sm:$0xff]  }
 0x50f   : > { %v8965_v10 = vadd.f32 %v13027_v13, %v17564_v16  ;;  %10584 = vmatprep.subr.bf16.mxu0 %v14341_v15  ;;  %v14383_v13 = vld [vmem:[%s18210_s7 + $0x344] ss:$16 sps:$4 sm:$0xff]   ;;  %v14336_v15 = vld [vmem:[%s18210_s7 + $0x2a8] ss:$16 sps:$4 sm:$0xff]  }
 0x510   : > { %v13029_v57 = vpop.f32.mrf.mxu1 }
 0x511   : > { %v14351_v57 = vld [vmem:[%s18210_s7 + $0x3e0] ss:$16 sps:$4 sm:$0xff]  }
 0x512   : > { %10585 = vmatpush1.bf16.msra.mxu0 %v14339_v25  ;;  %v14338_v25 = vld [vmem:[%s18210_s7 + $0x2ac] ss:$16 sps:$4 sm:$0xff]  }
 0x513   : > { %10586 = vmatprep.subr.bf16.mxu0 %v14347_v41  ;;  %v14350_v41 = vld [vmem:[%s18210_s7 + $0x26c] ss:$16 sps:$4 sm:$0xff]  }
 0x516   : > { %10587 = vmatpush1.bf16.msra.mxu0 %v14345_v56  ;;  %v14342_v56 = vld [vmem:[%s18210_s7 + $0x288] ss:$16 sps:$4 sm:$0xff]  }
 0x517   : > { %10588 = vmatprep.subr.bf16.mxu0 %v14353_v60  ;;  %v14356_v60 = vld [vmem:[%s18210_s7 + $0x24c] ss:$16 sps:$4 sm:$0xff]  }
 0x51a   : > { %v9044_v0 = vpop.f32.mrf.mxu1  ;;  %10589 = vmatpush2.bf16.msra.mxu0 %v14351_v57  ;;  %v14348_v57 = vld [vmem:[%s18210_s7 + $0x268] ss:$16 sps:$4 sm:$0xff]  }
 0x51b   : > { %10590 = vmatprep.subr.bf16.mxu0 %v14359_v63  ;;  %v14360_v63 = vld [vmem:[%s18210_s7 + $0x228] ss:$16 sps:$4 sm:$0xff]  }
 0x51c   : > { %v13413_v36 = vpop.f32.mrf.mxu1 }
 0x51d   : > { %v14365_v36 = vld [vmem:[%s18210_s7 + $0x3a4] ss:$16 sps:$4 sm:$0xff]  }
 0x51e   : > { %v9047_v8 = vpop.f32.mrf.mxu1  ;;  %10591 = vmatpush2.bf16.msra.mxu0 %v14357_v59  ;;  %v14362_v59 = vld [vmem:[%s18210_s7 + $0x22c] ss:$16 sps:$4 sm:$0xff]  }
 0x51f   : > { %10592 = vmatprep.subr.bf16.mxu0 %v14365_v36  ;;  %v14372_v36 = vld [vmem:[%s18210_s7 + $0x3e8] ss:$16 sps:$4 sm:$0xff]  }
 0x520   : > { %v13414_v4 = vpop.f32.mrf.mxu1 }
 0x521   : > { %v14375_v4 = vld [vmem:[%s18210_s7 + $0x360] ss:$16 sps:$4 sm:$0xff]  }
 0x522   : > { %10593 = vmatpush2.bf16.msra.mxu0 %v14363_v9  ;;  %v14374_v9 = vld [vmem:[%s18210_s7 + $0x3ec] ss:$16 sps:$4 sm:$0xff]  }
 0x523   : > { %10594 = vmatprep.subr.bf16.mxu0 %v14371_v11  ;;  %v14386_v11 = vld [vmem:[%s18210_s7 + $0x3ac] ss:$16 sps:$4 sm:$0xff]  }
 0x526   : > { %10595 = vmatpush2.bf16.msra.mxu0 %v14369_v2  ;;  %v14378_v2 = vld [vmem:[%s18210_s7 + $0x3c8] ss:$16 sps:$4 sm:$0xff]  }
 0x527   : > { %10596 = vmatprep.subr.bf16.mxu0 %v14377_v27  ;;  %v14392_v27 = vld [vmem:[%s18210_s7 + $0x38c] ss:$16 sps:$4 sm:$0xff]  }
 0x52a   : > { %v13047_v46 = vpop.f32.mrf.mxu0  ;;  %10597 = vmatpush2.bf16.msra.mxu0 %v14375_v4  ;;  %v14384_v4 = vld [vmem:[%s18210_s7 + $0x3a8] ss:$16 sps:$4 sm:$0xff]  }
 0x52b   : > { %10598 = vmatprep.subr.bf16.mxu0 %v14383_v13  ;;  %v14404_v13 = vld [vmem:[%s18210_s7 + $0x34c] ss:$16 sps:$4 sm:$0xff]  }
 0x52c   : > { %v13048_v55 = vpop.f32.mrf.mxu0 }
 0x52d   : > { %v13049_v18 = vadd.f32 %v13048_v55, %v13047_v46 }
 0x52e   : > { %v13050_v62 = vpop.f32.mrf.mxu0  ;;  %10599 = vmatpush2.bf16.msra.mxu0 %v14381_v5  ;;  %v14396_v5 = vld [vmem:[%s18210_s7 + $0x368] ss:$16 sps:$4 sm:$0xff]  }
 0x52f   : > { %v9005_v21 = vadd.f32 %v13049_v18, %v8965_v10  ;;  %v14387_v18 = vld [vmem:[%s18210_s7 + $0x320] ss:$16 sps:$4 sm:$0xff]   ;;  %v14389_v62 = vld [vmem:[%s18210_s7 + $0x324] ss:$16 sps:$4 sm:$0xff]  }
 0x530   : > { %v13051_v54 = vpop.f32.mrf.mxu0  ;;  %10600 = vmatprep.subr.bf16.mxu0 %v14389_v62  ;;  %v14407_v62 = vld [vmem:[%s18210_s7 + $0xcc] ss:$16 sps:$4 sm:$0xff]  }
 0x531   : > { %v9045_v24 = vadd.f32 %v9044_v0, %v9005_v21  ;;  %v14395_v54 = vld [vmem:[%s18210_s7 + $0x304] ss:$16 sps:$4 sm:$0xff]  }
 0x532   : > { %10601 = vmatpush2.bf16.msra.mxu0 %v14387_v18  ;;  %v14402_v18 = vld [vmem:[%s18210_s7 + $0x348] ss:$16 sps:$4 sm:$0xff]  }
 0x533   : > { %v9050_v48 = vmax.f32 %v9045_v24, 0.0  ;;  %v9549_v24 = vld [vmem:[#allocation4 + $0x4] sm:$0x3]  ;;  %10602 = vmatprep.subr.bf16.mxu0 %v14395_v54  ;;  %v14416_v54 = vld [vmem:[%s18210_s7 + $0x30c] ss:$16 sps:$4 sm:$0xff]  }
 0x535   : > { %v9051_v37 = vpack.c.bf16 %v9050_v48, %v9050_v48 }
 0x537   : > { %v9054_v7 = vsel %vm17567_vm13, %v9051_v37, %v9053_v34  ;;  %v14401_v34 = vld [vmem:[%s18210_s7 + $0xec] ss:$16 sps:$4 sm:$0xff]  }
 0x538   : > { %9055 = vst [vmem:[#allocation4 + $0x2] sm:$0x3] %v9054_v7 }
 0x53f   : > { %v17703_v19 = vld.sshfl [vmem:[#allocation4 + $0x2] sm:$0x1 pattern:$0x76325410] }
 0x540   : > { %9588 = vrot.lane.b32.xlu0 %v17703_v19, %s18246_s22  ;;  %v12185_v43 = vld.sshfl [vmem:[#allocation4 + $0x2] sm:$0x2 pattern:$0x76325410] }
 0x541   : > { %v9601_v23 = vrot.slane %v12185_v43, 1  ;;  %v14306_v43 = vld [vmem:[%s18210_s7 + $0x440] ss:$16 sps:$4 sm:$0xff]  }
 0x543   : > { %9602 = vrot.lane.b32.xlu1 %v9601_v23, %s18246_s22  ;;  %v14592_v23 = vmov 0  }
 0x54a   : > { %v13074_v33 = vpop.f32.mrf.mxu0 }
 0x54c   : > { %v13075_v52 = vpop.f32.mrf.mxu0 }
 0x54d   : > { %v13076_v53 = vadd.f32 %v13075_v52, %v13074_v33  ;;  %v14332_v52 = vld [vmem:[%s18210_s7 + $0x2cc] ss:$16 sps:$4 sm:$0xff]  }
 0x54e   : > { %v13077_v31 = vpop.f32.mrf.mxu0 }
 0x54f   : > { %v9461_v14 = vadd.f32 %v13076_v53, %v17564_v16  ;;  %v14393_v16 = vld [vmem:[%s18210_s7 + $0x300] ss:$16 sps:$4 sm:$0xff]   ;;  %v14330_v31 = vld [vmem:[%s18210_s7 + $0x2c8] ss:$16 sps:$4 sm:$0xff]  }
 0x550   : > { %v13078_v28 = vpop.f32.mrf.mxu0  ;;  %10603 = vmatpush2.bf16.msra.mxu0 %v14393_v16  ;;  %v14390_v53 = vld [vmem:[%s18210_s7 + $0x388] ss:$16 sps:$4 sm:$0xff]   ;;  %v14413_v16 = vld [vmem:[%s18210_s7 + $0xac] ss:$16 sps:$4 sm:$0xff]  }
 0x551   : > { %10654 = vmatprep.subr.bf16.mxu0 %v14401_v34  ;;  %v14344_v28 = vld [vmem:[%s18210_s7 + $0x28c] ss:$16 sps:$4 sm:$0xff]   ;;  %v14417_v34 = vld [vmem:[%s18210_s7 + $0x88] ss:$16 sps:$4 sm:$0xff]  }
 0x55a   : > { %v9540_v61 = vpop.f32.mrf.mxu0 }
 0x55c   : > { %v13425_v0 = vpop.f32.mrf.mxu0 }
 0x55d   : > { %v14368_v0 = vld [vmem:[%s18210_s7 + $0x20c] ss:$16 sps:$4 sm:$0xff]  }
 0x55e   : > { %v9543_v1 = vpop.f32.mrf.mxu0 }
 0x55f   : > { %v14366_v1 = vld [vmem:[%s18210_s7 + $0x208] ss:$16 sps:$4 sm:$0xff]  }
 0x560   : > { %v13426_v8 = vpop.f32.mrf.mxu0 }
 0x561   : > { %v14380_v8 = vld [vmem:[%s18210_s7 + $0x3cc] ss:$16 sps:$4 sm:$0xff]  }
 0x569   : > { %v13096_v58 = vpop.f32.mrf.mxu1 }
 0x56b   : > { %v13097_v46 = vpop.f32.mrf.mxu1 }
 0x56c   : > { %v13098_v45 = vadd.f32 %v13097_v46, %v13096_v58  ;;  %v14398_v58 = vld [vmem:[%s18210_s7 + $0x36c] ss:$16 sps:$4 sm:$0xff]  }
 0x56d   : > { %v13099_v55 = vpop.f32.mrf.mxu1 }
 0x56e   : > { %v9501_v10 = vadd.f32 %v13098_v45, %v9461_v14  ;;  %v9591_v14 = vshrl.u32 %v17703_v19, 16  ;;  %v14399_v55 = vld [vmem:[%s18210_s7 + $0xe8] ss:$16 sps:$4 sm:$0xff]   ;;  %v14410_v19 = vld [vmem:[%s18210_s7 + $0x32c] ss:$16 sps:$4 sm:$0xff]  }
 0x56f   : > { %v13100_v20 = vpop.f32.mrf.mxu1 }
 0x570   : > { %v9541_v21 = vadd.f32 %v9540_v61, %v9501_v10  ;;  %v14354_v61 = vld [vmem:[%s18210_s7 + $0x248] ss:$16 sps:$4 sm:$0xff]  }
 0x572   : > { %v9546_v38 = vmax.f32 %v9541_v21, 0.0  ;;  %v14405_v21 = vld [vmem:[%s18210_s7 + $0xc8] ss:$16 sps:$4 sm:$0xff]  }
 0x574   : > { %v9547_v30 = vpack.c.bf16 %v9546_v38, %v9546_v38  ;;  %v14408_v38 = vld [vmem:[%s18210_s7 + $0x328] ss:$16 sps:$4 sm:$0xff]  }
 0x576   : > { %v9550_v48 = vsel %vm17567_vm13, %v9547_v30, %v9549_v24  ;;  %v9570_v7 = vpop.permute.xlu1 %9569  ;;  %v14411_v24 = vld [vmem:[%s18210_s7 + $0xa8] ss:$16 sps:$4 sm:$0xff]  }
 0x577   : > { %9551 = vst [vmem:[#allocation4 + $0x4] sm:$0x3] %v9550_v48  ;;  %v14414_v30 = vld [vmem:[%s18210_s7 + $0x308] ss:$16 sps:$4 sm:$0xff]   ;;  %v14419_v48 = vld [vmem:[%s18210_s7 + $0x8c] ss:$16 sps:$4 sm:$0xff]  }
 0x57e   : > { %v17792_v12 = vld [vmem:[#allocation4 + $0x4] sm:$0x1]  ;;  %v17831_v33 = vld.sshfl [vmem:[#allocation4 + $0x4] sm:$0x2 pattern:$0x76325410] }
 0x57f   : > { %v9611_v37 = vrot.slane %v17792_v12, %v17591_v32  ;;  %v17808_v32 = vsel %vm557_vm5, %v17596_v6, %v9570_v7  ;;  %v14312_v6 = vld [vmem:[%s18210_s7 + $0x420] ss:$16 sps:$4 sm:$0xff]   ;;  %v9625_v47 = vrot.slane %v17831_v33, 1  ;;  %v14428_v7 = vld [vmem:[%s18210_s7 + $0x2c] ss:$16 sps:$4 sm:$0xff]  }
 0x580   : > { %v14487_v33 = vld [vmem:[%s18212_s9 + $0xb0] sm:$0xff]  }
 0x581   : > { %v9613_v35 = vshrl.u32 %v9611_v37, 16  ;;  %v14420_v37 = vld [vmem:[%s18210_s7 + $0x68] ss:$16 sps:$4 sm:$0xff]  }
 0x583   : > { %9615 = vrot.lane.b32.xlu0 %v9613_v35, %s18246_s22  ;;  %v14425_v35 = vld [vmem:[%s18210_s7 + $0x4c] ss:$16 sps:$4 sm:$0xff]  }
 0x5b2   : > { %v9589_v39 = vpop.permute.xlu0 %9588 }
 0x5b3   : > { %v17801_v40 = vsel %vm557_vm5, %v9579_v44, %v9589_v39  ;;  %v14468_v44 = vld [vmem:[%s18212_s9 + $0x78] sm:$0xff]  }
 0x5b4   : > { %10563 = vmatprep.mubr.bf16.mxu1 %v17801_v40  ;;  %v14469_v39 = vld [vmem:[%s18212_s9 + $0x38] sm:$0xff]  }
 0x5b5   : > { %10564 = vmatmul.mubr.bf16.vlgmr.msra.gmra.mxu1 %v17808_v32  ;;  %v9603_v46 = vpop.permute.xlu1 %9602 }
 0x5b6   : > { %10622 = vmatpush1.bf16.msra.mxu1 %v14300_v17  ;;  %10645 = vmatprep.mubr.bf16.mxu1 %v14592_v23  ;;  %v9636_v20 = vsel %vm557_vm5, %v9591_v14, %v9603_v46  ;;  %v14470_v17 = vld [vmem:[%s18212_s9 + $0x70] sm:$0xff]   ;;  %v14465_v46 = vld [vmem:[%s18210_s7 + $0x408] ss:$16 sps:$4 sm:$0xff]  }
 0x5b7   : > { %10623 = vmatprep.subr.bf16.mxu1 %v14308_v22  ;;  %v14431_v22 = vld [vmem:[%s18210_s7 + $0xc] ss:$16 sps:$4 sm:$0xff]  }
 0x5b8   : > { %v14481_v14 = vld [vmem:[%s18212_s9 + $0x8] sm:$0xff]  }
 0x5ba   : > { %10624 = vmatpush1.bf16.msra.mxu1 %v14306_v43  ;;  %v14471_v43 = vld [vmem:[%s18212_s9 + $0x30] sm:$0xff]  }
 0x5bb   : > { %10625 = vmatprep.subr.bf16.mxu1 %v14314_v50  ;;  %v14472_v50 = vld [vmem:[%s18212_s9 + $0x68] sm:$0xff]  }
 0x5be   : > { %10626 = vmatpush1.bf16.msra.mxu1 %v14312_v6  ;;  %v14429_v6 = vld [vmem:[%s18210_s7 + $0x8] ss:$16 sps:$4 sm:$0xff]  }
 0x5bf   : > { %10627 = vmatprep.subr.bf16.mxu1 %v14320_v49  ;;  %v14434_v49 = vld [vmem:[%s18210_s7 + $0x1ec] ss:$16 sps:$4 sm:$0xff]  }
 0x5c2   : > { %10628 = vmatpush1.bf16.msra.mxu1 %v14318_v29  ;;  %v14473_v29 = vld [vmem:[%s18212_s9 + $0x28] sm:$0xff]  }
 0x5c3   : > { %10695 = vmatprep.subr.bf16.mxu1 %v14326_v26  ;;  %v14474_v26 = vld [vmem:[%s18212_s9 + $0x60] sm:$0xff]  }
 0x5c5   : > { %12331 = vmatmul.mubr.msk.bf16.vlgmr.msra.gmra.mxu1 %vm557_vm5, %v9625_v47 }
 0x5c6   : > { %10696 = vmatpush1.bf16.msra.mxu1 %v14324_v51  ;;  %v14432_v51 = vld [vmem:[%s18210_s7 + $0x1e8] ss:$16 sps:$4 sm:$0xff]  }
 0x5c7   : > { %10697 = vmatprep.subr.bf16.mxu1 %v14332_v52  ;;  %v14437_v52 = vld [vmem:[%s18210_s7 + $0x1cc] ss:$16 sps:$4 sm:$0xff]  }
 0x5ca   : > { %10698 = vmatpush1.bf16.msra.mxu1 %v14330_v31  ;;  %v14475_v31 = vld [vmem:[%s18212_s9 + $0x20] sm:$0xff]  }
 0x5cb   : > { %10699 = vmatprep.subr.bf16.mxu1 %v14338_v25  ;;  %v14476_v25 = vld [vmem:[%s18212_s9 + $0x58] sm:$0xff]  }
 0x5ce   : > { %10700 = vmatpush1.bf16.msra.mxu1 %v14336_v15  ;;  %v14435_v15 = vld [vmem:[%s18210_s7 + $0x1c8] ss:$16 sps:$4 sm:$0xff]  }
 0x5cf   : > { %10701 = vmatprep.subr.bf16.mxu1 %v14344_v28  ;;  %v14440_v28 = vld [vmem:[%s18210_s7 + $0x1ac] ss:$16 sps:$4 sm:$0xff]  }
 0x5d2   : > { %10702 = vmatpush1.bf16.msra.mxu1 %v14342_v56  ;;  %v14477_v56 = vld [vmem:[%s18212_s9 + $0x18] sm:$0xff]  }
 0x5d3   : > { %10703 = vmatprep.subr.bf16.mxu1 %v14350_v41  ;;  %v14438_v41 = vld [vmem:[%s18210_s7 + $0x1a8] ss:$16 sps:$4 sm:$0xff]  }
 0x5d6   : > { %10704 = vmatpush1.bf16.msra.mxu1 %v14348_v57  ;;  %v14443_v57 = vld [vmem:[%s18210_s7 + $0x18c] ss:$16 sps:$4 sm:$0xff]  }
 0x5d7   : > { %10705 = vmatprep.subr.bf16.mxu1 %v14356_v60  ;;  %v14441_v60 = vld [vmem:[%s18210_s7 + $0x188] ss:$16 sps:$4 sm:$0xff]  }
 0x5da   : > { %10706 = vmatpush1.bf16.msra.mxu1 %v14354_v61  ;;  %v14446_v61 = vld [vmem:[%s18210_s7 + $0x16c] ss:$16 sps:$4 sm:$0xff]  }
 0x5db   : > { %10707 = vmatprep.subr.bf16.mxu1 %v14362_v59  ;;  %v14444_v59 = vld [vmem:[%s18210_s7 + $0x168] ss:$16 sps:$4 sm:$0xff]  }
 0x5de   : > { %10708 = vmatpush1.bf16.msra.mxu1 %v14360_v63  ;;  %v14449_v63 = vld [vmem:[%s18210_s7 + $0x14c] ss:$16 sps:$4 sm:$0xff]  }
 0x5df   : > { %10709 = vmatprep.subr.bf16.mxu1 %v14368_v0  ;;  %v14447_v0 = vld [vmem:[%s18210_s7 + $0x148] ss:$16 sps:$4 sm:$0xff]  }
 0x5e2   : > { %10710 = vmatpush1.bf16.msra.mxu1 %v14366_v1  ;;  %v14452_v1 = vld [vmem:[%s18210_s7 + $0x12c] ss:$16 sps:$4 sm:$0xff]  }
 0x5e3   : > { %10711 = vmatprep.subr.bf16.mxu1 %v14374_v9  ;;  %v14450_v9 = vld [vmem:[%s18210_s7 + $0x128] ss:$16 sps:$4 sm:$0xff]  }
 0x5e6   : > { %10712 = vmatpush2.bf16.msra.mxu1 %v14372_v36  ;;  %v14455_v36 = vld [vmem:[%s18210_s7 + $0x10c] ss:$16 sps:$4 sm:$0xff]  }
 0x5e7   : > { %10713 = vmatprep.subr.bf16.mxu1 %v14380_v8  ;;  %v14453_v8 = vld [vmem:[%s18210_s7 + $0x108] ss:$16 sps:$4 sm:$0xff]  }
 0x5ea   : > { %10714 = vmatpush2.bf16.msra.mxu1 %v14378_v2  ;;  %v14458_v2 = vld [vmem:[%s18210_s7 + $0x46c] ss:$16 sps:$4 sm:$0xff]  }
 0x5eb   : > { %10715 = vmatprep.subr.bf16.mxu1 %v14386_v11  ;;  %v14456_v11 = vld [vmem:[%s18210_s7 + $0x468] ss:$16 sps:$4 sm:$0xff]  }
 0x5ee   : > { %10716 = vmatpush2.bf16.msra.mxu1 %v14384_v4  ;;  %v14461_v4 = vld [vmem:[%s18210_s7 + $0x44c] ss:$16 sps:$4 sm:$0xff]  }
 0x5ef   : > { %10717 = vmatprep.subr.bf16.mxu1 %v14392_v27  ;;  %v14459_v27 = vld [vmem:[%s18210_s7 + $0x448] ss:$16 sps:$4 sm:$0xff]  }
 0x5f2   : > { %10718 = vmatpush2.bf16.msra.mxu1 %v14390_v53  ;;  %v14464_v53 = vld [vmem:[%s18210_s7 + $0x42c] ss:$16 sps:$4 sm:$0xff]  }
 0x5f3   : > { %10719 = vmatprep.subr.bf16.mxu1 %v14398_v58  ;;  %v14478_v58 = vld [vmem:[%s18212_s9 + $0x50] sm:$0xff]  }
 0x5f5   : > { %v9616_v45 = vpop.permute.xlu0 %9615 }
 0x5f6   : > { %10720 = vmatpush2.bf16.msra.mxu1 %v14396_v5  ;;  %v9640_v10 = vsel %vm557_vm5, %v17792_v12, %v9616_v45  ;;  %v14422_v12 = vld [vmem:[%s18210_s7 + $0x6c] ss:$16 sps:$4 sm:$0xff]   ;;  %v14479_v5 = vld [vmem:[%s18212_s9 + $0x10] sm:$0xff]   ;;  %v14482_v45 = vld [vmem:[%s18212_s9 + $0x40] sm:$0xff]  }
 0x5f7   : > { %10604 = vmatprep.mubr.bf16.mxu0 %v9640_v10  ;;  %10721 = vmatprep.subr.bf16.mxu1 %v14404_v13  ;;  %v14480_v13 = vld [vmem:[%s18212_s9 + $0x48] sm:$0xff]  }
 0x5f8   : > { %10727 = vmatprep.mubr.bf16.mxu1 %v9640_v10  ;;  %10605 = vmatmul.mubr.bf16.vlgmr.msra.gmra.mxu0 %v9636_v20  ;;  %v14484_v10 = vld [vmem:[%s18212_s9 + $0xf8] sm:$0xff]  }
 0x5f9   : > { %10655 = vmatpush1.bf16.msra.mxu0 %v14399_v55  ;;  %10686 = vmatprep.mubr.bf16.mxu0 %v17801_v40  ;;  %v14426_v40 = vld [vmem:[%s18210_s7 + $0x28] ss:$16 sps:$4 sm:$0xff]   ;;  %v14483_v55 = vld [vmem:[%s18212_s9] sm:$0xff]  }
 0x5fa   : > { %10722 = vmatpush2.bf16.msra.mxu1 %v14402_v18  ;;  %10656 = vmatprep.subr.bf16.mxu0 %v14407_v62  ;;  %v14485_v18 = vld [vmem:[%s18212_s9 + $0xb8] sm:$0xff]   ;;  %v14486_v62 = vld [vmem:[%s18212_s9 + $0xf0] sm:$0xff]  }
 0x5fb   : > { %10723 = vmatprep.subr.bf16.mxu1 %v14410_v19 }
 0x5fd   : > { %10657 = vmatpush1.bf16.msra.mxu0 %v14405_v21 }
 0x5fe   : > { %10724 = vmatpush2.bf16.msra.mxu1 %v14408_v38  ;;  %10658 = vmatprep.subr.bf16.mxu0 %v14413_v16  ;;  %v14488_v38 = vld [vmem:[%s18212_s9 + $0xe8] sm:$0xff]  }
 0x5ff   : > { %10725 = vmatprep.subr.bf16.mxu1 %v14416_v54  ;;  %v14489_v16 = vld [vmem:[%s18212_s9 + $0xa8] sm:$0xff]   ;;  %v14490_v54 = vld [vmem:[%s18212_s9 + $0xe0] sm:$0xff]  }
 0x601   : > { %10659 = vmatpush1.bf16.msra.mxu0 %v14411_v24  ;;  %v14491_v24 = vld [vmem:[%s18212_s9 + $0xa0] sm:$0xff]  }
 0x602   : > { %10726 = vmatpush2.bf16.msra.mxu1 %v14414_v30  ;;  %10660 = vmatprep.subr.bf16.mxu0 %v14419_v48  ;;  %v14492_v30 = vld [vmem:[%s18212_s9 + $0xd8] sm:$0xff]  }
 0x603   : > { %13107 = vmatprep.subr.bf16.mxu1 %v14468_v44  ;;  %v14493_v48 = vld [vmem:[%s18212_s9 + $0x98] sm:$0xff]   ;;  %v14496_v44 = vld [vmem:[%s18212_s9 + $0xc8] sm:$0xff]  }
 0x605   : > { %10728 = vmatmul.mubr.bf16.vlgmr.msra.gmra.mxu1 %v9636_v20  ;;  %10661 = vmatpush1.bf16.msra.mxu0 %v14417_v34  ;;  %v14494_v34 = vld [vmem:[%s18212_s9 + $0xd0] sm:$0xff]  }
 0x606   : > { %10662 = vmatprep.subr.bf16.mxu0 %v14422_v12  ;;  %13108 = vmatpush3.bf16.msra.mxu1 %v14469_v39  ;;  %v14497_v39 = vld [vmem:[%s18212_s9 + $0x88] sm:$0xff]  }
 0x607   : > { %13109 = vmatprep.subr.bf16.mxu1 %v14470_v17  ;;  %v14498_v17 = vld [vmem:[%s18212_s9 + $0xc0] sm:$0xff]  }
 0x609   : > { %10663 = vmatpush1.bf16.msra.mxu0 %v14420_v37  ;;  %v14495_v37 = vld [vmem:[%s18212_s9 + $0x90] sm:$0xff]  }
 0x60a   : > { %10664 = vmatprep.subr.bf16.mxu0 %v14425_v35  ;;  %13110 = vmatpush3.bf16.msra.mxu1 %v14471_v43  ;;  %v9786_v43 = vld [vmem:[%s18211_s8] sm:$0xf] }
 0x60b   : > { %13111 = vmatprep.subr.bf16.mxu1 %v14472_v50  ;;  %v10514_v50 = vsub.s32 1, %v17579_v42 }
 0x60d   : > { %10665 = vmatpush1.bf16.msra.mxu0 %v14423_v3 }
 0x60e   : > { %10666 = vmatprep.subr.bf16.mxu0 %v14428_v7  ;;  %13112 = vmatpush3.bf16.msra.mxu1 %v14473_v29 }
 0x60f   : > { %13113 = vmatprep.subr.bf16.mxu1 %v14474_v26 }
 0x611   : > { %10667 = vmatpush1.bf16.msra.mxu0 %v14426_v40  ;;  %v14499_v40 = vld [vmem:[%s18212_s9 + $0x80] sm:$0xff]  }
 0x612   : > { %10668 = vmatprep.subr.bf16.mxu0 %v14431_v22  ;;  %13114 = vmatpush3.bf16.msra.mxu1 %v14475_v31  ;;  %v10510_v22 = vsub.s32 0, %v17579_v42 }
 0x613   : > { %13115 = vmatprep.subr.bf16.mxu1 %v14476_v25 }
 0x615   : > { %10669 = vmatpush1.bf16.msra.mxu0 %v14429_v6  ;;  %v10511_v6 = vrot.slane %v9786_v43, %v10510_v22 }
 0x616   : > { %10670 = vmatprep.subr.bf16.mxu0 %v14434_v49  ;;  %13116 = vmatpush3.bf16.msra.mxu1 %v14477_v56  ;;  %v10515_v49 = vrot.slane %v9786_v43, %v10514_v50 }
 0x617   : > { %13117 = vmatprep.subr.bf16.mxu1 %v14478_v58 }
 0x619   : > { %10671 = vmatpush2.bf16.msra.mxu0 %v14432_v51 }
 0x61a   : > { %10672 = vmatprep.subr.bf16.mxu0 %v14437_v52  ;;  %13118 = vmatpush3.bf16.msra.mxu1 %v14479_v5 }
 0x61b   : > { %13119 = vmatprep.subr.bf16.mxu1 %v14480_v13 }
 0x61d   : > { %10673 = vmatpush2.bf16.msra.mxu0 %v14435_v15 }
 0x61e   : > { %10674 = vmatprep.subr.bf16.mxu0 %v14440_v28  ;;  %13120 = vmatpush3.bf16.msra.mxu1 %v14481_v14 }
 0x61f   : > { %13121 = vmatprep.subr.bf16.mxu1 %v14482_v45 }
 0x621   : > { %10675 = vmatpush2.bf16.msra.mxu0 %v14438_v41 }
 0x622   : > { %10676 = vmatprep.subr.bf16.mxu0 %v14443_v57  ;;  %13122 = vmatpush3.bf16.msra.mxu1 %v14483_v55 }
 0x625   : > { %10677 = vmatpush2.bf16.msra.mxu0 %v14441_v60 }
 0x626   : > { %10678 = vmatprep.subr.bf16.mxu0 %v14446_v61 }
 0x629   : > { %10679 = vmatpush2.bf16.msra.mxu0 %v14444_v59 }
 0x62a   : > { %10680 = vmatprep.subr.bf16.mxu0 %v14449_v63 }
 0x62d   : > { %10681 = vmatpush2.bf16.msra.mxu0 %v14447_v0 }
 0x62e   : > { %10682 = vmatprep.subr.bf16.mxu0 %v14452_v1 }
 0x631   : > { %10683 = vmatpush2.bf16.msra.mxu0 %v14450_v9 }
 0x632   : > { %10684 = vmatprep.subr.bf16.mxu0 %v14455_v36 }
 0x635   : > { %10685 = vmatpush2.bf16.msra.mxu0 %v14453_v8 }
 0x636   : > { %10744 = vmatprep.subr.bf16.mxu0 %v14458_v2  ;;  %v10518_v2 = vsub.s32 2, %v17579_v42 }
 0x638   : > { %10687 = vmatmul.mubr.bf16.vlgmr.msra.gmra.mxu0 %v17808_v32  ;;  %v14462_v32 = vld [vmem:[%s18210_s7 + $0x428] ss:$16 sps:$4 sm:$0xff]  }
 0x639   : > { %10745 = vmatpush1.bf16.msra.mxu0 %v14456_v11  ;;  %10768 = vmatprep.mubr.bf16.mxu0 %v14592_v23  ;;  %v14467_v23 = vld [vmem:[%s18210_s7 + $0x40c] ss:$16 sps:$4 sm:$0xff]  }
 0x63a   : > { %10746 = vmatprep.subr.bf16.mxu0 %v14461_v4  ;;  %v10522_v4 = vsub.s32 3, %v17579_v42 }
 0x63c   : > { %v10523_v58 = vrot.slane %v9786_v43, %v10522_v4 }
 0x63d   : > { %10747 = vmatpush1.bf16.msra.mxu0 %v14459_v27 }
 0x63e   : > { %10748 = vmatprep.subr.bf16.mxu0 %v14464_v53  ;;  %v10519_v53 = vrot.slane %v9786_v43, %v10518_v2 }
 0x641   : > { %10749 = vmatpush1.bf16.msra.mxu0 %v14462_v32 }
 0x642   : > { %10750 = vmatprep.subr.bf16.mxu0 %v14467_v23 }
 0x645   : > { %10751 = vmatpush1.bf16.msra.mxu0 %v14465_v46 }
 0x646   : > { %13129 = vmatprep.subr.bf16.mxu0 %v14484_v10 }
 0x648   : > { %12332 = vmatmul.mubr.msk.bf16.vlgmr.msra.gmra.mxu0 %vm557_vm5, %v9625_v47 }
 0x649   : > { %13130 = vmatpush3.bf16.msra.mxu0 %v14485_v18 }
 0x64a   : > { %13131 = vmatprep.subr.bf16.mxu0 %v14486_v62 }
 0x64d   : > { %13132 = vmatpush3.bf16.msra.mxu0 %v14487_v33 }
 0x64e   : > { %13133 = vmatprep.subr.bf16.mxu0 %v14488_v38 }
 0x651   : > { %13134 = vmatpush3.bf16.msra.mxu0 %v14489_v16 }
 0x652   : > { %13135 = vmatprep.subr.bf16.mxu0 %v14490_v54  ;;  %v10849_v54 = vld [vmem:[%s18213_s10] sm:$0x1] }
 0x655   : > { %13136 = vmatpush3.bf16.msra.mxu0 %v14491_v24 }
 0x656   : > { %13137 = vmatprep.subr.bf16.mxu0 %v14492_v30 }
 0x659   : > { %13138 = vmatpush3.bf16.msra.mxu0 %v14493_v48 }
 0x65a   : > { %13139 = vmatprep.subr.bf16.mxu0 %v14494_v34 }
 0x65d   : > { %13140 = vmatpush3.bf16.msra.mxu0 %v14495_v37 }
 0x65e   : > { %13141 = vmatprep.subr.bf16.mxu0 %v14496_v44 }
 0x661   : > { %13142 = vmatpush3.bf16.msra.mxu0 %v14497_v39 }
 0x662   : > { %13143 = vmatprep.subr.bf16.mxu0 %v14498_v17 }
 0x665   : > { %13144 = vmatpush3.bf16.msra.mxu0 %v14499_v40 }
 0x675   : > { %v10565_v47 = vpop.f32.mrf.mxu1 }
 0x676   : > { %v10566_v29 = vadd.f32 %v10565_v47, %v10511_v6 }
 0x677   : > { %v10567_v20 = vpop.f32.mrf.mxu1 }
 0x678   : > { %v10568_v51 = vadd.f32 %v10567_v20, %v10515_v49 }
 0x679   : > { %v10569_v19 = vpop.f32.mrf.mxu1 }
 0x67b   : > { %v10570_v21 = vpop.f32.mrf.mxu1 }
 0x685   : > { %v10647_v12 = vpop.f32.mrf.mxu1 }
 0x687   : > { %v10649_v35 = vpop.f32.mrf.mxu1 }
 0x689   : > { %v10651_v3 = vpop.f32.mrf.mxu1 }
 0x68b   : > { %v10652_v7 = vpop.f32.mrf.mxu1 }
 0x6b8   : > { %v10606_v26 = vpop.f32.mrf.mxu0 }
 0x6b9   : > { %v10607_v52 = vadd.f32 %v10606_v26, %v10566_v29 }
 0x6ba   : > { %v10608_v31 = vpop.f32.mrf.mxu0 }
 0x6bb   : > { %v10648_v25 = vadd.f32 %v10647_v12, %v10607_v52  ;;  %v10609_v15 = vadd.f32 %v10608_v31, %v10568_v51 }
 0x6bc   : > { %v10610_v28 = vpop.f32.mrf.mxu0 }
 0x6bd   : > { %v10650_v56 = vadd.f32 %v10649_v35, %v10609_v15  ;;  %v10777_v41 = vmax.f32 %v10648_v25, 0.0 }
 0x6be   : > { %v10611_v57 = vpop.f32.mrf.mxu0 }
 0x6bf   : > { %v10778_v60 = vmax.f32 %v10650_v56, 0.0  ;;  %v10781_v59 = vpack.c.bf16 %v10777_v41, %v10777_v41 }
 0x6c1   : > { %v10782_v61 = vpack.c.bf16 %v10778_v60, %v10778_v60 }
 0x6c3   : > { %11074 = vmatprep.mubr.bf16.mxu1 %v10782_v61 }
 0x6c4   : > { %11075 = vmatmul.mubr.bf16.vlgmr.msra.gmra.mxu1 %v10781_v59 }
 0x6c5   : > { %v10729_v63 = vpop.f32.mrf.mxu1 }
 0x6c7   : > { %v10731_v0 = vpop.f32.mrf.mxu1 }
 0x6c9   : > { %v10733_v1 = vpop.f32.mrf.mxu1 }
 0x6cb   : > { %v10734_v9 = vpop.f32.mrf.mxu1 }
 0x6f8   : > { %v10688_v36 = vpop.f32.mrf.mxu0 }
 0x6f9   : > { %v10689_v32 = vadd.f32 %v10688_v36, %v10519_v53 }
 0x6fa   : > { %v10690_v8 = vpop.f32.mrf.mxu0 }
 0x6fb   : > { %v10691_v5 = vadd.f32 %v10690_v8, %v10523_v58  ;;  %v10730_v23 = vadd.f32 %v10729_v63, %v10689_v32 }
 0x6fc   : > { %v10692_v11 = vpop.f32.mrf.mxu0 }
 0x6fd   : > { %v10732_v14 = vadd.f32 %v10731_v0, %v10691_v5 }
 0x6fe   : > { %v10693_v27 = vpop.f32.mrf.mxu0 }
 0x708   : > { %v10770_v13 = vpop.f32.mrf.mxu0 }
 0x709   : > { %v10771_v46 = vadd.f32 %v10770_v13, %v10730_v23 }
 0x70a   : > { %v10772_v45 = vpop.f32.mrf.mxu0 }
 0x70b   : > { %v10773_v55 = vadd.f32 %v10772_v45, %v10732_v14  ;;  %v10779_v10 = vmax.f32 %v10771_v46, 0.0 }
 0x70c   : > { %v10774_v18 = vpop.f32.mrf.mxu0 }
 0x70d   : > { %v10780_v62 = vmax.f32 %v10773_v55, 0.0  ;;  %v10783_v20 = vpack.c.bf16 %v10779_v10, %v10779_v10 }
 0x70e   : > { %v10775_v33 = vpop.f32.mrf.mxu0 }
 0x70f   : > { %v10784_v47 = vpack.c.bf16 %v10780_v62, %v10780_v62 }
 0x711   : > { %11114 = vmatprep.mubr.bf16.mxu0 %v10784_v47 }
 0x712   : > { %11115 = vmatmul.mubr.bf16.vlgmr.msra.gmra.mxu0 %v10783_v20 }
 0x784   : > { %v13123_v42 = vpop.f32.mrf.mxu1 }
 0x786   : > { %v13124_v19 = vpop.f32.mrf.mxu1 }
 0x787   : > { %v13125_v21 = vadd.f32 %v13124_v19, %v13123_v42 }
 0x788   : > { %v13126_v38 = vpop.f32.mrf.mxu1 }
 0x789   : > { %v11077_v48 = vadd.f32 %v13125_v21, %v10849_v54 }
 0x78a   : > { %v13127_v16 = vpop.f32.mrf.mxu1 }
 0x7d2   : > { %v13145_v24 = vpop.f32.mrf.mxu0 }
 0x7d4   : > { %v13146_v30 = vpop.f32.mrf.mxu0 }
 0x7d5   : > { %v13147_v34 = vadd.f32 %v13146_v30, %v13145_v24 }
 0x7d6   : > { %v13148_v12 = vpop.f32.mrf.mxu0 }
 0x7d7   : > { %v11117_v37 = vadd.f32 %v13147_v34, %v11077_v48 }
 0x7d8   : > { %v13149_v35 = vpop.f32.mrf.mxu0 }
 0x7d9   : > { %11122 = vst [vmem:[%s378_s29] sm:$0x1] %v11117_v37 }
 0x7da   : > { %14533 = shalt.err (!%p14530_p3)
}
 0x7db   : > { %s14534_s16 = scalar_lea.hbm %s18168_s23, 16  ;;  %s14538_s26 = scalar_lea.hbm %s18214_s11, 64 }
 0x7dc   : > { %p14535_p4 = scmp.ne.s32.totalorder %s18168_s23, %s14534_s16  ;;  %p14539_p9 = scmp.lt.s32.totalorder %s18168_s23, %s18214_s11 }
 0x7dd   : > { %p14540_p10 = scmp.lt.s32.totalorder %s14538_s26, %s14534_s16 }
 0x7de   : > { %p14536_p7 = pnand %p14535_p4, %p14692_p5 }
 0x7df   : > { %p14541_p11 = por %p14540_p10, %p14539_p9 }
 0x7e0   : > { %p14537_p8 = pneg %p14536_p7 }
 0x7e2   : > { %p14542_p12 = pnand %p14541_p11, %p14537_p8 }
 0x7e4   : > { %14545 = shalt.err (!%p14542_p12)
}
 0x7e5   : > { %13428 = dma.vmem_to_hbm [thread:$0]  (%p14692_p5), %s11137_s17, 16, %s18168_s23, %s11124_s28  }
 0x7e6 PF: > { %s18254_s14 = sld [smem:[#allocation8_spill]]  ;;  %p13434_p13 = scmp.ge.s32.totalorder %s14580_s20, 2 }
 0x7e8   : > { %p13431_p0 = pnand %p13434_p13, %p14696_p6 }
 0x7ea   : > { %p13432_p1 = pneg %p13431_p0 }
 0x7ec   : > { %s11148_s22 = sand.u32 1, %s18254_s14  }
 0x7ed   : > { %s11149_s13 = scalar_lea.sflag [#allocation6], %s11148_s22 }
 0x7ee   : > { %14563 = dma.done.wait (%p13432_p1), %s11149_s13, 16  }
 0x7ef   : > { %14565 = vsyncadd (%p13432_p1), %s11149_s13, 4294967280  ;;  %s18256_s20 = sld [smem:[#allocation10_spill]]  ;;  %s18259_s17 = smov %s14572_s18 }
 0x7f0   : > { %s18257_s19 = sld [smem:[#allocation9_spill]] }
 0x7f1   : > { %s18258_s21 = sld [smem:[#allocation11_spill]] }
 0x7f5   : > { %p21_p2 = scmp.ge.s32.totalorder %s18256_s20, 6  }
 0x7f6   : > { %s18260_s18 = smov %s18257_s19 }
 0x7f7   : > { %s18261_s19 = smov %s18258_s21  ;;  %23 = sbr.rel (!%p21_p2) target bundleno = 5 (0x5), region = 167 }
 0x7fc   :  { %11153 = vsyncpa [#allocation6], 1 }
 0x7fd   :  { %11155 = vsyncpa [#allocation6 + $0x1], 1 }

</bundles_post_ra>
